<compile_context>
chip_gen: v7x
topology: tpu7x:2x2x1
jax: 0.10.0
libtpu: 0.0.40
codegen_flags: <defaults>
</compile_context>

<pallas_src>
import numpy as np
import jax
import jax.numpy as jnp
from jax import lax
from jax.experimental import pallas as pl
from jax.experimental.pallas import tpu as pltpu

# ----- SE3Transformer.__init__ hyper-parameters (small synthetic config) -----
NUM_LAYERS = 2
ATOM_FEATURE_SIZE = 4
NUM_CHANNELS = 8
NUM_DEGREES = 2                      # degrees 0 .. NUM_DEGREES-1
EDGE_DIM = 4
DIV = 4
N_HEADS = 1                          # single head -> no head reshapes needed
NC_ATTN = NUM_CHANNELS // DIV        # attention channels per degree (f_mid)
RAD_H = 16                           # radial-MLP hidden width
OUT_STRUCTURE = [(NUM_CHANNELS, 0)]  # fibers['out']: degree-0 only (required by GAvgPooling)

_F32 = jnp.float32
_VMEM_LIMIT = 32 * 1024 * 1024       # safe on v5e/v6e/v7x (tiles here are KB-scale)


# =============================================================================
# Small in-kernel helpers (lowering-safe: concat / iota / compare / matmul only)
# =============================================================================
def _tile_rows(x, n):
    """Repeat a [R, C] block n times along rows -> [n*R, C] (src broadcast over dst)."""
    if n == 1:
        return x
    return jnp.concatenate([x] * n, axis=0)


def _tile_cols(x, n):
    """Repeat a [R, C] block n times along lanes -> [R, n*C]."""
    if n == 1:
        return x
    return jnp.concatenate([x] * n, axis=-1)


def _group_sum_matrix(groups, k):
    """[groups*k, groups] with M[g*k+j, g] = 1: lane-group reduction as an MXU matmul."""
    r = lax.broadcasted_iota(jnp.int32, (groups * k, groups), 0)
    c = lax.broadcasted_iota(jnp.int32, (groups * k, groups), 1)
    return jnp.logical_and(r >= c * k, r < (c + 1) * k).astype(_F32)


def _segment_expand_matrix(groups, k):
    """[groups, groups*k] with M[g, g*k+j] = 1: broadcast each group value to k lanes."""
    r = lax.broadcasted_iota(jnp.int32, (groups, groups * k), 0)
    c = lax.broadcasted_iota(jnp.int32, (groups, groups * k), 1)
    return jnp.logical_and(c >= r * k, c < (r + 1) * k).astype(_F32)


def _make_gs_cache():
    cache = {}

    def gs(groups, k):
        key = (groups, k)
        if key not in cache:
            cache[key] = _group_sum_matrix(groups, k)
        return cache[key]

    return gs


def _compute_messages(edge, rhat, basis27, h0, h1f, W1, b1, W2, b2,
                      pairs, blocks, offsets, td, gs):
    """Fused RadialFunc + per-edge Clebsch-Gordan contraction for one dst tile.

    edge [E,5], rhat [E,3], basis27 [E,27] (cols = (n,f,m)), h0 [N,c0], h1f [N,3*c1].
    W2 is block-diagonal over degree pairs; column layout per pair = (o, f, c).
    Returns acc[block][n] = [E, nco] message columns (degree-1 is rep-major, channel-minor).
    """
    hid = jnp.maximum(jnp.dot(edge, W1, preferred_element_type=_F32) + b1, 0.0)
    R = jnp.dot(hid, W2, preferred_element_type=_F32) + b2          # stays in VMEM

    need_h0 = any(di == 0 for (_, _, di, _, _) in pairs)
    need_h1 = any(di == 1 for (_, _, di, _, _) in pairs)
    need_t01 = any(do == 0 and di == 1 for (_, do, di, _, _) in pairs)
    need_t11 = any(do == 1 and di == 1 for (_, do, di, _, _) in pairs)

    h0e = _tile_rows(h0, td) if need_h0 else None                   # [E, c0]
    h1e = _tile_rows(h1f, td) if need_h1 else None                  # [E, 3*c1]
    ci1 = (h1f.shape[-1] // 3) if need_h1 else 0

    T01 = None
    if need_t01:  # sum_m h1[src,c,m] * rhat[e,m]
        T01 = jnp.dot(h1e * _tile_cols(rhat, ci1), gs(ci1, 3),
                      preferred_element_type=_F32)                  # [E, c1]

    T11 = None
    if need_t11:  # T11[n][e, f*c1 + c] = sum_m basis[e,f,n,m] * h1[src,c,m]
        h1rep = _tile_cols(h1e, 3)                                  # cols (f, c, m)
        T11 = []
        for n in range(3):
            bn = basis27[:, n * 9:(n + 1) * 9]                      # cols (f, m)
            bexp = jnp.concatenate(
                [_tile_cols(bn[:, f * 3:(f + 1) * 3], ci1) for f in range(3)], axis=-1)
            T11.append(jnp.dot(bexp * h1rep, gs(3 * ci1, 3),
                               preferred_element_type=_F32))        # [E, 3*c1]

    acc = [[None] * (2 * do + 1) for (_, do, _) in blocks]
    block_index = {(s, d): i for i, (s, d, _) in enumerate(blocks)}
    for pair, off in zip(pairs, offsets):
        stream, do, di, ci, nco = pair
        nf = 2 * min(do, di) + 1
        width = nco * nf * ci
        Rp = R[:, off:off + width]
        if do == 0 and di == 0:
            contribs = [jnp.dot(Rp * _tile_cols(h0e, nco), gs(nco, ci),
                                preferred_element_type=_F32)]
        elif do == 0 and di == 1:
            contribs = [jnp.dot(Rp * _tile_cols(T01, nco), gs(nco, ci),
                                preferred_element_type=_F32)]
        elif do == 1 and di == 0:
            base = jnp.dot(Rp * _tile_cols(h0e, nco), gs(nco, ci),
                           preferred_element_type=_F32)
            contribs = [base * rhat[:, n:n + 1] for n in range(3)]
        else:  # do == 1 and di == 1
            contribs = [jnp.dot(Rp * _tile_cols(T11[n], nco), gs(nco, 3 * ci),
                                preferred_element_type=_F32) for n in range(3)]
        bi = block_index[(stream, do)]
        for n, cb in enumerate(contribs):
            acc[bi][n] = cb if acc[bi][n] is None else acc[bi][n] + cb
    return acc


# =============================================================================
# Host-side weight preparation (tiny concats / kron expansions; runs under jit)
# =============================================================================
def fuse_radial(rparams, widths):
    """Concatenate W1s and block-diagonalize W2s so one kernel call evaluates all radial MLPs."""
    H = RAD_H
    W1 = jnp.concatenate([p["W1"] for p in rparams], axis=1)        # [5, H*P]
    b1 = jnp.concatenate([p["b1"] for p in rparams], axis=1)
    b2 = jnp.concatenate([p["b2"] for p in rparams], axis=1)
    SW = int(sum(widths))
    W2 = jnp.zeros((H * len(rparams), SW), _F32)
    off = 0
    for idx, p in enumerate(rparams):
        W2 = W2.at[idx * H:(idx + 1) * H, off:off + widths[idx]].set(p["W2"])
        off += widths[idx]
    return W1, b1, W2, b2


def prep_attention_weights(pres, pnorm, in_struct, key_degs):
    """G1x1SE3 / Wp / GNorm weights, degree-1 mixing Kronecker-expanded to flat (c,m) layouts."""
    A, C = NC_ATTN, NUM_CHANNELS
    eye3 = jnp.eye(3, dtype=_F32)
    wp = {"Wq0T": pres["Wq"]["0"].T}                                 # [c0, A]
    if 1 in key_degs:
        Wq1 = pres["Wq"]["1"]                                        # [A, c1]
        c1 = Wq1.shape[1]
        wp["Wq1m"] = jnp.einsum("ac,mn->cmna", Wq1, eye3).reshape(c1 * 3, 3 * A)
    Wp0 = pres["Wp"]["0"]                                            # [C, A + c0]
    wp["Wp0a"] = Wp0[:, :A].T
    wp["Wp0h"] = Wp0[:, A:].T
    Wp1 = pres["Wp"]["1"]                                            # [C, A (+ c1)]
    wp["Wp1a"] = jnp.einsum("oa,nm->naom", Wp1[:, :A], eye3).reshape(3 * A, C * 3)
    if 1 in in_struct:
        c1 = in_struct[1]
        wp["Wp1h"] = jnp.einsum("oc,nm->cnom", Wp1[:, A:], eye3).reshape(c1 * 3, C * 3)
    wp["s0"] = pnorm["0"]["scale"].reshape(1, C)
    wp["b0"] = pnorm["0"]["bias"].reshape(1, C)
    wp["s1"] = jnp.repeat(pnorm["1"]["scale"], 3).reshape(1, C * 3)
    wp["b1"] = jnp.repeat(pnorm["1"]["bias"], 3).reshape(1, C * 3)
    return wp


# =============================================================================
# Pallas kernels
# =============================================================================
def edge_messages(edge_flat, rhat_flat, basis27, h0, h1f, fused_radial,
                  pairs, blocks, offsets, n_nodes, td):
    """Fused GConvSE3Partial: radial MLPs + CG contraction -> per-edge k/v messages [B,NN,Dkv]."""
    B, NN, _ = edge_flat.shape
    N = n_nodes
    E = td * N                                   # edges per dst tile (td must divide N)
    W1, b1, W2, b2 = fused_radial
    HP, SW = W1.shape[1], W2.shape[1]
    dout = sum(nco * (2 * do + 1) for (_, do, nco) in blocks)
    use_basis = any(do == 1 and di == 1 for (_, do, di, _, _) in pairs)
    use_h1 = any(di == 1 for (_, _, di, _, _) in pairs)
    use_h0 = any(di == 0 for (_, _, di, _, _) in pairs)
    c0 = h0.shape[-1] if use_h0 else 0
    c13 = h1f.shape[-1] if use_h1 else 0

    def kernel(*refs):
        i = 0
        edge = refs[i][0]; i += 1                # [E, 5]
        rhat = refs[i][0]; i += 1                # [E, 3]
        basis = None
        if use_basis:
            basis = refs[i][0]; i += 1           # [E, 27]
        h0b = None
        if use_h0:
            h0b = refs[i][0]; i += 1             # [N, c0]
        h1b = None
        if use_h1:
            h1b = refs[i][0]; i += 1             # [N, 3*c1]
        W1r = refs[i][...]; i += 1
        b1r = refs[i][...]; i += 1
        W2r = refs[i][...]; i += 1
        b2r = refs[i][...]; i += 1
        out_ref = refs[i]

        gs = _make_gs_cache()
        acc = _compute_messages(edge, rhat, basis, h0b, h1b, W1r, b1r, W2r, b2r,
                                pairs, blocks, offsets, td, gs)
        cols = []
        for bi, (_, do, nco) in enumerate(blocks):
            for n in range(2 * do + 1):
                col = acc[bi][n]
                cols.append(col if col is not None else jnp.zeros((E, nco), _F32))
        out_ref[0] = jnp.concatenate(cols, axis=-1)

    in_arrays = [edge_flat, rhat_flat]
    in_specs = [pl.BlockSpec((1, E, 1 + EDGE_DIM), lambda b, t: (b, t, 0)),
                pl.BlockSpec((1, E, 3), lambda b, t: (b, t, 0))]
    if use_basis:
        in_arrays.append(basis27)
        in_specs.append(pl.BlockSpec((1, E, 27), lambda b, t: (b, t, 0)))
    if use_h0:
        in_arrays.append(h0)
        in_specs.append(pl.BlockSpec((1, N, c0), lambda b, t: (b, 0, 0)))
    if use_h1:
        in_arrays.append(h1f)
        in_specs.append(pl.BlockSpec((1, N, c13), lambda b, t: (b, 0, 0)))
    in_arrays += [W1, b1, W2, b2]
    in_specs += [pl.BlockSpec((1 + EDGE_DIM, HP), lambda b, t: (0, 0)),
                 pl.BlockSpec((1, HP), lambda b, t: (0, 0)),
                 pl.BlockSpec((HP, SW), lambda b, t: (0, 0)),
                 pl.BlockSpec((1, SW), lambda b, t: (0, 0))]

    return pl.pallas_call(
        kernel,
        grid=(B, N // td),
        in_specs=in_specs,
        out_specs=pl.BlockSpec((1, E, dout), lambda b, t: (b, t, 0)),
        out_shape=jax.ShapeDtypeStruct((B, NN, dout), _F32),
        compiler_params=pltpu.CompilerParams(
            dimension_semantics=("parallel", "parallel"),
            vmem_limit_bytes=_VMEM_LIMIT),
    )(*in_arrays)


def attention_node_update(h0, h1f, kv4, mask, wp, in_struct, key_degs, n_nodes, tn):
    """Fused GMABSE3 attention + Wp projection (skip='cat') + GNormSE3 -> next-layer features."""
    B, N, c0 = h0.shape
    A, C = NC_ATTN, NUM_CHANNELS
    Dk = sum(A * (2 * d + 1) for d in key_degs)
    Dv = sum(A * (2 * d + 1) for d in range(NUM_DEGREES))
    Dkv = kv4.shape[-1]
    scale = 1.0 / float(np.sqrt(Dk))
    has_h1 = 1 in in_struct
    has_k1 = 1 in key_degs
    c13 = h1f.shape[-1] if has_h1 else 0

    def kernel(*refs):
        i = 0
        h0d = refs[i][0]; i += 1                         # [TN, c0]
        h1d = None
        if has_h1:
            h1d = refs[i][0]; i += 1                     # [TN, 3*c1]
        kv = refs[i][0]; i += 1                          # [TN, N, Dkv]
        m = refs[i][0]; i += 1                           # [TN, N]
        Wq0T = refs[i][...]; i += 1
        Wq1m = None
        if has_k1:
            Wq1m = refs[i][...]; i += 1
        Wp0a = refs[i][...]; i += 1
        Wp0h = refs[i][...]; i += 1
        Wp1a = refs[i][...]; i += 1
        Wp1h = None
        if has_h1:
            Wp1h = refs[i][...]; i += 1
        s0 = refs[i][...]; i += 1
        bb0 = refs[i][...]; i += 1
        s1 = refs[i][...]; i += 1
        bb1 = refs[i][...]; i += 1
        out0_ref = refs[i]; i += 1
        out1_ref = refs[i]

        q = jnp.dot(h0d, Wq0T, preferred_element_type=_F32)          # [TN, A]
        if has_k1:
            q = jnp.concatenate(
                [q, jnp.dot(h1d, Wq1m, preferred_element_type=_F32)], axis=-1)
        k = kv[:, :, :Dk]
        v = kv[:, :, Dk:]
        # TODO(synk): for large N map the Dk contraction / src reduction onto the MXU
        #             (pad N to a lane multiple); at N=8 the VPU path is already cheap.
        s = jnp.sum(k * q[:, None, :], axis=-1) * scale              # [TN, N]
        mf = (m > 0).astype(_F32)
        s = jnp.where(m > 0, s, -1e30)
        s = s - jnp.max(s, axis=-1, keepdims=True)
        e = jnp.exp(s) * mf
        denom = jnp.sum(e, axis=-1, keepdims=True)
        alpha = e * pl.reciprocal(denom + 1e-20, approx=True)        # guard: empty rows -> 0
        attn = jnp.sum(alpha[:, :, None] * v, axis=1)                # [TN, Dv]

        # Degree 0: projection with skip='cat' folded into two matmuls, then GNormSE3.
        a0 = attn[:, :A]
        out0 = (jnp.dot(a0, Wp0a, preferred_element_type=_F32)
                + jnp.dot(h0d, Wp0h, preferred_element_type=_F32))   # [TN, C]
        nsq0 = out0 * out0
        inv0 = lax.rsqrt(nsq0 + 1e-12)
        g0 = jnp.maximum((nsq0 * inv0) * s0 + bb0, 0.0)
        out0_ref[0] = g0 * out0 * inv0

        # Degree 1 (flat channel-major (c, m) layout).
        a1 = attn[:, A:]                                             # rep-major (n, a)
        out1 = jnp.dot(a1, Wp1a, preferred_element_type=_F32)
        if has_h1:
            out1 = out1 + jnp.dot(h1d, Wp1h, preferred_element_type=_F32)   # [TN, 3C]
        gsum = _group_sum_matrix(C, 3)
        gexp = _segment_expand_matrix(C, 3)
        nsq1 = jnp.dot(jnp.dot(out1 * out1, gsum, preferred_element_type=_F32),
                       gexp, preferred_element_type=_F32)            # ||h_c||^2 per m lane
        inv1 = lax.rsqrt(nsq1 + 1e-12)
        g1 = jnp.maximum((nsq1 * inv1) * s1 + bb1, 0.0)
        out1_ref[0] = g1 * out1 * inv1

    in_arrays = [h0]
    in_specs = [pl.BlockSpec((1, tn, c0), lambda b, t: (b, t, 0))]
    if has_h1:
        in_arrays.append(h1f)
        in_specs.append(pl.BlockSpec((1, tn, c13), lambda b, t: (b, t, 0)))
    in_arrays += [kv4, mask]
    in_specs += [pl.BlockSpec((1, tn, N, Dkv), lambda b, t: (b, t, 0, 0)),
                 pl.BlockSpec((1, tn, N), lambda b, t: (b, t, 0))]
    wlist = [wp["Wq0T"]]
    if has_k1:
        wlist.append(wp["Wq1m"])
    wlist += [wp["Wp0a"], wp["Wp0h"], wp["Wp1a"]]
    if has_h1:
        wlist.append(wp["Wp1h"])
    wlist += [wp["s0"], wp["b0"], wp["s1"], wp["b1"]]
    for warr in wlist:
        in_arrays.append(warr)
        in_specs.append(pl.BlockSpec(warr.shape, lambda b, t: (0, 0)))

    return pl.pallas_call(
        kernel,
        grid=(B, N // tn),
        in_specs=in_specs,
        out_specs=(pl.BlockSpec((1, tn, C), lambda b, t: (b, t, 0)),
                   pl.BlockSpec((1, tn, 3 * C), lambda b, t: (b, t, 0))),
        out_shape=(jax.ShapeDtypeStruct((B, N, C), _F32),
                   jax.ShapeDtypeStruct((B, N, 3 * C), _F32)),
        compiler_params=pltpu.CompilerParams(
            dimension_semantics=("parallel", "parallel"),
            vmem_limit_bytes=_VMEM_LIMIT),
    )(*in_arrays)


def gconv_pool(pconv, h0, h1f, edge_flat, rhat_flat, mask_flat, in_struct, n_nodes):
    """Fused GConvSE3(mid -> degree-0, self_interaction) + masked mean + GAvgPooling."""
    B, N, c0 = h0.shape
    NN = N * N
    C = NUM_CHANNELS
    in_degs = sorted(in_struct)
    pairs = tuple(("o", 0, di, in_struct[di], C) for di in in_degs)
    blocks = (("o", 0, C),)
    widths = [C * (2 * min(0, di) + 1) * in_struct[di] for di in in_degs]
    offsets, off = [], 0
    for wdt in widths:
        offsets.append(off)
        off += wdt
    rparams = [pconv["radial"][f"0,{di}"] for di in in_degs]
    W1, b1, W2, b2 = fuse_radial(rparams, widths)
    HP, SW = W1.shape[1], W2.shape[1]
    WselfT = pconv["Wself"].T
    use_h1 = 1 in in_struct
    c13 = h1f.shape[-1] if use_h1 else 0
    pairs_t, offsets_t = tuple(pairs), tuple(offsets)

    def kernel(*refs):
        i = 0
        edge = refs[i][0]; i += 1                # [NN, 5]
        rhat = refs[i][0]; i += 1                # [NN, 3]
        h0b = refs[i][0]; i += 1                 # [N, c0]
        h1b = None
        if use_h1:
            h1b = refs[i][0]; i += 1             # [N, 3*c1]
        msk = refs[i][0]; i += 1                 # [NN, 1]
        W1r = refs[i][...]; i += 1
        b1r = refs[i][...]; i += 1
        W2r = refs[i][...]; i += 1
        b2r = refs[i][...]; i += 1
        WsT = refs[i][...]; i += 1
        out_ref = refs[i]

        gs = _make_gs_cache()
        acc = _compute_messages(edge, rhat, None, h0b, h1b, W1r, b1r, W2r, b2r,
                                pairs_t, blocks, offsets_t, N, gs)
        msg0 = acc[0][0]                                             # [NN, C]
        mm = msg0 * msk
        seg = _segment_expand_matrix(N, N)                           # dst segment-sum [N, NN]
        aggsum = jnp.dot(seg, mm, preferred_element_type=_F32)       # [N, C]
        cnt = jnp.dot(seg, msk, preferred_element_type=_F32)         # [N, 1]
        agg = aggsum * pl.reciprocal(cnt + 1e-9, approx=True)        # guard: isolated nodes
        selfi = jnp.dot(h0b, WsT, preferred_element_type=_F32)       # self-interaction
        node = agg + selfi
        out_ref[0] = jnp.mean(node, axis=0, keepdims=True)           # GAvgPooling -> [1, C]

    in_arrays = [edge_flat, rhat_flat, h0]
    in_specs = [pl.BlockSpec((1, NN, 1 + EDGE_DIM), lambda b: (b, 0, 0)),
                pl.BlockSpec((1, NN, 3), lambda b: (b, 0, 0)),
                pl.BlockSpec((1, N, c0), lambda b: (b, 0, 0))]
    if use_h1:
        in_arrays.append(h1f)
        in_specs.append(pl.BlockSpec((1, N, c13), lambda b: (b, 0, 0)))
    in_arrays.append(mask_flat)
    in_specs.append(pl.BlockSpec((1, NN, 1), lambda b: (b, 0, 0)))
    for warr in (W1, b1, W2, b2, WselfT):
        in_arrays.append(warr)
        in_specs.append(pl.BlockSpec(warr.shape, lambda b: (0, 0)))

    out = pl.pallas_call(
        kernel,
        grid=(B,),
        in_specs=in_specs,
        out_specs=pl.BlockSpec((1, 1, C), lambda b: (b, 0, 0)),
        out_shape=jax.ShapeDtypeStruct((B, 1, C), _F32),
        compiler_params=pltpu.CompilerParams(
            dimension_semantics=("parallel",),
            vmem_limit_bytes=_VMEM_LIMIT),
    )(*in_arrays)
    return out[:, 0, :]


# =============================================================================
# Basis (get_basis_and_r) — plain JAX glue (edge-flattened layouts)
# =============================================================================
def get_basis_and_r(x):
    """Equivariant kernel bases for degree pairs among {0,1} + pairwise distances.
    Returns rhat [B,NN,3], basis11 [B,NN,27] (cols = (n,f,m)), r [B,NN,1]."""
    B, N, _ = x.shape
    d = x[:, :, None, :] - x[:, None, :, :]                           # x_dst - x_src
    r = jnp.sqrt(jnp.sum(d * d, axis=-1, keepdims=True) + 1e-12)
    # TODO(synk): rhat on the diagonal (self-edges) is 0/1e-6; harmless since self-edges masked.
    rhat = d / r
    eye = jnp.eye(3, dtype=_F32)
    lc = np.zeros((3, 3, 3), np.float32)
    lc[0, 1, 2] = lc[1, 2, 0] = lc[2, 0, 1] = 1.0
    lc[0, 2, 1] = lc[2, 1, 0] = lc[1, 0, 2] = -1.0
    lc = jnp.asarray(lc)
    k0 = jnp.broadcast_to(eye / np.sqrt(3.0), (B, N, N, 3, 3))
    k1 = jnp.einsum("ack,bijk->bijac", lc, rhat) / np.sqrt(2.0)
    k2 = np.sqrt(1.5) * (rhat[..., :, None] * rhat[..., None, :] - eye / 3.0)
    b11 = jnp.stack([k0, k1, k2], axis=3)                             # [B,N,N,f,n,m]
    b11 = jnp.transpose(b11, (0, 1, 2, 4, 3, 5)).reshape(B, N * N, 27)
    return rhat.reshape(B, N * N, 3), b11, r.reshape(B, N * N, 1)


# =============================================================================
# Layers
# =============================================================================
def gse3res_gnorm_layer(pres, pnorm, h0, h1f, edge_flat, rhat_flat, basis27, mask,
                        in_struct, n_nodes):
    """GSE3Res (attention block, skip='cat') followed by GNormSE3, as two fused kernels."""
    B, N, _ = h0.shape
    A = NC_ATTN
    in_degs = sorted(in_struct)
    key_degs = [d for d in range(NUM_DEGREES) if d in in_degs]

    pairs, rparams = [], []
    for do in key_degs:
        for di in in_degs:
            pairs.append(("k", do, di, in_struct[di], A))
            rparams.append(pres["k_radial"][f"{do},{di}"])
    for do in range(NUM_DEGREES):
        for di in in_degs:
            pairs.append(("v", do, di, in_struct[di], A))
            rparams.append(pres["v_radial"][f"{do},{di}"])
    blocks = tuple([("k", do, A) for do in key_degs] +
                   [("v", do, A) for do in range(NUM_DEGREES)])
    widths = [nco * (2 * min(do, di) + 1) * ci for (_, do, di, ci, nco) in pairs]
    offsets, off = [], 0
    for wdt in widths:
        offsets.append(off)
        off += wdt
    fused = fuse_radial(rparams, widths)

    kv = edge_messages(edge_flat, rhat_flat, basis27, h0, h1f, fused,
                       tuple(pairs), blocks, tuple(offsets), N, td=N)
    Dk = sum(A * (2 * d + 1) for d in key_degs)
    Dv = sum(A * (2 * d + 1) for d in range(NUM_DEGREES))
    kv4 = kv.reshape(B, N, N, Dk + Dv)

    wp = prep_attention_weights(pres, pnorm, in_struct, key_degs)
    return attention_node_update(h0, h1f, kv4, mask, wp, in_struct, key_degs, N, tn=N)


def se3_transformer_forward(params, x, f, w):
    B, N, _ = x.shape
    NN = N * N
    rhat_flat, basis27, r_flat = get_basis_and_r(x)
    edge_flat = jnp.concatenate([r_flat, w.reshape(B, NN, EDGE_DIM)], axis=-1)   # [B,NN,5]
    mask = jnp.broadcast_to(1.0 - jnp.eye(N, dtype=_F32), (B, N, N))             # no self-edges
    mask_flat = mask.reshape(B, NN, 1)

    h0 = f                                       # h = {'0': G.ndata['f']}  [B, N, c0]
    h1f = None                                   # degree-1 features, flat (c, m) layout
    in_struct = {0: ATOM_FEATURE_SIZE}
    for L in range(NUM_LAYERS):
        h0, h1f = gse3res_gnorm_layer(params["res"][L], params["norm"][L],
                                      h0, h1f, edge_flat, rhat_flat, basis27,
                                      mask, in_struct, N)            # GSE3Res + GNormSE3
        in_struct = {d: NUM_CHANNELS for d in range(NUM_DEGREES)}
    return gconv_pool(params["conv"], h0, h1f, edge_flat, rhat_flat, mask_flat,
                      in_struct, N)                                  # GConvSE3 + GAvgPooling


# =============================================================================
# Deterministic parameter initialization (same pytree structure as before)
# =============================================================================
class KeyGen:
    def __init__(self, seed):
        self._key = jax.random.PRNGKey(seed)

    def __call__(self):
        self._key, sub = jax.random.split(self._key)
        return sub


def _dense(kg, shape, fan_in):
    return jax.random.normal(kg(), shape, _F32) / np.sqrt(float(fan_in))


def init_radial(kg, n_in, n_hidden, n_out):
    return {"W1": _dense(kg, (n_in, n_hidden), n_in),
            "b1": jnp.zeros((1, n_hidden), _F32),
            "W2": _dense(kg, (n_hidden, n_out), n_hidden),
            "b2": jnp.zeros((1, n_out), _F32)}


def init_gse3res(kg, in_struct):
    in_degs = sorted(in_struct)
    key_degs = [d for d in range(NUM_DEGREES) if d in in_degs]
    p = {"v_radial": {}, "k_radial": {}, "Wq": {}, "Wp": {}}
    for do in range(NUM_DEGREES):
        for di in in_degs:
            nf = 2 * min(do, di) + 1
            p["v_radial"][f"{do},{di}"] = init_radial(kg, EDGE_DIM + 1, RAD_H,
                                                      NC_ATTN * in_struct[di] * nf)
    for do in key_degs:
        for di in in_degs:
            nf = 2 * min(do, di) + 1
            p["k_radial"][f"{do},{di}"] = init_radial(kg, EDGE_DIM + 1, RAD_H,
                                                      NC_ATTN * in_struct[di] * nf)
    for d in key_degs:
        p["Wq"][str(d)] = _dense(kg, (NC_ATTN, in_struct[d]), in_struct[d])
    for d in range(NUM_DEGREES):
        cin = NC_ATTN + (in_struct[d] if d in in_degs else 0)
        p["Wp"][str(d)] = _dense(kg, (NUM_CHANNELS, cin), cin)
    return p


def init_params(seed=42):
    kg = KeyGen(seed)
    params = {"res": [], "norm": [], "conv": None}
    in_struct = {0: ATOM_FEATURE_SIZE}
    mid_struct = {d: NUM_CHANNELS for d in range(NUM_DEGREES)}
    for _ in range(NUM_LAYERS):
        params["res"].append(init_gse3res(kg, in_struct))
        params["norm"].append(
            {str(d): {"scale": 1.0 + 0.1 * jax.random.normal(kg(), (NUM_CHANNELS,), _F32),
                      "bias": 0.1 * jax.random.normal(kg(), (NUM_CHANNELS,), _F32)}
             for d in range(NUM_DEGREES)})
        in_struct = dict(mid_struct)
    conv = {"radial": {}, "Wself": _dense(kg, (NUM_CHANNELS, NUM_CHANNELS), NUM_CHANNELS)}
    for di in range(NUM_DEGREES):
        conv["radial"][f"0,{di}"] = init_radial(kg, EDGE_DIM + 1, RAD_H,
                                                NUM_CHANNELS * NUM_CHANNELS)
    params["conv"] = conv
    return params


# =============================================================================
if __name__ == "__main__":
    B, N = 2, 8
    key = jax.random.PRNGKey(0)
    kx, kf, kw = jax.random.split(key, 3)
    x = jax.random.normal(kx, (B, N, 3), _F32)                      # node coordinates
    f = jax.random.normal(kf, (B, N, ATOM_FEATURE_SIZE), _F32)      # G.ndata['f'] (degree-0)
    w = jax.random.normal(kw, (B, N, N, EDGE_DIM), _F32)            # edge features
    w = 0.5 * (w + jnp.swapaxes(w, 1, 2))

    params = init_params(seed=42)
    fwd = jax.jit(se3_transformer_forward)
    out = jax.block_until_ready(fwd(params, x, f, w))

    assert out.shape == (B, NUM_CHANNELS), out.shape
    assert bool(jnp.all(jnp.isfinite(out)))
    print("KERNEL_OK")
</pallas_src>

<mosaic_0001>
module attributes {stable_mosaic.version = 11 : i64} {
  func.func @kernel(%arg0: i32, %arg1: i32, %arg2: memref<1x64x5xf32, #tpu.memory_space<vmem>>, %arg3: memref<1x64x3xf32, #tpu.memory_space<vmem>>, %arg4: memref<1x8x4xf32, #tpu.memory_space<vmem>>, %arg5: memref<5x48xf32, #tpu.memory_space<vmem>>, %arg6: memref<1x48xf32, #tpu.memory_space<vmem>>, %arg7: memref<48x24xf32, #tpu.memory_space<vmem>>, %arg8: memref<1x24xf32, #tpu.memory_space<vmem>>, %arg9: memref<1x64x10xf32, #tpu.memory_space<vmem>>) attributes {dimension_semantics = [#tpu.dimension_semantics<parallel>, #tpu.dimension_semantics<parallel>], iteration_bounds = array<i64: 2, 1>, scalar_prefetch = 0 : i64, scratch_operands = 0 : i64, tpu.core_type = #tpu.core_type<tc>, window_params = [{transform_indices = @transform_0, window_bounds = array<i64: 1, 64, 5>}, {transform_indices = @transform_1, window_bounds = array<i64: 1, 64, 3>}, {transform_indices = @transform_2, window_bounds = array<i64: 1, 8, 4>}, {pipeline_mode = #tpu.pipeline_mode<synchronous>, transform_indices = @transform_3, window_bounds = array<i64: 5, 48>}, {pipeline_mode = #tpu.pipeline_mode<synchronous>, transform_indices = @transform_4, window_bounds = array<i64: 1, 48>}, {pipeline_mode = #tpu.pipeline_mode<synchronous>, transform_indices = @transform_5, window_bounds = array<i64: 48, 24>}, {pipeline_mode = #tpu.pipeline_mode<synchronous>, transform_indices = @transform_6, window_bounds = array<i64: 1, 24>}, {transform_indices = @transform_7, window_bounds = array<i64: 1, 64, 10>}]} {
    %c0 = arith.constant 0 : index
    %c0_0 = arith.constant 0 : index
    %c0_1 = arith.constant 0 : index
    %0 = vector.load %arg2[%c0, %c0_0, %c0_1] : memref<1x64x5xf32, #tpu.memory_space<vmem>>, vector<1x64x5xf32>
    %1 = vector.shape_cast %0 : vector<1x64x5xf32> to vector<64x5xf32>
    %c0_2 = arith.constant 0 : index
    %c0_3 = arith.constant 0 : index
    %c0_4 = arith.constant 0 : index
    %2 = vector.load %arg3[%c0_2, %c0_3, %c0_4] : memref<1x64x3xf32, #tpu.memory_space<vmem>>, vector<1x64x3xf32>
    %3 = vector.shape_cast %2 : vector<1x64x3xf32> to vector<64x3xf32>
    %c0_5 = arith.constant 0 : index
    %c0_6 = arith.constant 0 : index
    %c0_7 = arith.constant 0 : index
    %4 = vector.load %arg4[%c0_5, %c0_6, %c0_7] : memref<1x8x4xf32, #tpu.memory_space<vmem>>, vector<1x8x4xf32>
    %5 = vector.shape_cast %4 : vector<1x8x4xf32> to vector<8x4xf32>
    %c0_8 = arith.constant 0 : index
    %c0_9 = arith.constant 0 : index
    %6 = vector.load %arg5[%c0_8, %c0_9] : memref<5x48xf32, #tpu.memory_space<vmem>>, vector<5x48xf32>
    %c0_10 = arith.constant 0 : index
    %c0_11 = arith.constant 0 : index
    %7 = vector.load %arg6[%c0_10, %c0_11] : memref<1x48xf32, #tpu.memory_space<vmem>>, vector<1x48xf32>
    %c0_12 = arith.constant 0 : index
    %c0_13 = arith.constant 0 : index
    %8 = vector.load %arg7[%c0_12, %c0_13] : memref<48x24xf32, #tpu.memory_space<vmem>>, vector<48x24xf32>
    %c0_14 = arith.constant 0 : index
    %c0_15 = arith.constant 0 : index
    %9 = vector.load %arg8[%c0_14, %c0_15] : memref<1x24xf32, #tpu.memory_space<vmem>>, vector<1x24xf32>
    %cst = arith.constant dense<0.000000e+00> : vector<64x48xf32>
    %10 = tpu.matmul %1, %6, %cst {dimension_numbers = #tpu.dot_dimension_numbers<[1], [0], [0], [1], [0, 0, 1, 1], [], []>} : vector<64x5xf32>, vector<5x48xf32>, vector<64x48xf32> -> vector<64x48xf32>
    %11 = vector.broadcast %7 : vector<1x48xf32> to vector<64x48xf32>
    %12 = arith.addf %10, %11 : vector<64x48xf32>
    %cst_16 = arith.constant 0.000000e+00 : f32
    %13 = vector.broadcast %cst_16 : f32 to vector<64x48xf32>
    %14 = arith.maximumf %12, %13 : vector<64x48xf32>
    %cst_17 = arith.constant dense<0.000000e+00> : vector<64x24xf32>
    %15 = tpu.matmul %14, %8, %cst_17 {dimension_numbers = #tpu.dot_dimension_numbers<[1], [0], [0], [1], [0, 0, 1, 1], [], []>} : vector<64x48xf32>, vector<48x24xf32>, vector<64x24xf32> -> vector<64x24xf32>
    %16 = vector.broadcast %9 : vector<1x24xf32> to vector<64x24xf32>
    %17 = arith.addf %15, %16 : vector<64x24xf32>
    %18 = tpu.concatenate %5, %5, %5, %5, %5, %5, %5, %5 in 0 : vector<8x4xf32>, vector<8x4xf32>, vector<8x4xf32>, vector<8x4xf32>, vector<8x4xf32>, vector<8x4xf32>, vector<8x4xf32>, vector<8x4xf32> -> vector<64x4xf32>
    %19 = vector.extract_strided_slice %17 {offsets = [0, 0], sizes = [64, 8], strides = [1, 1]} : vector<64x24xf32> to vector<64x8xf32>
    %20 = tpu.concatenate %18, %18 in 1 : vector<64x4xf32>, vector<64x4xf32> -> vector<64x8xf32>
    %21 = arith.mulf %19, %20 : vector<64x8xf32>
    %22 = tpu.iota {dimensions = array<i32: 0>} : vector<8x2xi32>
    %23 = tpu.iota {dimensions = array<i32: 1>} : vector<8x2xi32>
    %c4_i32 = arith.constant 4 : i32
    %24 = vector.broadcast %c4_i32 : i32 to vector<8x2xi32>
    %25 = arith.muli %23, %24 : vector<8x2xi32>
    %26 = arith.cmpi sge, %22, %25 : vector<8x2xi32>
    %c1_i32 = arith.constant 1 : i32
    %27 = vector.broadcast %c1_i32 : i32 to vector<8x2xi32>
    %28 = arith.addi %23, %27 : vector<8x2xi32>
    %c4_i32_18 = arith.constant 4 : i32
    %29 = vector.broadcast %c4_i32_18 : i32 to vector<8x2xi32>
    %30 = arith.muli %28, %29 : vector<8x2xi32>
    %31 = arith.cmpi slt, %22, %30 : vector<8x2xi32>
    %32 = arith.andi %26, %31 : vector<8x2xi1>
    %33 = arith.extui %32 : vector<8x2xi1> to vector<8x2xi32>
    %34 = arith.sitofp %33 : vector<8x2xi32> to vector<8x2xf32>
    %cst_19 = arith.constant dense<0.000000e+00> : vector<64x2xf32>
    %35 = tpu.matmul %21, %34, %cst_19 {dimension_numbers = #tpu.dot_dimension_numbers<[1], [0], [0], [1], [0, 0, 1, 1], [], []>} : vector<64x8xf32>, vector<8x2xf32>, vector<64x2xf32> -> vector<64x2xf32>
    %36 = vector.extract_strided_slice %17 {offsets = [0, 8], sizes = [64, 8], strides = [1, 1]} : vector<64x24xf32> to vector<64x8xf32>
    %37 = tpu.concatenate %18, %18 in 1 : vector<64x4xf32>, vector<64x4xf32> -> vector<64x8xf32>
    %38 = arith.mulf %36, %37 : vector<64x8xf32>
    %cst_20 = arith.constant dense<0.000000e+00> : vector<64x2xf32>
    %39 = tpu.matmul %38, %34, %cst_20 {dimension_numbers = #tpu.dot_dimension_numbers<[1], [0], [0], [1], [0, 0, 1, 1], [], []>} : vector<64x8xf32>, vector<8x2xf32>, vector<64x2xf32> -> vector<64x2xf32>
    %40 = vector.extract_strided_slice %17 {offsets = [0, 16], sizes = [64, 8], strides = [1, 1]} : vector<64x24xf32> to vector<64x8xf32>
    %41 = tpu.concatenate %18, %18 in 1 : vector<64x4xf32>, vector<64x4xf32> -> vector<64x8xf32>
    %42 = arith.mulf %40, %41 : vector<64x8xf32>
    %cst_21 = arith.constant dense<0.000000e+00> : vector<64x2xf32>
    %43 = tpu.matmul %42, %34, %cst_21 {dimension_numbers = #tpu.dot_dimension_numbers<[1], [0], [0], [1], [0, 0, 1, 1], [], []>} : vector<64x8xf32>, vector<8x2xf32>, vector<64x2xf32> -> vector<64x2xf32>
    %44 = vector.extract_strided_slice %3 {offsets = [0, 0], sizes = [64, 1], strides = [1, 1]} : vector<64x3xf32> to vector<64x1xf32>
    %45 = vector.broadcast %44 : vector<64x1xf32> to vector<64x2xf32>
    %46 = arith.mulf %43, %45 : vector<64x2xf32>
    %47 = vector.extract_strided_slice %3 {offsets = [0, 1], sizes = [64, 1], strides = [1, 1]} : vector<64x3xf32> to vector<64x1xf32>
    %48 = vector.broadcast %47 : vector<64x1xf32> to vector<64x2xf32>
    %49 = arith.mulf %43, %48 : vector<64x2xf32>
    %50 = vector.extract_strided_slice %3 {offsets = [0, 2], sizes = [64, 1], strides = [1, 1]} : vector<64x3xf32> to vector<64x1xf32>
    %51 = vector.broadcast %50 : vector<64x1xf32> to vector<64x2xf32>
    %52 = arith.mulf %43, %51 : vector<64x2xf32>
    %53 = tpu.concatenate %35, %39, %46, %49, %52 in 1 : vector<64x2xf32>, vector<64x2xf32>, vector<64x2xf32>, vector<64x2xf32>, vector<64x2xf32> -> vector<64x10xf32>
    %c0_22 = arith.constant 0 : index
    %c0_23 = arith.constant 0 : index
    %c0_24 = arith.constant 0 : index
    %54 = vector.load %arg9[%c0_22, %c0_23, %c0_24] : memref<1x64x10xf32, #tpu.memory_space<vmem>>, vector<1x64x10xf32>
    %55 = vector.shape_cast %54 : vector<1x64x10xf32> to vector<64x10xf32>
    %56 = vector.shape_cast %53 : vector<64x10xf32> to vector<1x64x10xf32>
    tpu.vector_store %arg9[%c0_22, %c0_23, %c0_24], %56 {strides = array<i32>} : memref<1x64x10xf32, #tpu.memory_space<vmem>>, vector<1x64x10xf32>,
    return
  }
  func.func @transform_0(%arg0: i32, %arg1: i32) -> (i32, i32, i32) {
    %c0_i32 = arith.constant 0 : i32
    %c0_i32_0 = arith.constant 0 : i32
    return %arg0, %arg1, %c0_i32 : i32, i32, i32
  }
  func.func @transform_1(%arg0: i32, %arg1: i32) -> (i32, i32, i32) {
    %c0_i32 = arith.constant 0 : i32
    %c0_i32_0 = arith.constant 0 : i32
    return %arg0, %arg1, %c0_i32 : i32, i32, i32
  }
  func.func @transform_2(%arg0: i32, %arg1: i32) -> (i32, i32, i32) {
    %c0_i32 = arith.constant 0 : i32
    %c0_i32_0 = arith.constant 0 : i32
    %c0_i32_1 = arith.constant 0 : i32
    return %arg0, %c0_i32, %c0_i32_0 : i32, i32, i32
  }
  func.func @transform_3(%arg0: i32, %arg1: i32) -> (i32, i32) {
    %c0_i32 = arith.constant 0 : i32
    %c0_i32_0 = arith.constant 0 : i32
    %c0_i32_1 = arith.constant 0 : i32
    return %c0_i32, %c0_i32_0 : i32, i32
  }
  func.func @transform_4(%arg0: i32, %arg1: i32) -> (i32, i32) {
    %c0_i32 = arith.constant 0 : i32
    %c0_i32_0 = arith.constant 0 : i32
    %c0_i32_1 = arith.constant 0 : i32
    return %c0_i32, %c0_i32_0 : i32, i32
  }
  func.func @transform_5(%arg0: i32, %arg1: i32) -> (i32, i32) {
    %c0_i32 = arith.constant 0 : i32
    %c0_i32_0 = arith.constant 0 : i32
    %c0_i32_1 = arith.constant 0 : i32
    return %c0_i32, %c0_i32_0 : i32, i32
  }
  func.func @transform_6(%arg0: i32, %arg1: i32) -> (i32, i32) {
    %c0_i32 = arith.constant 0 : i32
    %c0_i32_0 = arith.constant 0 : i32
    %c0_i32_1 = arith.constant 0 : i32
    return %c0_i32, %c0_i32_0 : i32, i32
  }
  func.func @transform_7(%arg0: i32, %arg1: i32) -> (i32, i32, i32) {
    %c0_i32 = arith.constant 0 : i32
    %c0_i32_0 = arith.constant 0 : i32
    return %arg0, %arg1, %c0_i32 : i32, i32, i32
  }
}

module attributes {stable_mosaic.version = 11 : i64} {
  func.func @kernel(%arg0: i32, %arg1: i32, %arg2: memref<1x8x4xf32, #tpu.memory_space<vmem>>, %arg3: memref<1x8x8x10xf32, #tpu.memory_space<vmem>>, %arg4: memref<1x8x8xf32, #tpu.memory_space<vmem>>, %arg5: memref<4x2xf32, #tpu.memory_space<vmem>>, %arg6: memref<2x8xf32, #tpu.memory_space<vmem>>, %arg7: memref<4x8xf32, #tpu.memory_space<vmem>>, %arg8: memref<6x24xf32, #tpu.memory_space<vmem>>, %arg9: memref<1x8xf32, #tpu.memory_space<vmem>>, %arg10: memref<1x8xf32, #tpu.memory_space<vmem>>, %arg11: memref<1x24xf32, #tpu.memory_space<vmem>>, %arg12: memref<1x24xf32, #tpu.memory_space<vmem>>, %arg13: memref<1x8x8xf32, #tpu.memory_space<vmem>>, %arg14: memref<1x8x24xf32, #tpu.memory_space<vmem>>) attributes {dimension_semantics = [#tpu.dimension_semantics<parallel>, #tpu.dimension_semantics<parallel>], iteration_bounds = array<i64: 2, 1>, scalar_prefetch = 0 : i64, scratch_operands = 0 : i64, tpu.core_type = #tpu.core_type<tc>, window_params = [{transform_indices = @transform_0, window_bounds = array<i64: 1, 8, 4>}, {transform_indices = @transform_1, window_bounds = array<i64: 1, 8, 8, 10>}, {transform_indices = @transform_2, window_bounds = array<i64: 1, 8, 8>}, {pipeline_mode = #tpu.pipeline_mode<synchronous>, transform_indices = @transform_3, window_bounds = array<i64: 4, 2>}, {pipeline_mode = #tpu.pipeline_mode<synchronous>, transform_indices = @transform_4, window_bounds = array<i64: 2, 8>}, {pipeline_mode = #tpu.pipeline_mode<synchronous>, transform_indices = @transform_5, window_bounds = array<i64: 4, 8>}, {pipeline_mode = #tpu.pipeline_mode<synchronous>, transform_indices = @transform_6, window_bounds = array<i64: 6, 24>}, {pipeline_mode = #tpu.pipeline_mode<synchronous>, transform_indices = @transform_7, window_bounds = array<i64: 1, 8>}, {pipeline_mode = #tpu.pipeline_mode<synchronous>, transform_indices = @transform_8, window_bounds = array<i64: 1, 8>}, {pipeline_mode = #tpu.pipeline_mode<synchronous>, transform_indices = @transform_9, window_bounds = array<i64: 1, 24>}, {pipeline_mode = #tpu.pipeline_mode<synchronous>, transform_indices = @transform_10, window_bounds = array<i64: 1, 24>}, {transform_indices = @transform_11, window_bounds = array<i64: 1, 8, 8>}, {transform_indices = @transform_12, window_bounds = array<i64: 1, 8, 24>}]} {
    %c0 = arith.constant 0 : index
    %c0_0 = arith.constant 0 : index
    %c0_1 = arith.constant 0 : index
    %0 = vector.load %arg2[%c0, %c0_0, %c0_1] : memref<1x8x4xf32, #tpu.memory_space<vmem>>, vector<1x8x4xf32>
    %1 = vector.shape_cast %0 : vector<1x8x4xf32> to vector<8x4xf32>
    %c0_2 = arith.constant 0 : index
    %c0_3 = arith.constant 0 : index
    %c0_4 = arith.constant 0 : index
    %c0_5 = arith.constant 0 : index
    %2 = vector.load %arg3[%c0_2, %c0_3, %c0_4, %c0_5] : memref<1x8x8x10xf32, #tpu.memory_space<vmem>>, vector<1x8x8x10xf32>
    %3 = vector.shape_cast %2 : vector<1x8x8x10xf32> to vector<8x8x10xf32>
    %c0_6 = arith.constant 0 : index
    %c0_7 = arith.constant 0 : index
    %c0_8 = arith.constant 0 : index
    %4 = vector.load %arg4[%c0_6, %c0_7, %c0_8] : memref<1x8x8xf32, #tpu.memory_space<vmem>>, vector<1x8x8xf32>
    %5 = vector.shape_cast %4 : vector<1x8x8xf32> to vector<8x8xf32>
    %c0_9 = arith.constant 0 : index
    %c0_10 = arith.constant 0 : index
    %6 = vector.load %arg5[%c0_9, %c0_10] : memref<4x2xf32, #tpu.memory_space<vmem>>, vector<4x2xf32>
    %c0_11 = arith.constant 0 : index
    %c0_12 = arith.constant 0 : index
    %7 = vector.load %arg6[%c0_11, %c0_12] : memref<2x8xf32, #tpu.memory_space<vmem>>, vector<2x8xf32>
    %c0_13 = arith.constant 0 : index
    %c0_14 = arith.constant 0 : index
    %8 = vector.load %arg7[%c0_13, %c0_14] : memref<4x8xf32, #tpu.memory_space<vmem>>, vector<4x8xf32>
    %c0_15 = arith.constant 0 : index
    %c0_16 = arith.constant 0 : index
    %9 = vector.load %arg8[%c0_15, %c0_16] : memref<6x24xf32, #tpu.memory_space<vmem>>, vector<6x24xf32>
    %c0_17 = arith.constant 0 : index
    %c0_18 = arith.constant 0 : index
    %10 = vector.load %arg9[%c0_17, %c0_18] : memref<1x8xf32, #tpu.memory_space<vmem>>, vector<1x8xf32>
    %c0_19 = arith.constant 0 : index
    %c0_20 = arith.constant 0 : index
    %11 = vector.load %arg10[%c0_19, %c0_20] : memref<1x8xf32, #tpu.memory_space<vmem>>, vector<1x8xf32>
    %c0_21 = arith.constant 0 : index
    %c0_22 = arith.constant 0 : index
    %12 = vector.load %arg11[%c0_21, %c0_22] : memref<1x24xf32, #tpu.memory_space<vmem>>, vector<1x24xf32>
    %c0_23 = arith.constant 0 : index
    %c0_24 = arith.constant 0 : index
    %13 = vector.load %arg12[%c0_23, %c0_24] : memref<1x24xf32, #tpu.memory_space<vmem>>, vector<1x24xf32>
    %cst = arith.constant dense<0.000000e+00> : vector<8x2xf32>
    %14 = tpu.matmul %1, %6, %cst {dimension_numbers = #tpu.dot_dimension_numbers<[1], [0], [0], [1], [0, 0, 1, 1], [], []>} : vector<8x4xf32>, vector<4x2xf32>, vector<8x2xf32> -> vector<8x2xf32>
    %15 = vector.extract_strided_slice %3 {offsets = [0, 0, 0], sizes = [8, 8, 2], strides = [1, 1, 1]} : vector<8x8x10xf32> to vector<8x8x2xf32>
    %16 = vector.extract_strided_slice %3 {offsets = [0, 0, 2], sizes = [8, 8, 8], strides = [1, 1, 1]} : vector<8x8x10xf32> to vector<8x8x8xf32>
    %17 = vector.shape_cast %14 : vector<8x2xf32> to vector<8x1x2xf32>
    %18 = vector.broadcast %17 : vector<8x1x2xf32> to vector<8x8x2xf32>
    %19 = arith.mulf %15, %18 : vector<8x8x2xf32>
    %cst_25 = arith.constant dense<0.000000e+00> : vector<8x8xf32>
    %20 = vector.multi_reduction <add>, %19, %cst_25 [2] : vector<8x8x2xf32> to vector<8x8xf32>
    %cst_26 = arith.constant 0.707106769 : f32
    %21 = vector.broadcast %cst_26 : f32 to vector<8x8xf32>
    %22 = arith.mulf %20, %21 : vector<8x8xf32>
    %cst_27 = arith.constant 0.000000e+00 : f32
    %23 = vector.broadcast %cst_27 : f32 to vector<8x8xf32>
    %24 = arith.cmpf ogt, %5, %23 : vector<8x8xf32>
    %25 = arith.extui %24 : vector<8x8xi1> to vector<8x8xi32>
    %26 = arith.sitofp %25 : vector<8x8xi32> to vector<8x8xf32>
    %cst_28 = arith.constant 0.000000e+00 : f32
    %27 = vector.broadcast %cst_28 : f32 to vector<8x8xf32>
    %28 = arith.cmpf ogt, %5, %27 : vector<8x8xf32>
    %cst_29 = arith.constant -1.000000e+30 : f32
    %29 = vector.broadcast %cst_29 : f32 to vector<8x8xf32>
    %30 = arith.select %28, %22, %29 : vector<8x8xi1>, vector<8x8xf32>
    %cst_30 = arith.constant dense<0xFF800000> : vector<8xf32>
    %31 = vector.multi_reduction <maximumf>, %30, %cst_30 [1] : vector<8x8xf32> to vector<8xf32>
    %32 = vector.shape_cast %31 : vector<8xf32> to vector<8x1xf32>
    %33 = vector.broadcast %32 : vector<8x1xf32> to vector<8x8xf32>
    %34 = arith.subf %30, %33 : vector<8x8xf32>
    %35 = math.exp %34 : vector<8x8xf32>
    %36 = arith.mulf %35, %26 : vector<8x8xf32>
    %cst_31 = arith.constant dense<0.000000e+00> : vector<8xf32>
    %37 = vector.multi_reduction <add>, %36, %cst_31 [1] : vector<8x8xf32> to vector<8xf32>
    %38 = vector.shape_cast %37 : vector<8xf32> to vector<8x1xf32>
    %cst_32 = arith.constant 9.99999968E-21 : f32
    %39 = vector.broadcast %cst_32 : f32 to vector<8x1xf32>
    %40 = arith.addf %38, %39 : vector<8x1xf32>
    %41 = tpu.reciprocal %40 {approx = true} : vector<8x1xf32> -> vector<8x1xf32>
    %42 = vector.broadcast %41 : vector<8x1xf32> to vector<8x8xf32>
    %43 = arith.mulf %36, %42 : vector<8x8xf32>
    %44 = vector.shape_cast %43 : vector<8x8xf32> to vector<8x8x1xf32>
    %45 = vector.broadcast %44 : vector<8x8x1xf32> to vector<8x8x8xf32>
    %46 = arith.mulf %45, %16 : vector<8x8x8xf32>
    %cst_33 = arith.constant dense<0.000000e+00> : vector<8x8xf32>
    %47 = vector.multi_reduction <add>, %46, %cst_33 [1] : vector<8x8x8xf32> to vector<8x8xf32>
    %48 = vector.extract_strided_slice %47 {offsets = [0, 0], sizes = [8, 2], strides = [1, 1]} : vector<8x8xf32> to vector<8x2xf32>
    %cst_34 = arith.constant dense<0.000000e+00> : vector<8x8xf32>
    %49 = tpu.matmul %48, %7, %cst_34 {dimension_numbers = #tpu.dot_dimension_numbers<[1], [0], [0], [1], [0, 0, 1, 1], [], []>} : vector<8x2xf32>, vector<2x8xf32>, vector<8x8xf32> -> vector<8x8xf32>
    %cst_35 = arith.constant dense<0.000000e+00> : vector<8x8xf32>
    %50 = tpu.matmul %1, %8, %cst_35 {dimension_numbers = #tpu.dot_dimension_numbers<[1], [0], [0], [1], [0, 0, 1, 1], [], []>} : vector<8x4xf32>, vector<4x8xf32>, vector<8x8xf32> -> vector<8x8xf32>
    %51 = arith.addf %49, %50 : vector<8x8xf32>
    %52 = arith.mulf %51, %51 : vector<8x8xf32>
    %cst_36 = arith.constant 9.99999996E-13 : f32
    %53 = vector.broadcast %cst_36 : f32 to vector<8x8xf32>
    %54 = arith.addf %52, %53 : vector<8x8xf32>
    %55 = math.rsqrt %54 : vector<8x8xf32>
    %56 = arith.mulf %52, %55 : vector<8x8xf32>
    %57 = vector.broadcast %10 : vector<1x8xf32> to vector<8x8xf32>
    %58 = arith.mulf %56, %57 : vector<8x8xf32>
    %59 = vector.broadcast %11 : vector<1x8xf32> to vector<8x8xf32>
    %60 = arith.addf %58, %59 : vector<8x8xf32>
    %cst_37 = arith.constant 0.000000e+00 : f32
    %61 = vector.broadcast %cst_37 : f32 to vector<8x8xf32>
    %62 = arith.maximumf %60, %61 : vector<8x8xf32>
    %63 = arith.mulf %62, %51 : vector<8x8xf32>
    %64 = arith.mulf %63, %55 : vector<8x8xf32>
    %c0_38 = arith.constant 0 : index
    %c0_39 = arith.constant 0 : index
    %c0_40 = arith.constant 0 : index
    %65 = vector.load %arg13[%c0_38, %c0_39, %c0_40] : memref<1x8x8xf32, #tpu.memory_space<vmem>>, vector<1x8x8xf32>
    %66 = vector.shape_cast %65 : vector<1x8x8xf32> to vector<8x8xf32>
    %67 = vector.shape_cast %64 : vector<8x8xf32> to vector<1x8x8xf32>
    tpu.vector_store %arg13[%c0_38, %c0_39, %c0_40], %67 {strides = array<i32>} : memref<1x8x8xf32, #tpu.memory_space<vmem>>, vector<1x8x8xf32>,
    %68 = vector.extract_strided_slice %47 {offsets = [0, 2], sizes = [8, 6], strides = [1, 1]} : vector<8x8xf32> to vector<8x6xf32>
    %cst_41 = arith.constant dense<0.000000e+00> : vector<8x24xf32>
    %69 = tpu.matmul %68, %9, %cst_41 {dimension_numbers = #tpu.dot_dimension_numbers<[1], [0], [0], [1], [0, 0, 1, 1], [], []>} : vector<8x6xf32>, vector<6x24xf32>, vector<8x24xf32> -> vector<8x24xf32>
    %70 = tpu.iota {dimensions = array<i32: 0>} : vector<24x8xi32>
    %71 = tpu.iota {dimensions = array<i32: 1>} : vector<24x8xi32>
    %c3_i32 = arith.constant 3 : i32
    %72 = vector.broadcast %c3_i32 : i32 to vector<24x8xi32>
    %73 = arith.muli %71, %72 : vector<24x8xi32>
    %74 = arith.cmpi sge, %70, %73 : vector<24x8xi32>
    %c1_i32 = arith.constant 1 : i32
    %75 = vector.broadcast %c1_i32 : i32 to vector<24x8xi32>
    %76 = arith.addi %71, %75 : vector<24x8xi32>
    %c3_i32_42 = arith.constant 3 : i32
    %77 = vector.broadcast %c3_i32_42 : i32 to vector<24x8xi32>
    %78 = arith.muli %76, %77 : vector<24x8xi32>
    %79 = arith.cmpi slt, %70, %78 : vector<24x8xi32>
    %80 = arith.andi %74, %79 : vector<24x8xi1>
    %81 = arith.extui %80 : vector<24x8xi1> to vector<24x8xi32>
    %82 = arith.sitofp %81 : vector<24x8xi32> to vector<24x8xf32>
    %83 = tpu.iota {dimensions = array<i32: 0>} : vector<8x24xi32>
    %84 = tpu.iota {dimensions = array<i32: 1>} : vector<8x24xi32>
    %c3_i32_43 = arith.constant 3 : i32
    %85 = vector.broadcast %c3_i32_43 : i32 to vector<8x24xi32>
    %86 = arith.muli %83, %85 : vector<8x24xi32>
    %87 = arith.cmpi sge, %84, %86 : vector<8x24xi32>
    %c1_i32_44 = arith.constant 1 : i32
    %88 = vector.broadcast %c1_i32_44 : i32 to vector<8x24xi32>
    %89 = arith.addi %83, %88 : vector<8x24xi32>
    %c3_i32_45 = arith.constant 3 : i32
    %90 = vector.broadcast %c3_i32_45 : i32 to vector<8x24xi32>
    %91 = arith.muli %89, %90 : vector<8x24xi32>
    %92 = arith.cmpi slt, %84, %91 : vector<8x24xi32>
    %93 = arith.andi %87, %92 : vector<8x24xi1>
    %94 = arith.extui %93 : vector<8x24xi1> to vector<8x24xi32>
    %95 = arith.sitofp %94 : vector<8x24xi32> to vector<8x24xf32>
    %96 = arith.mulf %69, %69 : vector<8x24xf32>
    %cst_46 = arith.constant dense<0.000000e+00> : vector<8x8xf32>
    %97 = tpu.matmul %96, %82, %cst_46 {dimension_numbers = #tpu.dot_dimension_numbers<[1], [0], [0], [1], [0, 0, 1, 1], [], []>} : vector<8x24xf32>, vector<24x8xf32>, vector<8x8xf32> -> vector<8x8xf32>
    %cst_47 = arith.constant dense<0.000000e+00> : vector<8x24xf32>
    %98 = tpu.matmul %97, %95, %cst_47 {dimension_numbers = #tpu.dot_dimension_numbers<[1], [0], [0], [1], [0, 0, 1, 1], [], []>} : vector<8x8xf32>, vector<8x24xf32>, vector<8x24xf32> -> vector<8x24xf32>
    %cst_48 = arith.constant 9.99999996E-13 : f32
    %99 = vector.broadcast %cst_48 : f32 to vector<8x24xf32>
    %100 = arith.addf %98, %99 : vector<8x24xf32>
    %101 = math.rsqrt %100 : vector<8x24xf32>
    %102 = arith.mulf %98, %101 : vector<8x24xf32>
    %103 = vector.broadcast %12 : vector<1x24xf32> to vector<8x24xf32>
    %104 = arith.mulf %102, %103 : vector<8x24xf32>
    %105 = vector.broadcast %13 : vector<1x24xf32> to vector<8x24xf32>
    %106 = arith.addf %104, %105 : vector<8x24xf32>
    %cst_49 = arith.constant 0.000000e+00 : f32
    %107 = vector.broadcast %cst_49 : f32 to vector<8x24xf32>
    %108 = arith.maximumf %106, %107 : vector<8x24xf32>
    %109 = arith.mulf %108, %69 : vector<8x24xf32>
    %110 = arith.mulf %109, %101 : vector<8x24xf32>
    %c0_50 = arith.constant 0 : index
    %c0_51 = arith.constant 0 : index
    %c0_52 = arith.constant 0 : index
    %111 = vector.load %arg14[%c0_50, %c0_51, %c0_52] : memref<1x8x24xf32, #tpu.memory_space<vmem>>, vector<1x8x24xf32>
    %112 = vector.shape_cast %111 : vector<1x8x24xf32> to vector<8x24xf32>
    %113 = vector.shape_cast %110 : vector<8x24xf32> to vector<1x8x24xf32>
    tpu.vector_store %arg14[%c0_50, %c0_51, %c0_52], %113 {strides = array<i32>} : memref<1x8x24xf32, #tpu.memory_space<vmem>>, vector<1x8x24xf32>,
    return
  }
  func.func @transform_0(%arg0: i32, %arg1: i32) -> (i32, i32, i32) {
    %c0_i32 = arith.constant 0 : i32
    %c0_i32_0 = arith.constant 0 : i32
    return %arg0, %arg1, %c0_i32 : i32, i32, i32
  }
  func.func @transform_1(%arg0: i32, %arg1: i32) -> (i32, i32, i32, i32) {
    %c0_i32 = arith.constant 0 : i32
    %c0_i32_0 = arith.constant 0 : i32
    %c0_i32_1 = arith.constant 0 : i32
    return %arg0, %arg1, %c0_i32, %c0_i32_0 : i32, i32, i32, i32
  }
  func.func @transform_2(%arg0: i32, %arg1: i32) -> (i32, i32, i32) {
    %c0_i32 = arith.constant 0 : i32
    %c0_i32_0 = arith.constant 0 : i32
    return %arg0, %arg1, %c0_i32 : i32, i32, i32
  }
  func.func @transform_3(%arg0: i32, %arg1: i32) -> (i32, i32) {
    %c0_i32 = arith.constant 0 : i32
    %c0_i32_0 = arith.constant 0 : i32
    %c0_i32_1 = arith.constant 0 : i32
    return %c0_i32, %c0_i32_0 : i32, i32
  }
  func.func @transform_4(%arg0: i32, %arg1: i32) -> (i32, i32) {
    %c0_i32 = arith.constant 0 : i32
    %c0_i32_0 = arith.constant 0 : i32
    %c0_i32_1 = arith.constant 0 : i32
    return %c0_i32, %c0_i32_0 : i32, i32
  }
  func.func @transform_5(%arg0: i32, %arg1: i32) -> (i32, i32) {
    %c0_i32 = arith.constant 0 : i32
    %c0_i32_0 = arith.constant 0 : i32
    %c0_i32_1 = arith.constant 0 : i32
    return %c0_i32, %c0_i32_0 : i32, i32
  }
  func.func @transform_6(%arg0: i32, %arg1: i32) -> (i32, i32) {
    %c0_i32 = arith.constant 0 : i32
    %c0_i32_0 = arith.constant 0 : i32
    %c0_i32_1 = arith.constant 0 : i32
    return %c0_i32, %c0_i32_0 : i32, i32
  }
  func.func @transform_7(%arg0: i32, %arg1: i32) -> (i32, i32) {
    %c0_i32 = arith.constant 0 : i32
    %c0_i32_0 = arith.constant 0 : i32
    %c0_i32_1 = arith.constant 0 : i32
    return %c0_i32, %c0_i32_0 : i32, i32
  }
  func.func @transform_8(%arg0: i32, %arg1: i32) -> (i32, i32) {
    %c0_i32 = arith.constant 0 : i32
    %c0_i32_0 = arith.constant 0 : i32
    %c0_i32_1 = arith.constant 0 : i32
    return %c0_i32, %c0_i32_0 : i32, i32
  }
  func.func @transform_9(%arg0: i32, %arg1: i32) -> (i32, i32) {
    %c0_i32 = arith.constant 0 : i32
    %c0_i32_0 = arith.constant 0 : i32
    %c0_i32_1 = arith.constant 0 : i32
    return %c0_i32, %c0_i32_0 : i32, i32
  }
  func.func @transform_10(%arg0: i32, %arg1: i32) -> (i32, i32) {
    %c0_i32 = arith.constant 0 : i32
    %c0_i32_0 = arith.constant 0 : i32
    %c0_i32_1 = arith.constant 0 : i32
    return %c0_i32, %c0_i32_0 : i32, i32
  }
  func.func @transform_11(%arg0: i32, %arg1: i32) -> (i32, i32, i32) {
    %c0_i32 = arith.constant 0 : i32
    %c0_i32_0 = arith.constant 0 : i32
    return %arg0, %arg1, %c0_i32 : i32, i32, i32
  }
  func.func @transform_12(%arg0: i32, %arg1: i32) -> (i32, i32, i32) {
    %c0_i32 = arith.constant 0 : i32
    %c0_i32_0 = arith.constant 0 : i32
    return %arg0, %arg1, %c0_i32 : i32, i32, i32
  }
}

module attributes {stable_mosaic.version = 11 : i64} {
  func.func @kernel(%arg0: i32, %arg1: i32, %arg2: memref<1x64x5xf32, #tpu.memory_space<vmem>>, %arg3: memref<1x64x3xf32, #tpu.memory_space<vmem>>, %arg4: memref<1x64x27xf32, #tpu.memory_space<vmem>>, %arg5: memref<1x8x8xf32, #tpu.memory_space<vmem>>, %arg6: memref<1x8x24xf32, #tpu.memory_space<vmem>>, %arg7: memref<5x128xf32, #tpu.memory_space<vmem>>, %arg8: memref<1x128xf32, #tpu.memory_space<vmem>>, %arg9: memref<128x192xf32, #tpu.memory_space<vmem>>, %arg10: memref<1x192xf32, #tpu.memory_space<vmem>>, %arg11: memref<1x64x16xf32, #tpu.memory_space<vmem>>) attributes {dimension_semantics = [#tpu.dimension_semantics<parallel>, #tpu.dimension_semantics<parallel>], iteration_bounds = array<i64: 2, 1>, scalar_prefetch = 0 : i64, scratch_operands = 0 : i64, tpu.core_type = #tpu.core_type<tc>, window_params = [{transform_indices = @transform_0, window_bounds = array<i64: 1, 64, 5>}, {transform_indices = @transform_1, window_bounds = array<i64: 1, 64, 3>}, {transform_indices = @transform_2, window_bounds = array<i64: 1, 64, 27>}, {transform_indices = @transform_3, window_bounds = array<i64: 1, 8, 8>}, {transform_indices = @transform_4, window_bounds = array<i64: 1, 8, 24>}, {pipeline_mode = #tpu.pipeline_mode<synchronous>, transform_indices = @transform_5, window_bounds = array<i64: 5, 128>}, {pipeline_mode = #tpu.pipeline_mode<synchronous>, transform_indices = @transform_6, window_bounds = array<i64: 1, 128>}, {pipeline_mode = #tpu.pipeline_mode<synchronous>, transform_indices = @transform_7, window_bounds = array<i64: 128, 192>}, {pipeline_mode = #tpu.pipeline_mode<synchronous>, transform_indices = @transform_8, window_bounds = array<i64: 1, 192>}, {transform_indices = @transform_9, window_bounds = array<i64: 1, 64, 16>}]} {
    %c0 = arith.constant 0 : index
    %c0_0 = arith.constant 0 : index
    %c0_1 = arith.constant 0 : index
    %0 = vector.load %arg2[%c0, %c0_0, %c0_1] : memref<1x64x5xf32, #tpu.memory_space<vmem>>, vector<1x64x5xf32>
    %1 = vector.shape_cast %0 : vector<1x64x5xf32> to vector<64x5xf32>
    %c0_2 = arith.constant 0 : index
    %c0_3 = arith.constant 0 : index
    %c0_4 = arith.constant 0 : index
    %2 = vector.load %arg3[%c0_2, %c0_3, %c0_4] : memref<1x64x3xf32, #tpu.memory_space<vmem>>, vector<1x64x3xf32>
    %3 = vector.shape_cast %2 : vector<1x64x3xf32> to vector<64x3xf32>
    %c0_5 = arith.constant 0 : index
    %c0_6 = arith.constant 0 : index
    %c0_7 = arith.constant 0 : index
    %4 = vector.load %arg4[%c0_5, %c0_6, %c0_7] : memref<1x64x27xf32, #tpu.memory_space<vmem>>, vector<1x64x27xf32>
    %5 = vector.shape_cast %4 : vector<1x64x27xf32> to vector<64x27xf32>
    %c0_8 = arith.constant 0 : index
    %c0_9 = arith.constant 0 : index
    %c0_10 = arith.constant 0 : index
    %6 = vector.load %arg5[%c0_8, %c0_9, %c0_10] : memref<1x8x8xf32, #tpu.memory_space<vmem>>, vector<1x8x8xf32>
    %7 = vector.shape_cast %6 : vector<1x8x8xf32> to vector<8x8xf32>
    %c0_11 = arith.constant 0 : index
    %c0_12 = arith.constant 0 : index
    %c0_13 = arith.constant 0 : index
    %8 = vector.load %arg6[%c0_11, %c0_12, %c0_13] : memref<1x8x24xf32, #tpu.memory_space<vmem>>, vector<1x8x24xf32>
    %9 = vector.shape_cast %8 : vector<1x8x24xf32> to vector<8x24xf32>
    %c0_14 = arith.constant 0 : index
    %c0_15 = arith.constant 0 : index
    %10 = vector.load %arg7[%c0_14, %c0_15] : memref<5x128xf32, #tpu.memory_space<vmem>>, vector<5x128xf32>
    %c0_16 = arith.constant 0 : index
    %c0_17 = arith.constant 0 : index
    %11 = vector.load %arg8[%c0_16, %c0_17] : memref<1x128xf32, #tpu.memory_space<vmem>>, vector<1x128xf32>
    %c0_18 = arith.constant 0 : index
    %c0_19 = arith.constant 0 : index
    %12 = vector.load %arg9[%c0_18, %c0_19] : memref<128x192xf32, #tpu.memory_space<vmem>>, vector<128x192xf32>
    %c0_20 = arith.constant 0 : index
    %c0_21 = arith.constant 0 : index
    %13 = vector.load %arg10[%c0_20, %c0_21] : memref<1x192xf32, #tpu.memory_space<vmem>>, vector<1x192xf32>
    %cst = arith.constant dense<0.000000e+00> : vector<64x128xf32>
    %14 = tpu.matmul %1, %10, %cst {dimension_numbers = #tpu.dot_dimension_numbers<[1], [0], [0], [1], [0, 0, 1, 1], [], []>} : vector<64x5xf32>, vector<5x128xf32>, vector<64x128xf32> -> vector<64x128xf32>
    %15 = vector.broadcast %11 : vector<1x128xf32> to vector<64x128xf32>
    %16 = arith.addf %14, %15 : vector<64x128xf32>
    %cst_22 = arith.constant 0.000000e+00 : f32
    %17 = vector.broadcast %cst_22 : f32 to vector<64x128xf32>
    %18 = arith.maximumf %16, %17 : vector<64x128xf32>
    %cst_23 = arith.constant dense<0.000000e+00> : vector<64x192xf32>
    %19 = tpu.matmul %18, %12, %cst_23 {dimension_numbers = #tpu.dot_dimension_numbers<[1], [0], [0], [1], [0, 0, 1, 1], [], []>} : vector<64x128xf32>, vector<128x192xf32>, vector<64x192xf32> -> vector<64x192xf32>
    %20 = vector.broadcast %13 : vector<1x192xf32> to vector<64x192xf32>
    %21 = arith.addf %19, %20 : vector<64x192xf32>
    %22 = tpu.concatenate %7, %7, %7, %7, %7, %7, %7, %7 in 0 : vector<8x8xf32>, vector<8x8xf32>, vector<8x8xf32>, vector<8x8xf32>, vector<8x8xf32>, vector<8x8xf32>, vector<8x8xf32>, vector<8x8xf32> -> vector<64x8xf32>
    %23 = tpu.concatenate %9, %9, %9, %9, %9, %9, %9, %9 in 0 : vector<8x24xf32>, vector<8x24xf32>, vector<8x24xf32>, vector<8x24xf32>, vector<8x24xf32>, vector<8x24xf32>, vector<8x24xf32>, vector<8x24xf32> -> vector<64x24xf32>
    %24 = tpu.concatenate %3, %3, %3, %3, %3, %3, %3, %3 in 1 : vector<64x3xf32>, vector<64x3xf32>, vector<64x3xf32>, vector<64x3xf32>, vector<64x3xf32>, vector<64x3xf32>, vector<64x3xf32>, vector<64x3xf32> -> vector<64x24xf32>
    %25 = arith.mulf %23, %24 : vector<64x24xf32>
    %26 = tpu.iota {dimensions = array<i32: 0>} : vector<24x8xi32>
    %27 = tpu.iota {dimensions = array<i32: 1>} : vector<24x8xi32>
    %c3_i32 = arith.constant 3 : i32
    %28 = vector.broadcast %c3_i32 : i32 to vector<24x8xi32>
    %29 = arith.muli %27, %28 : vector<24x8xi32>
    %30 = arith.cmpi sge, %26, %29 : vector<24x8xi32>
    %c1_i32 = arith.constant 1 : i32
    %31 = vector.broadcast %c1_i32 : i32 to vector<24x8xi32>
    %32 = arith.addi %27, %31 : vector<24x8xi32>
    %c3_i32_24 = arith.constant 3 : i32
    %33 = vector.broadcast %c3_i32_24 : i32 to vector<24x8xi32>
    %34 = arith.muli %32, %33 : vector<24x8xi32>
    %35 = arith.cmpi slt, %26, %34 : vector<24x8xi32>
    %36 = arith.andi %30, %35 : vector<24x8xi1>
    %37 = arith.extui %36 : vector<24x8xi1> to vector<24x8xi32>
    %38 = arith.sitofp %37 : vector<24x8xi32> to vector<24x8xf32>
    %cst_25 = arith.constant dense<0.000000e+00> : vector<64x8xf32>
    %39 = tpu.matmul %25, %38, %cst_25 {dimension_numbers = #tpu.dot_dimension_numbers<[1], [0], [0], [1], [0, 0, 1, 1], [], []>} : vector<64x24xf32>, vector<24x8xf32>, vector<64x8xf32> -> vector<64x8xf32>
    %40 = tpu.concatenate %23, %23, %23 in 1 : vector<64x24xf32>, vector<64x24xf32>, vector<64x24xf32> -> vector<64x72xf32>
    %41 = vector.extract_strided_slice %5 {offsets = [0, 0], sizes = [64, 9], strides = [1, 1]} : vector<64x27xf32> to vector<64x9xf32>
    %42 = vector.extract_strided_slice %41 {offsets = [0, 0], sizes = [64, 3], strides = [1, 1]} : vector<64x9xf32> to vector<64x3xf32>
    %43 = tpu.concatenate %42, %42, %42, %42, %42, %42, %42, %42 in 1 : vector<64x3xf32>, vector<64x3xf32>, vector<64x3xf32>, vector<64x3xf32>, vector<64x3xf32>, vector<64x3xf32>, vector<64x3xf32>, vector<64x3xf32> -> vector<64x24xf32>
    %44 = vector.extract_strided_slice %41 {offsets = [0, 3], sizes = [64, 3], strides = [1, 1]} : vector<64x9xf32> to vector<64x3xf32>
    %45 = tpu.concatenate %44, %44, %44, %44, %44, %44, %44, %44 in 1 : vector<64x3xf32>, vector<64x3xf32>, vector<64x3xf32>, vector<64x3xf32>, vector<64x3xf32>, vector<64x3xf32>, vector<64x3xf32>, vector<64x3xf32> -> vector<64x24xf32>
    %46 = vector.extract_strided_slice %41 {offsets = [0, 6], sizes = [64, 3], strides = [1, 1]} : vector<64x9xf32> to vector<64x3xf32>
    %47 = tpu.concatenate %46, %46, %46, %46, %46, %46, %46, %46 in 1 : vector<64x3xf32>, vector<64x3xf32>, vector<64x3xf32>, vector<64x3xf32>, vector<64x3xf32>, vector<64x3xf32>, vector<64x3xf32>, vector<64x3xf32> -> vector<64x24xf32>
    %48 = tpu.concatenate %43, %45, %47 in 1 : vector<64x24xf32>, vector<64x24xf32>, vector<64x24xf32> -> vector<64x72xf32>
    %49 = arith.mulf %48, %40 : vector<64x72xf32>
    %50 = tpu.iota {dimensions = array<i32: 0>} : vector<72x24xi32>
    %51 = tpu.iota {dimensions = array<i32: 1>} : vector<72x24xi32>
    %c3_i32_26 = arith.constant 3 : i32
    %52 = vector.broadcast %c3_i32_26 : i32 to vector<72x24xi32>
    %53 = arith.muli %51, %52 : vector<72x24xi32>
    %54 = arith.cmpi sge, %50, %53 : vector<72x24xi32>
    %c1_i32_27 = arith.constant 1 : i32
    %55 = vector.broadcast %c1_i32_27 : i32 to vector<72x24xi32>
    %56 = arith.addi %51, %55 : vector<72x24xi32>
    %c3_i32_28 = arith.constant 3 : i32
    %57 = vector.broadcast %c3_i32_28 : i32 to vector<72x24xi32>
    %58 = arith.muli %56, %57 : vector<72x24xi32>
    %59 = arith.cmpi slt, %50, %58 : vector<72x24xi32>
    %60 = arith.andi %54, %59 : vector<72x24xi1>
    %61 = arith.extui %60 : vector<72x24xi1> to vector<72x24xi32>
    %62 = arith.sitofp %61 : vector<72x24xi32> to vector<72x24xf32>
    %cst_29 = arith.constant dense<0.000000e+00> : vector<64x24xf32>
    %63 = tpu.matmul %49, %62, %cst_29 {dimension_numbers = #tpu.dot_dimension_numbers<[1], [0], [0], [1], [0, 0, 1, 1], [], []>} : vector<64x72xf32>, vector<72x24xf32>, vector<64x24xf32> -> vector<64x24xf32>
    %64 = vector.extract_strided_slice %5 {offsets = [0, 9], sizes = [64, 9], strides = [1, 1]} : vector<64x27xf32> to vector<64x9xf32>
    %65 = vector.extract_strided_slice %64 {offsets = [0, 0], sizes = [64, 3], strides = [1, 1]} : vector<64x9xf32> to vector<64x3xf32>
    %66 = tpu.concatenate %65, %65, %65, %65, %65, %65, %65, %65 in 1 : vector<64x3xf32>, vector<64x3xf32>, vector<64x3xf32>, vector<64x3xf32>, vector<64x3xf32>, vector<64x3xf32>, vector<64x3xf32>, vector<64x3xf32> -> vector<64x24xf32>
    %67 = vector.extract_strided_slice %64 {offsets = [0, 3], sizes = [64, 3], strides = [1, 1]} : vector<64x9xf32> to vector<64x3xf32>
    %68 = tpu.concatenate %67, %67, %67, %67, %67, %67, %67, %67 in 1 : vector<64x3xf32>, vector<64x3xf32>, vector<64x3xf32>, vector<64x3xf32>, vector<64x3xf32>, vector<64x3xf32>, vector<64x3xf32>, vector<64x3xf32> -> vector<64x24xf32>
    %69 = vector.extract_strided_slice %64 {offsets = [0, 6], sizes = [64, 3], strides = [1, 1]} : vector<64x9xf32> to vector<64x3xf32>
    %70 = tpu.concatenate %69, %69, %69, %69, %69, %69, %69, %69 in 1 : vector<64x3xf32>, vector<64x3xf32>, vector<64x3xf32>, vector<64x3xf32>, vector<64x3xf32>, vector<64x3xf32>, vector<64x3xf32>, vector<64x3xf32> -> vector<64x24xf32>
    %71 = tpu.concatenate %66, %68, %70 in 1 : vector<64x24xf32>, vector<64x24xf32>, vector<64x24xf32> -> vector<64x72xf32>
    %72 = arith.mulf %71, %40 : vector<64x72xf32>
    %cst_30 = arith.constant dense<0.000000e+00> : vector<64x24xf32>
    %73 = tpu.matmul %72, %62, %cst_30 {dimension_numbers = #tpu.dot_dimension_numbers<[1], [0], [0], [1], [0, 0, 1, 1], [], []>} : vector<64x72xf32>, vector<72x24xf32>, vector<64x24xf32> -> vector<64x24xf32>
    %74 = vector.extract_strided_slice %5 {offsets = [0, 18], sizes = [64, 9], strides = [1, 1]} : vector<64x27xf32> to vector<64x9xf32>
    %75 = vector.extract_strided_slice %74 {offsets = [0, 0], sizes = [64, 3], strides = [1, 1]} : vector<64x9xf32> to vector<64x3xf32>
    %76 = tpu.concatenate %75, %75, %75, %75, %75, %75, %75, %75 in 1 : vector<64x3xf32>, vector<64x3xf32>, vector<64x3xf32>, vector<64x3xf32>, vector<64x3xf32>, vector<64x3xf32>, vector<64x3xf32>, vector<64x3xf32> -> vector<64x24xf32>
    %77 = vector.extract_strided_slice %74 {offsets = [0, 3], sizes = [64, 3], strides = [1, 1]} : vector<64x9xf32> to vector<64x3xf32>
    %78 = tpu.concatenate %77, %77, %77, %77, %77, %77, %77, %77 in 1 : vector<64x3xf32>, vector<64x3xf32>, vector<64x3xf32>, vector<64x3xf32>, vector<64x3xf32>, vector<64x3xf32>, vector<64x3xf32>, vector<64x3xf32> -> vector<64x24xf32>
    %79 = vector.extract_strided_slice %74 {offsets = [0, 6], sizes = [64, 3], strides = [1, 1]} : vector<64x9xf32> to vector<64x3xf32>
    %80 = tpu.concatenate %79, %79, %79, %79, %79, %79, %79, %79 in 1 : vector<64x3xf32>, vector<64x3xf32>, vector<64x3xf32>, vector<64x3xf32>, vector<64x3xf32>, vector<64x3xf32>, vector<64x3xf32>, vector<64x3xf32> -> vector<64x24xf32>
    %81 = tpu.concatenate %76, %78, %80 in 1 : vector<64x24xf32>, vector<64x24xf32>, vector<64x24xf32> -> vector<64x72xf32>
    %82 = arith.mulf %81, %40 : vector<64x72xf32>
    %cst_31 = arith.constant dense<0.000000e+00> : vector<64x24xf32>
    %83 = tpu.matmul %82, %62, %cst_31 {dimension_numbers = #tpu.dot_dimension_numbers<[1], [0], [0], [1], [0, 0, 1, 1], [], []>} : vector<64x72xf32>, vector<72x24xf32>, vector<64x24xf32> -> vector<64x24xf32>
    %84 = vector.extract_strided_slice %21 {offsets = [0, 0], sizes = [64, 16], strides = [1, 1]} : vector<64x192xf32> to vector<64x16xf32>
    %85 = tpu.concatenate %22, %22 in 1 : vector<64x8xf32>, vector<64x8xf32> -> vector<64x16xf32>
    %86 = arith.mulf %84, %85 : vector<64x16xf32>
    %87 = tpu.iota {dimensions = array<i32: 0>} : vector<16x2xi32>
    %88 = tpu.iota {dimensions = array<i32: 1>} : vector<16x2xi32>
    %c8_i32 = arith.constant 8 : i32
    %89 = vector.broadcast %c8_i32 : i32 to vector<16x2xi32>
    %90 = arith.muli %88, %89 : vector<16x2xi32>
    %91 = arith.cmpi sge, %87, %90 : vector<16x2xi32>
    %c1_i32_32 = arith.constant 1 : i32
    %92 = vector.broadcast %c1_i32_32 : i32 to vector<16x2xi32>
    %93 = arith.addi %88, %92 : vector<16x2xi32>
    %c8_i32_33 = arith.constant 8 : i32
    %94 = vector.broadcast %c8_i32_33 : i32 to vector<16x2xi32>
    %95 = arith.muli %93, %94 : vector<16x2xi32>
    %96 = arith.cmpi slt, %87, %95 : vector<16x2xi32>
    %97 = arith.andi %91, %96 : vector<16x2xi1>
    %98 = arith.extui %97 : vector<16x2xi1> to vector<16x2xi32>
    %99 = arith.sitofp %98 : vector<16x2xi32> to vector<16x2xf32>
    %cst_34 = arith.constant dense<0.000000e+00> : vector<64x2xf32>
    %100 = tpu.matmul %86, %99, %cst_34 {dimension_numbers = #tpu.dot_dimension_numbers<[1], [0], [0], [1], [0, 0, 1, 1], [], []>} : vector<64x16xf32>, vector<16x2xf32>, vector<64x2xf32> -> vector<64x2xf32>
    %101 = vector.extract_strided_slice %21 {offsets = [0, 16], sizes = [64, 16], strides = [1, 1]} : vector<64x192xf32> to vector<64x16xf32>
    %102 = tpu.concatenate %39, %39 in 1 : vector<64x8xf32>, vector<64x8xf32> -> vector<64x16xf32>
    %103 = arith.mulf %101, %102 : vector<64x16xf32>
    %cst_35 = arith.constant dense<0.000000e+00> : vector<64x2xf32>
    %104 = tpu.matmul %103, %99, %cst_35 {dimension_numbers = #tpu.dot_dimension_numbers<[1], [0], [0], [1], [0, 0, 1, 1], [], []>} : vector<64x16xf32>, vector<16x2xf32>, vector<64x2xf32> -> vector<64x2xf32>
    %105 = arith.addf %100, %104 : vector<64x2xf32>
    %106 = vector.extract_strided_slice %21 {offsets = [0, 32], sizes = [64, 16], strides = [1, 1]} : vector<64x192xf32> to vector<64x16xf32>
    %107 = tpu.concatenate %22, %22 in 1 : vector<64x8xf32>, vector<64x8xf32> -> vector<64x16xf32>
    %108 = arith.mulf %106, %107 : vector<64x16xf32>
    %cst_36 = arith.constant dense<0.000000e+00> : vector<64x2xf32>
    %109 = tpu.matmul %108, %99, %cst_36 {dimension_numbers = #tpu.dot_dimension_numbers<[1], [0], [0], [1], [0, 0, 1, 1], [], []>} : vector<64x16xf32>, vector<16x2xf32>, vector<64x2xf32> -> vector<64x2xf32>
    %110 = vector.extract_strided_slice %3 {offsets = [0, 0], sizes = [64, 1], strides = [1, 1]} : vector<64x3xf32> to vector<64x1xf32>
    %111 = vector.broadcast %110 : vector<64x1xf32> to vector<64x2xf32>
    %112 = arith.mulf %109, %111 : vector<64x2xf32>
    %113 = vector.extract_strided_slice %3 {offsets = [0, 1], sizes = [64, 1], strides = [1, 1]} : vector<64x3xf32> to vector<64x1xf32>
    %114 = vector.broadcast %113 : vector<64x1xf32> to vector<64x2xf32>
    %115 = arith.mulf %109, %114 : vector<64x2xf32>
    %116 = vector.extract_strided_slice %3 {offsets = [0, 2], sizes = [64, 1], strides = [1, 1]} : vector<64x3xf32> to vector<64x1xf32>
    %117 = vector.broadcast %116 : vector<64x1xf32> to vector<64x2xf32>
    %118 = arith.mulf %109, %117 : vector<64x2xf32>
    %119 = vector.extract_strided_slice %21 {offsets = [0, 48], sizes = [64, 48], strides = [1, 1]} : vector<64x192xf32> to vector<64x48xf32>
    %120 = tpu.concatenate %63, %63 in 1 : vector<64x24xf32>, vector<64x24xf32> -> vector<64x48xf32>
    %121 = arith.mulf %119, %120 : vector<64x48xf32>
    %122 = tpu.iota {dimensions = array<i32: 0>} : vector<48x2xi32>
    %123 = tpu.iota {dimensions = array<i32: 1>} : vector<48x2xi32>
    %c24_i32 = arith.constant 24 : i32
    %124 = vector.broadcast %c24_i32 : i32 to vector<48x2xi32>
    %125 = arith.muli %123, %124 : vector<48x2xi32>
    %126 = arith.cmpi sge, %122, %125 : vector<48x2xi32>
    %c1_i32_37 = arith.constant 1 : i32
    %127 = vector.broadcast %c1_i32_37 : i32 to vector<48x2xi32>
    %128 = arith.addi %123, %127 : vector<48x2xi32>
    %c24_i32_38 = arith.constant 24 : i32
    %129 = vector.broadcast %c24_i32_38 : i32 to vector<48x2xi32>
    %130 = arith.muli %128, %129 : vector<48x2xi32>
    %131 = arith.cmpi slt, %122, %130 : vector<48x2xi32>
    %132 = arith.andi %126, %131 : vector<48x2xi1>
    %133 = arith.extui %132 : vector<48x2xi1> to vector<48x2xi32>
    %134 = arith.sitofp %133 : vector<48x2xi32> to vector<48x2xf32>
    %cst_39 = arith.constant dense<0.000000e+00> : vector<64x2xf32>
    %135 = tpu.matmul %121, %134, %cst_39 {dimension_numbers = #tpu.dot_dimension_numbers<[1], [0], [0], [1], [0, 0, 1, 1], [], []>} : vector<64x48xf32>, vector<48x2xf32>, vector<64x2xf32> -> vector<64x2xf32>
    %136 = tpu.concatenate %73, %73 in 1 : vector<64x24xf32>, vector<64x24xf32> -> vector<64x48xf32>
    %137 = arith.mulf %119, %136 : vector<64x48xf32>
    %cst_40 = arith.constant dense<0.000000e+00> : vector<64x2xf32>
    %138 = tpu.matmul %137, %134, %cst_40 {dimension_numbers = #tpu.dot_dimension_numbers<[1], [0], [0], [1], [0, 0, 1, 1], [], []>} : vector<64x48xf32>, vector<48x2xf32>, vector<64x2xf32> -> vector<64x2xf32>
    %139 = tpu.concatenate %83, %83 in 1 : vector<64x24xf32>, vector<64x24xf32> -> vector<64x48xf32>
    %140 = arith.mulf %119, %139 : vector<64x48xf32>
    %cst_41 = arith.constant dense<0.000000e+00> : vector<64x2xf32>
    %141 = tpu.matmul %140, %134, %cst_41 {dimension_numbers = #tpu.dot_dimension_numbers<[1], [0], [0], [1], [0, 0, 1, 1], [], []>} : vector<64x48xf32>, vector<48x2xf32>, vector<64x2xf32> -> vector<64x2xf32>
    %142 = arith.addf %112, %135 : vector<64x2xf32>
    %143 = arith.addf %115, %138 : vector<64x2xf32>
    %144 = arith.addf %118, %141 : vector<64x2xf32>
    %145 = vector.extract_strided_slice %21 {offsets = [0, 96], sizes = [64, 16], strides = [1, 1]} : vector<64x192xf32> to vector<64x16xf32>
    %146 = tpu.concatenate %22, %22 in 1 : vector<64x8xf32>, vector<64x8xf32> -> vector<64x16xf32>
    %147 = arith.mulf %145, %146 : vector<64x16xf32>
    %cst_42 = arith.constant dense<0.000000e+00> : vector<64x2xf32>
    %148 = tpu.matmul %147, %99, %cst_42 {dimension_numbers = #tpu.dot_dimension_numbers<[1], [0], [0], [1], [0, 0, 1, 1], [], []>} : vector<64x16xf32>, vector<16x2xf32>, vector<64x2xf32> -> vector<64x2xf32>
    %149 = vector.extract_strided_slice %21 {offsets = [0, 112], sizes = [64, 16], strides = [1, 1]} : vector<64x192xf32> to vector<64x16xf32>
    %150 = tpu.concatenate %39, %39 in 1 : vector<64x8xf32>, vector<64x8xf32> -> vector<64x16xf32>
    %151 = arith.mulf %149, %150 : vector<64x16xf32>
    %cst_43 = arith.constant dense<0.000000e+00> : vector<64x2xf32>
    %152 = tpu.matmul %151, %99, %cst_43 {dimension_numbers = #tpu.dot_dimension_numbers<[1], [0], [0], [1], [0, 0, 1, 1], [], []>} : vector<64x16xf32>, vector<16x2xf32>, vector<64x2xf32> -> vector<64x2xf32>
    %153 = arith.addf %148, %152 : vector<64x2xf32>
    %154 = vector.extract_strided_slice %21 {offsets = [0, 128], sizes = [64, 16], strides = [1, 1]} : vector<64x192xf32> to vector<64x16xf32>
    %155 = tpu.concatenate %22, %22 in 1 : vector<64x8xf32>, vector<64x8xf32> -> vector<64x16xf32>
    %156 = arith.mulf %154, %155 : vector<64x16xf32>
    %cst_44 = arith.constant dense<0.000000e+00> : vector<64x2xf32>
    %157 = tpu.matmul %156, %99, %cst_44 {dimension_numbers = #tpu.dot_dimension_numbers<[1], [0], [0], [1], [0, 0, 1, 1], [], []>} : vector<64x16xf32>, vector<16x2xf32>, vector<64x2xf32> -> vector<64x2xf32>
    %158 = vector.extract_strided_slice %3 {offsets = [0, 0], sizes = [64, 1], strides = [1, 1]} : vector<64x3xf32> to vector<64x1xf32>
    %159 = vector.broadcast %158 : vector<64x1xf32> to vector<64x2xf32>
    %160 = arith.mulf %157, %159 : vector<64x2xf32>
    %161 = vector.extract_strided_slice %3 {offsets = [0, 1], sizes = [64, 1], strides = [1, 1]} : vector<64x3xf32> to vector<64x1xf32>
    %162 = vector.broadcast %161 : vector<64x1xf32> to vector<64x2xf32>
    %163 = arith.mulf %157, %162 : vector<64x2xf32>
    %164 = vector.extract_strided_slice %3 {offsets = [0, 2], sizes = [64, 1], strides = [1, 1]} : vector<64x3xf32> to vector<64x1xf32>
    %165 = vector.broadcast %164 : vector<64x1xf32> to vector<64x2xf32>
    %166 = arith.mulf %157, %165 : vector<64x2xf32>
    %167 = vector.extract_strided_slice %21 {offsets = [0, 144], sizes = [64, 48], strides = [1, 1]} : vector<64x192xf32> to vector<64x48xf32>
    %168 = tpu.concatenate %63, %63 in 1 : vector<64x24xf32>, vector<64x24xf32> -> vector<64x48xf32>
    %169 = arith.mulf %167, %168 : vector<64x48xf32>
    %cst_45 = arith.constant dense<0.000000e+00> : vector<64x2xf32>
    %170 = tpu.matmul %169, %134, %cst_45 {dimension_numbers = #tpu.dot_dimension_numbers<[1], [0], [0], [1], [0, 0, 1, 1], [], []>} : vector<64x48xf32>, vector<48x2xf32>, vector<64x2xf32> -> vector<64x2xf32>
    %171 = tpu.concatenate %73, %73 in 1 : vector<64x24xf32>, vector<64x24xf32> -> vector<64x48xf32>
    %172 = arith.mulf %167, %171 : vector<64x48xf32>
    %cst_46 = arith.constant dense<0.000000e+00> : vector<64x2xf32>
    %173 = tpu.matmul %172, %134, %cst_46 {dimension_numbers = #tpu.dot_dimension_numbers<[1], [0], [0], [1], [0, 0, 1, 1], [], []>} : vector<64x48xf32>, vector<48x2xf32>, vector<64x2xf32> -> vector<64x2xf32>
    %174 = tpu.concatenate %83, %83 in 1 : vector<64x24xf32>, vector<64x24xf32> -> vector<64x48xf32>
    %175 = arith.mulf %167, %174 : vector<64x48xf32>
    %cst_47 = arith.constant dense<0.000000e+00> : vector<64x2xf32>
    %176 = tpu.matmul %175, %134, %cst_47 {dimension_numbers = #tpu.dot_dimension_numbers<[1], [0], [0], [1], [0, 0, 1, 1], [], []>} : vector<64x48xf32>, vector<48x2xf32>, vector<64x2xf32> -> vector<64x2xf32>
    %177 = arith.addf %160, %170 : vector<64x2xf32>
    %178 = arith.addf %163, %173 : vector<64x2xf32>
    %179 = arith.addf %166, %176 : vector<64x2xf32>
    %180 = tpu.concatenate %105, %142, %143, %144, %153, %177, %178, %179 in 1 : vector<64x2xf32>, vector<64x2xf32>, vector<64x2xf32>, vector<64x2xf32>, vector<64x2xf32>, vector<64x2xf32>, vector<64x2xf32>, vector<64x2xf32> -> vector<64x16xf32>
    %c0_48 = arith.constant 0 : index
    %c0_49 = arith.constant 0 : index
    %c0_50 = arith.constant 0 : index
    %181 = vector.load %arg11[%c0_48, %c0_49, %c0_50] : memref<1x64x16xf32, #tpu.memory_space<vmem>>, vector<1x64x16xf32>
    %182 = vector.shape_cast %181 : vector<1x64x16xf32> to vector<64x16xf32>
    %183 = vector.shape_cast %180 : vector<64x16xf32> to vector<1x64x16xf32>
    tpu.vector_store %arg11[%c0_48, %c0_49, %c0_50], %183 {strides = array<i32>} : memref<1x64x16xf32, #tpu.memory_space<vmem>>, vector<1x64x16xf32>,
    return
  }
  func.func @transform_0(%arg0: i32, %arg1: i32) -> (i32, i32, i32) {
    %c0_i32 = arith.constant 0 : i32
    %c0_i32_0 = arith.constant 0 : i32
    return %arg0, %arg1, %c0_i32 : i32, i32, i32
  }
  func.func @transform_1(%arg0: i32, %arg1: i32) -> (i32, i32, i32) {
    %c0_i32 = arith.constant 0 : i32
    %c0_i32_0 = arith.constant 0 : i32
    return %arg0, %arg1, %c0_i32 : i32, i32, i32
  }
  func.func @transform_2(%arg0: i32, %arg1: i32) -> (i32, i32, i32) {
    %c0_i32 = arith.constant 0 : i32
    %c0_i32_0 = arith.constant 0 : i32
    return %arg0, %arg1, %c0_i32 : i32, i32, i32
  }
  func.func @transform_3(%arg0: i32, %arg1: i32) -> (i32, i32, i32) {
    %c0_i32 = arith.constant 0 : i32
    %c0_i32_0 = arith.constant 0 : i32
    %c0_i32_1 = arith.constant 0 : i32
    return %arg0, %c0_i32, %c0_i32_0 : i32, i32, i32
  }
  func.func @transform_4(%arg0: i32, %arg1: i32) -> (i32, i32, i32) {
    %c0_i32 = arith.constant 0 : i32
    %c0_i32_0 = arith.constant 0 : i32
    %c0_i32_1 = arith.constant 0 : i32
    return %arg0, %c0_i32, %c0_i32_0 : i32, i32, i32
  }
  func.func @transform_5(%arg0: i32, %arg1: i32) -> (i32, i32) {
    %c0_i32 = arith.constant 0 : i32
    %c0_i32_0 = arith.constant 0 : i32
    %c0_i32_1 = arith.constant 0 : i32
    return %c0_i32, %c0_i32_0 : i32, i32
  }
  func.func @transform_6(%arg0: i32, %arg1: i32) -> (i32, i32) {
    %c0_i32 = arith.constant 0 : i32
    %c0_i32_0 = arith.constant 0 : i32
    %c0_i32_1 = arith.constant 0 : i32
    return %c0_i32, %c0_i32_0 : i32, i32
  }
  func.func @transform_7(%arg0: i32, %arg1: i32) -> (i32, i32) {
    %c0_i32 = arith.constant 0 : i32
    %c0_i32_0 = arith.constant 0 : i32
    %c0_i32_1 = arith.constant 0 : i32
    return %c0_i32, %c0_i32_0 : i32, i32
  }
  func.func @transform_8(%arg0: i32, %arg1: i32) -> (i32, i32) {
    %c0_i32 = arith.constant 0 : i32
    %c0_i32_0 = arith.constant 0 : i32
    %c0_i32_1 = arith.constant 0 : i32
    return %c0_i32, %c0_i32_0 : i32, i32
  }
  func.func @transform_9(%arg0: i32, %arg1: i32) -> (i32, i32, i32) {
    %c0_i32 = arith.constant 0 : i32
    %c0_i32_0 = arith.constant 0 : i32
    return %arg0, %arg1, %c0_i32 : i32, i32, i32
  }
}

module attributes {stable_mosaic.version = 11 : i64} {
  func.func @kernel(%arg0: i32, %arg1: i32, %arg2: memref<1x8x8xf32, #tpu.memory_space<vmem>>, %arg3: memref<1x8x24xf32, #tpu.memory_space<vmem>>, %arg4: memref<1x8x8x16xf32, #tpu.memory_space<vmem>>, %arg5: memref<1x8x8xf32, #tpu.memory_space<vmem>>, %arg6: memref<8x2xf32, #tpu.memory_space<vmem>>, %arg7: memref<24x6xf32, #tpu.memory_space<vmem>>, %arg8: memref<2x8xf32, #tpu.memory_space<vmem>>, %arg9: memref<8x8xf32, #tpu.memory_space<vmem>>, %arg10: memref<6x24xf32, #tpu.memory_space<vmem>>, %arg11: memref<24x24xf32, #tpu.memory_space<vmem>>, %arg12: memref<1x8xf32, #tpu.memory_space<vmem>>, %arg13: memref<1x8xf32, #tpu.memory_space<vmem>>, %arg14: memref<1x24xf32, #tpu.memory_space<vmem>>, %arg15: memref<1x24xf32, #tpu.memory_space<vmem>>, %arg16: memref<1x8x8xf32, #tpu.memory_space<vmem>>, %arg17: memref<1x8x24xf32, #tpu.memory_space<vmem>>) attributes {dimension_semantics = [#tpu.dimension_semantics<parallel>, #tpu.dimension_semantics<parallel>], iteration_bounds = array<i64: 2, 1>, scalar_prefetch = 0 : i64, scratch_operands = 0 : i64, tpu.core_type = #tpu.core_type<tc>, window_params = [{transform_indices = @transform_0, window_bounds = array<i64: 1, 8, 8>}, {transform_indices = @transform_1, window_bounds = array<i64: 1, 8, 24>}, {transform_indices = @transform_2, window_bounds = array<i64: 1, 8, 8, 16>}, {transform_indices = @transform_3, window_bounds = array<i64: 1, 8, 8>}, {pipeline_mode = #tpu.pipeline_mode<synchronous>, transform_indices = @transform_4, window_bounds = array<i64: 8, 2>}, {pipeline_mode = #tpu.pipeline_mode<synchronous>, transform_indices = @transform_5, window_bounds = array<i64: 24, 6>}, {pipeline_mode = #tpu.pipeline_mode<synchronous>, transform_indices = @transform_6, window_bounds = array<i64: 2, 8>}, {pipeline_mode = #tpu.pipeline_mode<synchronous>, transform_indices = @transform_7, window_bounds = array<i64: 8, 8>}, {pipeline_mode = #tpu.pipeline_mode<synchronous>, transform_indices = @transform_8, window_bounds = array<i64: 6, 24>}, {pipeline_mode = #tpu.pipeline_mode<synchronous>, transform_indices = @transform_9, window_bounds = array<i64: 24, 24>}, {pipeline_mode = #tpu.pipeline_mode<synchronous>, transform_indices = @transform_10, window_bounds = array<i64: 1, 8>}, {pipeline_mode = #tpu.pipeline_mode<synchronous>, transform_indices = @transform_11, window_bounds = array<i64: 1, 8>}, {pipeline_mode = #tpu.pipeline_mode<synchronous>, transform_indices = @transform_12, window_bounds = array<i64: 1, 24>}, {pipeline_mode = #tpu.pipeline_mode<synchronous>, transform_indices = @transform_13, window_bounds = array<i64: 1, 24>}, {transform_indices = @transform_14, window_bounds = array<i64: 1, 8, 8>}, {transform_indices = @transform_15, window_bounds = array<i64: 1, 8, 24>}]} {
    %c0 = arith.constant 0 : index
    %c0_0 = arith.constant 0 : index
    %c0_1 = arith.constant 0 : index
    %0 = vector.load %arg2[%c0, %c0_0, %c0_1] : memref<1x8x8xf32, #tpu.memory_space<vmem>>, vector<1x8x8xf32>
    %1 = vector.shape_cast %0 : vector<1x8x8xf32> to vector<8x8xf32>
    %c0_2 = arith.constant 0 : index
    %c0_3 = arith.constant 0 : index
    %c0_4 = arith.constant 0 : index
    %2 = vector.load %arg3[%c0_2, %c0_3, %c0_4] : memref<1x8x24xf32, #tpu.memory_space<vmem>>, vector<1x8x24xf32>
    %3 = vector.shape_cast %2 : vector<1x8x24xf32> to vector<8x24xf32>
    %c0_5 = arith.constant 0 : index
    %c0_6 = arith.constant 0 : index
    %c0_7 = arith.constant 0 : index
    %c0_8 = arith.constant 0 : index
    %4 = vector.load %arg4[%c0_5, %c0_6, %c0_7, %c0_8] : memref<1x8x8x16xf32, #tpu.memory_space<vmem>>, vector<1x8x8x16xf32>
    %5 = vector.shape_cast %4 : vector<1x8x8x16xf32> to vector<8x8x16xf32>
    %c0_9 = arith.constant 0 : index
    %c0_10 = arith.constant 0 : index
    %c0_11 = arith.constant 0 : index
    %6 = vector.load %arg5[%c0_9, %c0_10, %c0_11] : memref<1x8x8xf32, #tpu.memory_space<vmem>>, vector<1x8x8xf32>
    %7 = vector.shape_cast %6 : vector<1x8x8xf32> to vector<8x8xf32>
    %c0_12 = arith.constant 0 : index
    %c0_13 = arith.constant 0 : index
    %8 = vector.load %arg6[%c0_12, %c0_13] : memref<8x2xf32, #tpu.memory_space<vmem>>, vector<8x2xf32>
    %c0_14 = arith.constant 0 : index
    %c0_15 = arith.constant 0 : index
    %9 = vector.load %arg7[%c0_14, %c0_15] : memref<24x6xf32, #tpu.memory_space<vmem>>, vector<24x6xf32>
    %c0_16 = arith.constant 0 : index
    %c0_17 = arith.constant 0 : index
    %10 = vector.load %arg8[%c0_16, %c0_17] : memref<2x8xf32, #tpu.memory_space<vmem>>, vector<2x8xf32>
    %c0_18 = arith.constant 0 : index
    %c0_19 = arith.constant 0 : index
    %11 = vector.load %arg9[%c0_18, %c0_19] : memref<8x8xf32, #tpu.memory_space<vmem>>, vector<8x8xf32>
    %c0_20 = arith.constant 0 : index
    %c0_21 = arith.constant 0 : index
    %12 = vector.load %arg10[%c0_20, %c0_21] : memref<6x24xf32, #tpu.memory_space<vmem>>, vector<6x24xf32>
    %c0_22 = arith.constant 0 : index
    %c0_23 = arith.constant 0 : index
    %13 = vector.load %arg11[%c0_22, %c0_23] : memref<24x24xf32, #tpu.memory_space<vmem>>, vector<24x24xf32>
    %c0_24 = arith.constant 0 : index
    %c0_25 = arith.constant 0 : index
    %14 = vector.load %arg12[%c0_24, %c0_25] : memref<1x8xf32, #tpu.memory_space<vmem>>, vector<1x8xf32>
    %c0_26 = arith.constant 0 : index
    %c0_27 = arith.constant 0 : index
    %15 = vector.load %arg13[%c0_26, %c0_27] : memref<1x8xf32, #tpu.memory_space<vmem>>, vector<1x8xf32>
    %c0_28 = arith.constant 0 : index
    %c0_29 = arith.constant 0 : index
    %16 = vector.load %arg14[%c0_28, %c0_29] : memref<1x24xf32, #tpu.memory_space<vmem>>, vector<1x24xf32>
    %c0_30 = arith.constant 0 : index
    %c0_31 = arith.constant 0 : index
    %17 = vector.load %arg15[%c0_30, %c0_31] : memref<1x24xf32, #tpu.memory_space<vmem>>, vector<1x24xf32>
    %cst = arith.constant dense<0.000000e+00> : vector<8x2xf32>
    %18 = tpu.matmul %1, %8, %cst {dimension_numbers = #tpu.dot_dimension_numbers<[1], [0], [0], [1], [0, 0, 1, 1], [], []>} : vector<8x8xf32>, vector<8x2xf32>, vector<8x2xf32> -> vector<8x2xf32>
    %cst_32 = arith.constant dense<0.000000e+00> : vector<8x6xf32>
    %19 = tpu.matmul %3, %9, %cst_32 {dimension_numbers = #tpu.dot_dimension_numbers<[1], [0], [0], [1], [0, 0, 1, 1], [], []>} : vector<8x24xf32>, vector<24x6xf32>, vector<8x6xf32> -> vector<8x6xf32>
    %20 = tpu.concatenate %18, %19 in 1 : vector<8x2xf32>, vector<8x6xf32> -> vector<8x8xf32>
    %21 = vector.extract_strided_slice %5 {offsets = [0, 0, 0], sizes = [8, 8, 8], strides = [1, 1, 1]} : vector<8x8x16xf32> to vector<8x8x8xf32>
    %22 = vector.extract_strided_slice %5 {offsets = [0, 0, 8], sizes = [8, 8, 8], strides = [1, 1, 1]} : vector<8x8x16xf32> to vector<8x8x8xf32>
    %23 = vector.shape_cast %20 : vector<8x8xf32> to vector<8x1x8xf32>
    %24 = vector.broadcast %23 : vector<8x1x8xf32> to vector<8x8x8xf32>
    %25 = arith.mulf %21, %24 : vector<8x8x8xf32>
    %cst_33 = arith.constant dense<0.000000e+00> : vector<8x8xf32>
    %26 = vector.multi_reduction <add>, %25, %cst_33 [2] : vector<8x8x8xf32> to vector<8x8xf32>
    %cst_34 = arith.constant 0.353553385 : f32
    %27 = vector.broadcast %cst_34 : f32 to vector<8x8xf32>
    %28 = arith.mulf %26, %27 : vector<8x8xf32>
    %cst_35 = arith.constant 0.000000e+00 : f32
    %29 = vector.broadcast %cst_35 : f32 to vector<8x8xf32>
    %30 = arith.cmpf ogt, %7, %29 : vector<8x8xf32>
    %31 = arith.extui %30 : vector<8x8xi1> to vector<8x8xi32>
    %32 = arith.sitofp %31 : vector<8x8xi32> to vector<8x8xf32>
    %cst_36 = arith.constant 0.000000e+00 : f32
    %33 = vector.broadcast %cst_36 : f32 to vector<8x8xf32>
    %34 = arith.cmpf ogt, %7, %33 : vector<8x8xf32>
    %cst_37 = arith.constant -1.000000e+30 : f32
    %35 = vector.broadcast %cst_37 : f32 to vector<8x8xf32>
    %36 = arith.select %34, %28, %35 : vector<8x8xi1>, vector<8x8xf32>
    %cst_38 = arith.constant dense<0xFF800000> : vector<8xf32>
    %37 = vector.multi_reduction <maximumf>, %36, %cst_38 [1] : vector<8x8xf32> to vector<8xf32>
    %38 = vector.shape_cast %37 : vector<8xf32> to vector<8x1xf32>
    %39 = vector.broadcast %38 : vector<8x1xf32> to vector<8x8xf32>
    %40 = arith.subf %36, %39 : vector<8x8xf32>
    %41 = math.exp %40 : vector<8x8xf32>
    %42 = arith.mulf %41, %32 : vector<8x8xf32>
    %cst_39 = arith.constant dense<0.000000e+00> : vector<8xf32>
    %43 = vector.multi_reduction <add>, %42, %cst_39 [1] : vector<8x8xf32> to vector<8xf32>
    %44 = vector.shape_cast %43 : vector<8xf32> to vector<8x1xf32>
    %cst_40 = arith.constant 9.99999968E-21 : f32
    %45 = vector.broadcast %cst_40 : f32 to vector<8x1xf32>
    %46 = arith.addf %44, %45 : vector<8x1xf32>
    %47 = tpu.reciprocal %46 {approx = true} : vector<8x1xf32> -> vector<8x1xf32>
    %48 = vector.broadcast %47 : vector<8x1xf32> to vector<8x8xf32>
    %49 = arith.mulf %42, %48 : vector<8x8xf32>
    %50 = vector.shape_cast %49 : vector<8x8xf32> to vector<8x8x1xf32>
    %51 = vector.broadcast %50 : vector<8x8x1xf32> to vector<8x8x8xf32>
    %52 = arith.mulf %51, %22 : vector<8x8x8xf32>
    %cst_41 = arith.constant dense<0.000000e+00> : vector<8x8xf32>
    %53 = vector.multi_reduction <add>, %52, %cst_41 [1] : vector<8x8x8xf32> to vector<8x8xf32>
    %54 = vector.extract_strided_slice %53 {offsets = [0, 0], sizes = [8, 2], strides = [1, 1]} : vector<8x8xf32> to vector<8x2xf32>
    %cst_42 = arith.constant dense<0.000000e+00> : vector<8x8xf32>
    %55 = tpu.matmul %54, %10, %cst_42 {dimension_numbers = #tpu.dot_dimension_numbers<[1], [0], [0], [1], [0, 0, 1, 1], [], []>} : vector<8x2xf32>, vector<2x8xf32>, vector<8x8xf32> -> vector<8x8xf32>
    %cst_43 = arith.constant dense<0.000000e+00> : vector<8x8xf32>
    %56 = tpu.matmul %1, %11, %cst_43 {dimension_numbers = #tpu.dot_dimension_numbers<[1], [0], [0], [1], [0, 0, 1, 1], [], []>} : vector<8x8xf32>, vector<8x8xf32>, vector<8x8xf32> -> vector<8x8xf32>
    %57 = arith.addf %55, %56 : vector<8x8xf32>
    %58 = arith.mulf %57, %57 : vector<8x8xf32>
    %cst_44 = arith.constant 9.99999996E-13 : f32
    %59 = vector.broadcast %cst_44 : f32 to vector<8x8xf32>
    %60 = arith.addf %58, %59 : vector<8x8xf32>
    %61 = math.rsqrt %60 : vector<8x8xf32>
    %62 = arith.mulf %58, %61 : vector<8x8xf32>
    %63 = vector.broadcast %14 : vector<1x8xf32> to vector<8x8xf32>
    %64 = arith.mulf %62, %63 : vector<8x8xf32>
    %65 = vector.broadcast %15 : vector<1x8xf32> to vector<8x8xf32>
    %66 = arith.addf %64, %65 : vector<8x8xf32>
    %cst_45 = arith.constant 0.000000e+00 : f32
    %67 = vector.broadcast %cst_45 : f32 to vector<8x8xf32>
    %68 = arith.maximumf %66, %67 : vector<8x8xf32>
    %69 = arith.mulf %68, %57 : vector<8x8xf32>
    %70 = arith.mulf %69, %61 : vector<8x8xf32>
    %c0_46 = arith.constant 0 : index
    %c0_47 = arith.constant 0 : index
    %c0_48 = arith.constant 0 : index
    %71 = vector.load %arg16[%c0_46, %c0_47, %c0_48] : memref<1x8x8xf32, #tpu.memory_space<vmem>>, vector<1x8x8xf32>
    %72 = vector.shape_cast %71 : vector<1x8x8xf32> to vector<8x8xf32>
    %73 = vector.shape_cast %70 : vector<8x8xf32> to vector<1x8x8xf32>
    tpu.vector_store %arg16[%c0_46, %c0_47, %c0_48], %73 {strides = array<i32>} : memref<1x8x8xf32, #tpu.memory_space<vmem>>, vector<1x8x8xf32>,
    %74 = vector.extract_strided_slice %53 {offsets = [0, 2], sizes = [8, 6], strides = [1, 1]} : vector<8x8xf32> to vector<8x6xf32>
    %cst_49 = arith.constant dense<0.000000e+00> : vector<8x24xf32>
    %75 = tpu.matmul %74, %12, %cst_49 {dimension_numbers = #tpu.dot_dimension_numbers<[1], [0], [0], [1], [0, 0, 1, 1], [], []>} : vector<8x6xf32>, vector<6x24xf32>, vector<8x24xf32> -> vector<8x24xf32>
    %cst_50 = arith.constant dense<0.000000e+00> : vector<8x24xf32>
    %76 = tpu.matmul %3, %13, %cst_50 {dimension_numbers = #tpu.dot_dimension_numbers<[1], [0], [0], [1], [0, 0, 1, 1], [], []>} : vector<8x24xf32>, vector<24x24xf32>, vector<8x24xf32> -> vector<8x24xf32>
    %77 = arith.addf %75, %76 : vector<8x24xf32>
    %78 = tpu.iota {dimensions = array<i32: 0>} : vector<24x8xi32>
    %79 = tpu.iota {dimensions = array<i32: 1>} : vector<24x8xi32>
    %c3_i32 = arith.constant 3 : i32
    %80 = vector.broadcast %c3_i32 : i32 to vector<24x8xi32>
    %81 = arith.muli %79, %80 : vector<24x8xi32>
    %82 = arith.cmpi sge, %78, %81 : vector<24x8xi32>
    %c1_i32 = arith.constant 1 : i32
    %83 = vector.broadcast %c1_i32 : i32 to vector<24x8xi32>
    %84 = arith.addi %79, %83 : vector<24x8xi32>
    %c3_i32_51 = arith.constant 3 : i32
    %85 = vector.broadcast %c3_i32_51 : i32 to vector<24x8xi32>
    %86 = arith.muli %84, %85 : vector<24x8xi32>
    %87 = arith.cmpi slt, %78, %86 : vector<24x8xi32>
    %88 = arith.andi %82, %87 : vector<24x8xi1>
    %89 = arith.extui %88 : vector<24x8xi1> to vector<24x8xi32>
    %90 = arith.sitofp %89 : vector<24x8xi32> to vector<24x8xf32>
    %91 = tpu.iota {dimensions = array<i32: 0>} : vector<8x24xi32>
    %92 = tpu.iota {dimensions = array<i32: 1>} : vector<8x24xi32>
    %c3_i32_52 = arith.constant 3 : i32
    %93 = vector.broadcast %c3_i32_52 : i32 to vector<8x24xi32>
    %94 = arith.muli %91, %93 : vector<8x24xi32>
    %95 = arith.cmpi sge, %92, %94 : vector<8x24xi32>
    %c1_i32_53 = arith.constant 1 : i32
    %96 = vector.broadcast %c1_i32_53 : i32 to vector<8x24xi32>
    %97 = arith.addi %91, %96 : vector<8x24xi32>
    %c3_i32_54 = arith.constant 3 : i32
    %98 = vector.broadcast %c3_i32_54 : i32 to vector<8x24xi32>
    %99 = arith.muli %97, %98 : vector<8x24xi32>
    %100 = arith.cmpi slt, %92, %99 : vector<8x24xi32>
    %101 = arith.andi %95, %100 : vector<8x24xi1>
    %102 = arith.extui %101 : vector<8x24xi1> to vector<8x24xi32>
    %103 = arith.sitofp %102 : vector<8x24xi32> to vector<8x24xf32>
    %104 = arith.mulf %77, %77 : vector<8x24xf32>
    %cst_55 = arith.constant dense<0.000000e+00> : vector<8x8xf32>
    %105 = tpu.matmul %104, %90, %cst_55 {dimension_numbers = #tpu.dot_dimension_numbers<[1], [0], [0], [1], [0, 0, 1, 1], [], []>} : vector<8x24xf32>, vector<24x8xf32>, vector<8x8xf32> -> vector<8x8xf32>
    %cst_56 = arith.constant dense<0.000000e+00> : vector<8x24xf32>
    %106 = tpu.matmul %105, %103, %cst_56 {dimension_numbers = #tpu.dot_dimension_numbers<[1], [0], [0], [1], [0, 0, 1, 1], [], []>} : vector<8x8xf32>, vector<8x24xf32>, vector<8x24xf32> -> vector<8x24xf32>
    %cst_57 = arith.constant 9.99999996E-13 : f32
    %107 = vector.broadcast %cst_57 : f32 to vector<8x24xf32>
    %108 = arith.addf %106, %107 : vector<8x24xf32>
    %109 = math.rsqrt %108 : vector<8x24xf32>
    %110 = arith.mulf %106, %109 : vector<8x24xf32>
    %111 = vector.broadcast %16 : vector<1x24xf32> to vector<8x24xf32>
    %112 = arith.mulf %110, %111 : vector<8x24xf32>
    %113 = vector.broadcast %17 : vector<1x24xf32> to vector<8x24xf32>
    %114 = arith.addf %112, %113 : vector<8x24xf32>
    %cst_58 = arith.constant 0.000000e+00 : f32
    %115 = vector.broadcast %cst_58 : f32 to vector<8x24xf32>
    %116 = arith.maximumf %114, %115 : vector<8x24xf32>
    %117 = arith.mulf %116, %77 : vector<8x24xf32>
    %118 = arith.mulf %117, %109 : vector<8x24xf32>
    %c0_59 = arith.constant 0 : index
    %c0_60 = arith.constant 0 : index
    %c0_61 = arith.constant 0 : index
    %119 = vector.load %arg17[%c0_59, %c0_60, %c0_61] : memref<1x8x24xf32, #tpu.memory_space<vmem>>, vector<1x8x24xf32>
    %120 = vector.shape_cast %119 : vector<1x8x24xf32> to vector<8x24xf32>
    %121 = vector.shape_cast %118 : vector<8x24xf32> to vector<1x8x24xf32>
    tpu.vector_store %arg17[%c0_59, %c0_60, %c0_61], %121 {strides = array<i32>} : memref<1x8x24xf32, #tpu.memory_space<vmem>>, vector<1x8x24xf32>,
    return
  }
  func.func @transform_0(%arg0: i32, %arg1: i32) -> (i32, i32, i32) {
    %c0_i32 = arith.constant 0 : i32
    %c0_i32_0 = arith.constant 0 : i32
    return %arg0, %arg1, %c0_i32 : i32, i32, i32
  }
  func.func @transform_1(%arg0: i32, %arg1: i32) -> (i32, i32, i32) {
    %c0_i32 = arith.constant 0 : i32
    %c0_i32_0 = arith.constant 0 : i32
    return %arg0, %arg1, %c0_i32 : i32, i32, i32
  }
  func.func @transform_2(%arg0: i32, %arg1: i32) -> (i32, i32, i32, i32) {
    %c0_i32 = arith.constant 0 : i32
    %c0_i32_0 = arith.constant 0 : i32
    %c0_i32_1 = arith.constant 0 : i32
    return %arg0, %arg1, %c0_i32, %c0_i32_0 : i32, i32, i32, i32
  }
  func.func @transform_3(%arg0: i32, %arg1: i32) -> (i32, i32, i32) {
    %c0_i32 = arith.constant 0 : i32
    %c0_i32_0 = arith.constant 0 : i32
    return %arg0, %arg1, %c0_i32 : i32, i32, i32
  }
  func.func @transform_4(%arg0: i32, %arg1: i32) -> (i32, i32) {
    %c0_i32 = arith.constant 0 : i32
    %c0_i32_0 = arith.constant 0 : i32
    %c0_i32_1 = arith.constant 0 : i32
    return %c0_i32, %c0_i32_0 : i32, i32
  }
  func.func @transform_5(%arg0: i32, %arg1: i32) -> (i32, i32) {
    %c0_i32 = arith.constant 0 : i32
    %c0_i32_0 = arith.constant 0 : i32
    %c0_i32_1 = arith.constant 0 : i32
    return %c0_i32, %c0_i32_0 : i32, i32
  }
  func.func @transform_6(%arg0: i32, %arg1: i32) -> (i32, i32) {
    %c0_i32 = arith.constant 0 : i32
    %c0_i32_0 = arith.constant 0 : i32
    %c0_i32_1 = arith.constant 0 : i32
    return %c0_i32, %c0_i32_0 : i32, i32
  }
  func.func @transform_7(%arg0: i32, %arg1: i32) -> (i32, i32) {
    %c0_i32 = arith.constant 0 : i32
    %c0_i32_0 = arith.constant 0 : i32
    %c0_i32_1 = arith.constant 0 : i32
    return %c0_i32, %c0_i32_0 : i32, i32
  }
  func.func @transform_8(%arg0: i32, %arg1: i32) -> (i32, i32) {
    %c0_i32 = arith.constant 0 : i32
    %c0_i32_0 = arith.constant 0 : i32
    %c0_i32_1 = arith.constant 0 : i32
    return %c0_i32, %c0_i32_0 : i32, i32
  }
  func.func @transform_9(%arg0: i32, %arg1: i32) -> (i32, i32) {
    %c0_i32 = arith.constant 0 : i32
    %c0_i32_0 = arith.constant 0 : i32
    %c0_i32_1 = arith.constant 0 : i32
    return %c0_i32, %c0_i32_0 : i32, i32
  }
  func.func @transform_10(%arg0: i32, %arg1: i32) -> (i32, i32) {
    %c0_i32 = arith.constant 0 : i32
    %c0_i32_0 = arith.constant 0 : i32
    %c0_i32_1 = arith.constant 0 : i32
    return %c0_i32, %c0_i32_0 : i32, i32
  }
  func.func @transform_11(%arg0: i32, %arg1: i32) -> (i32, i32) {
    %c0_i32 = arith.constant 0 : i32
    %c0_i32_0 = arith.constant 0 : i32
    %c0_i32_1 = arith.constant 0 : i32
    return %c0_i32, %c0_i32_0 : i32, i32
  }
  func.func @transform_12(%arg0: i32, %arg1: i32) -> (i32, i32) {
    %c0_i32 = arith.constant 0 : i32
    %c0_i32_0 = arith.constant 0 : i32
    %c0_i32_1 = arith.constant 0 : i32
    return %c0_i32, %c0_i32_0 : i32, i32
  }
  func.func @transform_13(%arg0: i32, %arg1: i32) -> (i32, i32) {
    %c0_i32 = arith.constant 0 : i32
    %c0_i32_0 = arith.constant 0 : i32
    %c0_i32_1 = arith.constant 0 : i32
    return %c0_i32, %c0_i32_0 : i32, i32
  }
  func.func @transform_14(%arg0: i32, %arg1: i32) -> (i32, i32, i32) {
    %c0_i32 = arith.constant 0 : i32
    %c0_i32_0 = arith.constant 0 : i32
    return %arg0, %arg1, %c0_i32 : i32, i32, i32
  }
  func.func @transform_15(%arg0: i32, %arg1: i32) -> (i32, i32, i32) {
    %c0_i32 = arith.constant 0 : i32
    %c0_i32_0 = arith.constant 0 : i32
    return %arg0, %arg1, %c0_i32 : i32, i32, i32
  }
}

module attributes {stable_mosaic.version = 11 : i64} {
  func.func @kernel(%arg0: i32, %arg1: memref<1x64x5xf32, #tpu.memory_space<vmem>>, %arg2: memref<1x64x3xf32, #tpu.memory_space<vmem>>, %arg3: memref<1x8x8xf32, #tpu.memory_space<vmem>>, %arg4: memref<1x8x24xf32, #tpu.memory_space<vmem>>, %arg5: memref<1x64x1xf32, #tpu.memory_space<vmem>>, %arg6: memref<5x32xf32, #tpu.memory_space<vmem>>, %arg7: memref<1x32xf32, #tpu.memory_space<vmem>>, %arg8: memref<32x128xf32, #tpu.memory_space<vmem>>, %arg9: memref<1x128xf32, #tpu.memory_space<vmem>>, %arg10: memref<8x8xf32, #tpu.memory_space<vmem>>, %arg11: memref<1x1x8xf32, #tpu.memory_space<vmem>>) attributes {dimension_semantics = [#tpu.dimension_semantics<parallel>], iteration_bounds = array<i64: 2>, scalar_prefetch = 0 : i64, scratch_operands = 0 : i64, tpu.core_type = #tpu.core_type<tc>, window_params = [{transform_indices = @transform_0, window_bounds = array<i64: 1, 64, 5>}, {transform_indices = @transform_1, window_bounds = array<i64: 1, 64, 3>}, {transform_indices = @transform_2, window_bounds = array<i64: 1, 8, 8>}, {transform_indices = @transform_3, window_bounds = array<i64: 1, 8, 24>}, {transform_indices = @transform_4, window_bounds = array<i64: 1, 64, 1>}, {pipeline_mode = #tpu.pipeline_mode<synchronous>, transform_indices = @transform_5, window_bounds = array<i64: 5, 32>}, {pipeline_mode = #tpu.pipeline_mode<synchronous>, transform_indices = @transform_6, window_bounds = array<i64: 1, 32>}, {pipeline_mode = #tpu.pipeline_mode<synchronous>, transform_indices = @transform_7, window_bounds = array<i64: 32, 128>}, {pipeline_mode = #tpu.pipeline_mode<synchronous>, transform_indices = @transform_8, window_bounds = array<i64: 1, 128>}, {pipeline_mode = #tpu.pipeline_mode<synchronous>, transform_indices = @transform_9, window_bounds = array<i64: 8, 8>}, {transform_indices = @transform_10, window_bounds = array<i64: 1, 1, 8>}]} {
    %c0 = arith.constant 0 : index
    %c0_0 = arith.constant 0 : index
    %c0_1 = arith.constant 0 : index
    %0 = vector.load %arg1[%c0, %c0_0, %c0_1] : memref<1x64x5xf32, #tpu.memory_space<vmem>>, vector<1x64x5xf32>
    %1 = vector.shape_cast %0 : vector<1x64x5xf32> to vector<64x5xf32>
    %c0_2 = arith.constant 0 : index
    %c0_3 = arith.constant 0 : index
    %c0_4 = arith.constant 0 : index
    %2 = vector.load %arg2[%c0_2, %c0_3, %c0_4] : memref<1x64x3xf32, #tpu.memory_space<vmem>>, vector<1x64x3xf32>
    %3 = vector.shape_cast %2 : vector<1x64x3xf32> to vector<64x3xf32>
    %c0_5 = arith.constant 0 : index
    %c0_6 = arith.constant 0 : index
    %c0_7 = arith.constant 0 : index
    %4 = vector.load %arg3[%c0_5, %c0_6, %c0_7] : memref<1x8x8xf32, #tpu.memory_space<vmem>>, vector<1x8x8xf32>
    %5 = vector.shape_cast %4 : vector<1x8x8xf32> to vector<8x8xf32>
    %c0_8 = arith.constant 0 : index
    %c0_9 = arith.constant 0 : index
    %c0_10 = arith.constant 0 : index
    %6 = vector.load %arg4[%c0_8, %c0_9, %c0_10] : memref<1x8x24xf32, #tpu.memory_space<vmem>>, vector<1x8x24xf32>
    %7 = vector.shape_cast %6 : vector<1x8x24xf32> to vector<8x24xf32>
    %c0_11 = arith.constant 0 : index
    %c0_12 = arith.constant 0 : index
    %c0_13 = arith.constant 0 : index
    %8 = vector.load %arg5[%c0_11, %c0_12, %c0_13] : memref<1x64x1xf32, #tpu.memory_space<vmem>>, vector<1x64x1xf32>
    %9 = vector.shape_cast %8 : vector<1x64x1xf32> to vector<64x1xf32>
    %c0_14 = arith.constant 0 : index
    %c0_15 = arith.constant 0 : index
    %10 = vector.load %arg6[%c0_14, %c0_15] : memref<5x32xf32, #tpu.memory_space<vmem>>, vector<5x32xf32>
    %c0_16 = arith.constant 0 : index
    %c0_17 = arith.constant 0 : index
    %11 = vector.load %arg7[%c0_16, %c0_17] : memref<1x32xf32, #tpu.memory_space<vmem>>, vector<1x32xf32>
    %c0_18 = arith.constant 0 : index
    %c0_19 = arith.constant 0 : index
    %12 = vector.load %arg8[%c0_18, %c0_19] : memref<32x128xf32, #tpu.memory_space<vmem>>, vector<32x128xf32>
    %c0_20 = arith.constant 0 : index
    %c0_21 = arith.constant 0 : index
    %13 = vector.load %arg9[%c0_20, %c0_21] : memref<1x128xf32, #tpu.memory_space<vmem>>, vector<1x128xf32>
    %c0_22 = arith.constant 0 : index
    %c0_23 = arith.constant 0 : index
    %14 = vector.load %arg10[%c0_22, %c0_23] : memref<8x8xf32, #tpu.memory_space<vmem>>, vector<8x8xf32>
    %cst = arith.constant dense<0.000000e+00> : vector<64x32xf32>
    %15 = tpu.matmul %1, %10, %cst {dimension_numbers = #tpu.dot_dimension_numbers<[1], [0], [0], [1], [0, 0, 1, 1], [], []>} : vector<64x5xf32>, vector<5x32xf32>, vector<64x32xf32> -> vector<64x32xf32>
    %16 = vector.broadcast %11 : vector<1x32xf32> to vector<64x32xf32>
    %17 = arith.addf %15, %16 : vector<64x32xf32>
    %cst_24 = arith.constant 0.000000e+00 : f32
    %18 = vector.broadcast %cst_24 : f32 to vector<64x32xf32>
    %19 = arith.maximumf %17, %18 : vector<64x32xf32>
    %cst_25 = arith.constant dense<0.000000e+00> : vector<64x128xf32>
    %20 = tpu.matmul %19, %12, %cst_25 {dimension_numbers = #tpu.dot_dimension_numbers<[1], [0], [0], [1], [0, 0, 1, 1], [], []>} : vector<64x32xf32>, vector<32x128xf32>, vector<64x128xf32> -> vector<64x128xf32>
    %21 = vector.broadcast %13 : vector<1x128xf32> to vector<64x128xf32>
    %22 = arith.addf %20, %21 : vector<64x128xf32>
    %23 = tpu.concatenate %5, %5, %5, %5, %5, %5, %5, %5 in 0 : vector<8x8xf32>, vector<8x8xf32>, vector<8x8xf32>, vector<8x8xf32>, vector<8x8xf32>, vector<8x8xf32>, vector<8x8xf32>, vector<8x8xf32> -> vector<64x8xf32>
    %24 = tpu.concatenate %7, %7, %7, %7, %7, %7, %7, %7 in 0 : vector<8x24xf32>, vector<8x24xf32>, vector<8x24xf32>, vector<8x24xf32>, vector<8x24xf32>, vector<8x24xf32>, vector<8x24xf32>, vector<8x24xf32> -> vector<64x24xf32>
    %25 = tpu.concatenate %3, %3, %3, %3, %3, %3, %3, %3 in 1 : vector<64x3xf32>, vector<64x3xf32>, vector<64x3xf32>, vector<64x3xf32>, vector<64x3xf32>, vector<64x3xf32>, vector<64x3xf32>, vector<64x3xf32> -> vector<64x24xf32>
    %26 = arith.mulf %24, %25 : vector<64x24xf32>
    %27 = tpu.iota {dimensions = array<i32: 0>} : vector<24x8xi32>
    %28 = tpu.iota {dimensions = array<i32: 1>} : vector<24x8xi32>
    %c3_i32 = arith.constant 3 : i32
    %29 = vector.broadcast %c3_i32 : i32 to vector<24x8xi32>
    %30 = arith.muli %28, %29 : vector<24x8xi32>
    %31 = arith.cmpi sge, %27, %30 : vector<24x8xi32>
    %c1_i32 = arith.constant 1 : i32
    %32 = vector.broadcast %c1_i32 : i32 to vector<24x8xi32>
    %33 = arith.addi %28, %32 : vector<24x8xi32>
    %c3_i32_26 = arith.constant 3 : i32
    %34 = vector.broadcast %c3_i32_26 : i32 to vector<24x8xi32>
    %35 = arith.muli %33, %34 : vector<24x8xi32>
    %36 = arith.cmpi slt, %27, %35 : vector<24x8xi32>
    %37 = arith.andi %31, %36 : vector<24x8xi1>
    %38 = arith.extui %37 : vector<24x8xi1> to vector<24x8xi32>
    %39 = arith.sitofp %38 : vector<24x8xi32> to vector<24x8xf32>
    %cst_27 = arith.constant dense<0.000000e+00> : vector<64x8xf32>
    %40 = tpu.matmul %26, %39, %cst_27 {dimension_numbers = #tpu.dot_dimension_numbers<[1], [0], [0], [1], [0, 0, 1, 1], [], []>} : vector<64x24xf32>, vector<24x8xf32>, vector<64x8xf32> -> vector<64x8xf32>
    %41 = vector.extract_strided_slice %22 {offsets = [0, 0], sizes = [64, 64], strides = [1, 1]} : vector<64x128xf32> to vector<64x64xf32>
    %42 = tpu.concatenate %23, %23, %23, %23, %23, %23, %23, %23 in 1 : vector<64x8xf32>, vector<64x8xf32>, vector<64x8xf32>, vector<64x8xf32>, vector<64x8xf32>, vector<64x8xf32>, vector<64x8xf32>, vector<64x8xf32> -> vector<64x64xf32>
    %43 = arith.mulf %41, %42 : vector<64x64xf32>
    %44 = tpu.iota {dimensions = array<i32: 0>} : vector<64x8xi32>
    %45 = tpu.iota {dimensions = array<i32: 1>} : vector<64x8xi32>
    %c8_i32 = arith.constant 8 : i32
    %46 = vector.broadcast %c8_i32 : i32 to vector<64x8xi32>
    %47 = arith.muli %45, %46 : vector<64x8xi32>
    %48 = arith.cmpi sge, %44, %47 : vector<64x8xi32>
    %c1_i32_28 = arith.constant 1 : i32
    %49 = vector.broadcast %c1_i32_28 : i32 to vector<64x8xi32>
    %50 = arith.addi %45, %49 : vector<64x8xi32>
    %c8_i32_29 = arith.constant 8 : i32
    %51 = vector.broadcast %c8_i32_29 : i32 to vector<64x8xi32>
    %52 = arith.muli %50, %51 : vector<64x8xi32>
    %53 = arith.cmpi slt, %44, %52 : vector<64x8xi32>
    %54 = arith.andi %48, %53 : vector<64x8xi1>
    %55 = arith.extui %54 : vector<64x8xi1> to vector<64x8xi32>
    %56 = arith.sitofp %55 : vector<64x8xi32> to vector<64x8xf32>
    %cst_30 = arith.constant dense<0.000000e+00> : vector<64x8xf32>
    %57 = tpu.matmul %43, %56, %cst_30 {dimension_numbers = #tpu.dot_dimension_numbers<[1], [0], [0], [1], [0, 0, 1, 1], [], []>} : vector<64x64xf32>, vector<64x8xf32>, vector<64x8xf32> -> vector<64x8xf32>
    %58 = vector.extract_strided_slice %22 {offsets = [0, 64], sizes = [64, 64], strides = [1, 1]} : vector<64x128xf32> to vector<64x64xf32>
    %59 = tpu.concatenate %40, %40, %40, %40, %40, %40, %40, %40 in 1 : vector<64x8xf32>, vector<64x8xf32>, vector<64x8xf32>, vector<64x8xf32>, vector<64x8xf32>, vector<64x8xf32>, vector<64x8xf32>, vector<64x8xf32> -> vector<64x64xf32>
    %60 = arith.mulf %58, %59 : vector<64x64xf32>
    %cst_31 = arith.constant dense<0.000000e+00> : vector<64x8xf32>
    %61 = tpu.matmul %60, %56, %cst_31 {dimension_numbers = #tpu.dot_dimension_numbers<[1], [0], [0], [1], [0, 0, 1, 1], [], []>} : vector<64x64xf32>, vector<64x8xf32>, vector<64x8xf32> -> vector<64x8xf32>
    %62 = arith.addf %57, %61 : vector<64x8xf32>
    %63 = vector.broadcast %9 : vector<64x1xf32> to vector<64x8xf32>
    %64 = arith.mulf %62, %63 : vector<64x8xf32>
    %65 = tpu.iota {dimensions = array<i32: 0>} : vector<8x64xi32>
    %66 = tpu.iota {dimensions = array<i32: 1>} : vector<8x64xi32>
    %c8_i32_32 = arith.constant 8 : i32
    %67 = vector.broadcast %c8_i32_32 : i32 to vector<8x64xi32>
    %68 = arith.muli %65, %67 : vector<8x64xi32>
    %69 = arith.cmpi sge, %66, %68 : vector<8x64xi32>
    %c1_i32_33 = arith.constant 1 : i32
    %70 = vector.broadcast %c1_i32_33 : i32 to vector<8x64xi32>
    %71 = arith.addi %65, %70 : vector<8x64xi32>
    %c8_i32_34 = arith.constant 8 : i32
    %72 = vector.broadcast %c8_i32_34 : i32 to vector<8x64xi32>
    %73 = arith.muli %71, %72 : vector<8x64xi32>
    %74 = arith.cmpi slt, %66, %73 : vector<8x64xi32>
    %75 = arith.andi %69, %74 : vector<8x64xi1>
    %76 = arith.extui %75 : vector<8x64xi1> to vector<8x64xi32>
    %77 = arith.sitofp %76 : vector<8x64xi32> to vector<8x64xf32>
    %cst_35 = arith.constant dense<0.000000e+00> : vector<8x8xf32>
    %78 = tpu.matmul %77, %64, %cst_35 {dimension_numbers = #tpu.dot_dimension_numbers<[1], [0], [0], [1], [0, 0, 1, 1], [], []>} : vector<8x64xf32>, vector<64x8xf32>, vector<8x8xf32> -> vector<8x8xf32>
    %cst_36 = arith.constant dense<0.000000e+00> : vector<8x1xf32>
    %79 = tpu.matmul %77, %9, %cst_36 {dimension_numbers = #tpu.dot_dimension_numbers<[1], [0], [0], [1], [0, 0, 1, 1], [], []>} : vector<8x64xf32>, vector<64x1xf32>, vector<8x1xf32> -> vector<8x1xf32>
    %cst_37 = arith.constant 9.99999971E-10 : f32
    %80 = vector.broadcast %cst_37 : f32 to vector<8x1xf32>
    %81 = arith.addf %79, %80 : vector<8x1xf32>
    %82 = tpu.reciprocal %81 {approx = true} : vector<8x1xf32> -> vector<8x1xf32>
    %83 = vector.broadcast %82 : vector<8x1xf32> to vector<8x8xf32>
    %84 = arith.mulf %78, %83 : vector<8x8xf32>
    %cst_38 = arith.constant dense<0.000000e+00> : vector<8x8xf32>
    %85 = tpu.matmul %5, %14, %cst_38 {dimension_numbers = #tpu.dot_dimension_numbers<[1], [0], [0], [1], [0, 0, 1, 1], [], []>} : vector<8x8xf32>, vector<8x8xf32>, vector<8x8xf32> -> vector<8x8xf32>
    %86 = arith.addf %84, %85 : vector<8x8xf32>
    %cst_39 = arith.constant dense<0.000000e+00> : vector<8xf32>
    %87 = vector.multi_reduction <add>, %86, %cst_39 [0] : vector<8x8xf32> to vector<8xf32>
    %88 = vector.shape_cast %87 : vector<8xf32> to vector<1x8xf32>
    %cst_40 = arith.constant 8.000000e+00 : f32
    %89 = vector.broadcast %cst_40 : f32 to vector<1x8xf32>
    %90 = arith.divf %88, %89 : vector<1x8xf32>
    %c0_41 = arith.constant 0 : index
    %c0_42 = arith.constant 0 : index
    %c0_43 = arith.constant 0 : index
    %91 = vector.load %arg11[%c0_41, %c0_42, %c0_43] : memref<1x1x8xf32, #tpu.memory_space<vmem>>, vector<1x1x8xf32>
    %92 = vector.shape_cast %91 : vector<1x1x8xf32> to vector<1x8xf32>
    %93 = vector.shape_cast %90 : vector<1x8xf32> to vector<1x1x8xf32>
    tpu.vector_store %arg11[%c0_41, %c0_42, %c0_43], %93 {strides = array<i32>} : memref<1x1x8xf32, #tpu.memory_space<vmem>>, vector<1x1x8xf32>,
    return
  }
  func.func @transform_0(%arg0: i32) -> (i32, i32, i32) {
    %c0_i32 = arith.constant 0 : i32
    %c0_i32_0 = arith.constant 0 : i32
    %c0_i32_1 = arith.constant 0 : i32
    return %arg0, %c0_i32, %c0_i32_0 : i32, i32, i32
  }
  func.func @transform_1(%arg0: i32) -> (i32, i32, i32) {
    %c0_i32 = arith.constant 0 : i32
    %c0_i32_0 = arith.constant 0 : i32
    %c0_i32_1 = arith.constant 0 : i32
    return %arg0, %c0_i32, %c0_i32_0 : i32, i32, i32
  }
  func.func @transform_2(%arg0: i32) -> (i32, i32, i32) {
    %c0_i32 = arith.constant 0 : i32
    %c0_i32_0 = arith.constant 0 : i32
    %c0_i32_1 = arith.constant 0 : i32
    return %arg0, %c0_i32, %c0_i32_0 : i32, i32, i32
  }
  func.func @transform_3(%arg0: i32) -> (i32, i32, i32) {
    %c0_i32 = arith.constant 0 : i32
    %c0_i32_0 = arith.constant 0 : i32
    %c0_i32_1 = arith.constant 0 : i32
    return %arg0, %c0_i32, %c0_i32_0 : i32, i32, i32
  }
  func.func @transform_4(%arg0: i32) -> (i32, i32, i32) {
    %c0_i32 = arith.constant 0 : i32
    %c0_i32_0 = arith.constant 0 : i32
    %c0_i32_1 = arith.constant 0 : i32
    return %arg0, %c0_i32, %c0_i32_0 : i32, i32, i32
  }
  func.func @transform_5(%arg0: i32) -> (i32, i32) {
    %c0_i32 = arith.constant 0 : i32
    %c0_i32_0 = arith.constant 0 : i32
    %c0_i32_1 = arith.constant 0 : i32
    return %c0_i32, %c0_i32_0 : i32, i32
  }
  func.func @transform_6(%arg0: i32) -> (i32, i32) {
    %c0_i32 = arith.constant 0 : i32
    %c0_i32_0 = arith.constant 0 : i32
    %c0_i32_1 = arith.constant 0 : i32
    return %c0_i32, %c0_i32_0 : i32, i32
  }
  func.func @transform_7(%arg0: i32) -> (i32, i32) {
    %c0_i32 = arith.constant 0 : i32
    %c0_i32_0 = arith.constant 0 : i32
    %c0_i32_1 = arith.constant 0 : i32
    return %c0_i32, %c0_i32_0 : i32, i32
  }
  func.func @transform_8(%arg0: i32) -> (i32, i32) {
    %c0_i32 = arith.constant 0 : i32
    %c0_i32_0 = arith.constant 0 : i32
    %c0_i32_1 = arith.constant 0 : i32
    return %c0_i32, %c0_i32_0 : i32, i32
  }
  func.func @transform_9(%arg0: i32) -> (i32, i32) {
    %c0_i32 = arith.constant 0 : i32
    %c0_i32_0 = arith.constant 0 : i32
    %c0_i32_1 = arith.constant 0 : i32
    return %c0_i32, %c0_i32_0 : i32, i32
  }
  func.func @transform_10(%arg0: i32) -> (i32, i32, i32) {
    %c0_i32 = arith.constant 0 : i32
    %c0_i32_0 = arith.constant 0 : i32
    %c0_i32_1 = arith.constant 0 : i32
    return %arg0, %c0_i32, %c0_i32_0 : i32, i32, i32
  }
}

</mosaic_0001>

<bundles_post_ra>
// kernel: se3_transformer_forward.5
= control target key start
LH: loop header
LB: loop body
LE: loop exit
PB: predicated region body
PF: predicated region fallthrough
CT: control target
= control target key end

     0   :  { %s1892_s24 = smov 0   ;;  %s1894_s25 = smov 0   ;;  %s2206_s0 = inlined_call_operand.vmem [shape: f32[2,64,5], index: 0, kind: input, shape index: {}]   ;;  %s2207_s1 = inlined_call_operand.vmem [shape: f32[2,64,3], index: 1, kind: input, shape index: {}]   ;;  %s2208_s2 = inlined_call_operand.vmem [shape: f32[2,8,4], index: 2, kind: input, shape index: {}]   ;;  %s2209_s3 = inlined_call_operand.vmem [shape: f32[5,48], index: 3, kind: input, shape index: {}]   ;;  %s2210_s4 = inlined_call_operand.vmem [shape: f32[1,48], index: 4, kind: input, shape index: {}]   ;;  %s2211_s5 = inlined_call_operand.vmem [shape: f32[48,24], index: 5, kind: input, shape index: {}]   ;;  %s2212_s6 = inlined_call_operand.vmem [shape: f32[1,24], index: 6, kind: input, shape index: {}]   ;;  %s2213_s7 = inlined_call_operand.vmem [shape: f32[2,64,10], index: 7, kind: output, shape index: {}]  }
   0x1   :  { %s1896_s26 = smov 0  }
   0x2 LB: > { %s29_s27 = sadd.s32 1, %s1835_s25  ;;  %p1570_p0 = scmp.ge.s32.totalorder %s1839_s26, 1  ;;  %s1839_s26 = sphi %s1896_s26, %s17_s26   ;;  %s1835_s25 = sphi %s1894_s25, %s2217_s25   ;;  %s1831_s24 = sphi %s1892_s24, %s2216_s24  }
   0x3   : > { %p31_p1 = scmp.ge.s32.totalorder %s29_s27, 2  ;;  %p284_p2 = scmp.lt.s32.totalorder %s1839_s26, 3 }
   0x5   : > { %s2219_s27 = smov (%p31_p1, %s29_s27), 0  ;;  %p285_p3 = pnand %p1570_p0, %p284_p2 }
   0x6   : > { %v388_v0 = vld [vmem:[%s2209_s3] sm:$0x1f] (!%p285_p3)  ;;  %vm428_vm0 = vcmask (!%p285_p3), 1044480   ;;  %p338_p4 = scmp.lt.s32.totalorder (!%p285_p3), %s1831_s24, 1  ;;  %v391_v2 = vld [vmem:[%s2211_s5 + $0x8] sm:$0xff] (!%p285_p3)  ;;  %vm403_vm1 = vcmask (!%p285_p3), 39936   ;;  %v695_v46 = vlaneseq (!%p285_p3) }
   0x7   : > { %288 = sbr.rel (%p285_p3) target bundleno = 967 (0x3c7), region = 48  ;;  %1680 = vmatprep.subr.msk.mxu0 (!%p285_p3), %vm428_vm0, %v388_v0  ;;  %1772 = vmatprep.subr.msk.mxu1 (!%p285_p3), %vm428_vm0, %v388_v0  ;;  %v390_v1 = vld [vmem:[%s2211_s5] sm:$0xff] (!%p285_p3)  ;;  %v392_v4 = vld [vmem:[%s2211_s5 + $0x10] sm:$0xff] (!%p285_p3)  ;;  %v393_v5 = vld [vmem:[%s2211_s5 + $0x18] sm:$0xff] (!%p285_p3)  ;;  %s1841_s23 = smov (!%p285_p3), 4   ;;  %vm685_vm2 = vcmask (!%p285_p3), 31744  }
   0x8   : > { %1681 = vmatpush3.msk.msra.mxu0 (!%p285_p3), %vm428_vm0, %v388_v0  ;;  %1773 = vmatpush3.msk.msra.mxu1 (!%p285_p3), %vm428_vm0, %v388_v0  ;;  %v1760_v3 = vpack.c.bf16 (!%p285_p3), %v391_v2, %v390_v1  ;;  %v1764_v11 = vpack.c.bf16 (!%p285_p3), %v393_v5, %v392_v4  ;;  %v394_v16 = vld [vmem:[%s2211_s5 + $0x20] sm:$0xff] (!%p285_p3)  ;;  %v395_v17 = vld [vmem:[%s2211_s5 + $0x28] sm:$0xff] (!%p285_p3)  ;;  %s1842_s8 = smov (!%p285_p3), 16   ;;  %s1843_s9 = smov (!%p285_p3), 8   ;;  %vm551_vm3 = vcmask (!%p285_p3), 392192   ;;  %v698_v47 = vand.u32 (!%p285_p3), 127, %v695_v46 }
   0x9   : > { %v1768_v18 = vpack.c.bf16 (!%p285_p3), %v395_v17, %v394_v16  ;;  %v1578_v21 = vld [vmem:[%s2210_s4] ss:$0 sm:$0xff] (!%p285_p3)  ;;  %v696_v49 = vshrl.u32 (!%p285_p3), %v695_v46, 7  ;;  %v1844_v53 = vmov (!%p285_p3), 1.0   ;;  %vm707_vm7 = vcmask (!%p285_p3), 64512   ;;  %s1845_s15 = smov (!%p285_p3), 120  }
   0xa   : > { %1761 = vmatprep.subr.bf16.mxu1 (!%p285_p3), %v1760_v3  ;;  %v701_v48 = vadd.s32 (!%p285_p3), 1, %v698_v47  ;;  %v699_v50 = vmul.u32 (!%p285_p3), 4, %v698_v47  ;;  %v1588_v54 = vld [vmem:[%s2212_s6] ss:$0 sm:$0xff] (!%p285_p3)  ;;  %s1846_s16 = smov (!%p285_p3), 112   ;;  %s1850_s20 = smov (!%p285_p3), 2  }
   0xb   : > { %s1851_s21 = smov (!%p285_p3), 6   ;;  %vm1406_vm8 = vcmask (!%p285_p3), 15360   ;;  %vm1423_vm9 = vcmask (!%p285_p3), 48128   ;;  %vm1440_vm10 = vcmask (!%p285_p3), 80896  }
   0xc   : > { %v702_v51 = vmul.u32 (!%p285_p3), 4, %v701_v48  ;;  %vm700_vm4 = vcmp.ge.s32.totalorder (!%p285_p3), %v696_v49, %v699_v50 }
   0xe   : > { %s2221_s24 = smov (!%p338_p4, %s1831_s24), 1  ;;  %vm703_vm5 = vcmp.lt.s32.totalorder %v696_v49, %v702_v51 }
   0xf   : > { %s1919_s11 = sshll.u32 %s2221_s24, 6  ;;  %s1575_s12 = sshll.u32 %s2221_s24, 3  ;;  %vm1966_vm6 = vmand %vm700_vm4, %vm703_vm5 }
  0x10   : > { %s345_s19 = scalar_lea.vmem %s2206_s0, %s1919_s11  ;;  %s360_s22 = scalar_lea.vmem %s2208_s2, %s1575_s12  ;;  %1718 = vmatprep.subr.msk.mxu0 %vm1966_vm6, %v1844_v53 }
  0x11   : > { %v371_v6 = vld [vmem:[%s345_s19] sm:$0xff]  ;;  %v372_v7 = vld [vmem:[%s345_s19 + $0x8] sm:$0xff]  ;;  %v373_v8 = vld [vmem:[%s345_s19 + $0x10] sm:$0xff]  ;;  %s2144_s24 = scalar_lea.vmem %s2213_s7, %s1919_s11 }
  0x12   : > { %1682 = vmatprep.mubr.msk.f32.mxu0 %vm403_vm1, %v371_v6  ;;  %1685 = vmatprep.mubr.msk.f32.mxu1 %vm403_vm1, %v373_v8  ;;  %v374_v9 = vld [vmem:[%s345_s19 + $0x18] sm:$0xff]  ;;  %v375_v10 = vld [vmem:[%s345_s19 + $0x20] sm:$0xff]  ;;  %v376_v13 = vld [vmem:[%s345_s19 + $0x28] sm:$0xff] }
  0x13   : > { %1683 = vmatmul.mubr.msk.f32.vlgmr.msra.gmra.mrb[0].mxu0 %vm403_vm1, %v372_v7  ;;  %1686 = vmatmul.mubr.msk.f32.vlgmr.msra.gmra.mrb[0].mxu1 %vm403_vm1, %v374_v9  ;;  %v387_v12 = vld [vmem:[%s360_s22] sm:$0xff]  ;;  %v377_v14 = vld [vmem:[%s345_s19 + $0x30] sm:$0xff]  ;;  %v378_v15 = vld [vmem:[%s345_s19 + $0x38] sm:$0xff]  ;;  %s355_s19 = scalar_lea.vmem %s2207_s1, %s1919_s11 }
  0x14   : > { %1688 = vmatprep.mubr.msk.f32.mxu1 %vm403_vm1, %v375_v10  ;;  %682 = vrot.lane.b32.xlu0 %v387_v12, %s1841_s23 }
  0x15   : > { %1763 = vmatpush3.bf16.msra.mxu1 %v1760_v3  ;;  %1719 = vmatpush3.msk.msra.mxu0 %vm1966_vm6, %v1844_v53 }
  0x16   : > { %1765 = vmatprep.subr.bf16.mxu1 %v1764_v11  ;;  %1732 = vmatprep.subr.msk.mxu0 %vm1966_vm6, %v1844_v53 }
  0x17   : > { %1689 = vmatmul.mubr.msk.f32.gmra.mrb[2].mxu1 %vm403_vm1, %v376_v13 }
  0x18   : > { %1691 = vmatprep.mubr.msk.f32.mxu1 %vm403_vm1, %v377_v14 }
  0x19   : > { %1767 = vmatpush3.bf16.msra.mxu1 %v1764_v11 }
  0x1a   : > { %1769 = vmatprep.subr.bf16.mxu1 %v1768_v18 }
  0x1b   : > { %1692 = vmatmul.mubr.msk.f32.gmra.mrb[4].mxu1 %vm403_vm1, %v378_v15 }
  0x1d   : > { %1771 = vmatpush3.bf16.msra.mxu1 %v1768_v18 }
  0x1e   : > { %1774 = vmatprep.subr.msk.mxu1 %vm1966_vm6, %v1844_v53 }
  0x86   : > { %v683_v19 = vpop.permute.xlu0 %682 }
  0x87   : > { %v1950_v20 = vsel %vm685_vm2, %v387_v12, %v683_v19 }
  0x88   : > { %994 = vrot.lane.b32.xlu1 %v1950_v20, %s1842_s8  ;;  %838 = vrot.lane.b32.xlu0 %v1950_v20, %s1843_s9 }
  0xe6   : > { %v1684_v22 = vpop.f32.mrb[0].mxu0  ;;  %v1687_v23 = vpop.f32.mrb[0].mxu1 }
  0xe7   : > { %v504_v24 = vadd.f32 %v1684_v22, %v1578_v21  ;;  %v498_v25 = vpop.f32.mrb[1].mxu0  ;;  %v508_v26 = vpop.f32.mrb[1].mxu1  ;;  %v514_v29 = vadd.f32 %v1687_v23, %v1578_v21 }
  0xe8   : > { %v499_v27 = vadd.f32 %v1578_v21, %v498_v25  ;;  %v509_v28 = vadd.f32 %v1578_v21, %v508_v26 }
  0xe9   : > { %v538_v33 = vmax.f32 %v504_v24, 0.0  ;;  %v540_v36 = vmax.f32 %v514_v29, 0.0 }
  0xea   : > { %v537_v30 = vmax.f32 %v499_v27, 0.0  ;;  %v539_v31 = vmax.f32 %v509_v28, 0.0  ;;  %v1690_v32 = vpop.f32.mrb[2].mxu1  ;;  %v1847_v28 = vmov 0  }
  0xeb   : > { %v518_v34 = vpop.f32.mrb[3].mxu1  ;;  %v524_v37 = vadd.f32 %v1690_v32, %v1578_v21  ;;  %1812 = vset.pattern.permute.xlu0 %v1847_v28  ;;  %1811 = vset.pattern.permute.xlu1 %v1847_v28 }
  0xec   : > { %1706 = vmatprep.mubr.msk.f32.mxu1 %vm551_vm3, %v537_v30  ;;  %v519_v35 = vadd.f32 %v1578_v21, %v518_v34  ;;  %v380_v34 = vld [vmem:[%s355_s19 + $0x8] sm:$0xff] }
  0xed   : > { %1707 = vmatmul.mubr.msk.f32.vlgmr.msra.gmra.mrb[6].mxu1 %vm551_vm3, %v538_v33  ;;  %v542_v42 = vmax.f32 %v524_v37, 0.0  ;;  %v381_v37 = vld [vmem:[%s355_s19 + $0x10] sm:$0xff] }
  0xee   : > { %v541_v38 = vmax.f32 %v519_v35, 0.0  ;;  %1709 = vmatprep.mubr.msk.f32.mxu1 %vm551_vm3, %v539_v31  ;;  %v1693_v39 = vpop.f32.mrb[4].mxu1  ;;  %1775 = vmatpush3.msk.msra.mxu1 %vm1966_vm6, %v1844_v53  ;;  %v379_v35 = vld [vmem:[%s355_s19] sm:$0xff] }
  0xef   : > { %v528_v40 = vpop.f32.mrb[5].mxu1  ;;  %v534_v43 = vadd.f32 %v1693_v39, %v1578_v21  ;;  %v382_v39 = vld [vmem:[%s355_s19 + $0x18] sm:$0xff] }
  0xf0   : > { %v529_v41 = vadd.f32 %v1578_v21, %v528_v40  ;;  %v384_v40 = vld [vmem:[%s355_s19 + $0x28] sm:$0xff] }
  0xf1   : > { %1710 = vmatmul.mubr.msk.f32.gmra.mrb[8].mxu1 %vm551_vm3, %v540_v36  ;;  %v544_v45 = vmax.f32 %v534_v43, 0.0  ;;  %v383_v36 = vld [vmem:[%s355_s19 + $0x20] sm:$0xff]  ;;  %v1849_v43 = vmov 2  }
  0xf2   : > { %v543_v44 = vmax.f32 %v529_v41, 0.0  ;;  %1712 = vmatprep.mubr.msk.f32.mxu1 %vm551_vm3, %v541_v38  ;;  %v385_v38 = vld [vmem:[%s355_s19 + $0x30] sm:$0xff]  ;;  %v1848_v41 = vmov 1  }
  0xf5   : > { %1713 = vmatmul.mubr.msk.f32.gmra.mrb[10].mxu1 %vm551_vm3, %v542_v42  ;;  %v386_v42 = vld [vmem:[%s355_s19 + $0x38] sm:$0xff] }
  0xf6   : > { %1715 = vmatprep.mubr.msk.f32.mxu1 %vm551_vm3, %v543_v44 }
  0xf9   : > { %1716 = vmatmul.mubr.msk.f32.gmra.mrb[12].mxu1 %vm551_vm3, %v544_v45 }
  0xfa   : > { %v1988_v56 = vpop.permute.xlu0 %838  ;;  %v1992_v62 = vpop.permute.xlu1 %994 }
 0x1c0   : > { %v1708_v55 = vpop.f32.mrb[6].mxu1 }
 0x1c1   : > { %v648_v57 = vadd.f32 %v1708_v55, %v1588_v54  ;;  %v642_v58 = vpop.f32.mrb[7].mxu1 }
 0x1c2   : > { %v643_v59 = vadd.f32 %v1588_v54, %v642_v58 }
 0x1c3   : > { %v842_v60 = vmul.f32 %v1988_v56, %v648_v57  ;;  %v688_v1 = vmul.f32 %v1950_v20, %v648_v57  ;;  %v998_v5 = vmul.f32 %v1992_v62, %v648_v57 }
 0x1c4   : > { %v687_v61 = vmul.f32 %v1950_v20, %v643_v59  ;;  %v1711_v63 = vpop.f32.mrb[8].mxu1  ;;  %v841_v0 = vmul.f32 %v1988_v56, %v643_v59  ;;  %v997_v8 = vmul.f32 %v1992_v62, %v643_v59 }
 0x1c5   : > { %v658_v2 = vadd.f32 %v1711_v63, %v1588_v54  ;;  %859 = vrot.lane.b32.xlu0 %v842_v60, %s1845_s15  ;;  %v652_v3 = vpop.f32.mrb[9].mxu1 }
 0x1c6   : > { %v653_v4 = vadd.f32 %v1588_v54, %v652_v3  ;;  %857 = vrot.lane.b32.xlu1 %v841_v0, %s1845_s15  ;;  %1720 = vmatprep.mubr.msk.f32.mxu0 %vm707_vm7, %v687_v61 }
 0x1c7   : > { %1721 = vmatmul.mubr.msk.f32.vlgmr.msra.gmra.mrb[2].mxu0 %vm707_vm7, %v688_v1  ;;  %v690_v9 = vmul.f32 %v1950_v20, %v658_v2  ;;  %v844_v13 = vmul.f32 %v1988_v56, %v658_v2  ;;  %v1000_v16 = vmul.f32 %v1992_v62, %v658_v2 }
 0x1c8   : > { %v689_v6 = vmul.f32 %v1950_v20, %v653_v4  ;;  %v1714_v7 = vpop.f32.mrb[10].mxu1  ;;  %1733 = vmatpush3.msk.msra.mxu0 %vm1966_vm6, %v1844_v53  ;;  %v843_v22 = vmul.f32 %v1988_v56, %v653_v4  ;;  %v999_v24 = vmul.f32 %v1992_v62, %v653_v4 }
 0x1c9   : > { %v668_v10 = vadd.f32 %v1714_v7, %v1588_v54  ;;  %1015 = vrot.lane.b32.xlu0 %v998_v5, %s1846_s16  ;;  %v662_v11 = vpop.f32.mrb[11].mxu1  ;;  %1746 = vmatprep.subr.msk.mxu0 %vm1966_vm6, %v1844_v53 }
 0x1ca   : > { %v663_v12 = vadd.f32 %v1588_v54, %v662_v11  ;;  %1013 = vrot.lane.b32.xlu1 %v997_v8, %s1846_s16  ;;  %1723 = vmatprep.mubr.msk.f32.mxu0 %vm707_vm7, %v689_v6 }
 0x1cb   : > { %1724 = vmatmul.mubr.msk.f32.gmra.mrb[4].mxu0 %vm707_vm7, %v690_v9  ;;  %v692_v17 = vmul.f32 %v1950_v20, %v668_v10  ;;  %v846_v26 = vmul.f32 %v1988_v56, %v668_v10  ;;  %v1002_v27 = vmul.f32 %v1992_v62, %v668_v10 }
 0x1cc   : > { %v691_v14 = vmul.f32 %v1950_v20, %v663_v12  ;;  %v1717_v15 = vpop.f32.mrb[12].mxu1  ;;  %v1001_v29 = vmul.f32 %v1992_v62, %v663_v12 }
 0x1cd   : > { %v678_v18 = vadd.f32 %v1717_v15, %v1588_v54  ;;  %863 = vrot.lane.b32.xlu0 %v844_v13, %s1845_s15  ;;  %v672_v19 = vpop.f32.mrb[13].mxu1 }
 0x1ce   : > { %v673_v21 = vadd.f32 %v1588_v54, %v672_v19  ;;  %1019 = vrot.lane.b32.xlu1 %v1000_v16, %s1846_s16  ;;  %1726 = vmatprep.mubr.msk.f32.mxu0 %vm707_vm7, %v691_v14 }
 0x1cf   : > { %1727 = vmatmul.mubr.msk.f32.gmra.mrb[6].mxu0 %vm707_vm7, %v692_v17  ;;  %v694_v25 = vmul.f32 %v1950_v20, %v678_v18  ;;  %v848_v32 = vmul.f32 %v1988_v56, %v678_v18  ;;  %v1004_v33 = vmul.f32 %v1992_v62, %v678_v18 }
 0x1d0   : > { %v693_v23 = vmul.f32 %v1950_v20, %v673_v21  ;;  %v845_v20 = vmul.f32 %v1988_v56, %v663_v12  ;;  %v847_v30 = vmul.f32 %v1988_v56, %v673_v21  ;;  %v1003_v31 = vmul.f32 %v1992_v62, %v673_v21 }
 0x1d1   : > { %861 = vrot.lane.b32.xlu0 %v843_v22, %s1845_s15 }
 0x1d2   : > { %1017 = vrot.lane.b32.xlu1 %v999_v24, %s1846_s16  ;;  %1729 = vmatprep.mubr.msk.f32.mxu0 %vm707_vm7, %v693_v23 }
 0x1d3   : > { %1730 = vmatmul.mubr.msk.f32.gmra.mrb[8].mxu0 %vm707_vm7, %v694_v25 }
 0x1d5   : > { %867 = vrot.lane.b32.xlu0 %v846_v26, %s1845_s15 }
 0x1d6   : > { %1023 = vrot.lane.b32.xlu1 %v1002_v27, %s1846_s16 }
 0x1d9   : > { %865 = vrot.lane.b32.xlu0 %v845_v20, %s1845_s15 }
 0x1da   : > { %1021 = vrot.lane.b32.xlu1 %v1001_v29, %s1846_s16 }
 0x1dd   : > { %869 = vrot.lane.b32.xlu0 %v847_v30, %s1845_s15 }
 0x1de   : > { %1025 = vrot.lane.b32.xlu1 %v1003_v31, %s1846_s16 }
 0x1e1   : > { %871 = vrot.lane.b32.xlu0 %v848_v32, %s1845_s15 }
 0x1e2   : > { %1027 = vrot.lane.b32.xlu1 %v1004_v33, %s1846_s16 }
 0x1e5   : > { %1157 = vperm.xlu0 %1812, %v380_v34  }
 0x1e6   : > { %1152 = vperm.xlu1 %1811, %v379_v35  }
 0x1e9   : > { %1172 = vperm.xlu0 %1812, %v383_v36  }
 0x1ea   : > { %1162 = vperm.xlu1 %1811, %v381_v37  }
 0x1ed   : > { %1182 = vperm.xlu0 %1812, %v385_v38  }
 0x1ee   : > { %1167 = vperm.xlu1 %1811, %v382_v39  }
 0x1f1   : > { %1813 = vset.pattern.permute.xlu0 %v1848_v41 }
 0x1f2   : > { %1177 = vperm.xlu1 %1811, %v384_v40   ;;  %1199 = vperm.xlu0 %1813, %v379_v35  }
 0x1f6   : > { %1187 = vperm.xlu1 %1811, %v386_v42   ;;  %1211 = vperm.xlu0 %1813, %v382_v39  }
 0x1fa   : > { %1814 = vset.pattern.permute.xlu1 %v1848_v41  ;;  %1219 = vperm.xlu0 %1813, %v384_v40  }
 0x1fb   : > { %1203 = vperm.xlu1 %1814, %v380_v34  }
 0x1fe   : > { %1227 = vperm.xlu0 %1813, %v386_v42  }
 0x1ff   : > { %1207 = vperm.xlu1 %1814, %v381_v37  }
 0x202   : > { %1816 = vset.pattern.permute.xlu0 %v1849_v43 }
 0x203   : > { %1215 = vperm.xlu1 %1814, %v383_v36   ;;  %1243 = vperm.xlu0 %1816, %v380_v34  }
 0x207   : > { %1223 = vperm.xlu1 %1814, %v385_v38   ;;  %1255 = vperm.xlu0 %1816, %v383_v36  }
 0x20b   : > { %1815 = vset.pattern.permute.xlu1 %v1849_v43  ;;  %1263 = vperm.xlu0 %1816, %v385_v38  }
 0x20c   : > { %1239 = vperm.xlu1 %1815, %v379_v35  }
 0x210   : > { %1247 = vperm.xlu1 %1815, %v381_v37  }
 0x214   : > { %1251 = vperm.xlu1 %1815, %v382_v39  }
 0x218   : > { %1259 = vperm.xlu1 %1815, %v384_v40  }
 0x21c   : > { %1267 = vperm.xlu1 %1815, %v386_v42  }
 0x237   : > { %v860_v44 = vpop.permute.xlu0 %859 }
 0x238   : > { %v858_v45 = vpop.permute.xlu1 %857 }
 0x239   : > { %1734 = vmatprep.mubr.msk.f32.mxu0 %vm707_vm7, %v858_v45 }
 0x23a   : > { %1735 = vmatmul.mubr.msk.f32.vlgmr.msra.gmra.mrb[10].mxu0 %vm707_vm7, %v860_v44 }
 0x23b   : > { %v1016_v46 = vpop.permute.xlu0 %1015  ;;  %1747 = vmatpush3.msk.msra.mxu0 %vm1966_vm6, %v1844_v53 }
 0x23c   : > { %v1014_v47 = vpop.permute.xlu1 %1013 }
 0x23d   : > { %1748 = vmatprep.mubr.msk.f32.mxu0 %vm707_vm7, %v1014_v47 }
 0x23e   : > { %1749 = vmatmul.mubr.msk.f32.vlgmr.msra.gmra.mrb[12].mxu0 %vm707_vm7, %v1016_v46 }
 0x23f   : > { %v864_v48 = vpop.permute.xlu0 %863 }
 0x240   : > { %v1020_v49 = vpop.permute.xlu1 %1019 }
 0x243   : > { %v862_v50 = vpop.permute.xlu0 %861 }
 0x244   : > { %1737 = vmatprep.mubr.msk.f32.mxu1 %vm707_vm7, %v862_v50  ;;  %v1018_v51 = vpop.permute.xlu1 %1017 }
 0x245   : > { %1738 = vmatmul.mubr.msk.f32.vlgmr.msra.gmra.mrb[14].mxu1 %vm707_vm7, %v864_v48  ;;  %1751 = vmatprep.mubr.msk.f32.mxu0 %vm707_vm7, %v1018_v51 }
 0x246   : > { %1752 = vmatmul.mubr.msk.f32.gmra.mrb[14].mxu0 %vm707_vm7, %v1020_v49 }
 0x247   : > { %v868_v54 = vpop.permute.xlu0 %867 }
 0x248   : > { %v1024_v52 = vpop.permute.xlu1 %1023 }
 0x24b   : > { %v866_v53 = vpop.permute.xlu0 %865 }
 0x24c   : > { %1740 = vmatprep.mubr.msk.f32.mxu1 %vm707_vm7, %v866_v53  ;;  %v1022_v55 = vpop.permute.xlu1 %1021 }
 0x24d   : > { %1741 = vmatmul.mubr.msk.f32.gmra.mrb[16].mxu1 %vm707_vm7, %v868_v54  ;;  %1754 = vmatprep.mubr.msk.f32.mxu0 %vm707_vm7, %v1022_v55 }
 0x24e   : > { %1755 = vmatmul.mubr.msk.f32.gmra.mrb[16].mxu0 %vm707_vm7, %v1024_v52 }
 0x24f   : > { %v870_v56 = vpop.permute.xlu0 %869 }
 0x250   : > { %1743 = vmatprep.mubr.msk.f32.mxu1 %vm707_vm7, %v870_v56  ;;  %v1026_v57 = vpop.permute.xlu1 %1025 }
 0x251   : > { %1757 = vmatprep.mubr.msk.f32.mxu0 %vm707_vm7, %v1026_v57 }
 0x253   : > { %v872_v58 = vpop.permute.xlu0 %871 }
 0x254   : > { %1744 = vmatmul.mubr.msk.f32.gmra.mrb[18].mxu1 %vm707_vm7, %v872_v58  ;;  %v1028_v59 = vpop.permute.xlu1 %1027 }
 0x255   : > { %1758 = vmatmul.mubr.msk.f32.gmra.mrb[18].mxu0 %vm707_vm7, %v1028_v59 }
 0x264   : > { %v1158_v6 = vpop.permute.xlu0 %1157 }
 0x265   : > { %v1153_v4 = vpop.permute.xlu1 %1152 }
 0x268   : > { %v2085_v8 = vpop.permute.xlu0 %1172 }
 0x269   : > { %v1163_v5 = vpop.permute.xlu1 %1162 }
 0x26c   : > { %v2089_v10 = vpop.permute.xlu0 %1182 }
 0x26d   : > { %v1168_v7 = vpop.permute.xlu1 %1167 }
 0x271   : > { %v2087_v9 = vpop.permute.xlu1 %1177  ;;  %v1200_v12 = vpop.permute.xlu0 %1199 }
 0x275   : > { %v2091_v11 = vpop.permute.xlu1 %1187  ;;  %v1212_v14 = vpop.permute.xlu0 %1211 }
 0x279   : > { %v1220_v19 = vpop.permute.xlu0 %1219 }
 0x27a   : > { %v1204_v13 = vpop.permute.xlu1 %1203 }
 0x27d   : > { %v2095_v23 = vpop.permute.xlu0 %1227 }
 0x27e   : > { %v1208_v16 = vpop.permute.xlu1 %1207 }
 0x282   : > { %v1216_v22 = vpop.permute.xlu1 %1215  ;;  %v1244_v30 = vpop.permute.xlu0 %1243 }
 0x286   : > { %v2098_v27 = vpop.permute.xlu1 %1223  ;;  %v1256_v57 = vpop.permute.xlu0 %1255 }
 0x28b   : > { %v1240_v32 = vpop.permute.xlu1 %1239 }
 0x28f   : > { %v1248_v44 = vpop.permute.xlu1 %1247 }
 0x293   : > { %v1252_v48 = vpop.permute.xlu1 %1251 }
 0x297   : > { %v1260_v56 = vpop.permute.xlu1 %1259 }
 0x29a   : > { %v2069_v60 = vpop.f32.mrb[2].mxu0 }
 0x29b   : > { %v2071_v61 = vpop.f32.mrb[3].mxu0 }
 0x29e   : > { %v2073_v62 = vpop.f32.mrb[4].mxu0 }
 0x29f   : > { %v2075_v63 = vpop.f32.mrb[5].mxu0 }
 0x2a2   : > { %v2077_v0 = vpop.f32.mrb[6].mxu0 }
 0x2a3   : > { %v2079_v1 = vpop.f32.mrb[7].mxu0 }
 0x2a6   : > { %v2081_v2 = vpop.f32.mrb[8].mxu0 }
 0x2a7   : > { %v2083_v3 = vpop.f32.mrb[9].mxu0 }
 0x30d   : > { %v1736_v15 = vpop.f32.mrb[10].mxu0 }
 0x30e   : > { %1288 = vrot.lane.b32.xlu1 %v1736_v15, %s1850_s20  ;;  %v955_v17 = vpop.f32.mrb[11].mxu0 }
 0x30f   : > { %1286 = vrot.lane.b32.xlu0 %v955_v17, %s1850_s20 }
 0x311   : > { %v1750_v18 = vpop.f32.mrb[12].mxu0 }
 0x312   : > { %v1111_v21 = vpop.f32.mrb[13].mxu0  ;;  %v1191_v20 = vmul.f32 %v1750_v18, %v1158_v6  ;;  %v1231_v31 = vmul.f32 %v1750_v18, %v1204_v13  ;;  %v1271_v38 = vmul.f32 %v1750_v18, %v1244_v30 }
 0x313   : > { %v1190_v29 = vmul.f32 %v1153_v4, %v1111_v21  ;;  %v1230_v33 = vmul.f32 %v1200_v12, %v1111_v21  ;;  %v1270_v39 = vmul.f32 %v1240_v32, %v1111_v21 }
 0x318   : > { %v1739_v24 = vpop.f32.mrb[14].mxu1 }
 0x319   : > { %v965_v25 = vpop.f32.mrb[15].mxu1  ;;  %1292 = vrot.lane.b32.xlu1 %v1739_v24, %s1850_s20  ;;  %v1753_v26 = vpop.f32.mrb[14].mxu0 }
 0x31a   : > { %1290 = vrot.lane.b32.xlu0 %v965_v25, %s1850_s20  ;;  %v1121_v28 = vpop.f32.mrb[15].mxu0  ;;  %v1193_v45 = vmul.f32 %v1753_v26, %v1168_v7  ;;  %v1233_v47 = vmul.f32 %v1753_v26, %v1212_v14  ;;  %v1273_v50 = vmul.f32 %v1753_v26, %v1252_v48 }
 0x31b   : > { %v1192_v46 = vmul.f32 %v1163_v5, %v1121_v28  ;;  %v1232_v49 = vmul.f32 %v1208_v16, %v1121_v28  ;;  %v1272_v51 = vmul.f32 %v1248_v44, %v1121_v28 }
 0x31d   : > { %1320 = vrot.lane.b32.xlu1 %v1191_v20, %s1841_s23 }
 0x31e   : > { %1318 = vrot.lane.b32.xlu0 %v1190_v29, %s1841_s23 }
 0x320   : > { %v1742_v34 = vpop.f32.mrb[16].mxu1 }
 0x321   : > { %v975_v35 = vpop.f32.mrb[17].mxu1  ;;  %1352 = vrot.lane.b32.xlu1 %v1231_v31, %s1851_s21  ;;  %v1756_v36 = vpop.f32.mrb[16].mxu0 }
 0x322   : > { %1350 = vrot.lane.b32.xlu0 %v1230_v33, %s1851_s21  ;;  %v1131_v37 = vpop.f32.mrb[17].mxu0  ;;  %v1195_v54 = vmul.f32 %v1756_v36, %v2087_v9  ;;  %v1235_v53 = vmul.f32 %v1756_v36, %v1220_v19  ;;  %v1275_v58 = vmul.f32 %v1756_v36, %v1260_v56  ;;  %v1264_v9 = vpop.permute.xlu0 %1263 }
 0x323   : > { %v1194_v52 = vmul.f32 %v2085_v8, %v1131_v37  ;;  %v1234_v55 = vmul.f32 %v1216_v22, %v1131_v37  ;;  %v1274_v59 = vmul.f32 %v1256_v57, %v1131_v37  ;;  %v1268_v8 = vpop.permute.xlu1 %1267 }
 0x325   : > { %1384 = vrot.lane.b32.xlu1 %v1271_v38, %s1843_s9 }
 0x326   : > { %1382 = vrot.lane.b32.xlu0 %v1270_v39, %s1843_s9 }
 0x327   : > { %v1745_v40 = vpop.f32.mrb[18].mxu1 }
 0x328   : > { %v985_v41 = vpop.f32.mrb[19].mxu1  ;;  %v1759_v42 = vpop.f32.mrb[18].mxu0 }
 0x329   : > { %1296 = vrot.lane.b32.xlu1 %v1742_v34, %s1850_s20  ;;  %v1141_v43 = vpop.f32.mrb[19].mxu0  ;;  %v1197_v4 = vmul.f32 %v1759_v42, %v2091_v11  ;;  %v1237_v6 = vmul.f32 %v1759_v42, %v2095_v23  ;;  %v1277_v12 = vmul.f32 %v1759_v42, %v1268_v8 }
 0x32a   : > { %1294 = vrot.lane.b32.xlu0 %v975_v35, %s1850_s20  ;;  %v1196_v5 = vmul.f32 %v2089_v10, %v1141_v43  ;;  %v1236_v7 = vmul.f32 %v2098_v27, %v1141_v43  ;;  %v1276_v13 = vmul.f32 %v1264_v9, %v1141_v43 }
 0x32d   : > { %1324 = vrot.lane.b32.xlu1 %v1193_v45, %s1841_s23 }
 0x32e   : > { %1322 = vrot.lane.b32.xlu0 %v1192_v46, %s1841_s23 }
 0x331   : > { %1356 = vrot.lane.b32.xlu1 %v1233_v47, %s1851_s21 }
 0x332   : > { %1354 = vrot.lane.b32.xlu0 %v1232_v49, %s1851_s21 }
 0x335   : > { %1388 = vrot.lane.b32.xlu1 %v1273_v50, %s1843_s9 }
 0x336   : > { %1386 = vrot.lane.b32.xlu0 %v1272_v51, %s1843_s9 }
 0x339   : > { %1300 = vrot.lane.b32.xlu1 %v1745_v40, %s1850_s20 }
 0x33a   : > { %1298 = vrot.lane.b32.xlu0 %v985_v41, %s1850_s20 }
 0x33d   : > { %1328 = vrot.lane.b32.xlu1 %v1195_v54, %s1841_s23 }
 0x33e   : > { %1326 = vrot.lane.b32.xlu0 %v1194_v52, %s1841_s23 }
 0x341   : > { %1360 = vrot.lane.b32.xlu1 %v1235_v53, %s1851_s21 }
 0x342   : > { %1358 = vrot.lane.b32.xlu0 %v1234_v55, %s1851_s21 }
 0x345   : > { %1392 = vrot.lane.b32.xlu1 %v1275_v58, %s1843_s9 }
 0x346   : > { %1390 = vrot.lane.b32.xlu0 %v1274_v59, %s1843_s9 }
 0x349   : > { %1332 = vrot.lane.b32.xlu1 %v1197_v4, %s1841_s23 }
 0x34a   : > { %1330 = vrot.lane.b32.xlu0 %v1196_v5, %s1841_s23 }
 0x34d   : > { %1364 = vrot.lane.b32.xlu1 %v1237_v6, %s1851_s21 }
 0x34e   : > { %1362 = vrot.lane.b32.xlu0 %v1236_v7, %s1851_s21 }
 0x351   : > { %1396 = vrot.lane.b32.xlu1 %v1277_v12, %s1843_s9 }
 0x352   : > { %1394 = vrot.lane.b32.xlu0 %v1276_v13, %s1843_s9 }
 0x380   : > { %v1289_v10 = vpop.permute.xlu1 %1288 }
 0x381   : > { %v1287_v11 = vpop.permute.xlu0 %1286  ;;  %v1408_v21 = vsel %vm1406_vm8, %v2069_v60, %v1289_v10 }
 0x382   : > { %v1407_v22 = vsel %vm1406_vm8, %v2071_v61, %v1287_v11 }
 0x38b   : > { %v1293_v14 = vpop.permute.xlu1 %1292 }
 0x38c   : > { %v1291_v15 = vpop.permute.xlu0 %1290  ;;  %v1410_v34 = vsel %vm1406_vm8, %v2073_v62, %v1293_v14 }
 0x38d   : > { %v1409_v35 = vsel %vm1406_vm8, %v2075_v63, %v1291_v15 }
 0x38f   : > { %v1321_v16 = vpop.permute.xlu1 %1320 }
 0x390   : > { %v1319_v17 = vpop.permute.xlu0 %1318  ;;  %v1416_v23 = vsel %vm685_vm2, %v1408_v21, %v1321_v16 }
 0x391   : > { %v1415_v24 = vsel %vm685_vm2, %v1407_v22, %v1319_v17 }
 0x393   : > { %v1353_v18 = vpop.permute.xlu1 %1352 }
 0x394   : > { %v1351_v19 = vpop.permute.xlu0 %1350  ;;  %v1425_v25 = vsel %vm1423_vm9, %v1416_v23, %v1353_v18 }
 0x395   : > { %v1424_v60 = vsel %vm1423_vm9, %v1415_v24, %v1351_v19 }
 0x397   : > { %v1385_v26 = vpop.permute.xlu1 %1384 }
 0x398   : > { %v1433_v27 = vsel %vm707_vm7, %v1425_v25, %v1385_v26  ;;  %v1383_v61 = vpop.permute.xlu0 %1382 }
 0x399   : > { %1442 = vst.msk [vmem:[%s2144_s24 + $0x8] sm:$0xff] %vm1440_vm10, %v1433_v27  ;;  %v1432_v28 = vsel %vm707_vm7, %v1424_v60, %v1383_v61 }
 0x39a   : > { %1441 = vst.msk [vmem:[%s2144_s24] sm:$0xff] %vm1440_vm10, %v1432_v28 }
 0x39b   : > { %v1297_v20 = vpop.permute.xlu1 %1296 }
 0x39c   : > { %v1295_v29 = vpop.permute.xlu0 %1294  ;;  %v1412_v48 = vsel %vm1406_vm8, %v2077_v0, %v1297_v20 }
 0x39d   : > { %v1411_v49 = vsel %vm1406_vm8, %v2079_v1, %v1295_v29 }
 0x39f   : > { %v1325_v30 = vpop.permute.xlu1 %1324 }
 0x3a0   : > { %v1323_v31 = vpop.permute.xlu0 %1322  ;;  %v1418_v36 = vsel %vm685_vm2, %v1410_v34, %v1325_v30 }
 0x3a1   : > { %v1417_v37 = vsel %vm685_vm2, %v1409_v35, %v1323_v31 }
 0x3a3   : > { %v1357_v32 = vpop.permute.xlu1 %1356 }
 0x3a4   : > { %v1355_v33 = vpop.permute.xlu0 %1354  ;;  %v1427_v38 = vsel %vm1423_vm9, %v1418_v36, %v1357_v32 }
 0x3a5   : > { %v1426_v40 = vsel %vm1423_vm9, %v1417_v37, %v1355_v33 }
 0x3a7   : > { %v1389_v39 = vpop.permute.xlu1 %1388 }
 0x3a8   : > { %v1435_v41 = vsel %vm707_vm7, %v1427_v38, %v1389_v39  ;;  %v1387_v42 = vpop.permute.xlu0 %1386 }
 0x3a9   : > { %1444 = vst.msk [vmem:[%s2144_s24 + $0x18] sm:$0xff] %vm1440_vm10, %v1435_v41  ;;  %v1434_v43 = vsel %vm707_vm7, %v1426_v40, %v1387_v42 }
 0x3aa   : > { %1443 = vst.msk [vmem:[%s2144_s24 + $0x10] sm:$0xff] %vm1440_vm10, %v1434_v43 }
 0x3ab   : > { %v1301_v62 = vpop.permute.xlu1 %1300 }
 0x3ac   : > { %v1299_v63 = vpop.permute.xlu0 %1298  ;;  %v1414_v4 = vsel %vm1406_vm8, %v2081_v2, %v1301_v62 }
 0x3ad   : > { %v1413_v5 = vsel %vm1406_vm8, %v2083_v3, %v1299_v63 }
 0x3af   : > { %v1329_v44 = vpop.permute.xlu1 %1328 }
 0x3b0   : > { %v1327_v45 = vpop.permute.xlu0 %1326  ;;  %v1420_v50 = vsel %vm685_vm2, %v1412_v48, %v1329_v44 }
 0x3b1   : > { %v1419_v51 = vsel %vm685_vm2, %v1411_v49, %v1327_v45 }
 0x3b3   : > { %v1361_v46 = vpop.permute.xlu1 %1360 }
 0x3b4   : > { %v1359_v47 = vpop.permute.xlu0 %1358  ;;  %v1429_v54 = vsel %vm1423_vm9, %v1420_v50, %v1361_v46 }
 0x3b5   : > { %v1428_v53 = vsel %vm1423_vm9, %v1419_v51, %v1359_v47 }
 0x3b7   : > { %v1393_v52 = vpop.permute.xlu1 %1392 }
 0x3b8   : > { %v1437_v55 = vsel %vm707_vm7, %v1429_v54, %v1393_v52  ;;  %v1391_v56 = vpop.permute.xlu0 %1390 }
 0x3b9   : > { %1446 = vst.msk [vmem:[%s2144_s24 + $0x28] sm:$0xff] %vm1440_vm10, %v1437_v55  ;;  %v1436_v0 = vsel %vm707_vm7, %v1428_v53, %v1391_v56 }
 0x3ba   : > { %1445 = vst.msk [vmem:[%s2144_s24 + $0x20] sm:$0xff] %vm1440_vm10, %v1436_v0 }
 0x3bb   : > { %v1333_v1 = vpop.permute.xlu1 %1332 }
 0x3bc   : > { %v1331_v57 = vpop.permute.xlu0 %1330  ;;  %v1422_v6 = vsel %vm685_vm2, %v1414_v4, %v1333_v1 }
 0x3bd   : > { %v1421_v7 = vsel %vm685_vm2, %v1413_v5, %v1331_v57 }
 0x3bf   : > { %v1365_v58 = vpop.permute.xlu1 %1364 }
 0x3c0   : > { %v1363_v59 = vpop.permute.xlu0 %1362  ;;  %v1431_v8 = vsel %vm1423_vm9, %v1422_v6, %v1365_v58 }
 0x3c1   : > { %v1430_v12 = vsel %vm1423_vm9, %v1421_v7, %v1363_v59 }
 0x3c3   : > { %v1397_v9 = vpop.permute.xlu1 %1396 }
 0x3c4   : > { %v1439_v13 = vsel %vm707_vm7, %v1431_v8, %v1397_v9  ;;  %v1395_v10 = vpop.permute.xlu0 %1394 }
 0x3c5   : > { %1448 = vst.msk [vmem:[%s2144_s24 + $0x38] sm:$0xff] %vm1440_vm10, %v1439_v13  ;;  %v1438_v11 = vsel %vm707_vm7, %v1430_v12, %v1395_v10 }
 0x3c6   : > { %1447 = vst.msk [vmem:[%s2144_s24 + $0x30] sm:$0xff] %vm1440_vm10, %v1438_v11 }
 0x3c7 PF: > { %s17_s26 = sadd.s32 1, %s1839_s26   ;;  %s2216_s24 = smov %s1835_s25 }
 0x3c8   : > { %p14_p5 = scmp.ge.s32.totalorder %s17_s26, 4   ;;  %s2217_s25 = smov %s2219_s27 }
 0x3ca   :  { %16 = sbr.rel (!%p14_p5) target bundleno = 2 (0x2), region = 84 }

// kernel: se3_transformer_forward.6
= control target key start
LH: loop header
LB: loop body
LE: loop exit
PB: predicated region body
PF: predicated region fallthrough
CT: control target
= control target key end

     0   :  { %s1787_s21 = smov 0   ;;  %s1789_s22 = smov 0   ;;  %s2001_s0 = inlined_call_operand.vmem [shape: f32[2,8,4], index: 0, kind: input, shape index: {}]   ;;  %s2002_s1 = inlined_call_operand.vmem [shape: f32[2,8,8,10], index: 1, kind: input, shape index: {}]   ;;  %s2003_s2 = inlined_call_operand.vmem [shape: f32[2,8,8], index: 2, kind: input, shape index: {}]   ;;  %s2004_s3 = inlined_call_operand.vmem [shape: f32[4,2], index: 3, kind: input, shape index: {}]   ;;  %s2005_s4 = inlined_call_operand.vmem [shape: f32[2,8], index: 4, kind: input, shape index: {}]   ;;  %s2006_s5 = inlined_call_operand.vmem [shape: f32[4,8], index: 5, kind: input, shape index: {}]   ;;  %s2007_s6 = inlined_call_operand.vmem [shape: f32[6,24], index: 6, kind: input, shape index: {}]   ;;  %s2008_s7 = inlined_call_operand.vmem [shape: f32[1,8], index: 7, kind: input, shape index: {}]   ;;  %s2009_s8 = inlined_call_operand.vmem [shape: f32[1,8], index: 8, kind: input, shape index: {}]   ;;  %s2010_s9 = inlined_call_operand.vmem [shape: f32[1,24], index: 9, kind: input, shape index: {}]   ;;  %s2011_s10 = inlined_call_operand.vmem [shape: f32[1,24], index: 10, kind: input, shape index: {}]   ;;  %s2012_s11 = inlined_call_operand.vmem [shape: f32[2,8,8], index: 11, kind: output, shape index: {0}]   ;;  %s2013_s12 = inlined_call_operand.vmem [shape: f32[2,8,24], index: 12, kind: output, shape index: {1}]  }
   0x1   :  { %s1791_s23 = smov 0  }
   0x2 LB: > { %s35_s24 = sadd.s32 1, %s1708_s22  ;;  %p1564_p0 = scmp.ge.s32.totalorder %s1712_s23, 1  ;;  %s1712_s23 = sphi %s1791_s23, %s23_s23   ;;  %s1708_s22 = sphi %s1789_s22, %s2015_s22   ;;  %s1704_s21 = sphi %s1787_s21, %s2014_s21  }
   0x3   : > { %p37_p1 = scmp.ge.s32.totalorder %s35_s24, 2  ;;  %p416_p2 = scmp.lt.s32.totalorder %s1712_s23, 3 }
   0x5   : > { %s2017_s24 = smov (%p37_p1, %s35_s24), 0  ;;  %p417_p3 = pnand %p1564_p0, %p416_p2 }
   0x6   : > { %v533_v0 = vld [vmem:[%s2004_s3] sm:$0xf] (!%p417_p3)  ;;  %vm545_vm0 = vcmask (!%p417_p3), 1043456   ;;  %p485_p4 = scmp.lt.s32.totalorder (!%p417_p3), %s1704_s21, 1  ;;  %v1714_v1 = vmov (!%p417_p3), 0.0   ;;  %vm1715_vm1 = vmmov (!%p417_p3), 0   ;;  %v624_v5 = vlaneseq (!%p417_p3) }
   0x7   : > { %420 = sbr.rel (%p417_p3) target bundleno = 1648 (0x670), region = 64  ;;  %1611 = vmatprep.subr.mxu0 (!%p417_p3), %v1714_v1  ;;  %1613 = vmatprep.mubr.msk.f32.mxu0 (!%p417_p3), %vm1715_vm1, %v1714_v1  ;;  %vm541_vm2 = vcmask (!%p417_p3), 31744   ;;  %v1716_v3 = vmov (!%p417_p3), 1966171168   ;;  %vm717_vm3 = vcmask (!%p417_p3), 15360   ;;  %vm795_vm4 = vcmask (!%p417_p3), 1041409  }
   0x8   : > { %1612 = vmatpush3.msk.msra.mxu0 (!%p417_p3), %vm545_vm0, %v533_v0  ;;  %1616 = vmatprep.subr.mxu1 (!%p417_p3), %v1714_v1  ;;  %v622_v4 = vunpack.c.l.s4 (!%p417_p3), %v1716_v3  ;;  %v1828_v7 = vshrl.u32 (!%p417_p3), %v624_v5, 7  ;;  %v1887_v57 = vand.u32 (!%p417_p3), 127, %v624_v5  ;;  %vm797_vm5 = vcmask (!%p417_p3), 1042434  }
   0x9   : > { %1618 = vmatprep.mubr.msk.f32.mxu1 (!%p417_p3), %vm1715_vm1, %v1714_v1  ;;  %1626 = vmatprep.subr.mxu0 (!%p417_p3), %v1714_v1  ;;  %vm799_vm6 = vcmask (!%p417_p3), 1043459   ;;  %vm801_vm7 = vcmask (!%p417_p3), 1044484   ;;  %vm803_vm8 = vcmask (!%p417_p3), 1045509   ;;  %vm805_vm9 = vcmask (!%p417_p3), 1046534  }
   0xa   : > { %v623_v6 = vunpack.c.0.s8 (!%p417_p3), %v622_v4  ;;  %v1837_v13 = vsub.s32 (!%p417_p3), 0, %v1828_v7  ;;  %v765_v59 = vsub.s32 (!%p417_p3), %v1887_v57, %v1828_v7  ;;  %vm807_vm10 = vcmask (!%p417_p3), 1047559  }
   0xb   : > { %vm811_vm12 = vcmask (!%p417_p3), 64512   ;;  %vm1139_vm13 = vcmask (!%p417_p3), 1045504   ;;  %vm1038_vm14 = vcmask (!%p417_p3), 1041408   ;;  %vm889_vm15 = vcmask (!%p417_p3), 80912  }
   0xc   : > { %v626_v8 = vsub.s32 (!%p417_p3), %v623_v6, %v1828_v7 }
   0xe   : > { %s2019_s21 = smov (!%p485_p4, %s1704_s21), 1 }
   0xf   : > { %s1816_s27 = sshll.u32 %s2019_s21, 3  ;;  %s1596_s13 = sshll.u32 %s2019_s21, 6 }
  0x10   : > { %s491_s30 = scalar_lea.vmem %s2001_s0, %s1816_s27  ;;  %s1834_s16 = scalar_lea.vmem %s2002_s1, %s1596_s13 }
  0x11   : > { %v1822_v2 = vld [vmem:[%s491_s30] sm:$0xff]  ;;  %v1844_v23 = vld [vmem:[%s1834_s16 + $0x8] sm:$0xff]  ;;  %v1848_v25 = vld [vmem:[%s1834_s16 + $0x10] sm:$0xff]  ;;  %s508_s19 = scalar_lea.vmem %s2003_s2, %s1816_s27  ;;  %s1718_s30 = smov 126  }
  0x12   : > { %1614 = vmatmul.mubr.msk.f32.vlgmr.msra.gmra.mrb[0].mxu0 %vm541_vm2, %v1822_v2  ;;  %v1840_v17 = vld [vmem:[%s1834_s16] sm:$0xff]  ;;  %v1856_v33 = vld [vmem:[%s1834_s16 + $0x18] sm:$0xff]  ;;  %v1869_v44 = vld [vmem:[%s1834_s16 + $0x28] sm:$0xff]  ;;  %s1719_s13 = smov 124   ;;  %s515_s20 = scalar_lea.vmem %s2012_s11, %s1816_s27 }
  0x13   : > { %1628 = vmatprep.mubr.msk.f32.mxu0 %vm1715_vm1, %v1714_v1  ;;  %v1861_v37 = vld [vmem:[%s1834_s16 + $0x20] sm:$0xff]  ;;  %v1873_v46 = vld [vmem:[%s1834_s16 + $0x30] sm:$0xff]  ;;  %v1881_v52 = vld [vmem:[%s1834_s16 + $0x38] sm:$0xff] }
  0xe5   : > { %v615_v9 = vpop.f32.mrb[0].mxu0 }
  0xe6   : > { %v620_v10 = vcombine.high %v615_v9, %v615_v9  ;;  %v627_v11 = vrot.slane %v615_v9, %v626_v8  ;;  %v1615_v12 = vpop.f32.mrb[1].mxu0 }
  0xe8   : > { %v634_v14 = vrot.slane %v620_v10, %v626_v8  ;;  %v635_v15 = vcombine.high %v627_v11, %v627_v11  ;;  %v643_v16 = vrot.slane %v627_v11, %v626_v8 }
  0xea   : > { %v636_v18 = vcombine.high %v634_v14, %v634_v14  ;;  %v650_v19 = vrot.slane %v634_v14, %v626_v8  ;;  %v657_v20 = vrot.slane %v635_v15, %v626_v8  ;;  %v672_v21 = vrot.slane %v643_v16, %v1837_v13 }
  0xeb   : > { %v665_v22 = vcombine.high %v643_v16, %v643_v16 }
  0xec   : > { %v709_v24 = vmul.f32 %v672_v21, %v1840_v17  ;;  %v676_v26 = vrot.slane %v657_v20, %v1837_v13  ;;  %v667_v27 = vcombine.high %v657_v20, %v657_v20  ;;  %v688_v29 = vrot.slane %v650_v19, %v1837_v13 }
  0xed   : > { %v680_v28 = vrot.slane %v665_v22, %v1837_v13  ;;  %v664_v30 = vrot.slane %v636_v18, %v626_v8  ;;  %v666_v35 = vcombine.high %v650_v19, %v650_v19 }
  0xee   : > { %v718_v31 = vsel %vm717_vm3, %v709_v24, 0.0  ;;  %v710_v32 = vmul.f32 %v676_v26, %v1844_v23  ;;  %v684_v34 = vrot.slane %v667_v27, %v1837_v13  ;;  %v713_v43 = vmul.f32 %v688_v29, %v1861_v37 }
  0xef   : > { %719 = vadd.xlane.f32.xlu0 %v718_v31  ;;  %v711_v36 = vmul.f32 %v680_v28, %v1848_v25  ;;  %v692_v40 = vrot.slane %v664_v30, %v1837_v13  ;;  %v668_v41 = vcombine.high %v664_v30, %v664_v30  ;;  %v696_v45 = vrot.slane %v666_v35, %v1837_v13  ;;  %v532_v28 = vld [vmem:[%s508_s19] sm:$0xff] }
  0xf0   : > { %v712_v39 = vmul.f32 %v684_v34, %v1856_v33  ;;  %v721_v42 = vsel %vm717_vm3, %v710_v32, 0.0  ;;  %v730_v50 = vsel %vm717_vm3, %v713_v43, 0.0  ;;  %vm750_vm11 = vcmp.gt.f32.partialorder %v532_v28, 0.0 }
  0xf1   : > { %v724_v38 = vsel %vm717_vm3, %v711_v36, 0.0  ;;  %v714_v48 = vmul.f32 %v692_v40, %v1869_v44  ;;  %v700_v49 = vrot.slane %v668_v41, %v1837_v13  ;;  %v715_v51 = vmul.f32 %v696_v45, %v1873_v46 }
  0xf2   : > { %725 = vadd.xlane.f32.xlu1 %v724_v38  ;;  %v727_v47 = vsel %vm717_vm3, %v712_v39, 0.0  ;;  %v1573_v41 = vsel %vm750_vm11, 1.0, %v1714_v1 }
  0xf3   : > { %722 = vadd.xlane.f32.xlu0 %v721_v42  ;;  %v733_v53 = vsel %vm717_vm3, %v714_v48, 0.0  ;;  %v716_v54 = vmul.f32 %v700_v49, %v1881_v52  ;;  %v736_v55 = vsel %vm717_vm3, %v715_v51, 0.0  ;;  %v834_v49 = vsub.s32 1, %v1828_v7 }
  0xf5   : > { %v739_v56 = vsel %vm717_vm3, %v716_v54, 0.0 }
  0xf6   : > { %728 = vadd.xlane.f32.xlu1 %v727_v47 }
  0xf7   : > { %731 = vadd.xlane.f32.xlu0 %v730_v50 }
  0xfa   : > { %734 = vadd.xlane.f32.xlu1 %v733_v53 }
  0xfb   : > { %737 = vadd.xlane.f32.xlu0 %v736_v55  ;;  %v841_v55 = vsub.s32 2, %v1828_v7 }
  0xfe   : > { %740 = vadd.xlane.f32.xlu1 %v739_v56  ;;  %v855_v56 = vsub.s32 4, %v1828_v7 }
 0x17c   : > { %v720_v58 = vpop.xlane.xlu0 %719 }
 0x17d   : > { %v742_v60 = vmul.f32 0.70710677, %v720_v58 }
 0x17f   : > { %v726_v61 = vpop.xlane.xlu1 %725  ;;  %v766_v3 = vrot.slane %v742_v60, %v765_v59  ;;  %v848_v60 = vsub.s32 3, %v1828_v7 }
 0x180   : > { %v744_v62 = vmul.f32 0.70710677, %v726_v61  ;;  %v723_v63 = vpop.xlane.xlu0 %722  ;;  %v869_v61 = vsub.s32 6, %v1828_v7 }
 0x181   : > { %v743_v0 = vmul.f32 0.70710677, %v723_v63 }
 0x182   : > { %v774_v8 = vrot.slane %v744_v62, %v765_v59 }
 0x183   : > { %v770_v4 = vrot.slane %v743_v0, %v765_v59  ;;  %v729_v6 = vpop.xlane.xlu1 %728  ;;  %v862_v0 = vsub.s32 5, %v1828_v7 }
 0x184   : > { %v745_v9 = vmul.f32 0.70710677, %v729_v6  ;;  %v732_v10 = vpop.xlane.xlu0 %731  ;;  %v535_v6 = vld [vmem:[%s2006_s5] sm:$0xf] }
 0x185   : > { %v796_v5 = vsel %vm795_vm4, %v770_v4, %v766_v3  ;;  %v746_v11 = vmul.f32 0.70710677, %v732_v10  ;;  %v876_v3 = vsub.s32 7, %v1828_v7  ;;  %1617 = vmatpush3.msk.msra.mxu1 %vm545_vm0, %v535_v6 }
 0x186   : > { %v798_v12 = vsel %vm797_vm5, %v774_v8, %v796_v5  ;;  %v778_v14 = vrot.slane %v745_v9, %v765_v59  ;;  %v536_v8 = vld [vmem:[%s2007_s6] sm:$0x3f]  ;;  %1619 = vmatmul.mubr.msk.f32.vlgmr.msra.gmra.mrb[0].mxu1 %vm541_vm2, %v1822_v2  ;;  %1621 = vmatprep.subr.mxu1 %v1714_v1 }
 0x187   : > { %v782_v15 = vrot.slane %v746_v11, %v765_v59  ;;  %v735_v16 = vpop.xlane.xlu1 %734  ;;  %1627 = vmatpush3.msk.msra.mxu0 %vm1139_vm13, %v536_v8  ;;  %v534_v9 = vld [vmem:[%s2005_s4] sm:$0x3]  ;;  %1623 = vmatprep.mubr.msk.f32.mxu1 %vm1715_vm1, %v1714_v1 }
 0x188   : > { %v800_v18 = vsel %vm799_vm6, %v778_v14, %v798_v12  ;;  %v747_v19 = vmul.f32 0.70710677, %v735_v16  ;;  %v738_v20 = vpop.xlane.xlu0 %737  ;;  %1622 = vmatpush3.msk.msra.mxu1 %vm1038_vm14, %v534_v9 }
 0x189   : > { %v802_v21 = vsel %vm801_vm7, %v782_v15, %v800_v18  ;;  %v748_v22 = vmul.f32 0.70710677, %v738_v20  ;;  %1640 = vmatprep.subr.mxu1 %v1714_v1 }
 0x18a   : > { %v786_v24 = vrot.slane %v747_v19, %v765_v59 }
 0x18b   : > { %v790_v26 = vrot.slane %v748_v22, %v765_v59  ;;  %v741_v27 = vpop.xlane.xlu1 %740 }
 0x18c   : > { %v749_v29 = vmul.f32 0.70710677, %v741_v27  ;;  %v804_v30 = vsel %vm803_vm8, %v786_v24, %v802_v21 }
 0x18d   : > { %v806_v31 = vsel %vm805_vm9, %v790_v26, %v804_v30 }
 0x18e   : > { %v794_v32 = vrot.slane %v749_v29, %v765_v59 }
 0x190   : > { %v808_v34 = vsel %vm807_vm10, %v794_v32, %v806_v31 }
 0x191   : > { %v810_v35 = vsel %vm750_vm11, %v808_v34, -1e+30 }
 0x192   : > { %v812_v36 = vsel %vm811_vm12, %v810_v35, -inf }
 0x193   : > { %813 = vmax.xlane.f32.xlu0 %v812_v36 }
 0x220   : > { %v814_v38 = vpop.xlane.xlu0 %813 }
 0x221   : > { %v815_v39 = vsub.f32 %v810_v35, %v814_v38 }
 0x223   : > { %v816_v40 = vmul.f32 1.442695, %v815_v39 }
 0x225   : > { %1682 = vpow2.f32 %v816_v40 }
 0x22f   : > { %v1683_v42 = vpop.eup %1682 }
 0x230   : > { %v818_v43 = vmul.f32 %v1683_v42, %v1573_v41 }
 0x232   : > { %v819_v45 = vsel %vm811_vm12, %v818_v43, 0.0 }
 0x233   : > { %820 = vadd.xlane.f32.xlu1 %v819_v45 }
 0x2c0   : > { %v821_v47 = vpop.xlane.xlu1 %820 }
 0x2c1   : > { %v822_v48 = vadd.f32 1e-20, %v821_v47 }
 0x2c3   : > { %1684 = vrcp.f32 %v822_v48 }
 0x2cd   : > { %v1685_v50 = vpop.eup %1684 }
 0x2ce   : > { %v824_v51 = vmul.f32 %v1685_v50, %v818_v43 }
 0x2d0   : > { %v835_v53 = vrot.slane %v824_v51, %v834_v49  ;;  %v828_v54 = vrot.slane %v824_v51, %v1837_v13  ;;  %v842_v58 = vrot.slane %v824_v51, %v841_v55  ;;  %v856_v59 = vrot.slane %v824_v51, %v855_v56 }
 0x2d1   : > { %v849_v62 = vrot.slane %v824_v51, %v848_v60  ;;  %v870_v63 = vrot.slane %v824_v51, %v869_v61  ;;  %v863_v13 = vrot.slane %v824_v51, %v862_v0  ;;  %v877_v4 = vrot.slane %v824_v51, %v876_v3 }
 0x2d2   : > { %837 = vbcast.lane.b32.xlu1 %v835_v53, 256  ;;  %830 = vbcast.lane.b32.xlu0 %v828_v54, 256 }
 0x2d6   : > { %844 = vbcast.lane.b32.xlu1 %v842_v58, 256  ;;  %858 = vbcast.lane.b32.xlu0 %v856_v59, 256 }
 0x2da   : > { %851 = vbcast.lane.b32.xlu1 %v849_v62, 256  ;;  %872 = vbcast.lane.b32.xlu0 %v870_v63, 256 }
 0x2de   : > { %865 = vbcast.lane.b32.xlu1 %v863_v13, 256 }
 0x2e2   : > { %879 = vbcast.lane.b32.xlu1 %v877_v4, 256 }
 0x344   : > { %v838_v10 = vpop.permute.xlu1 %837  ;;  %v831_v5 = vpop.permute.xlu0 %830 }
 0x345   : > { %v882_v11 = vmul.f32 %v838_v10, %v1844_v23  ;;  %v881_v12 = vmul.f32 %v831_v5, %v1840_v17 }
 0x347   : > { %v897_v14 = vsel %vm889_vm15, %v882_v11, 0.0  ;;  %v890_v15 = vsel %vm889_vm15, %v881_v12, 0.0  ;;  %v1717_v11 = vmov 0.0|0.0  }
 0x348   : > { %v898_v2 = vrot.slane %v897_v14, 4  ;;  %v891_v16 = vrot.slane %v890_v15, 4  ;;  %v845_v18 = vpop.permute.xlu1 %844  ;;  %v859_v19 = vpop.permute.xlu0 %858  ;;  %1645 = vmatprep.subr.bf16.mxu0 %v1717_v11 }
 0x349   : > { %v883_v20 = vmul.f32 %v845_v18, %v1848_v25  ;;  %v885_v21 = vmul.f32 %v859_v19, %v1861_v37 }
 0x34a   : > { %v899_v22 = vadd.f32 %v898_v2, %v897_v14  ;;  %v892_v24 = vadd.f32 %v891_v16, %v890_v15 }
 0x34b   : > { %v904_v26 = vsel %vm889_vm15, %v883_v20, 0.0  ;;  %v918_v23 = vsel %vm889_vm15, %v885_v21, 0.0 }
 0x34c   : > { %v900_v27 = vrot.slane %v899_v22, 2  ;;  %v893_v17 = vrot.slane %v892_v24, 2  ;;  %v905_v28 = vrot.slane %v904_v26, 4  ;;  %v919_v29 = vrot.slane %v918_v23, 4  ;;  %v852_v30 = vpop.permute.xlu1 %851  ;;  %v873_v31 = vpop.permute.xlu0 %872 }
 0x34d   : > { %v884_v32 = vmul.f32 %v852_v30, %v1856_v33  ;;  %v887_v34 = vmul.f32 %v873_v31, %v1873_v46  ;;  %v1217_v30 = vmul.u32 3, %v1887_v57 }
 0x34e   : > { %v901_v35 = vadd.f32 %v900_v27, %v899_v22  ;;  %v906_v25 = vadd.f32 %v905_v28, %v904_v26  ;;  %v920_v36 = vadd.f32 %v919_v29, %v918_v23  ;;  %v894_v37 = vadd.f32 %v893_v17, %v892_v24 }
 0x34f   : > { %v911_v38 = vsel %vm889_vm15, %v884_v32, 0.0  ;;  %v932_v39 = vsel %vm889_vm15, %v887_v34, 0.0  ;;  %v1221_v29 = vadd.s32 1, %v1887_v57  ;;  %v1215_v32 = vadd.s32 8, %v1828_v7 }
 0x350   : > { %v907_v40 = vrot.slane %v906_v25, 2  ;;  %v866_v41 = vpop.permute.xlu1 %865  ;;  %v921_v42 = vrot.slane %v920_v36, 2  ;;  %v912_v43 = vrot.slane %v911_v38, 4  ;;  %v933_v45 = vrot.slane %v932_v39, 4 }
 0x351   : > { %v886_v47 = vmul.f32 %v866_v41, %v1869_v44  ;;  %v902_v48 = vrot.slane %v901_v35, 1  ;;  %v895_v33 = vrot.slane %v894_v37, 1  ;;  %v1222_v31 = vmul.u32 3, %v1221_v29 }
 0x352   : > { %v908_v49 = vadd.f32 %v907_v40, %v906_v25  ;;  %v913_v50 = vadd.f32 %v912_v43, %v911_v38  ;;  %v934_v46 = vadd.f32 %v933_v45, %v932_v39  ;;  %v922_v56 = vadd.f32 %v921_v42, %v920_v36 }
 0x353   : > { %v925_v51 = vsel %vm889_vm15, %v886_v47, 0.0  ;;  %v903_v62 = vadd.f32 %v902_v48, %v901_v35  ;;  %v896_v63 = vadd.f32 %v895_v33, %v894_v37  ;;  %vm1218_vm0 = vcmp.ge.s32.totalorder %v1828_v7, %v1217_v30  ;;  %v1579_v33 = vld [vmem:[%s2009_s8] ss:$0 sm:$0xff] }
 0x354   : > { %v909_v53 = vrot.slane %v908_v49, 1  ;;  %v926_v54 = vrot.slane %v925_v51, 4  ;;  %v880_v55 = vpop.permute.xlu1 %879  ;;  %v914_v58 = vrot.slane %v913_v50, 2  ;;  %v935_v59 = vrot.slane %v934_v46, 2 }
 0x355   : > { %v888_v60 = vmul.f32 %v880_v55, %v1881_v52  ;;  %v923_v6 = vrot.slane %v922_v56, 1  ;;  %v1027_v12 = vsel %vm795_vm4, %v903_v62, %v896_v63  ;;  %vm1223_vm2 = vcmp.lt.s32.totalorder %v1828_v7, %v1222_v31  ;;  %v1592_v62 = vld [vmem:[%s2010_s9] ss:$0 sm:$0xff] }
 0x356   : > { %v927_v61 = vadd.f32 %v926_v54, %v925_v51  ;;  %v915_v0 = vadd.f32 %v914_v58, %v913_v50  ;;  %v910_v13 = vadd.f32 %v909_v53, %v908_v49  ;;  %v936_v9 = vadd.f32 %v935_v59, %v934_v46  ;;  %v1578_v49 = vld [vmem:[%s2008_s7] ss:$0 sm:$0xff] }
 0x357   : > { %v939_v44 = vsel %vm889_vm15, %v888_v60, 0.0  ;;  %v924_v16 = vadd.f32 %v923_v6, %v922_v56  ;;  %vm1219_vm4 = vcmp.ge.s32.totalorder %v1215_v32, %v1217_v30  ;;  %v1720_v25 = vmov 1.0|1.0  }
 0x358   : > { %v928_v3 = vrot.slane %v927_v61, 2  ;;  %v940_v4 = vrot.slane %v939_v44, 4  ;;  %v916_v8 = vrot.slane %v915_v0, 1  ;;  %v1028_v52 = vsel %vm797_vm5, %v910_v13, %v1027_v12 }
 0x359   : > { %v937_v18 = vrot.slane %v936_v9, 1  ;;  %vm1224_vm5 = vcmp.lt.s32.totalorder %v1215_v32, %v1222_v31  ;;  %v1216_v36 = vadd.s32 16, %v1828_v7  ;;  %v1721_v37 = vmov 1.0  }
 0x35a   : > { %v929_v10 = vadd.f32 %v928_v3, %v927_v61  ;;  %v941_v5 = vadd.f32 %v940_v4, %v939_v44  ;;  %v917_v14 = vadd.f32 %v916_v8, %v915_v0  ;;  %v1235_v38 = vmul.u32 3, %v1828_v7  ;;  %v1593_v0 = vld [vmem:[%s2011_s10] ss:$0 sm:$0xff] }
 0x35b   : > { %v938_v23 = vadd.f32 %v937_v18, %v936_v9  ;;  %vm1225_vm11 = vcmp.lt.s32.totalorder %v1216_v36, %v1222_v31  ;;  %v1237_v39 = vadd.s32 1, %v1828_v7 }
 0x35c   : > { %v930_v15 = vrot.slane %v929_v10, 1  ;;  %v942_v2 = vrot.slane %v941_v5, 2  ;;  %v1029_v19 = vsel %vm799_vm6, %v917_v14, %v1028_v52  ;;  %vm1226_vm6 = vmand %vm1218_vm0, %vm1223_vm2 }
 0x35d   : > { %v1030_v22 = vsel %vm801_vm7, %v924_v16, %v1029_v19  ;;  %vm1227_vm7 = vmand %vm1219_vm4, %vm1224_vm5  ;;  %v1238_v40 = vmul.u32 3, %v1237_v39 }
 0x35e   : > { %v931_v20 = vadd.f32 %v930_v15, %v929_v10  ;;  %v943_v21 = vadd.f32 %v942_v2, %v941_v5 }
 0x35f   : > { %vm1239_vm14 = vcmp.lt.s32.totalorder %v1887_v57, %v1238_v40 }
 0x360   : > { %v944_v24 = vrot.slane %v943_v21, 1  ;;  %v1031_v26 = vsel %vm803_vm8, %v931_v20, %v1030_v22  ;;  %vm1136_vm8 = vcmask 48128  }
 0x361   : > { %v1032_v17 = vsel %vm805_vm9, %v938_v23, %v1031_v26  ;;  %vm1646_vm9 = vmpackc.low %vm1227_vm7, %vm1226_vm6 }
 0x362   : > { %v945_v27 = vadd.f32 %v944_v24, %v943_v21 }
 0x364   : > { %v1033_v28 = vsel %vm807_vm10, %v945_v27, %v1032_v17  ;;  %vm1220_vm10 = vcmp.ge.s32.totalorder %v1216_v36, %v1217_v30 }
 0x365   : > { %1034 = vrot.lane.b32.xlu1 %v1033_v28, %s1718_s30  ;;  %1134 = vrot.lane.b32.xlu0 %v1033_v28, %s1719_s13  ;;  %vm1228_vm13 = vmand %vm1220_vm10, %vm1225_vm11  ;;  %s522_s13 = scalar_lea.vmem %s2013_s12, %s1816_s27 }
 0x3d7   : > { %v1035_v34 = vpop.permute.xlu1 %1034  ;;  %v1135_v35 = vpop.permute.xlu0 %1134 }
 0x3d8   : > { %1624 = vmatmul.mubr.msk.f32.vlgmr.msra.gmra.mrb[0].mxu1 %vm717_vm3, %v1035_v34  ;;  %1629 = vmatmul.mubr.msk.f32.vlgmr.msra.gmra.mrb[2].mxu0 %vm1136_vm8, %v1135_v35  ;;  %vm1236_vm3 = vcmp.ge.s32.totalorder %v1887_v57, %v1235_v38 }
 0x3d9   : > { %1647 = vmatpush3.bf16.msk.msra.mxu0 %vm1646_vm9, %v1720_v25  ;;  %1637 = vmatprep.mubr.msk.f32.mxu0 %vm1715_vm1, %v1714_v1  ;;  %vm1240_vm15 = vmand %vm1236_vm3, %vm1239_vm14 }
 0x3da   : > { %1635 = vmatprep.subr.mxu0 %v1714_v1  ;;  %1642 = vmatprep.mubr.msk.f32.mxu1 %vm1715_vm1, %v1714_v1  ;;  %vm1244_vm1 = vcmask 195584  }
 0x3db   : > { %1641 = vmatpush3.msk.msra.mxu1 %vm1240_vm15, %v1721_v37 }
 0x3dd   : > { %1636 = vmatpush3.msk.msra.mxu0 %vm1228_vm13, %v1721_v37 }
 0x4ab   : > { %v1108_v41 = vpop.f32.mrb[0].mxu1  ;;  %v1209_v1 = vpop.f32.mrb[2].mxu0 }
 0x4ac   : > { %v1112_v42 = vmul.f32 %v1108_v41, %v1108_v41  ;;  %v1243_v43 = vmul.f32 %v1209_v1, %v1209_v1  ;;  %v1625_v45 = vpop.f32.mrb[1].mxu1  ;;  %v1630_v47 = vpop.f32.mrb[3].mxu0 }
 0x4ae   : > { %v1113_v48 = vadd.f32 1e-12, %v1112_v42  ;;  %1638 = vmatmul.mubr.msk.f32.vlgmr.msra.gmra.mrb[4].mxu0 %vm1244_vm1, %v1243_v43 }
 0x4b0   : > { %1686 = vrsqrt.f32 %v1113_v48 }
 0x4ba   : > { %v1687_v7 = vpop.eup %1686 }
 0x4bb   : > { %v1115_v57 = vmul.f32 %v1687_v7, %v1112_v42 }
 0x4bd   : > { %v1122_v50 = vmul.f32 %v1578_v49, %v1115_v57 }
 0x4bf   : > { %v1129_v46 = vadd.f32 %v1579_v33, %v1122_v50 }
 0x4c1   : > { %v1130_v51 = vmax.f32 %v1129_v46, 0.0 }
 0x4c3   : > { %v1131_v53 = vmul.f32 %v1130_v51, %v1108_v41 }
 0x4c5   : > { %v1132_v54 = vmul.f32 %v1687_v7, %v1131_v53 }
 0x4c7   : > { %1133 = vst.msk [vmem:[%s515_s20] sm:$0xff] %vm811_vm12, %v1132_v54 }
 0x581   : > { %v1314_v55 = vpop.f32.mrb[4].mxu0 }
 0x582   : > { %v1639_v56 = vpop.f32.mrb[5].mxu0  ;;  %1643 = vmatmul.mubr.msk.f32.vlgmr.msra.gmra.mrb[2].mxu1 %vm811_vm12, %v1314_v55 }
 0x655   : > { %v1387_v58 = vpop.f32.mrb[2].mxu1 }
 0x656   : > { %v1391_v59 = vadd.f32 1e-12, %v1387_v58  ;;  %v1644_v60 = vpop.f32.mrb[3].mxu1 }
 0x658   : > { %1688 = vrsqrt.f32 %v1391_v59 }
 0x662   : > { %v1689_v61 = vpop.eup %1688 }
 0x663   : > { %v1393_v63 = vmul.f32 %v1689_v61, %v1387_v58 }
 0x665   : > { %v1400_v44 = vmul.f32 %v1592_v62, %v1393_v63 }
 0x667   : > { %v1407_v13 = vadd.f32 %v1593_v0, %v1400_v44 }
 0x669   : > { %v1408_v3 = vmax.f32 %v1407_v13, 0.0 }
 0x66b   : > { %v1409_v4 = vmul.f32 %v1408_v3, %v1209_v1 }
 0x66d   : > { %v1410_v6 = vmul.f32 %v1689_v61, %v1409_v4 }
 0x66f   : > { %1411 = vst.msk [vmem:[%s522_s13] sm:$0xff] %vm1244_vm1, %v1410_v6 }
 0x670 PF: > { %s23_s23 = sadd.s32 1, %s1712_s23   ;;  %s2014_s21 = smov %s1708_s22 }
 0x671   : > { %p20_p5 = scmp.ge.s32.totalorder %s23_s23, 4   ;;  %s2015_s22 = smov %s2017_s24 }
 0x673   :  { %22 = sbr.rel (!%p20_p5) target bundleno = 2 (0x2), region = 112 }

// kernel: se3_transformer_forward.8
= control target key start
LH: loop header
LB: loop body
LE: loop exit
PB: predicated region body
PF: predicated region fallthrough
CT: control target
= control target key end

     0   :  { %s2110_s18 = smov 0   ;;  %s2112_s19 = smov 0   ;;  %s2366_s0 = inlined_call_operand.vmem [shape: f32[2,8,8], index: 0, kind: input, shape index: {}]   ;;  %s2367_s1 = inlined_call_operand.vmem [shape: f32[2,8,24], index: 1, kind: input, shape index: {}]   ;;  %s2368_s2 = inlined_call_operand.vmem [shape: f32[2,8,8,16], index: 2, kind: input, shape index: {}]   ;;  %s2369_s3 = inlined_call_operand.vmem [shape: f32[2,8,8], index: 3, kind: input, shape index: {}]   ;;  %s2370_s4 = inlined_call_operand.vmem [shape: f32[8,2], index: 4, kind: input, shape index: {}]   ;;  %s2371_s5 = inlined_call_operand.vmem [shape: f32[24,6], index: 5, kind: input, shape index: {}]   ;;  %s2372_s6 = inlined_call_operand.vmem [shape: f32[2,8], index: 6, kind: input, shape index: {}]   ;;  %s2373_s7 = inlined_call_operand.vmem [shape: f32[8,8], index: 7, kind: input, shape index: {}]   ;;  %s2374_s8 = inlined_call_operand.vmem [shape: f32[6,24], index: 8, kind: input, shape index: {}]   ;;  %s2375_s9 = inlined_call_operand.vmem [shape: f32[24,24], index: 9, kind: input, shape index: {}]   ;;  %s2376_s10 = inlined_call_operand.vmem [shape: f32[1,8], index: 10, kind: input, shape index: {}]   ;;  %s2377_s11 = inlined_call_operand.vmem [shape: f32[1,8], index: 11, kind: input, shape index: {}]   ;;  %s2378_s12 = inlined_call_operand.vmem [shape: f32[1,24], index: 12, kind: input, shape index: {}]   ;;  %s2379_s13 = inlined_call_operand.vmem [shape: f32[1,24], index: 13, kind: input, shape index: {}]   ;;  %s2380_s14 = inlined_call_operand.vmem [shape: f32[2,8,8], index: 14, kind: output, shape index: {0}]   ;;  %s2381_s15 = inlined_call_operand.vmem [shape: f32[2,8,24], index: 15, kind: output, shape index: {1}]  }
   0x1   :  { %s2114_s20 = smov 0  }
   0x2 LB: > { %s38_s21 = sadd.s32 1, %s2015_s19  ;;  %p1835_p0 = scmp.ge.s32.totalorder %s2019_s20, 1  ;;  %s2019_s20 = sphi %s2114_s20, %s26_s20   ;;  %s2015_s19 = sphi %s2112_s19, %s2383_s19   ;;  %s2011_s18 = sphi %s2110_s18, %s2382_s18  }
   0x3   : > { %p40_p1 = scmp.ge.s32.totalorder %s38_s21, 2  ;;  %p505_p2 = scmp.lt.s32.totalorder %s2019_s20, 3 }
   0x5   : > { %s2385_s21 = smov (%p40_p1, %s38_s21), 0  ;;  %p506_p3 = pnand %p1835_p0, %p505_p2 }
   0x6   : > { %v643_v0 = vld [vmem:[%s2370_s4] sm:$0xff] (!%p506_p3)  ;;  %p587_p4 = scmp.lt.s32.totalorder (!%p506_p3), %s2011_s18, 1  ;;  %v2021_v1 = vmov (!%p506_p3), 0.0   ;;  %vm2022_vm0 = vmmov (!%p506_p3), 0   ;;  %v645_v3 = vld [vmem:[%s2371_s5 + $0x8] sm:$0xff] (!%p506_p3)  ;;  %v2023_v4 = vmov (!%p506_p3), 0.0|0.0   ;;  %v816_v15 = vlaneseq (!%p506_p3) }
   0x7   : > { %509 = sbr.rel (%p506_p3) target bundleno = 1778 (0x6f2), region = 76  ;;  %1891 = vmatprep.subr.mxu1 (!%p506_p3), %v2021_v1  ;;  %1893 = vmatprep.mubr.msk.f32.mxu1 (!%p506_p3), %vm2022_vm0, %v2021_v1  ;;  %v644_v2 = vld [vmem:[%s2371_s5] sm:$0xff] (!%p506_p3)  ;;  %vm657_vm1 = vcmask (!%p506_p3), 64512   ;;  %v646_v7 = vld [vmem:[%s2371_s5 + $0x10] sm:$0xff] (!%p506_p3)  ;;  %vm731_vm2 = vcmask (!%p506_p3), 195584   ;;  %s2024_s26 = smov (!%p506_p3), 2  }
   0x8   : > { %1892 = vmatpush3.msra.mxu1 (!%p506_p3), %v643_v0  ;;  %1905 = vmatprep.subr.mxu0 (!%p506_p3), %v2021_v1  ;;  %v1944_v5 = vpack.c.bf16 (!%p506_p3), %v645_v3, %v644_v2  ;;  %v2025_v13 = vmov (!%p506_p3), 1966171168   ;;  %v2175_v17 = vshrl.u32 (!%p506_p3), %v816_v15, 7  ;;  %vm809_vm3 = vcmask (!%p506_p3), 15360   ;;  %s2026_s24 = smov (!%p506_p3), 120   ;;  %s2027_s25 = smov (!%p506_p3), 118  }
   0x9   : > { %1943 = vmatprep.subr.bf16.mxu1 (!%p506_p3), %v2023_v4  ;;  %1907 = vmatprep.mubr.msk.f32.mxu0 (!%p506_p3), %vm2022_vm0, %v2021_v1  ;;  %v814_v14 = vunpack.c.l.s4 (!%p506_p3), %v2025_v13  ;;  %vm986_vm4 = vcmask (!%p506_p3), 1041409   ;;  %vm988_vm5 = vcmask (!%p506_p3), 1042434   ;;  %vm990_vm6 = vcmask (!%p506_p3), 1043459  }
   0xa   : > { %v2186_v23 = vsub.s32 (!%p506_p3), 0, %v2175_v17  ;;  %vm992_vm7 = vcmask (!%p506_p3), 1044484   ;;  %vm994_vm8 = vcmask (!%p506_p3), 1045509   ;;  %vm996_vm9 = vcmask (!%p506_p3), 1046534  }
   0xb   : > { %v815_v16 = vunpack.c.0.s8 (!%p506_p3), %v814_v14  ;;  %vm998_vm10 = vcmask (!%p506_p3), 1047559   ;;  %vm1225_vm12 = vcmask (!%p506_p3), 1041408   ;;  %vm1396_vm13 = vcmask (!%p506_p3), 1045504  }
   0xc   : > { %vm1079_vm14 = vcmask (!%p506_p3), 130112  }
   0xd   : > { %v818_v18 = vsub.s32 (!%p506_p3), %v815_v16, %v2175_v17 }
   0xe   : > { %s2387_s18 = smov (!%p587_p4, %s2011_s18), 1 }
   0xf   : > { %s2147_s28 = sshll.u32 %s2387_s18, 3  ;;  %s1868_s27 = sshll.u32 %s2387_s18, 6 }
  0x10   : > { %s593_s16 = scalar_lea.vmem %s2366_s0, %s2147_s28  ;;  %s600_s23 = scalar_lea.vmem %s2367_s1, %s2147_s28 }
  0x11   : > { %v2153_v6 = vld [vmem:[%s593_s16] sm:$0xff]  ;;  %s2183_s16 = scalar_lea.vmem %s2368_s2, %s1868_s27  ;;  %s617_s22 = scalar_lea.vmem %s2369_s3, %s2147_s28 }
  0x12   : > { %1894 = vmatmul.mubr.msk.f32.vlgmr.msra.gmra.mrb[0].mxu1 %vm657_vm1, %v2153_v6  ;;  %v2167_v8 = vld [vmem:[%s600_s23] sm:$0xff]  ;;  %v2193_v31 = vld [vmem:[%s2183_s16 + $0x8] sm:$0xff]  ;;  %v2199_v36 = vld [vmem:[%s2183_s16 + $0x10] sm:$0xff]  ;;  %s624_s17 = scalar_lea.vmem %s2380_s14, %s2147_s28  ;;  %s631_s29 = scalar_lea.vmem %s2381_s15, %s2147_s28 }
  0x13   : > { %1945 = vmatpush3.bf16.msra.mxu1 %v1944_v5  ;;  %1902 = vmatprep.mubr.msk.f32.mxu1 %vm2022_vm0, %v2021_v1  ;;  %v2189_v27 = vld [vmem:[%s2183_s16] sm:$0xff]  ;;  %v2213_v49 = vld [vmem:[%s2183_s16 + $0x18] sm:$0xff]  ;;  %v2219_v54 = vld [vmem:[%s2183_s16 + $0x28] sm:$0xff] }
  0x14   : > { %1900 = vmatprep.subr.mxu1 %v2021_v1  ;;  %v2207_v44 = vld [vmem:[%s2183_s16 + $0x20] sm:$0xff]  ;;  %v2225_v59 = vld [vmem:[%s2183_s16 + $0x30] sm:$0xff]  ;;  %v2231_v63 = vld [vmem:[%s2183_s16 + $0x38] sm:$0xff] }
  0x17   : > { %1901 = vmatpush3.msra.mxu1 %v646_v7 }
  0x18   : > { %1903 = vmatmul.mubr.msk.f32.vlgmr.msra.gmra.mrb[2].mxu1 %vm731_vm2, %v2167_v8  ;;  %1946 = vmatprep.subr.bf16.mxu1 %v2023_v4 }
  0x19   : > { %1921 = vmatprep.mubr.msk.f32.mxu1 %vm2022_vm0, %v2021_v1 }
  0xe5   : > { %v727_v9 = vpop.f32.mrb[0].mxu1 }
  0xe6   : > { %v1895_v10 = vpop.f32.mrb[1].mxu1 }
  0xe7   : > { %v2237_v10 = vand.u32 127, %v816_v15 }
  0xe9   : > { %v956_v16 = vsub.s32 %v2237_v10, %v2175_v17 }
  0xeb   : > { %v801_v11 = vpop.f32.mrb[2].mxu1 }
  0xec   : > { %806 = vrot.lane.b32.xlu0 %v801_v11, %s2024_s26  ;;  %v1904_v12 = vpop.f32.mrb[3].mxu1 }
 0x15e   : > { %v807_v19 = vpop.permute.xlu0 %806 }
 0x15f   : > { %v810_v20 = vsel %vm809_vm3, %v727_v9, %v807_v19 }
 0x160   : > { %v812_v21 = vcombine.high %v810_v20, %v810_v20  ;;  %v819_v22 = vrot.slane %v810_v20, %v818_v18 }
 0x162   : > { %v826_v24 = vrot.slane %v812_v21, %v818_v18  ;;  %v827_v25 = vcombine.high %v819_v22, %v819_v22  ;;  %v835_v26 = vrot.slane %v819_v22, %v818_v18 }
 0x164   : > { %v864_v28 = vrot.slane %v835_v26, %v2186_v23  ;;  %v849_v29 = vrot.slane %v827_v25, %v818_v18  ;;  %v857_v30 = vcombine.high %v835_v26, %v835_v26  ;;  %v842_v35 = vrot.slane %v826_v24, %v818_v18 }
 0x165   : > { %v828_v39 = vcombine.high %v826_v24, %v826_v24 }
 0x166   : > { %v901_v32 = vmul.f32 %v864_v28, %v2189_v27  ;;  %v868_v33 = vrot.slane %v849_v29, %v2186_v23  ;;  %v872_v34 = vrot.slane %v857_v30, %v2186_v23  ;;  %v880_v42 = vrot.slane %v842_v35, %v2186_v23 }
 0x167   : > { %v859_v43 = vcombine.high %v849_v29, %v849_v29  ;;  %v856_v48 = vrot.slane %v828_v39, %v818_v18  ;;  %v858_v53 = vcombine.high %v842_v35, %v842_v35  ;;  %v642_v39 = vld [vmem:[%s617_s22] sm:$0xff] }
 0x168   : > { %v909_v37 = vsel %vm657_vm1, %v901_v32, 0.0  ;;  %v902_v38 = vmul.f32 %v868_v33, %v2193_v31  ;;  %v903_v41 = vmul.f32 %v872_v34, %v2199_v36  ;;  %v905_v46 = vmul.f32 %v880_v42, %v2207_v44 }
 0x169   : > { %910 = vadd.xlane.f32.xlu0 %v909_v37  ;;  %v876_v47 = vrot.slane %v859_v43, %v2186_v23  ;;  %v884_v52 = vrot.slane %v856_v48, %v2186_v23  ;;  %v888_v57 = vrot.slane %v858_v53, %v2186_v23  ;;  %v860_v58 = vcombine.high %v856_v48, %v856_v48 }
 0x16a   : > { %v912_v40 = vsel %vm657_vm1, %v902_v38, 0.0  ;;  %v915_v45 = vsel %vm657_vm1, %v903_v41, 0.0  ;;  %v921_v50 = vsel %vm657_vm1, %v905_v46, 0.0  ;;  %vm941_vm11 = vcmp.gt.f32.partialorder %v642_v39, 0.0 }
 0x16b   : > { %913 = vadd.xlane.f32.xlu1 %v912_v40  ;;  %v904_v51 = vmul.f32 %v876_v47, %v2213_v49  ;;  %v906_v56 = vmul.f32 %v884_v52, %v2219_v54  ;;  %v907_v61 = vmul.f32 %v888_v57, %v2225_v59  ;;  %v892_v62 = vrot.slane %v860_v58, %v2186_v23 }
 0x16c   : > { %v1845_v53 = vsel %vm941_vm11, 1.0, %v2021_v1 }
 0x16d   : > { %v918_v55 = vsel %vm657_vm1, %v904_v51, 0.0  ;;  %v924_v60 = vsel %vm657_vm1, %v906_v56, 0.0  ;;  %v927_v0 = vsel %vm657_vm1, %v907_v61, 0.0  ;;  %v908_v2 = vmul.f32 %v892_v62, %v2231_v63 }
 0x16e   : > { %v1024_v61 = vsub.s32 1, %v2175_v17 }
 0x16f   : > { %916 = vadd.xlane.f32.xlu1 %v915_v45  ;;  %v930_v3 = vsel %vm657_vm1, %v908_v2, 0.0 }
 0x173   : > { %922 = vadd.xlane.f32.xlu1 %v921_v50 }
 0x177   : > { %919 = vadd.xlane.f32.xlu1 %v918_v55 }
 0x17b   : > { %925 = vadd.xlane.f32.xlu1 %v924_v60 }
 0x17f   : > { %928 = vadd.xlane.f32.xlu1 %v927_v0 }
 0x183   : > { %931 = vadd.xlane.f32.xlu1 %v930_v3 }
 0x1f6   : > { %v911_v11 = vpop.xlane.xlu0 %910 }
 0x1f7   : > { %v933_v18 = vmul.f32 0.35355338, %v911_v11 }
 0x1f8   : > { %v914_v5 = vpop.xlane.xlu1 %913 }
 0x1f9   : > { %v934_v13 = vmul.f32 0.35355338, %v914_v5  ;;  %v957_v24 = vrot.slane %v933_v18, %v956_v16  ;;  %v1031_v5 = vsub.s32 2, %v2175_v17  ;;  %v1059_v18 = vsub.s32 6, %v2175_v17 }
 0x1fb   : > { %v961_v21 = vrot.slane %v934_v13, %v956_v16  ;;  %v1052_v13 = vsub.s32 5, %v2175_v17 }
 0x1fc   : > { %v917_v7 = vpop.xlane.xlu1 %916 }
 0x1fd   : > { %v935_v14 = vmul.f32 0.35355338, %v917_v7  ;;  %v987_v29 = vsel %vm986_vm4, %v961_v21, %v957_v24  ;;  %v1038_v7 = vsub.s32 3, %v2175_v17  ;;  %v650_v21 = vld [vmem:[%s2375_s9] sm:$0xff] }
 0x1fe   : > { %v648_v24 = vld [vmem:[%s2373_s7] sm:$0xff] }
 0x1ff   : > { %v965_v22 = vrot.slane %v935_v14, %v956_v16  ;;  %1906 = vmatpush3.msra.mxu0 %v648_v24 }
 0x200   : > { %v923_v9 = vpop.xlane.xlu1 %922  ;;  %1908 = vmatmul.mubr.msk.f32.vlgmr.msra.gmra.mrb[0].mxu0 %vm657_vm1, %v2153_v6  ;;  %1910 = vmatprep.subr.mxu0 %v2021_v1 }
 0x201   : > { %v937_v15 = vmul.f32 0.35355338, %v923_v9  ;;  %v989_v32 = vsel %vm988_vm5, %v965_v22, %v987_v29  ;;  %v651_v22 = vld [vmem:[%s2375_s9 + $0x8] sm:$0xff]  ;;  %1912 = vmatprep.mubr.msk.f32.mxu0 %vm2022_vm0, %v2021_v1 }
 0x203   : > { %v973_v35 = vrot.slane %v937_v15, %v956_v16  ;;  %v652_v15 = vld [vmem:[%s2375_s9 + $0x10] sm:$0xff] }
 0x204   : > { %v920_v12 = vpop.xlane.xlu1 %919 }
 0x205   : > { %v936_v19 = vmul.f32 0.35355338, %v920_v12  ;;  %v1045_v12 = vsub.s32 4, %v2175_v17 }
 0x207   : > { %v969_v25 = vrot.slane %v936_v19, %v956_v16 }
 0x208   : > { %v926_v20 = vpop.xlane.xlu1 %925 }
 0x209   : > { %v938_v26 = vmul.f32 0.35355338, %v926_v20  ;;  %v991_v33 = vsel %vm990_vm6, %v969_v25, %v989_v32  ;;  %v1947_v25 = vpack.c.bf16 %v651_v22, %v650_v21 }
 0x20a   : > { %v993_v41 = vsel %vm992_vm7, %v973_v35, %v991_v33 }
 0x20b   : > { %v977_v34 = vrot.slane %v938_v26, %v956_v16  ;;  %v647_v26 = vld [vmem:[%s2372_s6] sm:$0x3]  ;;  %1948 = vmatpush3.bf16.msra.mxu1 %v1947_v25 }
 0x20c   : > { %v929_v28 = vpop.xlane.xlu1 %928  ;;  %1911 = vmatpush3.msk.msra.mxu0 %vm1225_vm12, %v647_v26  ;;  %1919 = vmatprep.subr.mxu1 %v2021_v1 }
 0x20d   : > { %v939_v30 = vmul.f32 0.35355338, %v929_v28  ;;  %v995_v43 = vsel %vm994_vm8, %v977_v34, %v993_v41  ;;  %1949 = vmatprep.subr.bf16.mxu0 %v2023_v4  ;;  %v649_v28 = vld [vmem:[%s2374_s8] sm:$0x3f] }
 0x20f   : > { %v981_v37 = vrot.slane %v939_v30, %v956_v16  ;;  %1920 = vmatpush3.msra.mxu1 %v652_v15 }
 0x210   : > { %v932_v38 = vpop.xlane.xlu1 %931  ;;  %1922 = vmatmul.mubr.msk.f32.vlgmr.msra.gmra.mrb[4].mxu1 %vm731_vm2, %v2167_v8  ;;  %1924 = vmatprep.subr.mxu1 %v2021_v1 }
 0x211   : > { %v940_v40 = vmul.f32 0.35355338, %v932_v38  ;;  %v997_v45 = vsel %vm996_vm9, %v981_v37, %v995_v43  ;;  %1925 = vmatpush3.msk.msra.mxu1 %vm1396_vm13, %v649_v28  ;;  %1926 = vmatprep.mubr.msk.f32.mxu1 %vm2022_vm0, %v2021_v1 }
 0x213   : > { %v985_v42 = vrot.slane %v940_v40, %v956_v16 }
 0x215   : > { %v999_v46 = vsel %vm998_vm10, %v985_v42, %v997_v45 }
 0x216   : > { %v1001_v47 = vsel %vm941_vm11, %v999_v46, -1e+30 }
 0x217   : > { %v1002_v48 = vsel %vm657_vm1, %v1001_v47, -inf }
 0x218   : > { %1003 = vmax.xlane.f32.xlu1 %v1002_v48 }
 0x2a5   : > { %v1004_v50 = vpop.xlane.xlu1 %1003 }
 0x2a6   : > { %v1005_v51 = vsub.f32 %v1001_v47, %v1004_v50 }
 0x2a8   : > { %v1006_v52 = vmul.f32 1.442695, %v1005_v51 }
 0x2aa   : > { %1989 = vpow2.f32 %v1006_v52 }
 0x2b4   : > { %v1990_v55 = vpop.eup %1989 }
 0x2b5   : > { %v1008_v56 = vmul.f32 %v1990_v55, %v1845_v53 }
 0x2b7   : > { %v1009_v57 = vsel %vm657_vm1, %v1008_v56, 0.0 }
 0x2b8   : > { %1010 = vadd.xlane.f32.xlu1 %v1009_v57 }
 0x345   : > { %v1011_v58 = vpop.xlane.xlu1 %1010 }
 0x346   : > { %v1012_v60 = vadd.f32 1e-20, %v1011_v58 }
 0x348   : > { %1991 = vrcp.f32 %v1012_v60 }
 0x352   : > { %v1992_v62 = vpop.eup %1991 }
 0x353   : > { %v1014_v0 = vmul.f32 %v1992_v62, %v1008_v56 }
 0x355   : > { %v1025_v2 = vrot.slane %v1014_v0, %v1024_v61  ;;  %v1018_v3 = vrot.slane %v1014_v0, %v2186_v23  ;;  %v1032_v9 = vrot.slane %v1014_v0, %v1031_v5  ;;  %v1039_v11 = vrot.slane %v1014_v0, %v1038_v7 }
 0x356   : > { %v1046_v14 = vrot.slane %v1014_v0, %v1045_v12  ;;  %v1053_v16 = vrot.slane %v1014_v0, %v1052_v13  ;;  %v1066_v23 = vsub.s32 7, %v2175_v17  ;;  %v1060_v19 = vrot.slane %v1014_v0, %v1059_v18 }
 0x357   : > { %1027 = vbcast.lane.b32.xlu1 %v1025_v2, 256  ;;  %1020 = vbcast.lane.b32.xlu0 %v1018_v3, 256 }
 0x358   : > { %v1067_v20 = vrot.slane %v1014_v0, %v1066_v23 }
 0x35b   : > { %1034 = vbcast.lane.b32.xlu1 %v1032_v9, 256  ;;  %1041 = vbcast.lane.b32.xlu0 %v1039_v11, 256 }
 0x35f   : > { %1048 = vbcast.lane.b32.xlu1 %v1046_v14, 256  ;;  %1055 = vbcast.lane.b32.xlu0 %v1053_v16, 256 }
 0x363   : > { %1062 = vbcast.lane.b32.xlu1 %v1060_v19, 256  ;;  %1069 = vbcast.lane.b32.xlu0 %v1067_v20, 256 }
 0x3c9   : > { %v1028_v6 = vpop.permute.xlu1 %1027  ;;  %v1021_v29 = vpop.permute.xlu0 %1020 }
 0x3ca   : > { %v1072_v4 = vmul.f32 %v1028_v6, %v2193_v31  ;;  %v1071_v30 = vmul.f32 %v1021_v29, %v2189_v27 }
 0x3cc   : > { %v1087_v32 = vsel %vm1079_vm14, %v1072_v4, 0.0  ;;  %v1080_v33 = vsel %vm1079_vm14, %v1071_v30, 0.0 }
 0x3cd   : > { %v1088_v34 = vrot.slane %v1087_v32, 4  ;;  %v1081_v35 = vrot.slane %v1080_v33, 4  ;;  %v1035_v8 = vpop.permute.xlu1 %1034  ;;  %v1042_v37 = vpop.permute.xlu0 %1041 }
 0x3ce   : > { %v1073_v38 = vmul.f32 %v1035_v8, %v2199_v36  ;;  %v1074_v39 = vmul.f32 %v1042_v37, %v2213_v49 }
 0x3cf   : > { %v1089_v40 = vadd.f32 %v1088_v34, %v1087_v32  ;;  %v1082_v41 = vadd.f32 %v1081_v35, %v1080_v33 }
 0x3d0   : > { %v1094_v42 = vsel %vm1079_vm14, %v1073_v38, 0.0  ;;  %v1101_v31 = vsel %vm1079_vm14, %v1074_v39, 0.0 }
 0x3d1   : > { %v1090_v43 = vrot.slane %v1089_v40, 2  ;;  %v1083_v27 = vrot.slane %v1082_v41, 2  ;;  %v1095_v45 = vrot.slane %v1094_v42, 4  ;;  %v1102_v46 = vrot.slane %v1101_v31, 4  ;;  %v1049_v47 = vpop.permute.xlu1 %1048  ;;  %v1056_v48 = vpop.permute.xlu0 %1055 }
 0x3d2   : > { %v1075_v50 = vmul.f32 %v1049_v47, %v2207_v44  ;;  %v1076_v51 = vmul.f32 %v1056_v48, %v2219_v54  ;;  %v1472_v48 = vadd.s32 8, %v2175_v17 }
 0x3d3   : > { %v1091_v52 = vadd.f32 %v1090_v43, %v1089_v40  ;;  %v1084_v36 = vadd.f32 %v1083_v27, %v1082_v41  ;;  %v1096_v53 = vadd.f32 %v1095_v45, %v1094_v42  ;;  %v1103_v49 = vadd.f32 %v1102_v46, %v1101_v31 }
 0x3d4   : > { %v1108_v55 = vsel %vm1079_vm14, %v1075_v50, 0.0  ;;  %v1115_v56 = vsel %vm1079_vm14, %v1076_v51, 0.0  ;;  %v1478_v45 = vadd.s32 1, %v2237_v10  ;;  %v1474_v46 = vmul.u32 3, %v2237_v10 }
 0x3d5   : > { %v1092_v57 = vrot.slane %v1091_v52, 1  ;;  %v1085_v58 = vrot.slane %v1084_v36, 1  ;;  %v1097_v60 = vrot.slane %v1096_v53, 2  ;;  %v1104_v61 = vrot.slane %v1103_v49, 2  ;;  %v1063_v62 = vpop.permute.xlu1 %1062  ;;  %v1070_v0 = vpop.permute.xlu0 %1069 }
 0x3d6   : > { %v1109_v2 = vrot.slane %v1108_v55, 4  ;;  %v1116_v3 = vrot.slane %v1115_v56, 4  ;;  %v1077_v44 = vmul.f32 %v1063_v62, %v2225_v59  ;;  %v1078_v54 = vmul.f32 %v1070_v0, %v2231_v63 }
 0x3d7   : > { %v1093_v5 = vadd.f32 %v1092_v57, %v1091_v52  ;;  %v1098_v7 = vadd.f32 %v1097_v60, %v1096_v53  ;;  %v1105_v9 = vadd.f32 %v1104_v61, %v1103_v49  ;;  %v1086_v16 = vadd.f32 %v1085_v58, %v1084_v36 }
 0x3d8   : > { %v1110_v11 = vadd.f32 %v1109_v2, %v1108_v55  ;;  %v1117_v12 = vadd.f32 %v1116_v3, %v1115_v56  ;;  %v1122_v13 = vsel %vm1079_vm14, %v1077_v44, 0.0  ;;  %v1129_v14 = vsel %vm1079_vm14, %v1078_v54, 0.0  ;;  %v1850_v44 = vld [vmem:[%s2377_s11] ss:$0 sm:$0xff] }
 0x3d9   : > { %v1099_v18 = vrot.slane %v1098_v7, 1  ;;  %v1106_v23 = vrot.slane %v1105_v9, 1  ;;  %v1123_v19 = vrot.slane %v1122_v13, 4  ;;  %v1130_v22 = vrot.slane %v1129_v14, 4 }
 0x3da   : > { %v1111_v20 = vrot.slane %v1110_v11, 2  ;;  %v1118_v21 = vrot.slane %v1117_v12, 2  ;;  %v1214_v15 = vsel %vm986_vm4, %v1093_v5, %v1086_v16  ;;  %v1479_v47 = vmul.u32 3, %v1478_v45 }
 0x3db   : > { %v1100_v24 = vadd.f32 %v1099_v18, %v1098_v7  ;;  %v1124_v59 = vadd.f32 %v1123_v19, %v1122_v13  ;;  %v1131_v26 = vadd.f32 %v1130_v22, %v1129_v14  ;;  %v1107_v28 = vadd.f32 %v1106_v23, %v1105_v9  ;;  %v1864_v23 = vld [vmem:[%s2378_s12] ss:$0 sm:$0xff] }
 0x3dc   : > { %v1112_v25 = vadd.f32 %v1111_v20, %v1110_v11  ;;  %v1119_v63 = vadd.f32 %v1118_v21, %v1117_v12  ;;  %vm1475_vm15 = vcmp.ge.s32.totalorder %v2175_v17, %v1474_v46  ;;  %vm1480_vm4 = vcmp.lt.s32.totalorder %v2175_v17, %v1479_v47  ;;  %v1865_v20 = vld [vmem:[%s2379_s13] ss:$0 sm:$0xff] }
 0x3dd   : > { %v1125_v6 = vrot.slane %v1124_v59, 2  ;;  %v1215_v29 = vsel %vm988_vm5, %v1100_v24, %v1214_v15  ;;  %v1132_v32 = vrot.slane %v1131_v26, 2  ;;  %vm1476_vm5 = vcmp.ge.s32.totalorder %v1472_v48, %v1474_v46 }
 0x3de   : > { %v1113_v4 = vrot.slane %v1112_v25, 1  ;;  %v1120_v30 = vrot.slane %v1119_v63, 1  ;;  %v1216_v38 = vsel %vm990_vm6, %v1107_v28, %v1215_v29  ;;  %vm1481_vm6 = vcmp.lt.s32.totalorder %v1472_v48, %v1479_v47 }
 0x3df   : > { %v1126_v33 = vadd.f32 %v1125_v6, %v1124_v59  ;;  %v1133_v8 = vadd.f32 %v1132_v32, %v1131_v26  ;;  %v2028_v52 = vmov 1.0|1.0   ;;  %v1473_v36 = vadd.s32 16, %v2175_v17 }
 0x3e0   : > { %v1114_v34 = vadd.f32 %v1113_v4, %v1112_v25  ;;  %v1121_v35 = vadd.f32 %v1120_v30, %v1119_v63  ;;  %v2029_v53 = vmov 1.0   ;;  %v1494_v49 = vadd.s32 1, %v2175_v17 }
 0x3e1   : > { %v1127_v37 = vrot.slane %v1126_v33, 1  ;;  %v1134_v39 = vrot.slane %v1133_v8, 1  ;;  %vm1477_vm11 = vcmp.ge.s32.totalorder %v1473_v36, %v1474_v46  ;;  %vm1482_vm12 = vcmp.lt.s32.totalorder %v1473_v36, %v1479_v47 }
 0x3e2   : > { %v1217_v40 = vsel %vm992_vm7, %v1114_v34, %v1216_v38  ;;  %vm1483_vm7 = vmand %vm1475_vm15, %vm1480_vm4  ;;  %v1492_v55 = vmul.u32 3, %v2175_v17  ;;  %v1495_v56 = vmul.u32 3, %v1494_v49 }
 0x3e3   : > { %v1128_v41 = vadd.f32 %v1127_v37, %v1126_v33  ;;  %v1135_v42 = vadd.f32 %v1134_v39, %v1133_v8  ;;  %v1218_v31 = vsel %vm994_vm8, %v1121_v35, %v1217_v40  ;;  %vm1484_vm8 = vmand %vm1476_vm5, %vm1481_vm6 }
 0x3e4   : > { %vm1485_vm13 = vmand %vm1477_vm11, %vm1482_vm12  ;;  %vm1496_vm14 = vcmp.lt.s32.totalorder %v2237_v10, %v1495_v56 }
 0x3e5   : > { %v1219_v43 = vsel %vm996_vm9, %v1128_v41, %v1218_v31  ;;  %vm1393_vm9 = vcmask 48128  }
 0x3e6   : > { %v1220_v27 = vsel %vm998_vm10, %v1135_v42, %v1219_v43  ;;  %vm1950_vm10 = vmpackc.low %vm1484_vm8, %vm1483_vm7 }
 0x3e7   : > { %1221 = vrot.lane.b32.xlu0 %v1220_v27, %s2026_s24  ;;  %1391 = vrot.lane.b32.xlu1 %v1220_v27, %s2027_s25 }
 0x459   : > { %v1222_v50 = vpop.permute.xlu0 %1221  ;;  %v1392_v51 = vpop.permute.xlu1 %1391 }
 0x45a   : > { %1913 = vmatmul.mubr.msk.f32.vlgmr.msra.gmra.mrb[0].mxu0 %vm809_vm3, %v1222_v50  ;;  %1927 = vmatmul.mubr.msk.f32.vlgmr.msra.gmra.mrb[4].mxu1 %vm1393_vm9, %v1392_v51  ;;  %vm1493_vm3 = vcmp.ge.s32.totalorder %v2237_v10, %v1492_v55  ;;  %v1849_v10 = vld [vmem:[%s2376_s10] ss:$0 sm:$0xff] }
 0x45b   : > { %1951 = vmatpush3.bf16.msk.msra.mxu0 %vm1950_vm10, %v2028_v52  ;;  %1935 = vmatprep.mubr.msk.f32.mxu0 %vm2022_vm0, %v2021_v1  ;;  %vm1497_vm15 = vmand %vm1493_vm3, %vm1496_vm14 }
 0x45c   : > { %1933 = vmatprep.subr.mxu0 %v2021_v1 }
 0x45f   : > { %1934 = vmatpush3.msk.msra.mxu0 %vm1485_vm13, %v2029_v53 }
 0x460   : > { %1938 = vmatprep.subr.mxu0 %v2021_v1 }
 0x52d   : > { %v1295_v57 = vpop.f32.mrb[0].mxu0  ;;  %v1466_v58 = vpop.f32.mrb[4].mxu1 }
 0x52e   : > { %v1299_v60 = vmul.f32 %v1295_v57, %v1295_v57  ;;  %v1500_v61 = vmul.f32 %v1466_v58, %v1466_v58  ;;  %v1914_v62 = vpop.f32.mrb[1].mxu0  ;;  %v1928_v0 = vpop.f32.mrb[5].mxu1 }
 0x530   : > { %v1300_v2 = vadd.f32 1e-12, %v1299_v60  ;;  %1936 = vmatmul.mubr.msk.f32.vlgmr.msra.gmra.mrb[2].mxu0 %vm731_vm2, %v1500_v61 }
 0x531   : > { %1939 = vmatpush3.msk.msra.mxu0 %vm1497_vm15, %v2029_v53  ;;  %1940 = vmatprep.mubr.msk.f32.mxu0 %vm2022_vm0, %v2021_v1 }
 0x532   : > { %1993 = vrsqrt.f32 %v1300_v2 }
 0x53c   : > { %v1994_v17 = vpop.eup %1993 }
 0x53d   : > { %v1302_v3 = vmul.f32 %v1994_v17, %v1299_v60 }
 0x53f   : > { %v1309_v54 = vmul.f32 %v1849_v10, %v1302_v3 }
 0x541   : > { %v1316_v5 = vadd.f32 %v1850_v44, %v1309_v54 }
 0x543   : > { %v1317_v7 = vmax.f32 %v1316_v5, 0.0 }
 0x545   : > { %v1318_v9 = vmul.f32 %v1317_v7, %v1295_v57 }
 0x547   : > { %v1319_v1 = vmul.f32 %v1994_v17, %v1318_v9 }
 0x549   : > { %1320 = vst.msk [vmem:[%s624_s17] sm:$0xff] %vm657_vm1, %v1319_v1 }
 0x603   : > { %v1570_v11 = vpop.f32.mrb[2].mxu0 }
 0x604   : > { %v1937_v12 = vpop.f32.mrb[3].mxu0  ;;  %1941 = vmatmul.mubr.msk.f32.vlgmr.msra.gmra.mrb[4].mxu0 %vm657_vm1, %v1570_v11 }
 0x6d7   : > { %v1643_v13 = vpop.f32.mrb[4].mxu0 }
 0x6d8   : > { %v1647_v14 = vadd.f32 1e-12, %v1643_v13  ;;  %v1942_v16 = vpop.f32.mrb[5].mxu0 }
 0x6da   : > { %1995 = vrsqrt.f32 %v1647_v14 }
 0x6e4   : > { %v1996_v18 = vpop.eup %1995 }
 0x6e5   : > { %v1649_v19 = vmul.f32 %v1996_v18, %v1643_v13 }
 0x6e7   : > { %v1656_v21 = vmul.f32 %v1864_v23, %v1649_v19 }
 0x6e9   : > { %v1663_v22 = vadd.f32 %v1865_v20, %v1656_v21 }
 0x6eb   : > { %v1664_v24 = vmax.f32 %v1663_v22, 0.0 }
 0x6ed   : > { %v1665_v59 = vmul.f32 %v1664_v24, %v1466_v58 }
 0x6ef   : > { %v1666_v25 = vmul.f32 %v1996_v18, %v1665_v59 }
 0x6f1   : > { %1667 = vst.msk [vmem:[%s631_s29] sm:$0xff] %vm731_vm2, %v1666_v25 }
 0x6f2 PF: > { %s26_s20 = sadd.s32 1, %s2019_s20   ;;  %s2382_s18 = smov %s2015_s19 }
 0x6f3   : > { %p23_p5 = scmp.ge.s32.totalorder %s26_s20, 4   ;;  %s2383_s19 = smov %s2385_s21 }
 0x6f5   :  { %25 = sbr.rel (!%p23_p5) target bundleno = 2 (0x2), region = 127 }

// kernel: se3_transformer_forward.9
= control target key start
LH: loop header
LB: loop body
LE: loop exit
PB: predicated region body
PF: predicated region fallthrough
CT: control target
= control target key end

     0   :  { %15 = vsyncpa [#allocation3], 0  ;;  %s3656_s0 = inlined_call_operand.vmem [shape: f32[2,64,5], index: 0, kind: input, shape index: {}]   ;;  %s3657_s1 = inlined_call_operand.vmem [shape: f32[2,64,3], index: 1, kind: input, shape index: {}]   ;;  %s3658_s2 = inlined_call_operand.vmem [shape: f32[2,8,8], index: 2, kind: input, shape index: {}]   ;;  %s3659_s3 = inlined_call_operand.vmem [shape: f32[2,8,24], index: 3, kind: input, shape index: {}]   ;;  %s3660_s4 = inlined_call_operand.vmem [shape: f32[2,64,1], index: 4, kind: input, shape index: {}]   ;;  %s3661_s5 = inlined_call_operand.vmem [shape: f32[5,32], index: 5, kind: input, shape index: {}]   ;;  %s3662_s6 = inlined_call_operand.vmem [shape: f32[1,32], index: 6, kind: input, shape index: {}]   ;;  %s3663_s7 = inlined_call_operand.vmem [shape: f32[32,128], index: 7, kind: input, shape index: {}]   ;;  %s3664_s8 = inlined_call_operand.vmem [shape: f32[1,128], index: 8, kind: input, shape index: {}]   ;;  %s3665_s9 = inlined_call_operand.vmem [shape: f32[8,8], index: 9, kind: input, shape index: {}]   ;;  %s3666_s10 = inlined_call_operand.hbm [shape: f32[2,1,8], index: 10, kind: output, shape index: {}]  }
   0x1   :  { %17 = vsyncpa [#allocation3 + $0x1], 0  ;;  %s2803_s13 = smov 0   ;;  %s2805_s14 = smov 0  }
   0x2   :  { %s2807_s15 = smov 0   ;;  %s2809_s16 = smov 0  }
   0x3 LB: > { %s2824_s17 = sadd.s32 4294967295, %s2724_s16   ;;  %s2192_s18 = sadd.s32 4294967294, %s2724_s16   ;;  %s2724_s16 = sphi %s2809_s16, %s3710_s16   ;;  %s2720_s15 = sphi %s2807_s15, %s3709_s15   ;;  %s2716_s14 = sphi %s2805_s14, %s3708_s14   ;;  %s2712_s13 = sphi %s2803_s13, %s3707_s13  }
   0x4   : > { %s2828_s19 = sadd.s32 1, %s2724_s16   ;;  %s265_s20 = sadd.s32 1, %s2720_s15 }
   0x5   : > { %s262_s21 = ssub.s32 %s2724_s16, %s2828_s19  ;;  %p275_p0 = scmp.ne.s32.totalorder %s2720_s15, %s2716_s14 }
   0x6   : > { %p263_p1 = scmp.eq.s32.totalorder %s262_s21, 0  ;;  %p276_p2 = scmp.eq.s32.totalorder %s2824_s17, 1 }
   0x7   : > { %p281_p3 = scmp.ne.s32.totalorder %s2716_s14, %s2712_s13  ;;  %p282_p4 = scmp.eq.s32.totalorder %s2192_s18, 1 }
   0x8   : > { %s2839_s22 = scalar_select %p263_p1, %s2720_s15, %s265_s20  }
   0x9   : > { %p2841_p5 = por %p276_p2, %p275_p0  ;;  %p2845_p6 = por %p282_p4, %p281_p3 }
   0xa   : > { %p2195_p7 = scmp.ge.s32.totalorder %s2724_s16, 1  ;;  %p353_p8 = scmp.lt.s32.totalorder %s2724_s16, 3 }
   0xc   : > { %p354_p9 = pnand %p2195_p7, %p353_p8 }
   0xd   : > { %p408_p10 = scmp.lt.s32.totalorder (!%p354_p9), %s2824_s17, 1  ;;  %s2726_s30 = smov (!%p354_p9), 6   ;;  %v457_v2 = vld [vmem:[%s3661_s5] sm:$0x1f] (!%p354_p9)  ;;  %vm496_vm0 = vcmask (!%p354_p9), 1044480   ;;  %vm471_vm1 = vcmask (!%p354_p9), 39936   ;;  %v996_v8 = vlaneseq (!%p354_p9) }
   0xe   : > { %357 = sbr.rel (%p354_p9) target bundleno = 1498 (0x5da), region = 60  ;;  %s2727_s11 = smov (!%p354_p9), 3   ;;  %2371 = vmatprep.subr.msk.mxu0 (!%p354_p9), %vm496_vm0, %v457_v2  ;;  %v2732_v21 = vmov (!%p354_p9), 1.0|1.0   ;;  %v2733_v22 = vmov (!%p354_p9), 1.0   ;;  %v459_v27 = vld [vmem:[%s3663_s7] sm:$0xff] (!%p354_p9) }
   0xf   : > { %s2728_s28 = smov (!%p354_p9), 9   ;;  %2372 = vmatpush3.msk.msra.mxu0 (!%p354_p9), %vm496_vm0, %v457_v2  ;;  %s2729_s12 = smov (!%p354_p9), 12   ;;  %v2908_v11 = vshrl.u32 (!%p354_p9), %v996_v8, 7  ;;  %v2910_v12 = vand.u32 (!%p354_p9), 127, %v996_v8  ;;  %v460_v28 = vld [vmem:[%s3663_s7 + $0x8] sm:$0xff] (!%p354_p9)  ;;  %v461_v30 = vld [vmem:[%s3663_s7 + $0x10] sm:$0xff] (!%p354_p9) }
  0x10   : > { %s2730_s18 = smov (!%p354_p9), 15   ;;  %s3669_s20 = smov (!%p354_p9), 18   ;;  %v2522_v29 = vpack.c.bf16 (!%p354_p9), %v460_v28, %v459_v27  ;;  %v462_v31 = vld [vmem:[%s3663_s7 + $0x18] sm:$0xff] (!%p354_p9)  ;;  %vm925_vm12 = vcmask (!%p354_p9), 23552   ;;  %vm934_vm13 = vcmask (!%p354_p9), 48128   ;;  %vm943_vm14 = vcmask (!%p354_p9), 72704  }
  0x11   : > { %v2921_v14 = vadd.s32 (!%p354_p9), 8, %v2908_v11  ;;  %v1002_v15 = vmul.u32 (!%p354_p9), 3, %v2910_v12  ;;  %v2925_v16 = vadd.s32 (!%p354_p9), 1, %v2910_v12  ;;  %v2942_v20 = vadd.s32 (!%p354_p9), 16, %v2908_v11  ;;  %s3667_s21 = smov (!%p354_p9), 21  }
  0x12   : > { %v2526_v32 = vpack.c.bf16 (!%p354_p9), %v462_v31, %v461_v30  ;;  %2523 = vmatprep.subr.bf16.mxu1 (!%p354_p9), %v2522_v29  ;;  %vm952_vm15 = vcmask (!%p354_p9), 97280   ;;  %vm961_vm0 = vcmask (!%p354_p9), 121856  }
  0x13   : > { %vm1003_vm2 = vcmp.ge.s32.totalorder (!%p354_p9), %v2908_v11, %v1002_v15  ;;  %v1007_v17 = vmul.u32 (!%p354_p9), 3, %v2925_v16  ;;  %vm1004_vm3 = vcmp.ge.s32.totalorder (!%p354_p9), %v2921_v14, %v1002_v15  ;;  %vm1005_vm9 = vcmp.ge.s32.totalorder (!%p354_p9), %v2942_v20, %v1002_v15  ;;  %2525 = vmatpush3.bf16.msra.mxu1 (!%p354_p9), %v2522_v29 }
  0x14   : > { %2527 = vmatprep.subr.bf16.mxu1 (!%p354_p9), %v2526_v32 }
  0x15   : > { %s2853_s25 = scalar_select %p408_p10, %s2824_s17, 1  ;;  %vm1008_vm4 = vcmp.lt.s32.totalorder %v2908_v11, %v1007_v17  ;;  %vm1009_vm5 = vcmp.lt.s32.totalorder %v2921_v14, %v1007_v17  ;;  %vm1010_vm10 = vcmp.lt.s32.totalorder %v2942_v20, %v1007_v17 }
  0x16   : > { %vm1011_vm6 = vmand %vm1003_vm2, %vm1008_vm4  ;;  %vm979_vm2 = vcmask 171008   ;;  %vm3678_vm4 = vcmask 261120  }
  0x17   : > { %s2856_s26 = sshll.u32 %s2853_s25, 6  ;;  %vm1012_vm7 = vmand %vm1004_vm3, %vm1009_vm5  ;;  %2529 = vmatpush3.bf16.msra.mxu1 %v2526_v32  ;;  %vm3679_vm3 = vcmask 195584   ;;  %vm3681_vm5 = vcmask 64512  }
  0x18   : > { %s2862_s29 = scalar_lea.vmem %s3657_s1, %s2856_s26  ;;  %s2885_s27 = scalar_lea.vmem %s3656_s0, %s2856_s26  ;;  %vm2530_vm8 = vmpackc.low %vm1012_vm7, %vm1011_vm6  ;;  %vm3680_vm6 = vcmask 130048   ;;  %vm3677_vm7 = vcmask 326656  }
  0x19   : > { %v2865_v0 = vld [vmem:[%s2862_s29] sm:$0xff]  ;;  %v2872_v1 = vld [vmem:[%s2862_s29 + $0x8] sm:$0xff]  ;;  %v2894_v5 = vld [vmem:[%s2862_s29 + $0x10] sm:$0xff]  ;;  %2531 = vmatprep.subr.msk.bf16.mxu0 %vm2530_vm8, %v2732_v21 }
  0x1a   : > { %781 = vrot.lane.b32.xlu1 %v2865_v0, %s2726_s30  ;;  %757 = vrot.lane.b32.xlu0 %v2865_v0, %s2727_s11  ;;  %v431_v3 = vld [vmem:[%s2885_s27] sm:$0xff]  ;;  %v432_v4 = vld [vmem:[%s2885_s27 + $0x8] sm:$0xff]  ;;  %vm1013_vm11 = vmand %vm1005_vm9, %vm1010_vm10  ;;  %vm3675_vm9 = vcmask 457728  }
  0x1b   : > { %2373 = vmatprep.mubr.msk.f32.mxu0 %vm471_vm1, %v431_v3  ;;  %v433_v6 = vld [vmem:[%s2885_s27 + $0x10] sm:$0xff]  ;;  %v434_v7 = vld [vmem:[%s2885_s27 + $0x18] sm:$0xff]  ;;  %v435_v9 = vld [vmem:[%s2885_s27 + $0x20] sm:$0xff] }
  0x1c   : > { %2374 = vmatmul.mubr.msk.f32.vlgmr.msra.gmra.mrb[0].mxu0 %vm471_vm1, %v432_v4  ;;  %v436_v10 = vld [vmem:[%s2885_s27 + $0x28] sm:$0xff]  ;;  %v2917_v13 = vld [vmem:[%s2862_s29 + $0x18] sm:$0xff]  ;;  %v437_v18 = vld [vmem:[%s2885_s27 + $0x30] sm:$0xff] }
  0x1d   : > { %2376 = vmatprep.mubr.msk.f32.mxu0 %vm471_vm1, %v433_v6  ;;  %v438_v19 = vld [vmem:[%s2885_s27 + $0x38] sm:$0xff]  ;;  %2533 = vmatpush3.bf16.msk.msra.mxu0 %vm2530_vm8, %v2732_v21  ;;  %v2965_v23 = vld [vmem:[%s2862_s29 + $0x20] sm:$0xff]  ;;  %v2976_v24 = vld [vmem:[%s2862_s29 + $0x28] sm:$0xff]  ;;  %s3672_s27 = smov 56   ;;  %vm3676_vm8 = vcmask 392192  }
  0x1e   : > { %783 = vrot.lane.b32.xlu1 %v2872_v1, %s2726_s30  ;;  %759 = vrot.lane.b32.xlu0 %v2872_v1, %s2727_s11  ;;  %v2999_v25 = vld [vmem:[%s2862_s29 + $0x30] sm:$0xff]  ;;  %v3010_v26 = vld [vmem:[%s2862_s29 + $0x38] sm:$0xff]  ;;  %s3684_s29 = smov 18  }
  0x1f   : > { %2409 = vmatprep.subr.msk.mxu0 %vm1013_vm11, %v2733_v22 }
  0x20   : > { %2377 = vmatmul.mubr.msk.f32.gmra.mrb[2].mxu0 %vm471_vm1, %v434_v7 }
  0x21   : > { %2379 = vmatprep.mubr.msk.f32.mxu0 %vm471_vm1, %v435_v9  ;;  %2410 = vmatpush3.msk.msra.mxu0 %vm1013_vm11, %v2733_v22 }
  0x22   : > { %807 = vrot.lane.b32.xlu1 %v2872_v1, %s2728_s28  ;;  %805 = vrot.lane.b32.xlu0 %v2865_v0, %s2728_s28 }
  0x24   : > { %2380 = vmatmul.mubr.msk.f32.gmra.mrb[4].mxu0 %vm471_vm1, %v436_v10 }
  0x25   : > { %2382 = vmatprep.mubr.msk.f32.mxu0 %vm471_vm1, %v437_v18 }
  0x26   : > { %761 = vrot.lane.b32.xlu1 %v2894_v5, %s2727_s11  ;;  %829 = vrot.lane.b32.xlu0 %v2865_v0, %s2729_s12 }
  0x28   : > { %2383 = vmatmul.mubr.msk.f32.gmra.mrb[6].mxu0 %vm471_vm1, %v438_v19  ;;  %vm970_vm1 = vcmask 146432  }
  0x2a   : > { %853 = vrot.lane.b32.xlu1 %v2865_v0, %s2730_s18  ;;  %831 = vrot.lane.b32.xlu0 %v2872_v1, %s2729_s12 }
  0x2e   : > { %785 = vrot.lane.b32.xlu1 %v2894_v5, %s2726_s30  ;;  %763 = vrot.lane.b32.xlu0 %v2917_v13, %s2727_s11 }
  0x32   : > { %877 = vrot.lane.b32.xlu1 %v2865_v0, %s3669_s20  ;;  %855 = vrot.lane.b32.xlu0 %v2872_v1, %s2730_s18 }
  0x36   : > { %809 = vrot.lane.b32.xlu1 %v2894_v5, %s2728_s28  ;;  %787 = vrot.lane.b32.xlu0 %v2917_v13, %s2726_s30 }
  0x3a   : > { %901 = vrot.lane.b32.xlu1 %v2865_v0, %s3667_s21  ;;  %879 = vrot.lane.b32.xlu0 %v2872_v1, %s3669_s20 }
  0x3e   : > { %833 = vrot.lane.b32.xlu1 %v2894_v5, %s2729_s12  ;;  %811 = vrot.lane.b32.xlu0 %v2917_v13, %s2728_s28 }
  0x42   : > { %765 = vrot.lane.b32.xlu1 %v2965_v23, %s2727_s11  ;;  %903 = vrot.lane.b32.xlu0 %v2872_v1, %s3667_s21 }
  0x46   : > { %857 = vrot.lane.b32.xlu1 %v2894_v5, %s2730_s18  ;;  %835 = vrot.lane.b32.xlu0 %v2917_v13, %s2729_s12 }
  0x4a   : > { %789 = vrot.lane.b32.xlu1 %v2965_v23, %s2726_s30  ;;  %767 = vrot.lane.b32.xlu0 %v2976_v24, %s2727_s11 }
  0x4e   : > { %881 = vrot.lane.b32.xlu1 %v2894_v5, %s3669_s20  ;;  %859 = vrot.lane.b32.xlu0 %v2917_v13, %s2730_s18 }
  0x52   : > { %813 = vrot.lane.b32.xlu1 %v2965_v23, %s2728_s28  ;;  %791 = vrot.lane.b32.xlu0 %v2976_v24, %s2726_s30 }
  0x56   : > { %905 = vrot.lane.b32.xlu1 %v2894_v5, %s3667_s21  ;;  %883 = vrot.lane.b32.xlu0 %v2917_v13, %s3669_s20 }
  0x5a   : > { %837 = vrot.lane.b32.xlu1 %v2965_v23, %s2729_s12  ;;  %815 = vrot.lane.b32.xlu0 %v2976_v24, %s2728_s28 }
  0x5e   : > { %769 = vrot.lane.b32.xlu1 %v2999_v25, %s2727_s11  ;;  %907 = vrot.lane.b32.xlu0 %v2917_v13, %s3667_s21 }
  0x62   : > { %861 = vrot.lane.b32.xlu1 %v2965_v23, %s2730_s18  ;;  %839 = vrot.lane.b32.xlu0 %v2976_v24, %s2729_s12 }
  0x66   : > { %793 = vrot.lane.b32.xlu1 %v2999_v25, %s2726_s30  ;;  %771 = vrot.lane.b32.xlu0 %v3010_v26, %s2727_s11 }
  0x6a   : > { %885 = vrot.lane.b32.xlu1 %v2965_v23, %s3669_s20  ;;  %863 = vrot.lane.b32.xlu0 %v2976_v24, %s2730_s18 }
  0x6e   : > { %817 = vrot.lane.b32.xlu1 %v2999_v25, %s2728_s28  ;;  %795 = vrot.lane.b32.xlu0 %v3010_v26, %s2726_s30  ;;  %s3673_s30 = smov 48  }
  0x72   : > { %909 = vrot.lane.b32.xlu1 %v2965_v23, %s3667_s21  ;;  %887 = vrot.lane.b32.xlu0 %v2976_v24, %s3669_s20  ;;  %s3671_s20 = sshll.u32 %s2853_s25, 3 }
  0x73   : > { %s425_s11 = scalar_lea.vmem %s3659_s3, %s3671_s20  ;;  %s2742_s20 = smov 64  }
  0x74   : > { %v3072_v54 = vld [vmem:[%s425_s11] sm:$0xff]  ;;  %s2740_s11 = smov 24  }
  0x76   : > { %841 = vrot.lane.b32.xlu1 %v2999_v25, %s2729_s12  ;;  %819 = vrot.lane.b32.xlu0 %v3010_v26, %s2728_s28  ;;  %s3686_s28 = sshll.u32 %s2853_s25, 3  ;;  %s3693_s25 = smov 32  }
  0x7a   : > { %843 = vrot.lane.b32.xlu1 %v3010_v26, %s2729_s12  ;;  %911 = vrot.lane.b32.xlu0 %v2976_v24, %s3667_s21  ;;  %s3674_s12 = smov 32   ;;  %s2738_s21 = smov 16  }
  0x7e   : > { %867 = vrot.lane.b32.xlu1 %v3010_v26, %s2730_s18  ;;  %865 = vrot.lane.b32.xlu0 %v2999_v25, %s2730_s18  ;;  %s3685_s18 = smov 21  }
  0x82   : > { %891 = vrot.lane.b32.xlu1 %v3010_v26, %s3684_s29  ;;  %889 = vrot.lane.b32.xlu0 %v2999_v25, %s3684_s29  ;;  %s2736_s29 = smov 8  }
  0x86   : > { %915 = vrot.lane.b32.xlu1 %v3010_v26, %s3685_s18  ;;  %913 = vrot.lane.b32.xlu0 %v2999_v25, %s3685_s18  ;;  %s2737_s18 = smov 40  }
  0x8c   : > { %v782_v33 = vpop.permute.xlu1 %781  ;;  %v758_v34 = vpop.permute.xlu0 %757 }
  0x8d   : > { %v926_v47 = vsel %vm925_vm12, %v2865_v0, %v758_v34 }
  0x8e   : > { %v935_v48 = vsel %vm934_vm13, %v926_v47, %v782_v33 }
  0x90   : > { %v784_v35 = vpop.permute.xlu1 %783  ;;  %v760_v36 = vpop.permute.xlu0 %759 }
  0x91   : > { %v927_v58 = vsel %vm925_vm12, %v2872_v1, %v760_v36 }
  0x92   : > { %v936_v61 = vsel %vm934_vm13, %v927_v58, %v784_v35 }
  0x94   : > { %v808_v37 = vpop.permute.xlu1 %807  ;;  %v806_v38 = vpop.permute.xlu0 %805 }
  0x95   : > { %v944_v51 = vsel %vm943_vm14, %v935_v48, %v806_v38  ;;  %v945_v0 = vsel %vm943_vm14, %v936_v61, %v808_v37 }
  0x98   : > { %v762_v39 = vpop.permute.xlu1 %761  ;;  %v830_v40 = vpop.permute.xlu0 %829 }
  0x99   : > { %v953_v52 = vsel %vm952_vm15, %v944_v51, %v830_v40  ;;  %v928_v22 = vsel %vm925_vm12, %v2894_v5, %v762_v39 }
  0x9c   : > { %v854_v41 = vpop.permute.xlu1 %853  ;;  %v832_v42 = vpop.permute.xlu0 %831 }
  0x9d   : > { %v962_v53 = vsel %vm961_vm0, %v953_v52, %v854_v41  ;;  %v954_v2 = vsel %vm952_vm15, %v945_v0, %v832_v42 }
  0xa0   : > { %v786_v43 = vpop.permute.xlu1 %785  ;;  %v764_v44 = vpop.permute.xlu0 %763 }
  0xa1   : > { %v937_v27 = vsel %vm934_vm13, %v928_v22, %v786_v43  ;;  %v929_v5 = vsel %vm925_vm12, %v2917_v13, %v764_v44 }
  0xa4   : > { %v878_v45 = vpop.permute.xlu1 %877  ;;  %v856_v46 = vpop.permute.xlu0 %855 }
  0xa5   : > { %v971_v55 = vsel %vm970_vm1, %v962_v53, %v878_v45  ;;  %v963_v3 = vsel %vm961_vm0, %v954_v2, %v856_v46 }
  0xa8   : > { %v810_v49 = vpop.permute.xlu1 %809  ;;  %v788_v50 = vpop.permute.xlu0 %787 }
  0xa9   : > { %v946_v30 = vsel %vm943_vm14, %v937_v27, %v810_v49  ;;  %v938_v38 = vsel %vm934_vm13, %v929_v5, %v788_v50 }
  0xac   : > { %v902_v56 = vpop.permute.xlu1 %901  ;;  %v880_v57 = vpop.permute.xlu0 %879 }
  0xad   : > { %v980_v59 = vsel %vm979_vm2, %v971_v55, %v902_v56  ;;  %v972_v4 = vsel %vm970_vm1, %v963_v3, %v880_v57 }
  0xae   : > { %v988_v60 = vmul.f32 %v980_v59, %v3072_v54 }
  0xb0   : > { %v834_v62 = vpop.permute.xlu1 %833  ;;  %v812_v63 = vpop.permute.xlu0 %811  ;;  %2411 = vmatprep.mubr.msk.f32.mxu0 %vm3679_vm3, %v988_v60 }
  0xb1   : > { %v955_v31 = vsel %vm952_vm15, %v946_v30, %v834_v62  ;;  %v947_v41 = vsel %vm943_vm14, %v938_v38, %v812_v63 }
  0xb4   : > { %v766_v1 = vpop.permute.xlu1 %765  ;;  %v904_v6 = vpop.permute.xlu0 %903 }
  0xb5   : > { %v981_v7 = vsel %vm979_vm2, %v972_v4, %v904_v6  ;;  %v930_v55 = vsel %vm925_vm12, %v2965_v23, %v766_v1 }
  0xb6   : > { %v989_v8 = vmul.f32 %v981_v7, %v3072_v54 }
  0xb8   : > { %v858_v9 = vpop.permute.xlu1 %857  ;;  %v836_v10 = vpop.permute.xlu0 %835  ;;  %2412 = vmatmul.mubr.msk.f32.vlgmr.msra.gmra.mrb[8].mxu0 %vm3679_vm3, %v989_v8 }
  0xb9   : > { %v964_v32 = vsel %vm961_vm0, %v955_v31, %v858_v9  ;;  %v956_v42 = vsel %vm952_vm15, %v947_v41, %v836_v10 }
  0xbc   : > { %v790_v15 = vpop.permute.xlu1 %789  ;;  %v768_v17 = vpop.permute.xlu0 %767 }
  0xbd   : > { %v939_v56 = vsel %vm934_vm13, %v930_v55, %v790_v15  ;;  %v931_v23 = vsel %vm925_vm12, %v2976_v24, %v768_v17 }
  0xc0   : > { %v882_v18 = vpop.permute.xlu1 %881  ;;  %v860_v19 = vpop.permute.xlu0 %859 }
  0xc1   : > { %v973_v33 = vsel %vm970_vm1, %v964_v32, %v882_v18  ;;  %v965_v43 = vsel %vm961_vm0, %v956_v42, %v860_v19 }
  0xc4   : > { %v814_v28 = vpop.permute.xlu1 %813  ;;  %v792_v29 = vpop.permute.xlu0 %791 }
  0xc5   : > { %v948_v59 = vsel %vm943_vm14, %v939_v56, %v814_v28  ;;  %v940_v4 = vsel %vm934_vm13, %v931_v23, %v792_v29 }
  0xc8   : > { %v906_v34 = vpop.permute.xlu1 %905  ;;  %v884_v35 = vpop.permute.xlu0 %883 }
  0xc9   : > { %v982_v36 = vsel %vm979_vm2, %v973_v33, %v906_v34  ;;  %v974_v45 = vsel %vm970_vm1, %v965_v43, %v884_v35  ;;  %v2204_v35 = vld [vmem:[%s3662_s6] ss:$0 sm:$0xff] }
  0xca   : > { %v990_v37 = vmul.f32 %v982_v36, %v3072_v54 }
  0xcc   : > { %v838_v39 = vpop.permute.xlu1 %837  ;;  %v816_v40 = vpop.permute.xlu0 %815  ;;  %2414 = vmatprep.mubr.msk.f32.mxu0 %vm3679_vm3, %v990_v37 }
  0xcd   : > { %v957_v60 = vsel %vm952_vm15, %v948_v59, %v838_v39  ;;  %v949_v7 = vsel %vm943_vm14, %v940_v4, %v816_v40 }
  0xd0   : > { %v770_v46 = vpop.permute.xlu1 %769  ;;  %v908_v47 = vpop.permute.xlu0 %907 }
  0xd1   : > { %v983_v48 = vsel %vm979_vm2, %v974_v45, %v908_v47  ;;  %v932_v27 = vsel %vm925_vm12, %v2999_v25, %v770_v46 }
  0xd2   : > { %v991_v13 = vmul.f32 %v983_v48, %v3072_v54 }
  0xd4   : > { %v862_v44 = vpop.permute.xlu1 %861  ;;  %v840_v49 = vpop.permute.xlu0 %839  ;;  %2415 = vmatmul.mubr.msk.f32.gmra.mrb[10].mxu0 %vm3679_vm3, %v991_v13 }
  0xd5   : > { %v966_v61 = vsel %vm961_vm0, %v957_v60, %v862_v44  ;;  %v958_v8 = vsel %vm952_vm15, %v949_v7, %v840_v49 }
  0xd8   : > { %v794_v50 = vpop.permute.xlu1 %793  ;;  %v772_v51 = vpop.permute.xlu0 %771 }
  0xd9   : > { %v933_v28 = vsel %vm925_vm12, %v3010_v26, %v772_v51  ;;  %v941_v29 = vsel %vm934_vm13, %v932_v27, %v794_v50  ;;  %v3268_v27 = vld [vmem:[%s3664_s8] ss:$0 sm:$0xff] }
  0xdc   : > { %v886_v52 = vpop.permute.xlu1 %885  ;;  %v864_v53 = vpop.permute.xlu0 %863 }
  0xdd   : > { %v975_v62 = vsel %vm970_vm1, %v966_v61, %v886_v52  ;;  %v967_v9 = vsel %vm961_vm0, %v958_v8, %v864_v53 }
  0xe0   : > { %v818_v57 = vpop.permute.xlu1 %817  ;;  %v796_v58 = vpop.permute.xlu0 %795 }
  0xe1   : > { %v942_v30 = vsel %vm934_vm13, %v933_v28, %v796_v58  ;;  %v950_v33 = vsel %vm943_vm14, %v941_v29, %v818_v57 }
  0xe4   : > { %v910_v63 = vpop.permute.xlu1 %909  ;;  %v888_v0 = vpop.permute.xlu0 %887 }
  0xe5   : > { %v984_v2 = vsel %vm979_vm2, %v975_v62, %v910_v63  ;;  %v976_v10 = vsel %vm970_vm1, %v967_v9, %v888_v0 }
  0xe6   : > { %v992_v3 = vmul.f32 %v984_v2, %v3072_v54 }
  0xe8   : > { %v842_v1 = vpop.permute.xlu1 %841  ;;  %v820_v6 = vpop.permute.xlu0 %819  ;;  %2417 = vmatprep.mubr.msk.f32.mxu0 %vm3679_vm3, %v992_v3 }
  0xe9   : > { %v951_v34 = vsel %vm943_vm14, %v942_v30, %v820_v6  ;;  %v959_v36 = vsel %vm952_vm15, %v950_v33, %v842_v1 }
  0xec   : > { %v844_v15 = vpop.permute.xlu1 %843  ;;  %v912_v18 = vpop.permute.xlu0 %911 }
  0xed   : > { %v985_v19 = vsel %vm979_vm2, %v976_v10, %v912_v18  ;;  %v960_v25 = vsel %vm952_vm15, %v951_v34, %v844_v15 }
  0xee   : > { %v993_v24 = vmul.f32 %v985_v19, %v3072_v54 }
  0xef   : > { %v2375_v5 = vpop.f32.mrb[0].mxu0 }
  0xf0   : > { %v868_v17 = vpop.permute.xlu1 %867  ;;  %v866_v22 = vpop.permute.xlu0 %865  ;;  %2418 = vmatmul.mubr.msk.f32.gmra.mrb[12].mxu0 %vm3679_vm3, %v993_v24  ;;  %v572_v42 = vadd.f32 %v2375_v5, %v2204_v35 }
  0xf1   : > { %v969_v26 = vsel %vm961_vm0, %v960_v25, %v868_v17  ;;  %v968_v37 = vsel %vm961_vm0, %v959_v36, %v866_v22  ;;  %v566_v46 = vpop.f32.mrb[1].mxu0 }
  0xf2   : > { %v567_v13 = vadd.f32 %v2204_v35, %v566_v46  ;;  %v606_v44 = vmax.f32 %v572_v42, 0.0 }
  0xf3   : > { %v2378_v49 = vpop.f32.mrb[2].mxu0 }
  0xf4   : > { %v892_v31 = vpop.permute.xlu1 %891  ;;  %v890_v32 = vpop.permute.xlu0 %889  ;;  %v605_v50 = vmax.f32 %v567_v13, 0.0  ;;  %v582_v51 = vadd.f32 %v2378_v49, %v2204_v35 }
  0xf5   : > { %v978_v38 = vsel %vm970_vm1, %v969_v26, %v892_v31  ;;  %v977_v39 = vsel %vm970_vm1, %v968_v37, %v890_v32  ;;  %v576_v52 = vpop.f32.mrb[3].mxu0 }
  0xf6   : > { %v577_v53 = vadd.f32 %v2204_v35, %v576_v52  ;;  %2393 = vmatprep.mubr.msk.f32.mxu1 %vm3678_vm4, %v605_v50  ;;  %v608_v55 = vmax.f32 %v582_v51, 0.0 }
  0xf7   : > { %2394 = vmatmul.mubr.msk.f32.vlgmr.msra.gmra.mrb[0].mxu1 %vm3678_vm4, %v606_v44  ;;  %v2381_v57 = vpop.f32.mrb[4].mxu0 }
  0xf8   : > { %v916_v40 = vpop.permute.xlu1 %915  ;;  %v914_v41 = vpop.permute.xlu0 %913  ;;  %v607_v56 = vmax.f32 %v577_v53, 0.0 }
  0xf9   : > { %v987_v43 = vsel %vm979_vm2, %v978_v38, %v916_v40  ;;  %v986_v45 = vsel %vm979_vm2, %v977_v39, %v914_v41  ;;  %v586_v58 = vpop.f32.mrb[5].mxu0 }
  0xfa   : > { %v995_v47 = vmul.f32 %v987_v43, %v3072_v54  ;;  %v994_v48 = vmul.f32 %v986_v45, %v3072_v54  ;;  %v592_v54 = vadd.f32 %v2381_v57, %v2204_v35  ;;  %v587_v59 = vadd.f32 %v2204_v35, %v586_v58  ;;  %2396 = vmatprep.mubr.msk.f32.mxu1 %vm3678_vm4, %v607_v56 }
  0xfb   : > { %2397 = vmatmul.mubr.msk.f32.gmra.mrb[2].mxu1 %vm3678_vm4, %v608_v55  ;;  %v2384_v62 = vpop.f32.mrb[6].mxu0 }
  0xfc   : > { %2420 = vmatprep.mubr.msk.f32.mxu0 %vm3679_vm3, %v994_v48  ;;  %v610_v60 = vmax.f32 %v592_v54, 0.0  ;;  %v609_v61 = vmax.f32 %v587_v59, 0.0  ;;  %v602_v63 = vadd.f32 %v2384_v62, %v2204_v35  ;;  %v596_v0 = vpop.f32.mrb[7].mxu0 }
  0xfd   : > { %2421 = vmatmul.mubr.msk.f32.gmra.mrb[14].mxu0 %vm3679_vm3, %v995_v47  ;;  %v597_v2 = vadd.f32 %v2204_v35, %v596_v0 }
  0xfe   : > { %2399 = vmatprep.mubr.msk.f32.mxu1 %vm3678_vm4, %v609_v61  ;;  %v612_v3 = vmax.f32 %v602_v63, 0.0 }
  0xff   : > { %v611_v23 = vmax.f32 %v597_v2, 0.0  ;;  %2400 = vmatmul.mubr.msk.f32.gmra.mrb[4].mxu1 %vm3678_vm4, %v610_v60 }
 0x101   : > { %2402 = vmatprep.mubr.msk.f32.mxu1 %vm3678_vm4, %v611_v23 }
 0x103   : > { %2403 = vmatmul.mubr.msk.f32.gmra.mrb[6].mxu1 %vm3678_vm4, %v612_v3 }
 0x18b   : > { %v3159_v4 = vpop.f32.mrb[8].mxu0 }
 0x18c   : > { %1321 = vrot.lane.b32.xlu0 %v3159_v4, %s3674_s12  ;;  %1249 = vrot.lane.b32.xlu1 %v3159_v4, %s2736_s29  ;;  %v3165_v1 = vpop.f32.mrb[9].mxu0 }
 0x190   : > { %1345 = vrot.lane.b32.xlu0 %v3159_v4, %s2737_s18  ;;  %1273 = vrot.lane.b32.xlu1 %v3159_v4, %s2738_s21 }
 0x194   : > { %1369 = vrot.lane.b32.xlu0 %v3159_v4, %s3673_s30  ;;  %1297 = vrot.lane.b32.xlu1 %v3159_v4, %s2740_s11 }
 0x198   : > { %1393 = vrot.lane.b32.xlu0 %v3159_v4, %s3672_s27  ;;  %1343 = vrot.lane.b32.xlu1 %v3165_v1, %s2737_s18 }
 0x19c   : > { %1367 = vrot.lane.b32.xlu1 %v3165_v1, %s3673_s30  ;;  %1247 = vrot.lane.b32.xlu0 %v3165_v1, %s2736_s29 }
 0x1a0   : > { %1391 = vrot.lane.b32.xlu1 %v3165_v1, %s3672_s27  ;;  %1271 = vrot.lane.b32.xlu0 %v3165_v1, %s2738_s21 }
 0x1a4   : > { %1295 = vrot.lane.b32.xlu0 %v3165_v1, %s2740_s11 }
 0x1a7   : > { %v3189_v6 = vpop.f32.mrb[10].mxu0 }
 0x1a8   : > { %1319 = vrot.lane.b32.xlu0 %v3165_v1, %s3674_s12  ;;  %v3193_v7 = vpop.f32.mrb[11].mxu0 }
 0x1a9   : > { %1251 = vrot.lane.b32.xlu1 %v3193_v7, %s2736_s29 }
 0x1ac   : > { %1253 = vrot.lane.b32.xlu0 %v3189_v6, %s2736_s29 }
 0x1ad   : > { %1275 = vrot.lane.b32.xlu1 %v3193_v7, %s2738_s21 }
 0x1b0   : > { %1277 = vrot.lane.b32.xlu0 %v3189_v6, %s2738_s21 }
 0x1b1   : > { %1299 = vrot.lane.b32.xlu1 %v3193_v7, %s2740_s11 }
 0x1b4   : > { %1301 = vrot.lane.b32.xlu0 %v3189_v6, %s2740_s11 }
 0x1b5   : > { %1323 = vrot.lane.b32.xlu1 %v3193_v7, %s3674_s12 }
 0x1b8   : > { %1325 = vrot.lane.b32.xlu0 %v3189_v6, %s3674_s12 }
 0x1b9   : > { %1347 = vrot.lane.b32.xlu1 %v3193_v7, %s2737_s18 }
 0x1bc   : > { %1349 = vrot.lane.b32.xlu0 %v3189_v6, %s2737_s18 }
 0x1bd   : > { %1371 = vrot.lane.b32.xlu1 %v3193_v7, %s3673_s30 }
 0x1c0   : > { %1373 = vrot.lane.b32.xlu0 %v3189_v6, %s3673_s30 }
 0x1c1   : > { %1395 = vrot.lane.b32.xlu1 %v3193_v7, %s3672_s27 }
 0x1c3   : > { %v3221_v8 = vpop.f32.mrb[12].mxu0 }
 0x1c4   : > { %1397 = vrot.lane.b32.xlu0 %v3189_v6, %s3672_s27  ;;  %v3225_v9 = vpop.f32.mrb[13].mxu0 }
 0x1c5   : > { %1255 = vrot.lane.b32.xlu1 %v3225_v9, %s2736_s29 }
 0x1c8   : > { %1257 = vrot.lane.b32.xlu0 %v3221_v8, %s2736_s29 }
 0x1c9   : > { %1279 = vrot.lane.b32.xlu1 %v3225_v9, %s2738_s21 }
 0x1ca   : > { %v3249_v18 = vpop.f32.mrb[0].mxu1 }
 0x1cb   : > { %v3251_v19 = vpop.f32.mrb[1].mxu1 }
 0x1cc   : > { %1281 = vrot.lane.b32.xlu0 %v3221_v8, %s2738_s21 }
 0x1cd   : > { %1303 = vrot.lane.b32.xlu1 %v3225_v9, %s2740_s11 }
 0x1ce   : > { %v3257_v24 = vpop.f32.mrb[2].mxu1 }
 0x1cf   : > { %v3259_v17 = vpop.f32.mrb[3].mxu1 }
 0x1d0   : > { %1305 = vrot.lane.b32.xlu0 %v3221_v8, %s2740_s11  ;;  %v3239_v10 = vpop.f32.mrb[14].mxu0 }
 0x1d1   : > { %1327 = vrot.lane.b32.xlu1 %v3225_v9, %s3674_s12  ;;  %v3243_v15 = vpop.f32.mrb[15].mxu0 }
 0x1d2   : > { %v2401_v22 = vpop.f32.mrb[4].mxu1 }
 0x1d3   : > { %v730_v28 = vpop.f32.mrb[5].mxu1  ;;  %v3273_v29 = vadd.f32 %v2401_v22, %v3268_v27 }
 0x1d4   : > { %1329 = vrot.lane.b32.xlu0 %v3221_v8, %s3674_s12  ;;  %v3276_v30 = vadd.f32 %v3268_v27, %v730_v28 }
 0x1d5   : > { %1351 = vrot.lane.b32.xlu1 %v3225_v9, %s2737_s18 }
 0x1d6   : > { %v2404_v31 = vpop.f32.mrb[6].mxu1 }
 0x1d7   : > { %v3281_v32 = vadd.f32 %v2404_v31, %v3268_v27  ;;  %v740_v33 = vpop.f32.mrb[7].mxu1 }
 0x1d8   : > { %1353 = vrot.lane.b32.xlu0 %v3221_v8, %s2737_s18  ;;  %v3286_v34 = vadd.f32 %v3268_v27, %v740_v33 }
 0x1d9   : > { %1375 = vrot.lane.b32.xlu1 %v3225_v9, %s3673_s30 }
 0x1dc   : > { %1377 = vrot.lane.b32.xlu0 %v3221_v8, %s3673_s30 }
 0x1dd   : > { %1399 = vrot.lane.b32.xlu1 %v3225_v9, %s3672_s27 }
 0x1e0   : > { %1401 = vrot.lane.b32.xlu0 %v3221_v8, %s3672_s27 }
 0x1e1   : > { %1333 = vrot.lane.b32.xlu1 %v3239_v10, %s3674_s12 }
 0x1e4   : > { %1261 = vrot.lane.b32.xlu0 %v3239_v10, %s2736_s29 }
 0x1e5   : > { %1357 = vrot.lane.b32.xlu1 %v3239_v10, %s2737_s18 }
 0x1e8   : > { %1285 = vrot.lane.b32.xlu0 %v3239_v10, %s2738_s21 }
 0x1e9   : > { %1381 = vrot.lane.b32.xlu1 %v3239_v10, %s3673_s30 }
 0x1ec   : > { %1309 = vrot.lane.b32.xlu0 %v3239_v10, %s2740_s11 }
 0x1ed   : > { %1259 = vrot.lane.b32.xlu1 %v3243_v15, %s2736_s29 }
 0x1f0   : > { %1355 = vrot.lane.b32.xlu0 %v3243_v15, %s2737_s18 }
 0x1f1   : > { %1283 = vrot.lane.b32.xlu1 %v3243_v15, %s2738_s21 }
 0x1f4   : > { %1379 = vrot.lane.b32.xlu0 %v3243_v15, %s3673_s30  ;;  %s430_s30 = scalar_lea.vmem %s3660_s4, %s2856_s26 }
 0x1f5   : > { %1307 = vrot.lane.b32.xlu1 %v3243_v15, %s2740_s11 }
 0x1f8   : > { %1403 = vrot.lane.b32.xlu0 %v3243_v15, %s3672_s27 }
 0x1f9   : > { %1331 = vrot.lane.b32.xlu1 %v3243_v15, %s3674_s12  ;;  %s421_s12 = scalar_lea.vmem %s3658_s2, %s3686_s28 }
 0x1fd   : > { %1405 = vrot.lane.b32.xlu1 %v3239_v10, %s3672_s27  ;;  %s406_s27 = sand.u32 1, %s2716_s14  }
 0x1fe   : > { %v1322_v35 = vpop.permute.xlu0 %1321  ;;  %v1250_v36 = vpop.permute.xlu1 %1249  ;;  %s407_s28 = scalar_lea.vmem [#allocation2], %s406_s27 }
 0x1ff   : > { %v1416_v37 = vsel %vm3681_vm5, %v3159_v4, %v1250_v36 }
 0x202   : > { %v1346_v25 = vpop.permute.xlu0 %1345  ;;  %v1274_v26 = vpop.permute.xlu1 %1273 }
 0x203   : > { %v1424_v5 = vsel %vm3680_vm6, %v1416_v37, %v1274_v26 }
 0x206   : > { %v1370_v38 = vpop.permute.xlu0 %1369  ;;  %v1298_v39 = vpop.permute.xlu1 %1297 }
 0x207   : > { %v1432_v40 = vsel %vm3679_vm3, %v1424_v5, %v1298_v39 }
 0x208   : > { %v1440_v41 = vsel %vm3678_vm4, %v1432_v40, %v1322_v35 }
 0x209   : > { %v1448_v42 = vsel %vm3677_vm7, %v1440_v41, %v1346_v25 }
 0x20a   : > { %v1394_v43 = vpop.permute.xlu0 %1393  ;;  %v1456_v45 = vsel %vm3676_vm8, %v1448_v42, %v1370_v38  ;;  %v1344_v47 = vpop.permute.xlu1 %1343 }
 0x20b   : > { %v1464_v46 = vsel %vm3675_vm9, %v1456_v45, %v1394_v43 }
 0x20c   : > { %1481 = vrot.lane.b32.xlu1 %v1464_v46, %s2742_s20 }
 0x20e   : > { %v1248_v48 = vpop.permute.xlu0 %1247  ;;  %v1368_v13 = vpop.permute.xlu1 %1367 }
 0x20f   : > { %v1415_v51 = vsel %vm3681_vm5, %v3165_v1, %v1248_v48 }
 0x212   : > { %v1272_v44 = vpop.permute.xlu0 %1271  ;;  %v1392_v50 = vpop.permute.xlu1 %1391 }
 0x213   : > { %v1423_v52 = vsel %vm3680_vm6, %v1415_v51, %v1272_v44 }
 0x216   : > { %v1296_v49 = vpop.permute.xlu0 %1295 }
 0x217   : > { %v1431_v53 = vsel %vm3679_vm3, %v1423_v52, %v1296_v49 }
 0x21a   : > { %v1320_v55 = vpop.permute.xlu0 %1319 }
 0x21b   : > { %v1439_v56 = vsel %vm3678_vm4, %v1431_v53, %v1320_v55  ;;  %v1252_v57 = vpop.permute.xlu1 %1251 }
 0x21c   : > { %v1447_v54 = vsel %vm3677_vm7, %v1439_v56, %v1344_v47  ;;  %v1417_v4 = vsel %vm3681_vm5, %v3193_v7, %v1252_v57 }
 0x21d   : > { %v1455_v58 = vsel %vm3676_vm8, %v1447_v54, %v1368_v13 }
 0x21e   : > { %v1254_v59 = vpop.permute.xlu0 %1253  ;;  %v1463_v60 = vsel %vm3675_vm9, %v1455_v58, %v1392_v50 }
 0x21f   : > { %v1276_v61 = vpop.permute.xlu1 %1275  ;;  %1479 = vrot.lane.b32.xlu0 %v1463_v60, %s2742_s20  ;;  %v1418_v33 = vsel %vm3681_vm5, %v3189_v6, %v1254_v59 }
 0x220   : > { %v1425_v22 = vsel %vm3680_vm6, %v1417_v4, %v1276_v61 }
 0x222   : > { %v1278_v62 = vpop.permute.xlu0 %1277 }
 0x223   : > { %v1300_v63 = vpop.permute.xlu1 %1299  ;;  %v1426_v36 = vsel %vm3680_vm6, %v1418_v33, %v1278_v62 }
 0x224   : > { %v1433_v31 = vsel %vm3679_vm3, %v1425_v22, %v1300_v63 }
 0x226   : > { %v1302_v0 = vpop.permute.xlu0 %1301 }
 0x227   : > { %v1324_v2 = vpop.permute.xlu1 %1323  ;;  %v1434_v37 = vsel %vm3679_vm3, %v1426_v36, %v1302_v0 }
 0x228   : > { %v1441_v35 = vsel %vm3678_vm4, %v1433_v31, %v1324_v2 }
 0x22a   : > { %v1326_v3 = vpop.permute.xlu0 %1325 }
 0x22b   : > { %v1348_v23 = vpop.permute.xlu1 %1347  ;;  %v1442_v38 = vsel %vm3678_vm4, %v1434_v37, %v1326_v3 }
 0x22c   : > { %v1449_v25 = vsel %vm3677_vm7, %v1441_v35, %v1348_v23 }
 0x22e   : > { %v1350_v1 = vpop.permute.xlu0 %1349 }
 0x22f   : > { %v1372_v28 = vpop.permute.xlu1 %1371  ;;  %v1450_v40 = vsel %vm3677_vm7, %v1442_v38, %v1350_v1 }
 0x230   : > { %v1457_v7 = vsel %vm3676_vm8, %v1449_v25, %v1372_v28 }
 0x232   : > { %v1374_v26 = vpop.permute.xlu0 %1373 }
 0x233   : > { %v1396_v5 = vpop.permute.xlu1 %1395  ;;  %v1458_v6 = vsel %vm3676_vm8, %v1450_v40, %v1374_v26 }
 0x234   : > { %v1465_v39 = vsel %vm3675_vm9, %v1457_v7, %v1396_v5 }
 0x235   : > { %1483 = vrot.lane.b32.xlu0 %v1465_v39, %s2742_s20 }
 0x236   : > { %v1398_v41 = vpop.permute.xlu0 %1397 }
 0x237   : > { %v1466_v42 = vsel %vm3675_vm9, %v1458_v6, %v1398_v41  ;;  %v1256_v43 = vpop.permute.xlu1 %1255 }
 0x238   : > { %1485 = vrot.lane.b32.xlu1 %v1466_v42, %s2742_s20  ;;  %v1419_v51 = vsel %vm3681_vm5, %v3225_v9, %v1256_v43 }
 0x23a   : > { %v1258_v45 = vpop.permute.xlu0 %1257 }
 0x23b   : > { %v1280_v46 = vpop.permute.xlu1 %1279  ;;  %v1420_v57 = vsel %vm3681_vm5, %v3221_v8, %v1258_v45 }
 0x23c   : > { %v1427_v53 = vsel %vm3680_vm6, %v1419_v51, %v1280_v46  ;;  %v3391_v51 = vld [vmem:[%s421_s12] sm:$0xff]  ;;  %s3696_s12 = smov 48  }
 0x23e   : > { %v1282_v47 = vpop.permute.xlu0 %1281 }
 0x23f   : > { %v1304_v48 = vpop.permute.xlu1 %1303  ;;  %v1428_v58 = vsel %vm3680_vm6, %v1420_v57, %v1282_v47 }
 0x240   : > { %v1435_v56 = vsel %vm3679_vm3, %v1427_v53, %v1304_v48  ;;  %v1197_v48 = vmul.u32 8, %v2910_v12  ;;  %v1194_v53 = vadd.s32 40, %v2908_v11 }
 0x242   : > { %v1306_v13 = vpop.permute.xlu0 %1305  ;;  %vm1198_vm10 = vcmp.ge.s32.totalorder %v2908_v11, %v1197_v48  ;;  %vm1199_vm11 = vcmp.ge.s32.totalorder %v2921_v14, %v1197_v48  ;;  %vm1200_vm15 = vcmp.ge.s32.totalorder %v2942_v20, %v1197_v48 }
 0x243   : > { %v1328_v44 = vpop.permute.xlu1 %1327  ;;  %v1436_v61 = vsel %vm3679_vm3, %v1428_v58, %v1306_v13  ;;  %v1206_v13 = vmul.u32 8, %v2925_v16  ;;  %v1192_v16 = vadd.s32 24, %v2908_v11 }
 0x244   : > { %v1443_v54 = vsel %vm3678_vm4, %v1435_v56, %v1328_v44 }
 0x245   : > { %vm1207_vm12 = vcmp.lt.s32.totalorder %v2908_v11, %v1206_v13  ;;  %vm1208_vm13 = vcmp.lt.s32.totalorder %v2921_v14, %v1206_v13  ;;  %vm1209_vm0 = vcmp.lt.s32.totalorder %v2942_v20, %v1206_v13  ;;  %v1196_v20 = vadd.s32 56, %v2908_v11 }
 0x246   : > { %v1330_v49 = vpop.permute.xlu0 %1329  ;;  %vm1215_vm14 = vmand %vm1198_vm10, %vm1207_vm12  ;;  %vm1210_vm10 = vcmp.lt.s32.totalorder %v1192_v16, %v1206_v13 }
 0x247   : > { %v1352_v50 = vpop.permute.xlu1 %1351  ;;  %v1444_v63 = vsel %vm3678_vm4, %v1436_v61, %v1330_v49  ;;  %vm1216_vm1 = vmand %vm1199_vm11, %vm1208_vm13  ;;  %vm1203_vm13 = vcmp.ge.s32.totalorder %v1194_v53, %v1197_v48 }
 0x248   : > { %v1451_v59 = vsel %vm3677_vm7, %v1443_v54, %v1352_v50  ;;  %vm3406_vm2 = vmpackc.low %vm1216_vm1, %vm1215_vm14  ;;  %vm1212_vm14 = vcmp.lt.s32.totalorder %v1194_v53, %v1206_v13  ;;  %v3438_v54 = vadd.f32 %v3249_v18, %v3268_v27  ;;  %v3465_v18 = vadd.f32 %v3268_v27, %v3251_v19 }
 0x249   : > { %2535 = vmatprep.subr.msk.bf16.mxu1 %vm3406_vm2, %v2732_v21  ;;  %vm1217_vm12 = vmand %vm1200_vm15, %vm1209_vm0 }
 0x24a   : > { %v1354_v52 = vpop.permute.xlu0 %1353  ;;  %2537 = vmatpush3.bf16.msk.msra.mxu1 %vm3406_vm2, %v2732_v21 }
 0x24b   : > { %v1376_v55 = vpop.permute.xlu1 %1375  ;;  %v1452_v2 = vsel %vm3677_vm7, %v1444_v63, %v1354_v52  ;;  %v1193_v52 = vadd.s32 32, %v2908_v11 }
 0x24c   : > { %v1459_v9 = vsel %vm3676_vm8, %v1451_v59, %v1376_v55  ;;  %v1195_v55 = vadd.s32 48, %v2908_v11 }
 0x24e   : > { %v1378_v60 = vpop.permute.xlu0 %1377  ;;  %vm1204_vm0 = vcmp.ge.s32.totalorder %v1195_v55, %v1197_v48 }
 0x24f   : > { %v1400_v62 = vpop.permute.xlu1 %1399  ;;  %v1460_v8 = vsel %vm3676_vm8, %v1452_v2, %v1378_v60  ;;  %v3476_v2 = vadd.f32 %v3257_v24, %v3268_v27 }
 0x250   : > { %v1467_v0 = vsel %vm3675_vm9, %v1459_v9, %v1400_v62  ;;  %v3471_v62 = vadd.f32 %v3268_v27, %v3259_v17 }
 0x251   : > { %1487 = vrot.lane.b32.xlu0 %v1467_v0, %s2742_s20 }
 0x252   : > { %v1402_v3 = vpop.permute.xlu0 %1401 }
 0x253   : > { %v1468_v23 = vsel %vm3675_vm9, %v1460_v8, %v1402_v3  ;;  %v1334_v4 = vpop.permute.xlu1 %1333 }
 0x254   : > { %1489 = vrot.lane.b32.xlu1 %v1468_v23, %s2742_s20 }
 0x256   : > { %v1262_v1 = vpop.permute.xlu0 %1261 }
 0x257   : > { %v1358_v22 = vpop.permute.xlu1 %1357  ;;  %v1422_v26 = vsel %vm3681_vm5, %v3239_v10, %v1262_v1 }
 0x25a   : > { %v1286_v28 = vpop.permute.xlu0 %1285 }
 0x25b   : > { %v1382_v31 = vpop.permute.xlu1 %1381  ;;  %v1430_v37 = vsel %vm3680_vm6, %v1422_v26, %v1286_v28  ;;  %v2743_v26 = vmov 0  }
 0x25c   : > { %2658 = vset.pattern.permute.xlu1 %v2743_v26  ;;  %2659 = vset.pattern.permute.xlu0 %v2743_v26 }
 0x25e   : > { %v1310_v33 = vpop.permute.xlu0 %1309 }
 0x25f   : > { %v1260_v35 = vpop.permute.xlu1 %1259  ;;  %v1438_v7 = vsel %vm3679_vm3, %v1430_v37, %v1310_v33  ;;  %v3501_v37 = vld [vmem:[%s430_s30] sm:$0xff] }
 0x260   : > { %v1446_v39 = vsel %vm3678_vm4, %v1438_v7, %v1334_v4  ;;  %v1421_v40 = vsel %vm3681_vm5, %v3243_v15, %v1260_v35  ;;  %vm1214_vm5 = vcmp.lt.s32.totalorder %v1196_v20, %v1206_v13  ;;  %v3503_v7 = vld [vmem:[%s430_s30 + $0x10] sm:$0xff] }
 0x261   : > { %v1454_v10 = vsel %vm3677_vm7, %v1446_v39, %v1358_v22  ;;  %v3510_v39 = vld [vmem:[%s430_s30 + $0x28] sm:$0xff] }
 0x262   : > { %v1356_v36 = vpop.permute.xlu0 %1355  ;;  %v1462_v15 = vsel %vm3676_vm8, %v1454_v10, %v1382_v31  ;;  %v3521_v10 = vld [vmem:[%s430_s30 + $0x30] sm:$0xff] }
 0x263   : > { %v1284_v25 = vpop.permute.xlu1 %1283 }
 0x264   : > { %v1429_v6 = vsel %vm3680_vm6, %v1421_v40, %v1284_v25  ;;  %vm1205_vm6 = vcmp.ge.s32.totalorder %v1196_v20, %v1197_v48  ;;  %v3512_v40 = vld [vmem:[%s430_s30 + $0x8] sm:$0xff] }
 0x266   : > { %v1380_v38 = vpop.permute.xlu0 %1379 }
 0x267   : > { %v1308_v5 = vpop.permute.xlu1 %1307 }
 0x268   : > { %v1437_v41 = vsel %vm3679_vm3, %v1429_v6, %v1308_v5  ;;  %vm1220_vm3 = vmand %vm1203_vm13, %vm1212_vm14  ;;  %v3505_v5 = vld [vmem:[%s430_s30 + $0x18] sm:$0xff]  ;;  %vm3704_vm13 = vcmask 457728   ;;  %vm2745_vm14 = vmmov 0  }
 0x26a   : > { %v1404_v46 = vpop.permute.xlu0 %1403 }
 0x26b   : > { %v1332_v42 = vpop.permute.xlu1 %1331 }
 0x26c   : > { %v1445_v43 = vsel %vm3678_vm4, %v1437_v41, %v1332_v42  ;;  %vm1213_vm4 = vcmp.lt.s32.totalorder %v1195_v55, %v1206_v13  ;;  %v2579_v41 = vpack.c.bf16 %v3512_v40, %v3501_v37  ;;  %v3517_v42 = vld [vmem:[%s430_s30 + $0x38] sm:$0xff] }
 0x26d   : > { %v1453_v45 = vsel %vm3677_vm7, %v1445_v43, %v1356_v36  ;;  %vm1211_vm7 = vcmp.lt.s32.totalorder %v1193_v52, %v1206_v13  ;;  %v3519_v43 = vld [vmem:[%s430_s30 + $0x20] sm:$0xff] }
 0x26e   : > { %v1461_v47 = vsel %vm3676_vm8, %v1453_v45, %v1380_v38  ;;  %vm1202_vm8 = vcmp.ge.s32.totalorder %v1193_v52, %v1197_v48  ;;  %v2582_v38 = vpack.c.bf16 %v3505_v5, %v3503_v7 }
 0x26f   : > { %v1406_v44 = vpop.permute.xlu1 %1405  ;;  %v1469_v49 = vsel %vm3675_vm9, %v1461_v47, %v1404_v46  ;;  %vm1219_vm15 = vmand %vm1202_vm8, %vm1211_vm7  ;;  %v2585_v47 = vpack.c.bf16 %v3510_v39, %v3519_v43 }
 0x270   : > { %v1470_v50 = vsel %vm3675_vm9, %v1462_v15, %v1406_v44  ;;  %1491 = vrot.lane.b32.xlu0 %v1469_v49, %s2742_s20  ;;  %vm1201_vm9 = vcmp.ge.s32.totalorder %v1192_v16, %v1197_v48  ;;  %vm1221_vm7 = vmand %vm1204_vm0, %vm1213_vm4  ;;  %vm3698_vm4 = vcmask 64512   ;;  %v2588_v48 = vpack.c.bf16 %v3517_v42, %v3521_v10 }
 0x271   : > { %1493 = vrot.lane.b32.xlu1 %v1470_v50, %s2742_s20  ;;  %vm1218_vm11 = vmand %vm1201_vm9, %vm1210_vm10  ;;  %vm3701_vm10 = vcmask 261120  }
 0x272   : > { %vm3422_vm1 = vmpackc.low %vm1218_vm11, %vm1217_vm12  ;;  %vm3702_vm12 = vcmask 326656   ;;  %vm1535_vm11 = vcmask 523264  }
 0x273   : > { %2539 = vmatprep.subr.msk.bf16.mxu1 %vm3422_vm1, %v2732_v21  ;;  %vm3432_vm9 = vmpackc.low %vm1220_vm3, %vm1219_vm15 }
 0x274   : > { %1151 = vrot.lane.b32.xlu0 %v3391_v51, %s2736_s29  ;;  %2541 = vmatpush3.bf16.msk.msra.mxu1 %vm3422_vm1, %v2732_v21  ;;  %vm1222_vm8 = vmand %vm1205_vm6, %vm1214_vm5  ;;  %s3697_s29 = smov 56   ;;  %vm3699_vm5 = vcmask 130048   ;;  %vm3700_vm6 = vcmask 195584  }
 0x275   : > { %1154 = vrot.lane.b32.xlu1 %v3391_v51, %s2738_s21  ;;  %2543 = vmatprep.subr.msk.bf16.mxu1 %vm3432_vm9, %v2732_v21  ;;  %vm3446_vm3 = vmpackc.low %vm1222_vm8, %vm1221_vm7  ;;  %vm2074_vm8 = vcmask 57344   ;;  %s2077_s21 = scalar_lea.sflag [#allocation3], %s406_s27 }
 0x276   : > { %vm3706_vm7 = vmmov %vm3698_vm4 }
 0x278   : > { %1163 = vrot.lane.b32.xlu0 %v3391_v51, %s2737_s18  ;;  %2545 = vmatpush3.bf16.msk.msra.mxu1 %vm3432_vm9, %v2732_v21 }
 0x279   : > { %1157 = vrot.lane.b32.xlu1 %v3391_v51, %s2740_s11  ;;  %2547 = vmatprep.subr.msk.bf16.mxu1 %vm3446_vm3, %v2732_v21 }
 0x27c   : > { %2549 = vmatpush3.bf16.msk.msra.mxu1 %vm3446_vm3, %v2732_v21 }
 0x27d   : > { %1160 = vrot.lane.b32.xlu1 %v3391_v51, %s3693_s25  ;;  %2551 = vmatprep.subr.msk.bf16.mxu1 %vm3406_vm2, %v2732_v21  ;;  %s2089_s25 = sshll.u32 %s407_s28, 4  ;;  %s3616_s25 = int_to_ptr.vmem [resolvable:$true] %s2089_s25 }
 0x27e   : > { %v1482_v58 = vpop.permute.xlu1 %1481  ;;  %s2662_s30 = scalar_lea.vmem %s3616_s25, 16 }
 0x27f   : > { %v1504_v59 = vmul.f32 %v1482_v58, %v3438_v54  ;;  %p2663_p11 = scmp.ne.s32.totalorder %s3616_s25, %s2662_s30 }
 0x281   : > { %1521 = vrot.lane.b32.xlu1 %v1504_v59, %s2742_s20  ;;  %p2664_p12 = pnand %p2663_p11, %p2841_p5 }
 0x283   : > { %p2665_p13 = pneg %p2664_p12 }
 0x291   : > { %v1480_v61 = vpop.permute.xlu0 %1479 }
 0x292   : > { %v1503_v9 = vmul.f32 %v1480_v61, %v3465_v18 }
 0x294   : > { %1519 = vrot.lane.b32.xlu0 %v1503_v9, %s2742_s20 }
 0x2a7   : > { %v1484_v63 = vpop.permute.xlu0 %1483 }
 0x2a8   : > { %v1505_v0 = vmul.f32 %v1484_v63, %v3471_v62 }
 0x2aa   : > { %v1486_v8 = vpop.permute.xlu1 %1485  ;;  %1523 = vrot.lane.b32.xlu0 %v1505_v0, %s2742_s20 }
 0x2ab   : > { %v1506_v19 = vmul.f32 %v1486_v8, %v3476_v2 }
 0x2ad   : > { %1525 = vrot.lane.b32.xlu1 %v1506_v19, %s2742_s20 }
 0x2b1   : > { %1166 = vrot.lane.b32.xlu1 %v3391_v51, %s3696_s12 }
 0x2b5   : > { %1169 = vrot.lane.b32.xlu1 %v3391_v51, %s3697_s29 }
 0x2b9   : > { %1788 = vperm.xlu1 %2658, %v3501_v37  }
 0x2bd   : > { %1798 = vperm.xlu1 %2658, %v3503_v7  }
 0x2c1   : > { %1803 = vperm.xlu1 %2658, %v3505_v5  }
 0x2c3   : > { %v1488_v23 = vpop.permute.xlu0 %1487 }
 0x2c4   : > { %v1507_v24 = vmul.f32 %v1488_v23, %v3276_v30 }
 0x2c5   : > { %1813 = vperm.xlu1 %2658, %v3510_v39  }
 0x2c6   : > { %v1490_v17 = vpop.permute.xlu1 %1489 }
 0x2c7   : > { %v1508_v3 = vmul.f32 %v1490_v17, %v3273_v29 }
 0x2c9   : > { %1529 = vrot.lane.b32.xlu0 %v1508_v3, %s2742_s20  ;;  %1823 = vperm.xlu1 %2658, %v3517_v42  }
 0x2cd   : > { %1527 = vrot.lane.b32.xlu0 %v1507_v24, %s2742_s20 }
 0x2e2   : > { %v1492_v27 = vpop.permute.xlu0 %1491 }
 0x2e3   : > { %v1509_v4 = vmul.f32 %v1492_v27, %v3286_v34  ;;  %v1494_v1 = vpop.permute.xlu1 %1493 }
 0x2e4   : > { %v1510_v28 = vmul.f32 %v1494_v1, %v3281_v32 }
 0x2e5   : > { %1531 = vrot.lane.b32.xlu0 %v1509_v4, %s2742_s20 }
 0x2e6   : > { %v1152_v22 = vpop.permute.xlu0 %1151 }
 0x2e7   : > { %v1155_v31 = vpop.permute.xlu1 %1154  ;;  %v1173_v33 = vsel %vm3698_vm4, %v3391_v51, %v1152_v22 }
 0x2e8   : > { %v1175_v35 = vsel %vm3699_vm5, %v1173_v33, %v1155_v31  ;;  %v1834_v33 = vmul.u32 8, %v2908_v11 }
 0x2e9   : > { %1533 = vrot.lane.b32.xlu0 %v1510_v28, %s2742_s20  ;;  %s2281_s20 = sshll.u32 %s2824_s17, 4  ;;  %s2747_s17 = smov [#allocation2]  }
 0x2ea   : > { %v1164_v45 = vpop.permute.xlu0 %1163  ;;  %s3614_s18 = scalar_lea.hbm %s3666_s10, %s2281_s20  ;;  %s2666_s26 = sshll.u32 %s2747_s17, 4  ;;  %s2667_s26 = int_to_ptr.vmem [resolvable:$false] %s2666_s26 }
 0x2eb   : > { %v1158_v36 = vpop.permute.xlu1 %1157  ;;  %s2668_s11 = scalar_lea.vmem %s2667_s26, 32  ;;  %p2669_p0 = scmp.lt.s32.totalorder %s3616_s25, %s2667_s26 }
 0x2ec   : > { %v1176_v25 = vsel %vm3700_vm6, %v1175_v35, %v1158_v36  ;;  %p2670_p1 = scmp.lt.s32.totalorder %s2668_s11, %s2662_s30 }
 0x2ed   : > { %1793 = vperm.xlu0 %2659, %v3512_v40  }
 0x2ee   : > { %p2671_p2 = por %p2670_p1, %p2669_p0 }
 0x2ef   : > { %v1161_v6 = vpop.permute.xlu1 %1160 }
 0x2f0   : > { %v1177_v46 = vsel %vm3701_vm10, %v1176_v25, %v1161_v6  ;;  %p2672_p3 = pnand %p2671_p2, %p2665_p13 }
 0x2f1   : > { %v1179_v13 = vsel %vm3702_vm12, %v1177_v46, %v1164_v45  ;;  %1808 = vperm.xlu0 %2659, %v3519_v43  }
 0x2f3   : > { %v1522_v44 = vpop.permute.xlu1 %1521 }
 0x2f5   : > { %1818 = vperm.xlu0 %2659, %v3521_v10  }
 0x306   : > { %v1520_v15 = vpop.permute.xlu0 %1519 }
 0x307   : > { %2439 = vmatprep.mubr.msk.f32.mxu1 %vm1535_vm11, %v1520_v15 }
 0x308   : > { %2440 = vmatmul.mubr.msk.f32.vlgmr.msra.gmra.mrb[8].mxu1 %vm1535_vm11, %v1522_v44 }
 0x309   : > { %2553 = vmatpush3.bf16.msk.msra.mxu1 %vm3406_vm2, %v2732_v21  ;;  %vm3703_vm2 = vcmask 392192  }
 0x30a   : > { %2555 = vmatprep.subr.msk.bf16.mxu1 %vm3422_vm1, %v2732_v21 }
 0x30d   : > { %2557 = vmatpush3.bf16.msk.msra.mxu1 %vm3422_vm1, %v2732_v21  ;;  %vm1835_vm1 = vcmp.ge.s32.totalorder %v2910_v12, %v1834_v33 }
 0x30e   : > { %2559 = vmatprep.subr.msk.bf16.mxu1 %vm3432_vm9, %v2732_v21 }
 0x311   : > { %2561 = vmatpush3.bf16.msk.msra.mxu1 %vm3432_vm9, %v2732_v21  ;;  %vm3705_vm9 = vmmov %vm3698_vm4 }
 0x312   : > { %2563 = vmatprep.subr.msk.bf16.mxu1 %vm3446_vm3, %v2732_v21 }
 0x315   : > { %2565 = vmatpush3.bf16.msk.msra.mxu1 %vm3446_vm3, %v2732_v21 }
 0x31c   : > { %v1524_v49 = vpop.permute.xlu0 %1523 }
 0x31d   : > { %2442 = vmatprep.mubr.msk.f32.mxu1 %vm1535_vm11, %v1524_v49 }
 0x31f   : > { %v1526_v50 = vpop.permute.xlu1 %1525 }
 0x320   : > { %2443 = vmatmul.mubr.msk.f32.gmra.mrb[10].mxu1 %vm1535_vm11, %v1526_v50 }
 0x323   : > { %v1167_v53 = vpop.permute.xlu1 %1166 }
 0x324   : > { %v1181_v14 = vsel %vm3703_vm2, %v1179_v13, %v1167_v53 }
 0x327   : > { %v1170_v55 = vpop.permute.xlu1 %1169 }
 0x328   : > { %v1183_v56 = vsel %vm3704_vm13, %v1181_v14, %v1170_v55 }
 0x329   : > { %v1184_v57 = vmul.f32 %v1183_v56, %v3465_v18  ;;  %v1185_v58 = vmul.f32 %v1183_v56, %v3438_v54  ;;  %v1186_v59 = vmul.f32 %v1183_v56, %v3471_v62  ;;  %v1187_v60 = vmul.f32 %v1183_v56, %v3476_v2 }
 0x32a   : > { %v1188_v61 = vmul.f32 %v1183_v56, %v3276_v30  ;;  %v1189_v18 = vmul.f32 %v1183_v56, %v3273_v29  ;;  %v1190_v9 = vmul.f32 %v1183_v56, %v3286_v34  ;;  %v1191_v54 = vmul.f32 %v1183_v56, %v3281_v32 }
 0x32b   : > { %v2744_v62 = vmov 0.0|0.0   ;;  %v2746_v30 = vmov 0.0   ;;  %v1836_v32 = vadd.s32 1, %v2908_v11 }
 0x32c   : > { %2566 = vmatprep.subr.bf16.mxu0 %v2744_v62  ;;  %2495 = vmatprep.mubr.msk.f32.mxu0 %vm2745_vm14, %v2746_v30 }
 0x32d   : > { %v1837_v35 = vmul.u32 8, %v1836_v32 }
 0x32f   : > { %vm1838_vm15 = vcmp.lt.s32.totalorder %v2910_v12, %v1837_v35  ;;  %v464_v12 = vld [vmem:[%s3665_s9] sm:$0xff] }
 0x330   : > { %vm1839_vm0 = vmand %vm1835_vm1, %vm1838_vm15 }
 0x331   : > { %v2277_v50 = vsel %vm1839_vm0, 1.0, %v2746_v30 }
 0x338   : > { %v1789_v63 = vpop.permute.xlu1 %1788 }
 0x33b   : > { %v1530_v16 = vpop.permute.xlu0 %1529 }
 0x33c   : > { %v1799_v0 = vpop.permute.xlu1 %1798 }
 0x33f   : > { %v1528_v52 = vpop.permute.xlu0 %1527 }
 0x340   : > { %2445 = vmatprep.mubr.msk.f32.mxu1 %vm1535_vm11, %v1528_v52  ;;  %v1804_v29 = vpop.permute.xlu1 %1803 }
 0x341   : > { %2446 = vmatmul.mubr.msk.f32.gmra.mrb[12].mxu1 %vm1535_vm11, %v1530_v16 }
 0x344   : > { %v1814_v4 = vpop.permute.xlu1 %1813 }
 0x348   : > { %v1824_v6 = vpop.permute.xlu1 %1823 }
 0x357   : > { %v1532_v20 = vpop.permute.xlu0 %1531 }
 0x358   : > { %2448 = vmatprep.mubr.msk.f32.mxu1 %vm1535_vm11, %v1532_v20 }
 0x35b   : > { %v1534_v21 = vpop.permute.xlu0 %1533 }
 0x35c   : > { %2449 = vmatmul.mubr.msk.f32.gmra.mrb[14].mxu1 %vm1535_vm11, %v1534_v21 }
 0x35d   : > { %2467 = vmatprep.mubr.msk.f32.mxu1 %vm1535_vm11, %v1184_v57 }
 0x360   : > { %2468 = vmatmul.mubr.msk.f32.vlgmr.msra.gmra.mrb[8].mxu1 %vm1535_vm11, %v1185_v58 }
 0x361   : > { %2470 = vmatprep.mubr.msk.f32.mxu1 %vm1535_vm11, %v1186_v59 }
 0x364   : > { %2471 = vmatmul.mubr.msk.f32.gmra.mrb[10].mxu1 %vm1535_vm11, %v1187_v60 }
 0x365   : > { %2473 = vmatprep.mubr.msk.f32.mxu1 %vm1535_vm11, %v1188_v61 }
 0x368   : > { %2474 = vmatmul.mubr.msk.f32.gmra.mrb[12].mxu1 %vm1535_vm11, %v1189_v18 }
 0x369   : > { %2476 = vmatprep.mubr.msk.f32.mxu1 %vm1535_vm11, %v1190_v9 }
 0x36c   : > { %2477 = vmatmul.mubr.msk.f32.gmra.mrb[14].mxu1 %vm1535_vm11, %v1191_v54  ;;  %v1794_v2 = vpop.permute.xlu0 %1793 }
 0x370   : > { %v1809_v22 = vpop.permute.xlu0 %1808 }
 0x374   : > { %v1819_v13 = vpop.permute.xlu0 %1818 }
 0x433   : > { %v2469_v8 = vpop.f32.mrb[8].mxu1 }
 0x434   : > { %v1827_v34 = vmul.f32 %v2469_v8, %v1794_v2  ;;  %v1747_v19 = vpop.f32.mrb[9].mxu1 }
 0x435   : > { %v1826_v17 = vmul.f32 %v1789_v63, %v1747_v19 }
 0x437   : > { %v2567_v3 = vpack.c.bf16 %v1827_v34, %v1826_v17  ;;  %v2472_v23 = vpop.f32.mrb[10].mxu1 }
 0x438   : > { %v1829_v24 = vmul.f32 %v2472_v23, %v1804_v29  ;;  %v1757_v27 = vpop.f32.mrb[11].mxu1 }
 0x439   : > { %v1828_v1 = vmul.f32 %v1799_v0, %v1757_v27  ;;  %2568 = vmatpush3.bf16.msra.mxu0 %v2567_v3 }
 0x43a   : > { %2569 = vmatprep.subr.bf16.mxu0 %v2744_v62 }
 0x43b   : > { %v2570_v28 = vpack.c.bf16 %v1829_v24, %v1828_v1  ;;  %v2475_v31 = vpop.f32.mrb[12].mxu1 }
 0x43c   : > { %v1831_v36 = vmul.f32 %v2475_v31, %v1814_v4  ;;  %v1767_v25 = vpop.f32.mrb[13].mxu1 }
 0x43d   : > { %v1830_v26 = vmul.f32 %v1809_v22, %v1767_v25  ;;  %2571 = vmatpush3.bf16.msra.mxu0 %v2570_v28 }
 0x43e   : > { %2572 = vmatprep.subr.bf16.mxu0 %v2744_v62 }
 0x43f   : > { %v2573_v45 = vpack.c.bf16 %v1831_v36, %v1830_v26  ;;  %v2478_v46 = vpop.f32.mrb[14].mxu1 }
 0x440   : > { %v1833_v15 = vmul.f32 %v2478_v46, %v1824_v6  ;;  %v1777_v44 = vpop.f32.mrb[15].mxu1 }
 0x441   : > { %v1832_v49 = vmul.f32 %v1819_v13, %v1777_v44  ;;  %2574 = vmatpush3.bf16.msra.mxu0 %v2573_v45 }
 0x442   : > { %2575 = vmatprep.subr.bf16.mxu0 %v2744_v62 }
 0x443   : > { %v2576_v11 = vpack.c.bf16 %v1833_v15, %v1832_v49 }
 0x445   : > { %2577 = vmatpush3.bf16.msra.mxu0 %v2576_v11 }
 0x446   : > { %2578 = vmatprep.subr.bf16.mxu0 %v2744_v62 }
 0x448   : > { %2496 = vmatmul.mubr.msk.f32.vlgmr.msra.gmra.mrb[16].mxu0 %vm1535_vm11, %v2277_v50 }
 0x449   : > { %2580 = vmatpush3.bf16.msra.mxu0 %v2579_v41  ;;  %2514 = vmatprep.mubr.msk.f32.mxu0 %vm2745_vm14, %v2746_v30 }
 0x44a   : > { %2581 = vmatprep.subr.bf16.mxu0 %v2744_v62 }
 0x44d   : > { %2583 = vmatpush3.bf16.msra.mxu0 %v2582_v38 }
 0x44e   : > { %2584 = vmatprep.subr.bf16.mxu0 %v2744_v62 }
 0x451   : > { %2586 = vmatpush3.bf16.msra.mxu0 %v2585_v47 }
 0x452   : > { %2587 = vmatprep.subr.bf16.mxu0 %v2744_v62 }
 0x455   : > { %2589 = vmatpush3.bf16.msra.mxu0 %v2588_v48 }
 0x456   : > { %2517 = vmatprep.subr.mxu0 %v2746_v30 }
 0x458   : > { %2515 = vmatmul.mubr.msk.f32.vlgmr.msra.gmra.mrb[18].mxu0 %vm1535_vm11, %v2277_v50 }
 0x459   : > { %2518 = vmatpush3.msra.mxu0 %v464_v12  ;;  %2519 = vmatprep.mubr.msk.f32.mxu0 %vm2745_vm14, %v2746_v30 }
 0x45c   : > { %2520 = vmatmul.mubr.msk.f32.vlgmr.msra.gmra.mrb[20].mxu0 %vm3705_vm9, %v3391_v51 }
 0x51b   : > { %v1911_v37 = vpop.f32.mrb[16].mxu0 }
 0x51c   : > { %v2497_v7 = vpop.f32.mrb[17].mxu0 }
 0x52b   : > { %v1981_v5 = vpop.f32.mrb[18].mxu0 }
 0x52c   : > { %v1982_v38 = vadd.f32 1e-09, %v1981_v5  ;;  %v2516_v39 = vpop.f32.mrb[19].mxu0 }
 0x52e   : > { %2660 = vrcp.f32 %v1982_v38 }
 0x52f   : > { %v2060_v41 = vpop.f32.mrb[20].mxu0 }
 0x530   : > { %v2521_v42 = vpop.f32.mrb[21].mxu0 }
 0x538   : > { %v2661_v40 = vpop.eup %2660 }
 0x539   : > { %1988 = vperm.xlu0 %2659, %v2661_v40  }
 0x5b8   : > { %v1989_v43 = vpop.permute.xlu0 %1988 }
 0x5b9   : > { %v1991_v10 = vmul.f32 %v1989_v43, %v1911_v37 }
 0x5bb   : > { %v2064_v47 = vadd.f32 %v2060_v41, %v1991_v10 }
 0x5bd   : > { %v2065_v48 = vsel %vm3706_vm7, %v2064_v47, 0.0 }
 0x5be   : > { %v2066_v16 = vrot.slane %v2065_v48, 4 }
 0x5c0   : > { %v2067_v52 = vadd.f32 %v2066_v16, %v2065_v48 }
 0x5c2   : > { %v2068_v51 = vrot.slane %v2067_v52, 2 }
 0x5c4   : > { %v2069_v53 = vadd.f32 %v2068_v51, %v2067_v52 }
 0x5c6   : > { %v2070_v14 = vrot.slane %v2069_v53, 1 }
 0x5c8   : > { %v2071_v55 = vadd.f32 %v2070_v14, %v2069_v53 }
 0x5ca   : > { %v2073_v20 = vmul.f32 0.125, %v2071_v55 }
 0x5cc   : > { %2075 = vst.msk [vmem:[%s407_s28] sm:$0x1] %vm2074_vm8, %v2073_v20 }
 0x5cd   : > { %2675 = shalt.err (!%p2672_p3)
}
 0x5ce   : > { %s2676_s27 = scalar_lea.hbm %s3614_s18, 16  ;;  %s2680_s12 = scalar_lea.hbm %s3666_s10, 32 }
 0x5cf   : > { %p2677_p4 = scmp.ne.s32.totalorder %s3614_s18, %s2676_s27  ;;  %p2681_p9 = scmp.lt.u32.totalorder %s3614_s18, %s3666_s10 }
 0x5d0   : > { %p2682_p10 = scmp.lt.u32.totalorder %s2680_s12, %s2676_s27  ;;  %p2684_p12 = scmp.lt.u32.totalorder %s2676_s27, %s3614_s18 }
 0x5d1   : > { %p2678_p7 = pnand %p2677_p4, %p2841_p5 }
 0x5d2   : > { %p2683_p11 = por %p2682_p10, %p2681_p9 }
 0x5d3   : > { %p2679_p8 = pneg %p2678_p7 }
 0x5d4   : > { %p2685_p13 = por %p2684_p12, %p2683_p11 }
 0x5d6   : > { %p2686_p0 = pnand %p2685_p13, %p2679_p8 }
 0x5d8   : > { %2689 = shalt.err (!%p2686_p0)
}
 0x5d9   : > { %2598 = dma.vmem_to_hbm [thread:$0]  (%p2841_p5), %s3616_s25, 16, %s3614_s18, %s2077_s21  }
 0x5da PF: > { %p2604_p1 = scmp.ge.s32.totalorder %s2724_s16, 2  ;;  %s2101_s30 = sand.u32 1, %s2712_s13  }
 0x5db   : > { %s2102_s26 = scalar_lea.sflag [#allocation3], %s2101_s30 }
 0x5dc   : > { %p2601_p2 = pnand %p2604_p1, %p2845_p6 }
 0x5de   : > { %2707 = dma.done.wait (!%p2601_p2), %s2102_s26, 16  }
 0x5df   : > { %2709 = vsyncadd (!%p2601_p2), %s2102_s26, 4294967280  ;;  %p20_p3 = scmp.ge.s32.totalorder %s2828_s19, 4   ;;  %s3707_s13 = smov %s2716_s14 }
 0x5e0   : > { %s3708_s14 = smov %s2720_s15  ;;  %s3709_s15 = smov %s2839_s22 }
 0x5e1   : > { %s3710_s16 = smov %s2828_s19  ;;  %22 = sbr.rel (!%p20_p3) target bundleno = 3 (0x3), region = 107 }
 0x5e8   :  { %2106 = vsyncpa [#allocation3], 1 }
 0x5e9   :  { %2108 = vsyncpa [#allocation3 + $0x1], 1 }

// kernel: se3_transformer_forward.7
= control target key start
LH: loop header
LB: loop body
LE: loop exit
PB: predicated region body
PF: predicated region fallthrough
CT: control target
= control target key end

     0   :  { %s6891_s30 = smov 0   ;;  %s6893_s10 = smov 0   ;;  %s10780_s0 = inlined_call_operand.vmem [shape: f32[2,64,5], index: 0, kind: input, shape index: {}]   ;;  %s10781_s1 = inlined_call_operand.vmem [shape: f32[2,64,3], index: 1, kind: input, shape index: {}]   ;;  %s10782_s2 = inlined_call_operand.vmem [shape: f32[2,64,27], index: 2, kind: input, shape index: {}]   ;;  %s10783_s3 = inlined_call_operand.vmem [shape: f32[2,8,8], index: 3, kind: input, shape index: {}]   ;;  %s10784_s4 = inlined_call_operand.vmem [shape: f32[2,8,24], index: 4, kind: input, shape index: {}]   ;;  %s10785_s5 = inlined_call_operand.vmem [shape: f32[5,128], index: 5, kind: input, shape index: {}]   ;;  %s10786_s6 = inlined_call_operand.vmem [shape: f32[1,128], index: 6, kind: input, shape index: {}]   ;;  %s10787_s7 = inlined_call_operand.vmem [shape: f32[128,192], index: 7, kind: input, shape index: {}]   ;;  %s10788_s8 = inlined_call_operand.vmem [shape: f32[1,192], index: 8, kind: input, shape index: {}]   ;;  %s10789_s9 = inlined_call_operand.vmem [shape: f32[2,64,16], index: 9, kind: output, shape index: {}]  }
   0x1   :  { %s6895_s11 = smov 0  }
   0x2 LB: > { %s31_s12 = sadd.s32 1, %s6802_s10  ;;  %p5663_p0 = scmp.ge.s32.totalorder %s6806_s11, 1  ;;  %s6806_s11 = sphi %s6895_s11, %s19_s11   ;;  %s6802_s10 = sphi %s6893_s10, %s11474_s10   ;;  %s6798_s30 = sphi %s6891_s30, %s11473_s30  }
   0x3   : > { %p33_p1 = scmp.ge.s32.totalorder %s31_s12, 2  ;;  %p360_p2 = scmp.lt.s32.totalorder %s6806_s11, 3 }
   0x5   : > { %s11476_s12 = smov (%p33_p1, %s31_s12), 0  ;;  %p361_p3 = pnand %p5663_p0, %p360_p2 }
   0x7   : > { %364 = sbr.rel (%p361_p3) target bundleno = 1615 (0x64f), region = 56 }
   0xe   : > { %p431_p4 = scmp.lt.s32.totalorder %s6798_s30, 1  ;;  %s6808_s17 = smov 3   ;;  %v504_v8 = vld [vmem:[%s10785_s5] sm:$0x1f]  ;;  %vm570_vm0 = vcmask 1044480   ;;  %vm545_vm1 = vcmask 39936   ;;  %v688_v11 = vlaneseq }
   0xf   : > { %s10816_s18 = smov 6   ;;  %s6810_s19 = smov 9   ;;  %6128 = vmatprep.subr.msk.mxu0 %vm570_vm0, %v504_v8  ;;  %v11011_v22 = vmov 0  ;;  %v10792_v25 = vmov 1.0|1.0   ;;  %v10790_v29 = vmov 1.0  }
  0x10   : > { %s11478_s30 = smov (!%p431_p4, %s6798_s30), 1  ;;  %s10814_s20 = smov 12   ;;  %6129 = vmatpush3.msk.msra.mxu0 %vm570_vm0, %v504_v8  ;;  %v7033_v12 = vand.u32 127, %v688_v11  ;;  %v7040_v15 = vshrl.u32 %v688_v11, 7  ;;  %v11018_v32 = vmov 0 }
  0x11   : > { %s6912_s13 = sshll.u32 %s11478_s30, 6  ;;  %s6812_s21 = smov 15  }
  0x12   : > { %s6918_s16 = scalar_lea.vmem %s10781_s1, %s6912_s13  ;;  %s7023_s26 = scalar_lea.vmem %s10780_s0, %s6912_s13  ;;  %11007 = vst [vmem:[#allocation2_spill] sm:$0xff] %v7033_v12  ;;  %11008 = vst [vmem:[#allocation3_spill] sm:$0xff] %v7040_v15  ;;  %v7043_v16 = vadd.s32 1, %v7033_v12  ;;  %v7049_v17 = vadd.s32 8, %v7040_v15  ;;  %v7052_v18 = vmul.u32 3, %v7033_v12  ;;  %v1061_v24 = vadd.s32 16, %v7040_v15 }
  0x13   : > { %v6921_v0 = vld [vmem:[%s6918_s16 + $0x10] sm:$0xff]  ;;  %v6926_v1 = vld [vmem:[%s6918_s16] sm:$0xff]  ;;  %v6929_v2 = vld [vmem:[%s6918_s16 + $0x18] sm:$0xff]  ;;  %s6813_s27 = smov 18   ;;  %v7099_v28 = vmul.u32 24, %v7033_v12  ;;  %v7107_v30 = vadd.s32 24, %v7040_v15  ;;  %s7163_s25 = scalar_lea.vmem %s10782_s2, %s6912_s13 }
  0x14   : > { %823 = vrot.lane.b32.xlu1 %v6921_v0, %s6808_s17  ;;  %819 = vrot.lane.b32.xlu0 %v6926_v1, %s6808_s17  ;;  %v6936_v3 = vld [vmem:[%s6918_s16 + $0x8] sm:$0xff]  ;;  %v6946_v5 = vld [vmem:[%s6918_s16 + $0x20] sm:$0xff]  ;;  %11009 = vst [vmem:[#allocation4_spill] sm:$0xff] %v7043_v16  ;;  %11010 = vst [vmem:[#allocation5_spill] sm:$0xff] %v7049_v17  ;;  %v7055_v19 = vmul.u32 3, %v7043_v16  ;;  %vm1065_vm2 = vcmp.ge.s32.totalorder %v7040_v15, %v7052_v18  ;;  %vm1066_vm3 = vcmp.ge.s32.totalorder %v7049_v17, %v7052_v18  ;;  %s6816_s28 = smov 21  }
  0x15   : > { %v6939_v4 = vld [vmem:[%s6918_s16 + $0x28] sm:$0xff]  ;;  %v6949_v6 = vld [vmem:[%s6918_s16 + $0x38] sm:$0xff]  ;;  %v6956_v7 = vld [vmem:[%s6918_s16 + $0x30] sm:$0xff]  ;;  %vm1067_vm9 = vcmp.ge.s32.totalorder %v1061_v24, %v7052_v18  ;;  %11016 = vst [vmem:[#allocation7_spill] sm:$0xff] %v7099_v28  ;;  %v7110_v31 = vmul.u32 24, %v7043_v16  ;;  %vm3523_vm12 = vcmp.ge.s32.totalorder %v1061_v24, %v7099_v28  ;;  %vm3524_vm13 = vcmp.ge.s32.totalorder %v7107_v30, %v7099_v28  ;;  %s10818_s29 = sshll.u32 %s11478_s30, 3 }
  0x16   : > { %v478_v9 = vld [vmem:[%s7023_s26] sm:$0xff]  ;;  %v479_v10 = vld [vmem:[%s7023_s26 + $0x8] sm:$0xff]  ;;  %v480_v13 = vld [vmem:[%s7023_s26 + $0x10] sm:$0xff]  ;;  %vm1070_vm4 = vcmp.lt.s32.totalorder %v7040_v15, %v7055_v19  ;;  %vm1071_vm5 = vcmp.lt.s32.totalorder %v7049_v17, %v7055_v19  ;;  %vm1072_vm10 = vcmp.lt.s32.totalorder %v1061_v24, %v7055_v19  ;;  %s7150_s22 = scalar_lea.vmem %s10784_s4, %s10818_s29  ;;  %s6818_s14 = smov 24  }
  0x17   : > { %6130 = vmatprep.mubr.msk.f32.mxu0 %vm545_vm1, %v478_v9  ;;  %v481_v14 = vld [vmem:[%s7023_s26 + $0x18] sm:$0xff]  ;;  %v482_v20 = vld [vmem:[%s7023_s26 + $0x20] sm:$0xff]  ;;  %v483_v21 = vld [vmem:[%s7023_s26 + $0x28] sm:$0xff]  ;;  %11017 = vst [vmem:[#allocation8_spill] sm:$0xff] %v7110_v31  ;;  %vm3530_vm14 = vcmp.lt.s32.totalorder %v1061_v24, %v7110_v31  ;;  %vm3531_vm15 = vcmp.lt.s32.totalorder %v7107_v30, %v7110_v31  ;;  %s6819_s15 = smov 125   ;;  %s6820_s23 = smov 122  }
  0x18   : > { %825 = vrot.lane.b32.xlu1 %v6929_v2, %s6808_s17  ;;  %821 = vrot.lane.b32.xlu0 %v6936_v3, %s6808_s17  ;;  %vm1073_vm6 = vmand %vm1065_vm2, %vm1070_vm4  ;;  %v484_v23 = vld [vmem:[%s7023_s26 + $0x30] sm:$0xff]  ;;  %v485_v26 = vld [vmem:[%s7023_s26 + $0x38] sm:$0xff]  ;;  %s10819_s26 = smov 48   ;;  %vm987_vm4 = vcmask 23552   ;;  %s6823_s24 = smov 113  }
  0x19   : > { %6131 = vmatmul.mubr.msk.f32.vlgmr.msra.gmra.mrb[0].mxu0 %vm545_vm1, %v479_v10  ;;  %vm1074_vm7 = vmand %vm1066_vm3, %vm1071_vm5  ;;  %v7157_v33 = vld [vmem:[%s7150_s22] sm:$0xff]  ;;  %v7170_v34 = vld [vmem:[%s7163_s25 + $0x8] sm:$0xff]  ;;  %vm996_vm3 = vcmask 48128   ;;  %vm10985_vm5 = vcmask 72704   ;;  %s6831_s29 = smov 32  }
  0x1a   : > { %6133 = vmatprep.mubr.msk.f32.mxu0 %vm545_vm1, %v480_v13  ;;  %vm7075_vm8 = vmpackc.low %vm1074_vm7, %vm1073_vm6  ;;  %11021 = vst [vmem:[#allocation10_spill] sm:$0xff] %v7170_v34  ;;  %v7177_v36 = vld [vmem:[%s7163_s25] sm:$0xff]  ;;  %v7182_v37 = vld [vmem:[%s7163_s25 + $0x18] sm:$0xff]  ;;  %vm11005_vm6 = vcmask 97280   ;;  %vm1023_vm7 = vcmask 121856  }
  0x1b   : > { %v11012_v22 = vsel %vm7075_vm8, 4294967295, %v11011_v22  ;;  %6523 = vmatprep.subr.msk.bf16.mxu0 %vm7075_vm8, %v10792_v25  ;;  %vm7094_vm11 = vmand %vm1067_vm9, %vm1072_vm10  ;;  %11022 = vst [vmem:[#allocation11_spill] sm:$0xff] %v7177_v36  ;;  %v7191_v40 = vld [vmem:[%s7163_s25 + $0x10] sm:$0xff]  ;;  %v7196_v41 = vld [vmem:[%s7163_s25 + $0x28] sm:$0xff]  ;;  %vm1032_vm9 = vcmask 146432   ;;  %vm10834_vm10 = vcmask 171008  }
  0x1c   : > { %829 = vrot.lane.b32.xlu1 %v6939_v4, %s6808_s17  ;;  %827 = vrot.lane.b32.xlu0 %v6946_v5, %s6808_s17  ;;  %11013 = vst [vmem:[#allocation6_spill] sm:$0xff] %v11012_v22  ;;  %vm3536_vm0 = vmand %vm3523_vm12, %vm3530_vm14  ;;  %v7205_v44 = vld [vmem:[%s7163_s25 + $0x20] sm:$0xff]  ;;  %v7216_v47 = vld [vmem:[%s7163_s25 + $0x30] sm:$0xff]  ;;  %vm10833_vm12 = vcmask 195584   ;;  %vm1714_vm14 = vcmp.lt.s32.totalorder %v7107_v30, %v7055_v19  ;;  %v11121_v22 = vmov 0.0  }
  0x1d   : > { %6134 = vmatmul.mubr.msk.f32.gmra.mrb[2].mxu0 %vm545_vm1, %v481_v14  ;;  %11023 = vst [vmem:[#allocation12_spill] sm:$0xff] %v7182_v37  ;;  %11024 = vst [vmem:[#allocation13_spill] sm:$0xff] %v7191_v40 }
  0x1e   : > { %6136 = vmatprep.mubr.msk.f32.mxu0 %vm545_vm1, %v482_v20  ;;  %6525 = vmatpush3.bf16.msk.msra.mxu0 %vm7075_vm8, %v10792_v25 }
  0x1f   : > { %6146 = vmatprep.subr.msk.mxu0 %vm7094_vm11, %v10790_v29 }
  0x20   : > { %833 = vrot.lane.b32.xlu1 %v6949_v6, %s6808_s17  ;;  %831 = vrot.lane.b32.xlu0 %v6956_v7, %s6808_s17 }
  0x21   : > { %6137 = vmatmul.mubr.msk.f32.gmra.mrb[4].mxu0 %vm545_vm1, %v483_v21 }
  0x22   : > { %6139 = vmatprep.mubr.msk.f32.mxu0 %vm545_vm1, %v484_v23  ;;  %6147 = vmatpush3.msk.msra.mxu0 %vm7094_vm11, %v10790_v29 }
  0x23   : > { %6527 = vmatprep.subr.msk.bf16.mxu0 %vm7075_vm8, %v10792_v25 }
  0x24   : > { %845 = vrot.lane.b32.xlu1 %v6936_v3, %s10816_s18  ;;  %843 = vrot.lane.b32.xlu0 %v6926_v1, %s10816_s18 }
  0x25   : > { %6140 = vmatmul.mubr.msk.f32.gmra.mrb[6].mxu0 %vm545_vm1, %v485_v26  ;;  %vm3537_vm1 = vmand %vm3524_vm13, %vm3531_vm15  ;;  %vm1708_vm13 = vcmp.ge.s32.totalorder %v7107_v30, %v7052_v18 }
  0x26   : > { %vm7128_vm2 = vmpackc.low %vm3537_vm1, %vm3536_vm0 }
  0x27   : > { %v11019_v32 = vsel %vm7128_vm2, 4294967295, %v11018_v32  ;;  %vm7438_vm15 = vmand %vm1708_vm13, %vm1714_vm14 }
  0x28   : > { %849 = vrot.lane.b32.xlu1 %v6929_v2, %s10816_s18  ;;  %847 = vrot.lane.b32.xlu0 %v6921_v0, %s10816_s18  ;;  %11020 = vst [vmem:[#allocation9_spill] sm:$0xff] %v11019_v32  ;;  %vm7473_vm0 = vmpackc.low %vm7438_vm15, %vm7094_vm11 }
  0x2c   : > { %853 = vrot.lane.b32.xlu1 %v6939_v4, %s10816_s18  ;;  %851 = vrot.lane.b32.xlu0 %v6946_v5, %s10816_s18 }
  0x30   : > { %857 = vrot.lane.b32.xlu1 %v6949_v6, %s10816_s18  ;;  %855 = vrot.lane.b32.xlu0 %v6956_v7, %s10816_s18 }
  0x34   : > { %869 = vrot.lane.b32.xlu1 %v6936_v3, %s6810_s19  ;;  %867 = vrot.lane.b32.xlu0 %v6926_v1, %s6810_s19 }
  0x38   : > { %873 = vrot.lane.b32.xlu1 %v6929_v2, %s6810_s19  ;;  %871 = vrot.lane.b32.xlu0 %v6921_v0, %s6810_s19 }
  0x3c   : > { %877 = vrot.lane.b32.xlu1 %v6939_v4, %s6810_s19  ;;  %875 = vrot.lane.b32.xlu0 %v6946_v5, %s6810_s19 }
  0x40   : > { %881 = vrot.lane.b32.xlu1 %v6949_v6, %s6810_s19  ;;  %879 = vrot.lane.b32.xlu0 %v6956_v7, %s6810_s19 }
  0x44   : > { %893 = vrot.lane.b32.xlu1 %v6936_v3, %s10814_s20  ;;  %891 = vrot.lane.b32.xlu0 %v6926_v1, %s10814_s20 }
  0x48   : > { %897 = vrot.lane.b32.xlu1 %v6929_v2, %s10814_s20  ;;  %895 = vrot.lane.b32.xlu0 %v6921_v0, %s10814_s20 }
  0x4c   : > { %901 = vrot.lane.b32.xlu1 %v6939_v4, %s10814_s20  ;;  %899 = vrot.lane.b32.xlu0 %v6946_v5, %s10814_s20 }
  0x50   : > { %905 = vrot.lane.b32.xlu1 %v6949_v6, %s10814_s20  ;;  %903 = vrot.lane.b32.xlu0 %v6956_v7, %s10814_s20 }
  0x54   : > { %917 = vrot.lane.b32.xlu1 %v6936_v3, %s6812_s21  ;;  %915 = vrot.lane.b32.xlu0 %v6926_v1, %s6812_s21 }
  0x58   : > { %921 = vrot.lane.b32.xlu1 %v6929_v2, %s6812_s21  ;;  %919 = vrot.lane.b32.xlu0 %v6921_v0, %s6812_s21 }
  0x5c   : > { %925 = vrot.lane.b32.xlu1 %v6939_v4, %s6812_s21  ;;  %923 = vrot.lane.b32.xlu0 %v6946_v5, %s6812_s21 }
  0x60   : > { %929 = vrot.lane.b32.xlu1 %v6949_v6, %s6812_s21  ;;  %927 = vrot.lane.b32.xlu0 %v6956_v7, %s6812_s21 }
  0x64   : > { %941 = vrot.lane.b32.xlu1 %v6936_v3, %s6813_s27  ;;  %939 = vrot.lane.b32.xlu0 %v6926_v1, %s6813_s27 }
  0x68   : > { %945 = vrot.lane.b32.xlu1 %v6929_v2, %s6813_s27  ;;  %943 = vrot.lane.b32.xlu0 %v6921_v0, %s6813_s27 }
  0x6c   : > { %949 = vrot.lane.b32.xlu1 %v6939_v4, %s6813_s27  ;;  %947 = vrot.lane.b32.xlu0 %v6946_v5, %s6813_s27 }
  0x70   : > { %953 = vrot.lane.b32.xlu1 %v6949_v6, %s6813_s27  ;;  %951 = vrot.lane.b32.xlu0 %v6956_v7, %s6813_s27 }
  0x74   : > { %965 = vrot.lane.b32.xlu1 %v6936_v3, %s6816_s28  ;;  %963 = vrot.lane.b32.xlu0 %v6926_v1, %s6816_s28 }
  0x78   : > { %969 = vrot.lane.b32.xlu1 %v6929_v2, %s6816_s28  ;;  %967 = vrot.lane.b32.xlu0 %v6921_v0, %s6816_s28 }
  0x7c   : > { %973 = vrot.lane.b32.xlu1 %v6939_v4, %s6816_s28  ;;  %971 = vrot.lane.b32.xlu0 %v6946_v5, %s6816_s28 }
  0x80   : > { %977 = vrot.lane.b32.xlu1 %v6949_v6, %s6816_s28  ;;  %975 = vrot.lane.b32.xlu0 %v6956_v7, %s6816_s28 }
  0x84   : > { %1216 = vrot.lane.b32.xlu1 %v7157_v33, %s10819_s26  ;;  %1213 = vrot.lane.b32.xlu0 %v7157_v33, %s6818_s14  ;;  %s6838_s26 = smov 4  }
  0x86   : > { %v7172_v35 = vpop.permute.xlu1 %823  ;;  %v7184_v38 = vpop.permute.xlu0 %819 }
  0x88   : > { %1232 = vrot.lane.b32.xlu1 %v7170_v34, %s6808_s17  ;;  %1230 = vrot.lane.b32.xlu0 %v7177_v36, %s6808_s17 }
  0x8a   : > { %v7186_v39 = vpop.permute.xlu1 %825  ;;  %v7198_v42 = vpop.permute.xlu0 %821 }
  0x8c   : > { %1236 = vrot.lane.b32.xlu1 %v7182_v37, %s6808_s17  ;;  %1234 = vrot.lane.b32.xlu0 %v7191_v40, %s6808_s17 }
  0x8e   : > { %v7200_v43 = vpop.permute.xlu1 %829  ;;  %v7209_v45 = vpop.permute.xlu0 %827 }
  0x90   : > { %1240 = vrot.lane.b32.xlu1 %v7196_v41, %s6808_s17  ;;  %1238 = vrot.lane.b32.xlu0 %v7205_v44, %s6808_s17 }
  0x92   : > { %v7211_v46 = vpop.permute.xlu1 %833  ;;  %v7220_v48 = vpop.permute.xlu0 %831 }
  0x93   : > { %v995_v30 = vsel %vm987_vm4, %v6949_v6, %v7211_v46 }
  0x94   : > { %1454 = vrot.lane.b32.xlu1 %v7177_v36, %s6819_s15  ;;  %1242 = vrot.lane.b32.xlu0 %v7216_v47, %s6808_s17 }
  0x96   : > { %v7222_v49 = vpop.permute.xlu1 %845  ;;  %v7228_v50 = vpop.permute.xlu0 %843 }
  0x98   : > { %1534 = vrot.lane.b32.xlu1 %v7177_v36, %s6820_s23  ;;  %1456 = vrot.lane.b32.xlu0 %v7170_v34, %s6819_s15 }
  0x9a   : > { %v7230_v51 = vpop.permute.xlu1 %849  ;;  %v7236_v52 = vpop.permute.xlu0 %847 }
  0x9c   : > { %1536 = vrot.lane.b32.xlu1 %v7170_v34, %s6820_s23  ;;  %1254 = vrot.lane.b32.xlu0 %v7177_v36, %s10816_s18 }
  0x9e   : > { %v7238_v53 = vpop.permute.xlu1 %853  ;;  %v7244_v54 = vpop.permute.xlu0 %851 }
  0xa0   : > { %1278 = vrot.lane.b32.xlu1 %v7177_v36, %s6810_s19  ;;  %1256 = vrot.lane.b32.xlu0 %v7170_v34, %s10816_s18 }
  0xa2   : > { %v7246_v55 = vpop.permute.xlu1 %857  ;;  %v7252_v56 = vpop.permute.xlu0 %855 }
  0xa4   : > { %1302 = vrot.lane.b32.xlu1 %v7177_v36, %s10814_s20  ;;  %1280 = vrot.lane.b32.xlu0 %v7170_v34, %s6810_s19 }
  0xa6   : > { %v7254_v57 = vpop.permute.xlu1 %869  ;;  %v7260_v58 = vpop.permute.xlu0 %867 }
  0xa8   : > { %1326 = vrot.lane.b32.xlu1 %v7177_v36, %s6812_s21  ;;  %1304 = vrot.lane.b32.xlu0 %v7170_v34, %s10814_s20 }
  0xaa   : > { %v7262_v59 = vpop.permute.xlu1 %873  ;;  %v7268_v60 = vpop.permute.xlu0 %871 }
  0xac   : > { %1350 = vrot.lane.b32.xlu1 %v7177_v36, %s6813_s27  ;;  %1328 = vrot.lane.b32.xlu0 %v7170_v34, %s6812_s21  ;;  %v989_v36 = vsel %vm987_vm4, %v6936_v3, %v7198_v42  ;;  %v988_v3 = vsel %vm987_vm4, %v6926_v1, %v7184_v38 }
  0xae   : > { %v7270_v61 = vpop.permute.xlu1 %877  ;;  %v7276_v62 = vpop.permute.xlu0 %875 }
  0xb0   : > { %1352 = vrot.lane.b32.xlu1 %v7170_v34, %s6813_s27  ;;  %1458 = vrot.lane.b32.xlu0 %v7191_v40, %s6819_s15 }
  0xb2   : > { %v7278_v63 = vpop.permute.xlu1 %881  ;;  %v7284_v8 = vpop.permute.xlu0 %879 }
  0xb3   : > { %11025 = vst [vmem:[#allocation14_spill] sm:$0xff] %v7284_v8 }
  0xb4   : > { %1538 = vrot.lane.b32.xlu1 %v7191_v40, %s6820_s23  ;;  %1460 = vrot.lane.b32.xlu0 %v7182_v37, %s6819_s15 }
  0xb6   : > { %v894_v9 = vpop.permute.xlu1 %893  ;;  %v7290_v10 = vpop.permute.xlu0 %891 }
  0xb8   : > { %1540 = vrot.lane.b32.xlu1 %v7182_v37, %s6820_s23  ;;  %1258 = vrot.lane.b32.xlu0 %v7191_v40, %s10816_s18 }
  0xba   : > { %v7292_v11 = vpop.permute.xlu1 %897  ;;  %v7298_v13 = vpop.permute.xlu0 %895 }
  0xbc   : > { %1282 = vrot.lane.b32.xlu1 %v7191_v40, %s6810_s19  ;;  %1260 = vrot.lane.b32.xlu0 %v7182_v37, %s10816_s18 }
  0xbe   : > { %v7300_v14 = vpop.permute.xlu1 %901  ;;  %v7306_v20 = vpop.permute.xlu0 %899 }
  0xc0   : > { %1306 = vrot.lane.b32.xlu1 %v7191_v40, %s10814_s20  ;;  %1284 = vrot.lane.b32.xlu0 %v7182_v37, %s6810_s19 }
  0xc2   : > { %v7308_v21 = vpop.permute.xlu1 %905  ;;  %v7314_v23 = vpop.permute.xlu0 %903 }
  0xc3   : > { %11026 = vst [vmem:[#allocation15_spill] sm:$0xff] %v7314_v23  ;;  %v998_v23 = vsel %vm996_vm3, %v989_v36, %v7222_v49  ;;  %v991_v36 = vsel %vm987_vm4, %v6929_v2, %v7186_v39  ;;  %v997_v49 = vsel %vm996_vm3, %v988_v3, %v7228_v50  ;;  %v990_v2 = vsel %vm987_vm4, %v6921_v0, %v7172_v35 }
  0xc4   : > { %1308 = vrot.lane.b32.xlu1 %v7182_v37, %s10814_s20  ;;  %1462 = vrot.lane.b32.xlu0 %v7205_v44, %s6819_s15  ;;  %v1000_v1 = vsel %vm996_vm3, %v991_v36, %v7230_v51 }
  0xc5   : > { %v1009_v39 = vsel %vm10985_vm5, %v1000_v1, %v7262_v59  ;;  %v999_v59 = vsel %vm996_vm3, %v990_v2, %v7236_v52 }
  0xc6   : > { %v918_v24 = vpop.permute.xlu1 %917  ;;  %v916_v26 = vpop.permute.xlu0 %915  ;;  %v1018_v0 = vsel %vm11005_vm6, %v1009_v39, %v7292_v11 }
  0xc8   : > { %1464 = vrot.lane.b32.xlu1 %v7196_v41, %s6819_s15  ;;  %1330 = vrot.lane.b32.xlu0 %v7191_v40, %s6812_s21 }
  0xca   : > { %v7320_v29 = vpop.permute.xlu1 %921  ;;  %v7326_v25 = vpop.permute.xlu0 %919 }
  0xcc   : > { %1262 = vrot.lane.b32.xlu1 %v7205_v44, %s10816_s18  ;;  %1542 = vrot.lane.b32.xlu0 %v7205_v44, %s6820_s23 }
  0xce   : > { %v7328_v32 = vpop.permute.xlu1 %925  ;;  %v7334_v31 = vpop.permute.xlu0 %923 }
  0xd0   : > { %1354 = vrot.lane.b32.xlu1 %v7191_v40, %s6813_s27  ;;  %1332 = vrot.lane.b32.xlu0 %v7182_v37, %s6812_s21 }
  0xd2   : > { %v7336_v28 = vpop.permute.xlu1 %929  ;;  %v7342_v17 = vpop.permute.xlu0 %927 }
  0xd3   : > { %11027 = vst [vmem:[#allocation16_spill] sm:$0xff] %v7336_v28  ;;  %11028 = vst [vmem:[#allocation17_spill] sm:$0xff] %v7342_v17  ;;  %v1007_v28 = vsel %vm10985_vm5, %v998_v23, %v7254_v57 }
  0xd4   : > { %1264 = vrot.lane.b32.xlu1 %v7196_v41, %s10816_s18  ;;  %1544 = vrot.lane.b32.xlu0 %v7196_v41, %s6820_s23  ;;  %v1016_v42 = vsel %vm11005_vm6, %v1007_v28, %v894_v9  ;;  %v1006_v28 = vsel %vm10985_vm5, %v997_v49, %v7260_v58  ;;  %v992_v58 = vsel %vm987_vm4, %v6946_v5, %v7209_v45 }
  0xd5   : > { %v1025_v57 = vsel %vm1023_vm7, %v1016_v42, %v918_v24  ;;  %v1015_v50 = vsel %vm11005_vm6, %v1006_v28, %v7290_v10  ;;  %v1008_v45 = vsel %vm10985_vm5, %v999_v59, %v7268_v60  ;;  %v1001_v3 = vsel %vm996_vm3, %v992_v58, %v7244_v54 }
  0xd6   : > { %v942_v16 = vpop.permute.xlu1 %941  ;;  %v940_v12 = vpop.permute.xlu0 %939  ;;  %v1024_v35 = vsel %vm1023_vm7, %v1015_v50, %v916_v26  ;;  %v1004_v42 = vsel %vm996_vm3, %v995_v30, %v7246_v55  ;;  %v1010_v36 = vsel %vm10985_vm5, %v1001_v3, %v7276_v62 }
  0xd7   : > { %v1034_v38 = vsel %vm1032_vm9, %v1025_v57, %v942_v16  ;;  %v993_v16 = vsel %vm987_vm4, %v6939_v4, %v7200_v43  ;;  %v1027_v4 = vsel %vm1023_vm7, %v1018_v0, %v7320_v29  ;;  %v1033_v43 = vsel %vm1032_vm9, %v1024_v35, %v940_v12 }
  0xd8   : > { %1356 = vrot.lane.b32.xlu1 %v7182_v37, %s6813_s27  ;;  %1286 = vrot.lane.b32.xlu0 %v7205_v44, %s6810_s19  ;;  %v7361_v37 = vld [vmem:[%s7163_s25 + $0x38] sm:$0xff]  ;;  %v1002_v10 = vsel %vm996_vm3, %v993_v16, %v7238_v53  ;;  %v1013_v55 = vsel %vm10985_vm5, %v1004_v42, %v7278_v63  ;;  %v11035_v57 = vmov 1.0|1.0  }
  0xd9   : > { %11029 = vst [vmem:[#allocation18_spill] sm:$0xff] %v7361_v37  ;;  %v1011_v52 = vsel %vm10985_vm5, %v1002_v10, %v7270_v61  ;;  %v1022_v1 = vsel %vm11005_vm6, %v1013_v55, %v7308_v21  ;;  %v11056_v42 = vld [vmem:[#allocation13_spill] sm:$0xff] }
  0xda   : > { %v946_v15 = vpop.permute.xlu1 %945  ;;  %v7352_v40 = vpop.permute.xlu0 %943  ;;  %v1020_v61 = vsel %vm11005_vm6, %v1011_v52, %v7300_v14  ;;  %v1019_v14 = vsel %vm11005_vm6, %v1010_v36, %v7306_v20 }
  0xdb   : > { %v1036_v11 = vsel %vm1032_vm9, %v1027_v4, %v946_v15  ;;  %v1017_v15 = vsel %vm11005_vm6, %v1008_v45, %v7298_v13  ;;  %v1029_v6 = vsel %vm1023_vm7, %v1020_v61, %v7328_v32  ;;  %v1028_v20 = vsel %vm1023_vm7, %v1019_v14, %v7334_v31  ;;  %v11037_v31 = vld [vmem:[#allocation14_spill] sm:$0xff] }
  0xdc   : > { %1310 = vrot.lane.b32.xlu1 %v7205_v44, %s10814_s20  ;;  %1288 = vrot.lane.b32.xlu0 %v7196_v41, %s6810_s19  ;;  %v1026_v13 = vsel %vm1023_vm7, %v1017_v15, %v7326_v25  ;;  %v11032_v25 = vmov 0 }
  0xdd   : > { %v1035_v46 = vsel %vm1032_vm9, %v1026_v13, %v7352_v40  ;;  %v11033_v25 = vsel %vm7473_vm0, 4294967295, %v11032_v25 }
  0xde   : > { %v7354_v34 = vpop.permute.xlu1 %949  ;;  %v7366_v17 = vpop.permute.xlu0 %947  ;;  %11034 = vst [vmem:[#allocation19_spill] sm:$0xff] %v11033_v25 }
  0xdf   : > { %v1038_v32 = vsel %vm1032_vm9, %v1029_v6, %v7354_v34  ;;  %v994_v34 = vsel %vm987_vm4, %v6956_v7, %v7220_v48  ;;  %v1037_v7 = vsel %vm1032_vm9, %v1028_v20, %v7366_v17 }
  0xe0   : > { %1312 = vrot.lane.b32.xlu1 %v7196_v41, %s10814_s20  ;;  %1466 = vrot.lane.b32.xlu0 %v7216_v47, %s6819_s15  ;;  %v1003_v28 = vsel %vm996_vm3, %v994_v34, %v7252_v56 }
  0xe1   : > { %v1012_v21 = vsel %vm10985_vm5, %v1003_v28, %v11037_v31 }
  0xe2   : > { %v7370_v8 = vpop.permute.xlu1 %953  ;;  %v7388_v23 = vpop.permute.xlu0 %951 }
  0xe4   : > { %1468 = vrot.lane.b32.xlu1 %v7361_v37, %s6819_s15  ;;  %1334 = vrot.lane.b32.xlu0 %v7205_v44, %s6812_s21  ;;  %s6826_s15 = smov 104  }
  0xe6   : > { %v966_v9 = vpop.permute.xlu1 %965  ;;  %v964_v5 = vpop.permute.xlu0 %963 }
  0xe7   : > { %v1043_v51 = vsel %vm10834_vm10, %v1034_v38, %v966_v9  ;;  %v1042_v26 = vsel %vm10834_vm10, %v1033_v43, %v964_v5  ;;  %v11036_v38 = vld [vmem:[#allocation16_spill] sm:$0xff] }
  0xe8   : > { %1244 = vrot.lane.b32.xlu1 %v7361_v37, %s6808_s17  ;;  %v1051_v24 = vmul.f32 %v1043_v51, %v7157_v33  ;;  %v1050_v53 = vmul.f32 %v1042_v26, %v7157_v33  ;;  %1546 = vrot.lane.b32.xlu0 %v7216_v47, %s6820_s23  ;;  %v1031_v9 = vsel %vm1023_vm7, %v1022_v1, %v11036_v38  ;;  %v11038_v51 = vld [vmem:[#allocation15_spill] sm:$0xff]  ;;  %s6821_s17 = smov 119  }
  0xe9   : > { %v1040_v2 = vsel %vm1032_vm9, %v1031_v9, %v7370_v8  ;;  %v1021_v16 = vsel %vm11005_vm6, %v1012_v21, %v11038_v51  ;;  %v11039_v8 = vld [vmem:[#allocation17_spill] sm:$0xff] }
  0xea   : > { %v970_v12 = vpop.permute.xlu1 %969  ;;  %v968_v54 = vpop.permute.xlu0 %967  ;;  %6148 = vmatprep.mubr.msk.f32.mxu0 %vm10833_vm12, %v1050_v53  ;;  %v1030_v0 = vsel %vm1023_vm7, %v1021_v16, %v11039_v8 }
  0xeb   : > { %v1045_v60 = vsel %vm10834_vm10, %v1036_v11, %v970_v12  ;;  %v1044_v40 = vsel %vm10834_vm10, %v1035_v46, %v968_v54  ;;  %6149 = vmatmul.mubr.msk.f32.vlgmr.msra.gmra.mrb[8].mxu0 %vm10833_vm12, %v1051_v24  ;;  %v1039_v35 = vsel %vm1032_vm9, %v1030_v0, %v7388_v23  ;;  %v11047_v12 = vld [vmem:[#allocation10_spill] sm:$0xff]  ;;  %v11059_v46 = vld [vmem:[#allocation12_spill] sm:$0xff] }
  0xec   : > { %1336 = vrot.lane.b32.xlu1 %v7196_v41, %s6812_s21  ;;  %v1053_v62 = vmul.f32 %v1045_v60, %v7157_v33  ;;  %v1052_v49 = vmul.f32 %v1044_v40, %v7157_v33  ;;  %1266 = vrot.lane.b32.xlu0 %v7216_v47, %s10816_s18  ;;  %v7678_v31 = vpop.f32.mrb[0].mxu0 }
  0xed   : > { %6529 = vmatpush3.bf16.msk.msra.mxu0 %vm7075_vm8, %v11035_v57 }
  0xee   : > { %v974_v27 = vpop.permute.xlu1 %973  ;;  %6531 = vmatprep.subr.msk.bf16.mxu0 %vm7473_vm0, %v11035_v57  ;;  %v972_v48 = vpop.permute.xlu0 %971  ;;  %6151 = vmatprep.mubr.msk.f32.mxu0 %vm10833_vm12, %v1052_v49 }
  0xef   : > { %v1047_v63 = vsel %vm10834_vm10, %v1038_v32, %v974_v27  ;;  %v1046_v50 = vsel %vm10834_vm10, %v1037_v7, %v972_v48  ;;  %6152 = vmatmul.mubr.msk.f32.gmra.mrb[10].mxu0 %vm10833_vm12, %v1053_v62 }
  0xf0   : > { %1548 = vrot.lane.b32.xlu1 %v7361_v37, %s6820_s23  ;;  %v1055_v39 = vmul.f32 %v1047_v63, %v7157_v33  ;;  %v1054_v17 = vmul.f32 %v1046_v50, %v7157_v33  ;;  %1358 = vrot.lane.b32.xlu0 %v7205_v44, %s6813_s27 }
  0xf1   : > { %6533 = vmatpush3.bf16.msk.msra.mxu0 %vm7473_vm0, %v11035_v57 }
  0xf2   : > { %v978_v56 = vpop.permute.xlu1 %977  ;;  %v976_v59 = vpop.permute.xlu0 %975  ;;  %6154 = vmatprep.mubr.msk.f32.mxu0 %vm10833_vm12, %v1054_v17 }
  0xf3   : > { %v1049_v58 = vsel %vm10834_vm10, %v1040_v2, %v978_v56  ;;  %v1048_v4 = vsel %vm10834_vm10, %v1039_v35, %v976_v59  ;;  %6155 = vmatmul.mubr.msk.f32.gmra.mrb[12].mxu0 %vm10833_vm12, %v1055_v39  ;;  %v7682_v2 = vpop.f32.mrb[1].mxu0 }
  0xf4   : > { %1290 = vrot.lane.b32.xlu1 %v7216_v47, %s6810_s19  ;;  %v1057_v10 = vmul.f32 %v1049_v58, %v7157_v33  ;;  %v1056_v5 = vmul.f32 %v1048_v4, %v7157_v33  ;;  %1268 = vrot.lane.b32.xlu0 %v7361_v37, %s10816_s18  ;;  %v11042_v33 = vld [vmem:[#allocation11_spill] sm:$0xff]  ;;  %v7686_v39 = vpop.f32.mrb[2].mxu0 }
  0xf5   : > { %v7690_v50 = vpop.f32.mrb[3].mxu0  ;;  %v507_v4 = vld [vmem:[%s10787_s7 + $0x8] sm:$0xff] }
  0xf6   : > { %v7539_v43 = vpop.permute.xlu1 %1216  ;;  %v7546_v23 = vpop.permute.xlu0 %1213  ;;  %6157 = vmatprep.mubr.msk.f32.mxu0 %vm10833_vm12, %v1056_v5  ;;  %v509_v5 = vld [vmem:[%s10787_s7 + $0x18] sm:$0xff] }
  0xf7   : > { %11040 = vst [vmem:[#allocation16_spill] sm:$0xff] %v7539_v43  ;;  %11041 = vst [vmem:[#allocation14_spill] sm:$0xff] %v7546_v23  ;;  %6158 = vmatmul.mubr.msk.f32.gmra.mrb[14].mxu0 %vm10833_vm12, %v1057_v10  ;;  %v7694_v51 = vpop.f32.mrb[4].mxu0  ;;  %v6490_v43 = vpack.c.bf16 %v509_v5, %v507_v4  ;;  %v506_v23 = vld [vmem:[%s10787_s7] sm:$0xff]  ;;  %v511_v4 = vld [vmem:[%s10787_s7 + $0x28] sm:$0xff] }
  0xf8   : > { %1292 = vrot.lane.b32.xlu1 %v7361_v37, %s6810_s19  ;;  %1360 = vrot.lane.b32.xlu0 %v7196_v41, %s6813_s27  ;;  %s6822_s19 = smov 116   ;;  %v7698_v17 = vpop.f32.mrb[5].mxu0  ;;  %v513_v5 = vld [vmem:[%s10787_s7 + $0x38] sm:$0xff] }
  0xf9   : > { %v7702_v58 = vpop.f32.mrb[6].mxu0  ;;  %6491 = vmatprep.subr.bf16.mxu1 %v6490_v43  ;;  %v510_v43 = vld [vmem:[%s10787_s7 + $0x20] sm:$0xff] }
  0xfa   : > { %v7550_v45 = vpop.permute.xlu1 %1232  ;;  %v7556_v11 = vpop.permute.xlu0 %1230  ;;  %11076 = vst [vmem:[#allocation44_spill] sm:$0xff] %v7702_v58 }
  0xfb   : > { %11043 = vst [vmem:[#allocation15_spill] sm:$0xff] %v7556_v11  ;;  %v7706_v8 = vpop.f32.mrb[7].mxu0 }
  0xfc   : > { %1868 = vrot.lane.b32.xlu1 %v11042_v33, %s6821_s17  ;;  %1314 = vrot.lane.b32.xlu0 %v7216_v47, %s10814_s20  ;;  %11077 = vst [vmem:[#allocation45_spill] sm:$0xff] %v7706_v8 }
  0xfe   : > { %v7558_v24 = vpop.permute.xlu1 %1236  ;;  %v7564_v26 = vpop.permute.xlu0 %1234 }
  0xff   : > { %11044 = vst [vmem:[#allocation17_spill] sm:$0xff] %v7558_v24  ;;  %11045 = vst [vmem:[#allocation11_spill] sm:$0xff] %v7564_v26 }
 0x100   : > { %1316 = vrot.lane.b32.xlu1 %v7361_v37, %s10814_s20  ;;  %1948 = vrot.lane.b32.xlu0 %v11042_v33, %s6822_s19  ;;  %s6830_s20 = smov 112  }
 0x102   : > { %v7566_v29 = vpop.permute.xlu1 %1240  ;;  %v7572_v52 = vpop.permute.xlu0 %1238 }
 0x103   : > { %11046 = vst [vmem:[#allocation20_spill] sm:$0xff] %v7566_v29  ;;  %11048 = vst [vmem:[#allocation10_spill] sm:$0xff] %v7572_v52  ;;  %v11133_v25 = vld [vmem:[#allocation45_spill] sm:$0xff] }
 0x104   : > { %1870 = vrot.lane.b32.xlu1 %v11047_v12, %s6821_s17  ;;  %1338 = vrot.lane.b32.xlu0 %v7216_v47, %s6812_s21 }
 0x106   : > { %v7574_v15 = vpop.permute.xlu1 %1454  ;;  %v7580_v53 = vpop.permute.xlu0 %1242 }
 0x107   : > { %11049 = vst [vmem:[#allocation21_spill] sm:$0xff] %v7574_v15  ;;  %11050 = vst [vmem:[#allocation22_spill] sm:$0xff] %v7580_v53  ;;  %v508_v53 = vld [vmem:[%s10787_s7 + $0x10] sm:$0xff] }
 0x108   : > { %2028 = vrot.lane.b32.xlu1 %v11042_v33, %s6823_s24  ;;  %1950 = vrot.lane.b32.xlu0 %v11047_v12, %s6822_s19  ;;  %v6492_v52 = vpack.c.bf16 %v508_v53, %v506_v23  ;;  %v512_v23 = vld [vmem:[%s10787_s7 + $0x30] sm:$0xff] }
 0x109   : > { %v6496_v53 = vpack.c.bf16 %v512_v23, %v510_v43  ;;  %v516_v43 = vld [vmem:[%s10787_s7 + $0x50] sm:$0xff] }
 0x10a   : > { %v7582_v60 = vpop.permute.xlu1 %1534  ;;  %v7588_v30 = vpop.permute.xlu0 %1456  ;;  %6493 = vmatpush1.bf16.msra.mxu1 %v6492_v52 }
 0x10b   : > { %11051 = vst [vmem:[#allocation23_spill] sm:$0xff] %v7582_v60  ;;  %11052 = vst [vmem:[#allocation24_spill] sm:$0xff] %v7588_v30 }
 0x10c   : > { %1362 = vrot.lane.b32.xlu1 %v7216_v47, %s6813_s27  ;;  %1340 = vrot.lane.b32.xlu0 %v7361_v37, %s6812_s21  ;;  %s6824_s21 = smov 107  }
 0x10e   : > { %v7590_v3 = vpop.permute.xlu1 %1536  ;;  %v7596_v61 = vpop.permute.xlu0 %1254 }
 0x10f   : > { %11053 = vst [vmem:[#allocation25_spill] sm:$0xff] %v7590_v3  ;;  %11054 = vst [vmem:[#allocation26_spill] sm:$0xff] %v7596_v61 }
 0x110   : > { %1364 = vrot.lane.b32.xlu1 %v7361_v37, %s6813_s27  ;;  %2030 = vrot.lane.b32.xlu0 %v11047_v12, %s6823_s24  ;;  %s6825_s27 = smov 110  }
 0x112   : > { %v7598_v13 = vpop.permute.xlu1 %1278  ;;  %v7604_v36 = vpop.permute.xlu0 %1256 }
 0x113   : > { %11055 = vst [vmem:[#allocation27_spill] sm:$0xff] %v7598_v13  ;;  %11057 = vst [vmem:[#allocation13_spill] sm:$0xff] %v7604_v36 }
 0x114   : > { %1952 = vrot.lane.b32.xlu1 %v11056_v42, %s6822_s19  ;;  %1872 = vrot.lane.b32.xlu0 %v11056_v42, %s6821_s17 }
 0x116   : > { %v7606_v6 = vpop.permute.xlu1 %1302  ;;  %v7612_v54 = vpop.permute.xlu0 %1280 }
 0x117   : > { %11058 = vst [vmem:[#allocation28_spill] sm:$0xff] %v7606_v6  ;;  %11060 = vst [vmem:[#allocation12_spill] sm:$0xff] %v7612_v54 }
 0x118   : > { %1954 = vrot.lane.b32.xlu1 %v11059_v46, %s6822_s19  ;;  %1874 = vrot.lane.b32.xlu0 %v11059_v46, %s6821_s17 }
 0x11a   : > { %v7614_v55 = vpop.permute.xlu1 %1326  ;;  %v7620_v32 = vpop.permute.xlu0 %1304 }
 0x11b   : > { %11061 = vst [vmem:[#allocation29_spill] sm:$0xff] %v7614_v55  ;;  %11062 = vst [vmem:[#allocation30_spill] sm:$0xff] %v7620_v32 }
 0x11c   : > { %2034 = vrot.lane.b32.xlu1 %v11059_v46, %s6823_s24  ;;  %2032 = vrot.lane.b32.xlu0 %v11056_v42, %s6823_s24 }
 0x11e   : > { %v7622_v62 = vpop.permute.xlu1 %1350  ;;  %v7628_v40 = vpop.permute.xlu0 %1328 }
 0x11f   : > { %11063 = vst [vmem:[#allocation31_spill] sm:$0xff] %v7622_v62  ;;  %11064 = vst [vmem:[#allocation32_spill] sm:$0xff] %v7628_v40 }
 0x120   : > { %1956 = vrot.lane.b32.xlu1 %v7205_v44, %s6822_s19  ;;  %1876 = vrot.lane.b32.xlu0 %v7205_v44, %s6821_s17 }
 0x122   : > { %v7630_v27 = vpop.permute.xlu1 %1352  ;;  %v7636_v14 = vpop.permute.xlu0 %1458 }
 0x123   : > { %11065 = vst [vmem:[#allocation33_spill] sm:$0xff] %v7630_v27 }
 0x124   : > { %1958 = vrot.lane.b32.xlu1 %v7196_v41, %s6822_s19  ;;  %1878 = vrot.lane.b32.xlu0 %v7196_v41, %s6821_s17 }
 0x126   : > { %v7638_v49 = vpop.permute.xlu1 %1538  ;;  %v7644_v63 = vpop.permute.xlu0 %1460 }
 0x128   : > { %2038 = vrot.lane.b32.xlu1 %v7196_v41, %s6823_s24  ;;  %2036 = vrot.lane.b32.xlu0 %v7205_v44, %s6823_s24 }
 0x12a   : > { %v7646_v34 = vpop.permute.xlu1 %1540  ;;  %v7652_v1 = vpop.permute.xlu0 %1258 }
 0x12b   : > { %11066 = vst [vmem:[#allocation34_spill] sm:$0xff] %v7646_v34  ;;  %11067 = vst [vmem:[#allocation35_spill] sm:$0xff] %v7652_v1 }
 0x12c   : > { %1960 = vrot.lane.b32.xlu1 %v7216_v47, %s6822_s19  ;;  %1880 = vrot.lane.b32.xlu0 %v7216_v47, %s6821_s17 }
 0x12e   : > { %v7654_v20 = vpop.permute.xlu1 %1282  ;;  %v7660_v28 = vpop.permute.xlu0 %1260 }
 0x12f   : > { %11068 = vst [vmem:[#allocation36_spill] sm:$0xff] %v7654_v20  ;;  %11069 = vst [vmem:[#allocation37_spill] sm:$0xff] %v7660_v28 }
 0x130   : > { %1962 = vrot.lane.b32.xlu1 %v7361_v37, %s6822_s19  ;;  %1882 = vrot.lane.b32.xlu0 %v7361_v37, %s6821_s17  ;;  %s11455_s19 = smov 6  }
 0x132   : > { %v7662_v38 = vpop.permute.xlu1 %1306  ;;  %v7668_v9 = vpop.permute.xlu0 %1284 }
 0x133   : > { %11070 = vst [vmem:[#allocation38_spill] sm:$0xff] %v7662_v38  ;;  %11071 = vst [vmem:[#allocation39_spill] sm:$0xff] %v7668_v9 }
 0x134   : > { %2042 = vrot.lane.b32.xlu1 %v7361_v37, %s6823_s24  ;;  %2040 = vrot.lane.b32.xlu0 %v7216_v47, %s6823_s24  ;;  %s11456_s24 = smov 12  }
 0x136   : > { %v7670_v7 = vpop.permute.xlu1 %1308  ;;  %v7676_v48 = vpop.permute.xlu0 %1462 }
 0x137   : > { %11072 = vst [vmem:[#allocation40_spill] sm:$0xff] %v7670_v7  ;;  %11073 = vst [vmem:[#allocation41_spill] sm:$0xff] %v7676_v48  ;;  %v1479_v48 = vsel %vm987_vm4, %v7588_v30, %v11047_v12 }
 0x138   : > { %2405 = vrot.lane.b32.xlu1 %v11042_v33, %s6824_s21  ;;  %2325 = vrot.lane.b32.xlu0 %v11042_v33, %s6825_s27 }
 0x13a   : > { %v7680_v21 = vpop.permute.xlu1 %1464  ;;  %v7692_v56 = vpop.permute.xlu0 %1330 }
 0x13b   : > { %11074 = vst [vmem:[#allocation42_spill] sm:$0xff] %v7692_v56 }
 0x13c   : > { %2407 = vrot.lane.b32.xlu1 %v11047_v12, %s6824_s21  ;;  %2327 = vrot.lane.b32.xlu0 %v11047_v12, %s6825_s27 }
 0x13e   : > { %v7696_v16 = vpop.permute.xlu1 %1262  ;;  %v7708_v0 = vpop.permute.xlu0 %1542 }
 0x13f   : > { %11075 = vst [vmem:[#allocation43_spill] sm:$0xff] %v7696_v16  ;;  %11078 = vst [vmem:[#allocation46_spill] sm:$0xff] %v7708_v0 }
 0x140   : > { %2487 = vrot.lane.b32.xlu1 %v11047_v12, %s6826_s15  ;;  %2485 = vrot.lane.b32.xlu0 %v11042_v33, %s6826_s15 }
 0x142   : > { %v7710_v35 = vpop.permute.xlu1 %1354  ;;  %v7716_v59 = vpop.permute.xlu0 %1332 }
 0x143   : > { %11079 = vst [vmem:[#allocation47_spill] sm:$0xff] %v7710_v35  ;;  %11080 = vst [vmem:[#allocation48_spill] sm:$0xff] %v7716_v59 }
 0x144   : > { %2409 = vrot.lane.b32.xlu1 %v11056_v42, %s6824_s21  ;;  %2329 = vrot.lane.b32.xlu0 %v11056_v42, %s6825_s27 }
 0x146   : > { %v7718_v10 = vpop.permute.xlu1 %1264  ;;  %v7736_v16 = vpop.permute.xlu0 %1544 }
 0x147   : > { %11081 = vst [vmem:[#allocation49_spill] sm:$0xff] %v7718_v10  ;;  %11082 = vst [vmem:[#allocation50_spill] sm:$0xff] %v7736_v16  ;;  %v6494_v10 = vpack.c.bf16 %v513_v5, %v511_v4  ;;  %v515_v4 = vld [vmem:[%s10787_s7 + $0x48] sm:$0xff]  ;;  %v517_v5 = vld [vmem:[%s10787_s7 + $0x58] sm:$0xff]  ;;  %v1558_v16 = vsel %vm987_vm4, %v7582_v60, %v7574_v15 }
 0x148   : > { %2411 = vrot.lane.b32.xlu1 %v11059_v46, %s6824_s21  ;;  %2331 = vrot.lane.b32.xlu0 %v11059_v46, %s6825_s27 }
 0x149   : > { %6495 = vmatprep.subr.bf16.mxu1 %v6494_v10  ;;  %v514_v10 = vld [vmem:[%s10787_s7 + $0x40] sm:$0xff] }
 0x14a   : > { %v7738_v58 = vpop.permute.xlu1 %1356  ;;  %v7756_v52 = vpop.permute.xlu0 %1286  ;;  %6497 = vmatpush1.bf16.msra.mxu1 %v6496_v53  ;;  %v6500_v53 = vpack.c.bf16 %v516_v43, %v514_v10  ;;  %v520_v10 = vld [vmem:[%s10787_s7 + $0x70] sm:$0xff] }
 0x14b   : > { %11083 = vst [vmem:[#allocation51_spill] sm:$0xff] %v7738_v58  ;;  %11084 = vst [vmem:[#allocation52_spill] sm:$0xff] %v7756_v52  ;;  %v6498_v52 = vpack.c.bf16 %v517_v5, %v515_v4  ;;  %v519_v4 = vld [vmem:[%s10787_s7 + $0x68] sm:$0xff]  ;;  %v521_v5 = vld [vmem:[%s10787_s7 + $0x78] sm:$0xff] }
 0x14c   : > { %2491 = vrot.lane.b32.xlu1 %v11059_v46, %s6826_s15  ;;  %2489 = vrot.lane.b32.xlu0 %v11056_v42, %s6826_s15 }
 0x14d   : > { %6499 = vmatprep.subr.bf16.mxu1 %v6498_v52  ;;  %v518_v52 = vld [vmem:[%s10787_s7 + $0x60] sm:$0xff] }
 0x14e   : > { %v7758_v29 = vpop.permute.xlu1 %1310  ;;  %v7776_v23 = vpop.permute.xlu0 %1288  ;;  %6501 = vmatpush1.bf16.msra.mxu1 %v6500_v53  ;;  %v6504_v53 = vpack.c.bf16 %v520_v10, %v518_v52  ;;  %v524_v52 = vld [vmem:[%s10787_s7 + $0x90] sm:$0xff] }
 0x14f   : > { %11085 = vst [vmem:[#allocation53_spill] sm:$0xff] %v7758_v29  ;;  %11086 = vst [vmem:[#allocation54_spill] sm:$0xff] %v7776_v23  ;;  %v6502_v23 = vpack.c.bf16 %v521_v5, %v519_v4  ;;  %v523_v4 = vld [vmem:[%s10787_s7 + $0x88] sm:$0xff]  ;;  %v525_v5 = vld [vmem:[%s10787_s7 + $0x98] sm:$0xff] }
 0x150   : > { %2413 = vrot.lane.b32.xlu1 %v7205_v44, %s6824_s21  ;;  %2333 = vrot.lane.b32.xlu0 %v7205_v44, %s6825_s27 }
 0x151   : > { %6503 = vmatprep.subr.bf16.mxu1 %v6502_v23  ;;  %v522_v23 = vld [vmem:[%s10787_s7 + $0x80] sm:$0xff] }
 0x152   : > { %v7778_v29 = vpop.permute.xlu1 %1312  ;;  %v7796_v43 = vpop.permute.xlu0 %1466  ;;  %6505 = vmatpush1.bf16.msra.mxu1 %v6504_v53  ;;  %v6508_v53 = vpack.c.bf16 %v524_v52, %v522_v23  ;;  %v528_v52 = vld [vmem:[%s10787_s7 + $0xb0] sm:$0xff] }
 0x153   : > { %11087 = vst [vmem:[#allocation55_spill] sm:$0xff] %v7778_v29  ;;  %11088 = vst [vmem:[#allocation56_spill] sm:$0xff] %v7796_v43  ;;  %v6506_v43 = vpack.c.bf16 %v525_v5, %v523_v4  ;;  %v529_v4 = vld [vmem:[%s10787_s7 + $0xb8] sm:$0xff]  ;;  %v11092_v5 = vld [vmem:[#allocation3_spill] sm:$0xff] }
 0x154   : > { %2415 = vrot.lane.b32.xlu1 %v7196_v41, %s6824_s21  ;;  %2335 = vrot.lane.b32.xlu0 %v7196_v41, %s6825_s27  ;;  %v7829_v8 = vadd.s32 32, %v11092_v5  ;;  %v7832_v23 = vadd.s32 40, %v11092_v5 }
 0x155   : > { %6507 = vmatprep.subr.bf16.mxu1 %v6506_v43 }
 0x156   : > { %v7798_v29 = vpop.permute.xlu1 %1468  ;;  %v7816_v10 = vpop.permute.xlu0 %1334  ;;  %6509 = vmatpush1.bf16.msra.mxu1 %v6508_v53  ;;  %11093 = vst [vmem:[#allocation60_spill] sm:$0xff] %v7829_v8  ;;  %11094 = vst [vmem:[#allocation61_spill] sm:$0xff] %v7832_v23  ;;  %vm1709_vm11 = vcmp.ge.s32.totalorder %v7829_v8, %v7052_v18  ;;  %vm1710_vm1 = vcmp.ge.s32.totalorder %v7832_v23, %v7052_v18  ;;  %vm1715_vm13 = vcmp.lt.s32.totalorder %v7829_v8, %v7055_v19 }
 0x157   : > { %11089 = vst [vmem:[#allocation57_spill] sm:$0xff] %v7798_v29  ;;  %11090 = vst [vmem:[#allocation58_spill] sm:$0xff] %v7816_v10  ;;  %vm1716_vm14 = vcmp.lt.s32.totalorder %v7832_v23, %v7055_v19  ;;  %v532_v23 = vld [vmem:[%s10787_s7 + $0xd0] sm:$0xff]  ;;  %v1705_v8 = vadd.s32 48, %v11092_v5 }
 0x158   : > { %2495 = vrot.lane.b32.xlu1 %v7196_v41, %s6826_s15  ;;  %2493 = vrot.lane.b32.xlu0 %v7205_v44, %s6826_s15  ;;  %v527_v41 = vld [vmem:[%s10787_s7 + $0xa8] sm:$0xff]  ;;  %v526_v44 = vld [vmem:[%s10787_s7 + $0xa0] sm:$0xff]  ;;  %vm1721_vm15 = vmand %vm1709_vm11, %vm1715_vm13 }
 0x159   : > { %v6510_v43 = vpack.c.bf16 %v529_v4, %v527_v41  ;;  %vm1722_vm12 = vmand %vm1710_vm1, %vm1716_vm14  ;;  %v531_v4 = vld [vmem:[%s10787_s7 + $0xc8] sm:$0xff]  ;;  %vm1717_vm1 = vcmp.lt.s32.totalorder %v1705_v8, %v7055_v19 }
 0x15a   : > { %v7818_v29 = vpop.permute.xlu1 %1244  ;;  %v7842_v53 = vpop.permute.xlu0 %1546  ;;  %vm7864_vm10 = vmpackc.low %vm1722_vm12, %vm1721_vm15  ;;  %vm1711_vm12 = vcmp.ge.s32.totalorder %v1705_v8, %v7052_v18 }
 0x15b   : > { %11091 = vst [vmem:[#allocation59_spill] sm:$0xff] %v7818_v29  ;;  %11095 = vst [vmem:[#allocation62_spill] sm:$0xff] %v7842_v53  ;;  %v6512_v29 = vpack.c.bf16 %v528_v52, %v526_v44  ;;  %6511 = vmatprep.subr.bf16.mxu1 %v6510_v43  ;;  %v533_v44 = vld [vmem:[%s10787_s7 + $0xd8] sm:$0xff]  ;;  %v11097_v43 = vmov 0  ;;  %v530_v52 = vld [vmem:[%s10787_s7 + $0xc0] sm:$0xff]  ;;  %6535 = vmatprep.subr.msk.bf16.mxu0 %vm7864_vm10, %v11035_v57 }
 0x15c   : > { %2417 = vrot.lane.b32.xlu1 %v7216_v47, %s6824_s21  ;;  %2337 = vrot.lane.b32.xlu0 %v7216_v47, %s6825_s27  ;;  %v11098_v43 = vsel %vm7864_vm10, 4294967295, %v11097_v43  ;;  %v6516_v53 = vpack.c.bf16 %v532_v23, %v530_v52  ;;  %v1559_v23 = vsel %vm987_vm4, %v7590_v3, %v7588_v30  ;;  %v1478_v52 = vsel %vm987_vm4, %v7574_v15, %v11042_v33  ;;  %vm1723_vm14 = vmand %vm1711_vm12, %vm1717_vm1 }
 0x15d   : > { %6513 = vmatpush1.bf16.msra.mxu1 %v6512_v29  ;;  %11099 = vst [vmem:[#allocation64_spill] sm:$0xff] %v11098_v43  ;;  %v6514_v29 = vpack.c.bf16 %v533_v44, %v531_v4  ;;  %6537 = vmatpush3.bf16.msk.msra.mxu0 %vm7864_vm10, %v11035_v57  ;;  %v535_v4 = vld [vmem:[%s10787_s7 + $0xe8] sm:$0xff]  ;;  %v537_v44 = vld [vmem:[%s10787_s7 + $0xf8] sm:$0xff]  ;;  %v1707_v30 = vadd.s32 64, %v11092_v5  ;;  %v1566_v3 = vsel %vm996_vm3, %v1558_v16, %v11042_v33  ;;  %v11104_v16 = vmov 0 }
 0x15e   : > { %v7850_v41 = vpop.permute.xlu1 %1336  ;;  %v7875_v10 = vpop.permute.xlu0 %1266  ;;  %v6518_v8 = vpack.c.bf16 %v537_v44, %v535_v4  ;;  %v1487_v44 = vsel %vm996_vm3, %v1479_v48, %v7550_v45 }
 0x15f   : > { %11096 = vst [vmem:[#allocation63_spill] sm:$0xff] %v7850_v41  ;;  %11100 = vst [vmem:[#allocation65_spill] sm:$0xff] %v7875_v10  ;;  %v1706_v41 = vadd.s32 56, %v11092_v5  ;;  %v7892_v10 = vld [vmem:[%s10786_s6] ss:$0 sm:$0xff]  ;;  %6515 = vmatprep.subr.bf16.mxu1 %v6514_v29  ;;  %v1567_v5 = vsel %vm996_vm3, %v1559_v23, %v11047_v12  ;;  %v1495_v48 = vsel %vm10985_vm5, %v1487_v44, %v7604_v36 }
 0x160   : > { %2419 = vrot.lane.b32.xlu1 %v7361_v37, %s6824_s21  ;;  %2339 = vrot.lane.b32.xlu0 %v7361_v37, %s6825_s27  ;;  %v534_v29 = vld [vmem:[%s10787_s7 + $0xe0] sm:$0xff]  ;;  %v1503_v23 = vsel %vm11005_vm6, %v1495_v48, %v7612_v54  ;;  %vm1719_vm1 = vcmp.lt.s32.totalorder %v1707_v30, %v7055_v19  ;;  %s6833_s27 = smov 80  }
 0x161   : > { %vm1712_vm11 = vcmp.ge.s32.totalorder %v1706_v41, %v7052_v18  ;;  %6517 = vmatpush1.bf16.msra.mxu1 %v6516_v53  ;;  %vm1718_vm13 = vcmp.lt.s32.totalorder %v1706_v41, %v7055_v19  ;;  %v536_v53 = vld [vmem:[%s10787_s7 + $0xf0] sm:$0xff]  ;;  %v1486_v41 = vsel %vm996_vm3, %v1478_v52, %v7556_v11  ;;  %v1511_v52 = vsel %vm1023_vm7, %v1503_v23, %v7620_v32 }
 0x162   : > { %v7881_v0 = vpop.permute.xlu1 %1548  ;;  %v7921_v60 = vpop.permute.xlu0 %1358  ;;  %vm1724_vm15 = vmand %vm1712_vm11, %vm1718_vm13  ;;  %6519 = vmatprep.subr.bf16.mxu1 %v6518_v8  ;;  %vm1713_vm11 = vcmp.ge.s32.totalorder %v1707_v30, %v7052_v18  ;;  %v1574_v8 = vsel %vm10985_vm5, %v1566_v3, %v7556_v11  ;;  %v11107_v3 = vmov 0  ;;  %v10855_v19 = vmov 0.0  }
 0x163   : > { %11101 = vst [vmem:[#allocation66_spill] sm:$0xff] %v7881_v0  ;;  %11102 = vst [vmem:[#allocation67_spill] sm:$0xff] %v7921_v60  ;;  %762 = vmatprep.mubr.f32.mxu1 %v10855_v19  ;;  %v1494_v48 = vsel %vm10985_vm5, %v1486_v41, %v7596_v61  ;;  %v1582_v41 = vsel %vm11005_vm6, %v1574_v8, %v7596_v61 }
 0x164   : > { %2499 = vrot.lane.b32.xlu1 %v7361_v37, %s6826_s15  ;;  %v641_v37 = vadd.f32 %v7892_v10, %v7682_v2  ;;  %vm7938_vm12 = vmpackc.low %vm1724_vm15, %vm1723_vm14  ;;  %v6520_v2 = vpack.c.bf16 %v536_v53, %v534_v29  ;;  %2497 = vrot.lane.b32.xlu0 %v7216_v47, %s6826_s15  ;;  %v646_v29 = vadd.f32 %v7678_v31, %v7892_v10  ;;  %v11111_v31 = vmov 1.0   ;;  %s11117_s15 = smov 48  }
 0x165   : > { %v11105_v16 = vsel %vm7938_vm12, 4294967295, %v11104_v16  ;;  %6539 = vmatprep.subr.msk.bf16.mxu0 %vm7938_vm12, %v11035_v57  ;;  %vm7972_vm13 = vmand %vm1713_vm11, %vm1719_vm1  ;;  %v1502_v18 = vsel %vm11005_vm6, %v1494_v48, %v7598_v13  ;;  %vm11112_vm14 = vcmask 171008  }
 0x166   : > { %v7932_v4 = vpop.permute.xlu1 %1290  ;;  %11106 = vst [vmem:[#allocation69_spill] sm:$0xff] %v11105_v16  ;;  %6541 = vmatpush3.bf16.msk.msra.mxu0 %vm7938_vm12, %v11035_v57  ;;  %v7962_v47 = vpop.permute.xlu0 %1268  ;;  %v679_v53 = vmax.f32 %v641_v37, 0.0  ;;  %6521 = vmatpush1.bf16.msra.mxu1 %v6520_v2  ;;  %v11108_v3 = vsel %vm7972_vm13, 4294967295, %v11107_v3  ;;  %v1510_v30 = vsel %vm1023_vm7, %v1502_v18, %v7606_v6  ;;  %v680_v48 = vmax.f32 %v646_v29, 0.0  ;;  %vm11114_vm15 = vmmov %vm11112_vm14  ;;  %v8165_v16 = vld [vmem:[%s7163_s25 + $0x20] sm:$0xff] }
 0x167   : > { %11103 = vst [vmem:[#allocation68_spill] sm:$0xff] %v7932_v4  ;;  %11109 = vst [vmem:[#allocation70_spill] sm:$0xff] %v11108_v3  ;;  %6176 = vmatprep.subr.msk.mxu0 %vm7972_vm13, %v11111_v31  ;;  %6670 = vmatprep.subr.msk.bf16.mxu1 %vm7075_vm8, %v11035_v57  ;;  %v1518_v23 = vsel %vm1032_vm9, %v1510_v30, %v7614_v55  ;;  %v1481_v29 = vsel %vm987_vm4, %v7644_v63, %v11059_v46  ;;  %v11144_v3 = vld [vmem:[#allocation63_spill] sm:$0xff] }
 0x168   : > { %1376 = vrot.lane.b32.xlu1 %v11047_v12, %s6816_s28  ;;  %v1575_v12 = vsel %vm10985_vm5, %v1567_v5, %v7550_v45  ;;  %v1519_v5 = vsel %vm1032_vm9, %v1511_v52, %v7628_v40  ;;  %1374 = vrot.lane.b32.xlu0 %v11042_v33, %s6816_s28  ;;  %v1526_v8 = vsel %vm11114_vm15, %v1518_v23, %v7622_v62  ;;  %vm11116_vm11 = vmmov %vm11112_vm14  ;;  %v11141_v62 = vld [vmem:[#allocation55_spill] sm:$0xff] }
 0x169   : > { %v1527_v37 = vsel %vm11112_vm14, %v1519_v5, %v7630_v27  ;;  %v1583_v2 = vsel %vm11005_vm6, %v1575_v12, %v7604_v36  ;;  %v651_v5 = vadd.f32 %v7892_v10, %v7690_v50  ;;  %763 = vmatmul.mubr.f32.vlgmr.msra.gmra.mrb[0].mxu1 %v679_v53  ;;  %v1561_v53 = vsel %vm987_vm4, %v7646_v34, %v7644_v63  ;;  %vm11119_vm1 = vmmov %vm11116_vm11 }
 0x16a   : > { %v7977_v44 = vpop.permute.xlu1 %1292  ;;  %6177 = vmatpush3.msk.msra.mxu0 %vm7972_vm13, %v11111_v31  ;;  %v8005_v33 = vpop.permute.xlu0 %1360  ;;  %v1591_v52 = vsel %vm1023_vm7, %v1583_v2, %v7612_v54  ;;  %768 = vmatprep.mubr.f32.mxu1 %v10855_v19  ;;  %v1560_v23 = vsel %vm987_vm4, %v7638_v49, %v7636_v14  ;;  %v1569_v19 = vsel %vm996_vm3, %v1561_v53, %v11059_v46  ;;  %vm11124_vm14 = vmmov %vm11119_vm1 }
 0x16b   : > { %11110 = vst [vmem:[#allocation71_spill] sm:$0xff] %v7977_v44  ;;  %11113 = vst [vmem:[#allocation72_spill] sm:$0xff] %v8005_v33  ;;  %6543 = vmatprep.subr.msk.bf16.mxu0 %vm7075_vm8, %v11035_v57  ;;  %v1599_v18 = vsel %vm1032_vm9, %v1591_v52, %v7620_v32  ;;  %6675 = vmatpush3.bf16.msk.msra.mxu1 %vm7075_vm8, %v11035_v57  ;;  %v656_v52 = vadd.f32 %v7686_v39, %v7892_v10 }
 0x16c   : > { %1624 = vrot.lane.b32.xlu1 %v1527_v37, %s6818_s14  ;;  %v1590_v37 = vsel %vm1023_vm7, %v1582_v41, %v7598_v13  ;;  %1622 = vrot.lane.b32.xlu0 %v1526_v8, %s6818_s14  ;;  %v1607_v50 = vsel %vm11116_vm11, %v1599_v18, %v7628_v40  ;;  %v1480_v41 = vsel %vm987_vm4, %v7636_v14, %v11056_v42  ;;  %v681_v8 = vmax.f32 %v651_v5, 0.0  ;;  %vm11126_vm15 = vmmov %vm11119_vm1  ;;  %v11149_v40 = vld [vmem:[#allocation62_spill] sm:$0xff] }
 0x16d   : > { %6671 = vmatprep.subr.msk.bf16.mxu1 %vm7473_vm0, %v11035_v57  ;;  %v1598_v30 = vsel %vm1032_vm9, %v1590_v37, %v7606_v6  ;;  %769 = vmatmul.mubr.f32.gmra.mrb[2].mxu1 %v680_v48  ;;  %v1489_v37 = vsel %vm996_vm3, %v1481_v29, %v7558_v24  ;;  %v1488_v48 = vsel %vm996_vm3, %v1480_v41, %v7564_v26  ;;  %vm11128_vm11 = vmmov %vm11119_vm1 }
 0x16e   : > { %v8018_v12 = vpop.permute.xlu1 %1868  ;;  %v8043_v2 = vpop.permute.xlu0 %1314  ;;  %v1606_v18 = vsel %vm11119_vm1, %v1598_v30, %v7614_v55  ;;  %774 = vmatprep.mubr.f32.mxu1 %v11121_v22  ;;  %v1497_v39 = vsel %vm10985_vm5, %v1489_v37, %v7660_v28  ;;  %v1568_v29 = vsel %vm996_vm3, %v1560_v23, %v11056_v42  ;;  %v661_v41 = vadd.f32 %v7892_v10, %v7698_v17 }
 0x16f   : > { %11115 = vst [vmem:[#allocation73_spill] sm:$0xff] %v8018_v12  ;;  %11118 = vst [vmem:[#allocation74_spill] sm:$0xff] %v8043_v2  ;;  %v1505_v5 = vsel %vm11005_vm6, %v1497_v39, %v7668_v9  ;;  %6676 = vmatpush3.bf16.msk.msra.mxu1 %vm7473_vm0, %v11035_v57  ;;  %v1496_v37 = vsel %vm10985_vm5, %v1488_v48, %v7652_v1 }
 0x170   : > { %1656 = vrot.lane.b32.xlu1 %v1607_v50, %s11117_s15  ;;  %1654 = vrot.lane.b32.xlu0 %v1606_v18, %s11117_s15  ;;  %v1513_v30 = vsel %vm1023_vm7, %v1505_v5, %v7670_v7  ;;  %v682_v18 = vmax.f32 %v656_v52, 0.0  ;;  %v1504_v17 = vsel %vm11005_vm6, %v1496_v37, %v7654_v20  ;;  %v666_v37 = vadd.f32 %v7694_v51, %v7892_v10 }
 0x171   : > { %775 = vmatmul.mubr.f32.gmra.mrb[4].mxu1 %v681_v8  ;;  %6672 = vmatprep.subr.msk.bf16.mxu1 %vm7864_vm10, %v11035_v57  ;;  %v1521_v39 = vsel %vm1032_vm9, %v1513_v30, %v7716_v59  ;;  %v1512_v52 = vsel %vm1023_vm7, %v1504_v17, %v7662_v38  ;;  %v1576_v8 = vsel %vm10985_vm5, %v1568_v29, %v7564_v26  ;;  %v683_v29 = vmax.f32 %v661_v41, 0.0  ;;  %v8134_v41 = vld [vmem:[%s7163_s25 + $0x28] sm:$0xff] }
 0x172   : > { %v8055_v50 = vpop.permute.xlu1 %1316  ;;  %v8076_v53 = vpop.permute.xlu0 %1948  ;;  %780 = vmatprep.mubr.f32.mxu1 %v11121_v22  ;;  %v1520_v5 = vsel %vm1032_vm9, %v1512_v52, %v7692_v56  ;;  %v1584_v51 = vsel %vm11005_vm6, %v1576_v8, %v7652_v1  ;;  %v11129_v52 = vld [vmem:[#allocation50_spill] sm:$0xff]  ;;  %v11130_v8 = vld [vmem:[#allocation41_spill] sm:$0xff] }
 0x173   : > { %11120 = vst [vmem:[#allocation75_spill] sm:$0xff] %v8055_v50  ;;  %11122 = vst [vmem:[#allocation76_spill] sm:$0xff] %v8076_v53  ;;  %6677 = vmatpush3.bf16.msk.msra.mxu1 %vm7864_vm10, %v11035_v57 }
 0x174   : > { %1380 = vrot.lane.b32.xlu1 %v11059_v46, %s6816_s28  ;;  %v1577_v46 = vsel %vm10985_vm5, %v1569_v19, %v7558_v24  ;;  %1378 = vrot.lane.b32.xlu0 %v11056_v42, %s6816_s28  ;;  %v1529_v19 = vsel %vm11124_vm14, %v1521_v39, %v7738_v58  ;;  %v671_v58 = vadd.f32 %v7892_v10, %v11133_v25  ;;  %vm11146_vm14 = vmmov %vm11119_vm1 }
 0x175   : > { %v1585_v48 = vsel %vm11005_vm6, %v1577_v46, %v7660_v28  ;;  %781 = vmatmul.mubr.f32.gmra.mrb[6].mxu1 %v682_v18  ;;  %6673 = vmatprep.subr.msk.bf16.mxu1 %vm7938_vm12, %v11035_v57  ;;  %v1528_v46 = vsel %vm11126_vm15, %v1520_v5, %v7710_v35  ;;  %v1592_v5 = vsel %vm1023_vm7, %v1584_v51, %v7654_v20  ;;  %v684_v35 = vmax.f32 %v666_v37, 0.0  ;;  %v11135_v37 = vld [vmem:[#allocation20_spill] sm:$0xff]  ;;  %vm11153_vm15 = vmmov %vm11119_vm1 }
 0x176   : > { %v8087_v23 = vpop.permute.xlu1 %1870  ;;  %v8110_v42 = vpop.permute.xlu0 %1338  ;;  %v1593_v30 = vsel %vm1023_vm7, %v1585_v48, %v7668_v9  ;;  %786 = vmatprep.mubr.f32.mxu1 %v11121_v22  ;;  %v1563_v48 = vsel %vm987_vm4, %v11129_v52, %v7680_v21  ;;  %v1600_v43 = vsel %vm1032_vm9, %v1592_v5, %v7662_v38  ;;  %v1482_v5 = vsel %vm987_vm4, %v11130_v8, %v8165_v16 }
 0x177   : > { %11123 = vst [vmem:[#allocation77_spill] sm:$0xff] %v8087_v23  ;;  %11125 = vst [vmem:[#allocation78_spill] sm:$0xff] %v8110_v42  ;;  %v1601_v17 = vsel %vm1032_vm9, %v1593_v30, %v7670_v7  ;;  %v11131_v30 = vld [vmem:[#allocation46_spill] sm:$0xff]  ;;  %6678 = vmatpush3.bf16.msk.msra.mxu1 %vm7938_vm12, %v11035_v57  ;;  %v1608_v51 = vsel %vm11119_vm1, %v1600_v43, %v7692_v56  ;;  %v1571_v25 = vsel %vm996_vm3, %v1563_v48, %v8134_v41  ;;  %v11137_v57 = vld [vmem:[#allocation44_spill] sm:$0xff] }
 0x178   : > { %1628 = vrot.lane.b32.xlu1 %v1529_v19, %s6818_s14  ;;  %1626 = vrot.lane.b32.xlu0 %v1528_v46, %s6818_s14  ;;  %v1609_v18 = vsel %vm11128_vm11, %v1601_v17, %v7716_v59  ;;  %v1483_v19 = vsel %vm987_vm4, %v7680_v21, %v8134_v41  ;;  %v1562_v46 = vsel %vm987_vm4, %v11131_v30, %v11130_v8  ;;  %vm11155_vm11 = vmmov %vm11119_vm1 }
 0x179   : > { %787 = vmatmul.mubr.f32.gmra.mrb[8].mxu1 %v683_v29  ;;  %6674 = vmatprep.subr.msk.mxu1 %vm7972_vm13, %v11111_v31  ;;  %v1491_v38 = vsel %vm996_vm3, %v1483_v19, %v11135_v37  ;;  %v11136_v29 = vld [vmem:[#allocation49_spill] sm:$0xff]  ;;  %v1570_v56 = vsel %vm996_vm3, %v1562_v46, %v8165_v16  ;;  %v676_v59 = vadd.f32 %v11137_v57, %v7892_v10  ;;  %v11138_v19 = vld [vmem:[#allocation54_spill] sm:$0xff]  ;;  %v685_v10 = vmax.f32 %v671_v58, 0.0 }
 0x17a   : > { %v8123_v39 = vpop.permute.xlu1 %2028  ;;  %v8151_v17 = vpop.permute.xlu0 %1950  ;;  %792 = vmatprep.mubr.f32.mxu1 %v11121_v22  ;;  %v1499_v43 = vsel %vm10985_vm5, %v1491_v38, %v11136_v29  ;;  %v1579_v57 = vsel %vm10985_vm5, %v1571_v25, %v11135_v37  ;;  %v11147_v25 = vld [vmem:[#allocation53_spill] sm:$0xff] }
 0x17b   : > { %11127 = vst [vmem:[#allocation79_spill] sm:$0xff] %v8123_v39  ;;  %11132 = vst [vmem:[#allocation50_spill] sm:$0xff] %v8151_v17  ;;  %v1507_v7 = vsel %vm11005_vm6, %v1499_v43, %v11138_v19  ;;  %6679 = vmatpush3.msk.msra.mxu1 %vm7972_vm13, %v11111_v31  ;;  %v11143_v43 = vld [vmem:[#allocation43_spill] sm:$0xff] }
 0x17c   : > { %1660 = vrot.lane.b32.xlu1 %v1609_v18, %s11117_s15  ;;  %1658 = vrot.lane.b32.xlu0 %v1608_v51, %s11117_s15  ;;  %v11140_v51 = vld [vmem:[#allocation10_spill] sm:$0xff]  ;;  %v1515_v46 = vsel %vm1023_vm7, %v1507_v7, %v11141_v62  ;;  %v11145_v7 = vld [vmem:[#allocation52_spill] sm:$0xff] }
 0x17d   : > { %v1490_v38 = vsel %vm996_vm3, %v1482_v5, %v11140_v51  ;;  %793 = vmatmul.mubr.f32.gmra.mrb[10].mxu1 %v684_v35  ;;  %v1523_v31 = vsel %vm1032_vm9, %v1515_v46, %v11144_v3  ;;  %v1578_v27 = vsel %vm10985_vm5, %v1570_v56, %v11140_v51  ;;  %v686_v5 = vmax.f32 %v676_v59, 0.0  ;;  %v11148_v46 = vld [vmem:[#allocation56_spill] sm:$0xff]  ;;  %v11150_v51 = vld [vmem:[#allocation57_spill] sm:$0xff] }
 0x17e   : > { %v8162_v18 = vpop.permute.xlu1 %1362  ;;  %v8189_v48 = vpop.permute.xlu0 %1340  ;;  %v1498_v6 = vsel %vm10985_vm5, %v1490_v38, %v11143_v43  ;;  %798 = vmatprep.mubr.f32.mxu1 %v11121_v22  ;;  %v1531_v35 = vsel %vm11146_vm14, %v1523_v31, %v8005_v33  ;;  %v1587_v56 = vsel %vm11005_vm6, %v1579_v57, %v11136_v29  ;;  %v1564_v32 = vsel %vm987_vm4, %v11149_v40, %v11148_v46  ;;  %vm11165_vm14 = vmmov %vm11119_vm1 }
 0x17f   : > { %11134 = vst [vmem:[#allocation41_spill] sm:$0xff] %v8162_v18  ;;  %11139 = vst [vmem:[#allocation46_spill] sm:$0xff] %v8189_v48  ;;  %v1506_v58 = vsel %vm11005_vm6, %v1498_v6, %v11145_v7  ;;  %v1565_v6 = vsel %vm987_vm4, %v7881_v0, %v11150_v51  ;;  %v1973_v59 = vsel %vm987_vm4, %v8151_v17, %v8087_v23 }
 0x180   : > { %1384 = vrot.lane.b32.xlu1 %v8134_v41, %s6816_s28  ;;  %1382 = vrot.lane.b32.xlu0 %v8165_v16, %s6816_s28  ;;  %v1514_v38 = vsel %vm1023_vm7, %v1506_v58, %v11147_v25  ;;  %v11152_v58 = vld [vmem:[#allocation58_spill] sm:$0xff]  ;;  %v1586_v57 = vsel %vm11005_vm6, %v1578_v27, %v11143_v43  ;;  %v1595_v33 = vsel %vm1023_vm7, %v1587_v56, %v11138_v19 }
 0x181   : > { %799 = vmatmul.mubr.f32.gmra.mrb[12].mxu1 %v685_v10  ;;  %v1594_v40 = vsel %vm1023_vm7, %v1586_v57, %v11145_v7  ;;  %v1603_v20 = vsel %vm1032_vm9, %v1595_v33, %v11141_v62  ;;  %v1972_v27 = vsel %vm987_vm4, %v8076_v53, %v8018_v12  ;;  %v11157_v33 = vld [vmem:[#allocation25_spill] sm:$0xff]  ;;  %v11161_v7 = vld [vmem:[#allocation22_spill] sm:$0xff] }
 0x182   : > { %v8197_v55 = vpop.permute.xlu1 %1364  ;;  %v8226_v31 = vpop.permute.xlu0 %2030  ;;  %804 = vmatprep.mubr.f32.mxu1 %v11121_v22  ;;  %v1611_v10 = vsel %vm11155_vm11, %v1603_v20, %v11144_v3  ;;  %v1981_v22 = vsel %vm996_vm3, %v1973_v59, %v11157_v33  ;;  %v11160_v3 = vld [vmem:[#allocation59_spill] sm:$0xff]  ;;  %vm11169_vm11 = vmmov %vm11119_vm1 }
 0x183   : > { %11142 = vst [vmem:[#allocation45_spill] sm:$0xff] %v8197_v55  ;;  %11151 = vst [vmem:[#allocation44_spill] sm:$0xff] %v8226_v31 }
 0x184   : > { %1632 = vrot.lane.b32.xlu1 %v1531_v35, %s6818_s14  ;;  %v1522_v35 = vsel %vm1032_vm9, %v1514_v38, %v11152_v58  ;;  %v8250_v38 = vld [vmem:[%s7163_s25 + $0x30] sm:$0xff] }
 0x185   : > { %v1530_v29 = vsel %vm11153_vm15, %v1522_v35, %v7921_v60  ;;  %v1572_v56 = vsel %vm996_vm3, %v1564_v32, %v8250_v38  ;;  %v11156_v35 = vld [vmem:[#allocation18_spill] sm:$0xff]  ;;  %v1602_v60 = vsel %vm1032_vm9, %v1594_v40, %v11147_v25  ;;  %v1484_v20 = vsel %vm987_vm4, %v11148_v46, %v8250_v38  ;;  %805 = vmatmul.mubr.f32.gmra.mrb[14].mxu1 %v686_v5  ;;  %v11158_v40 = vld [vmem:[#allocation23_spill] sm:$0xff]  ;;  %vm11167_vm15 = vmmov %vm11119_vm1 }
 0x186   : > { %v8236_v0 = vpop.permute.xlu1 %1952  ;;  %1630 = vrot.lane.b32.xlu0 %v1530_v29, %s6818_s14  ;;  %v1573_v57 = vsel %vm996_vm3, %v1565_v6, %v11156_v35  ;;  %v2053_v29 = vsel %vm987_vm4, %v8226_v31, %v8151_v17  ;;  %v8267_v32 = vpop.permute.xlu0 %1872  ;;  %v1610_v6 = vsel %vm11119_vm1, %v1602_v60, %v11152_v58  ;;  %v1485_v59 = vsel %vm987_vm4, %v11150_v51, %v11156_v35 }
 0x187   : > { %11154 = vst [vmem:[#allocation80_spill] sm:$0xff] %v8236_v0  ;;  %v1493_v62 = vsel %vm996_vm3, %v1485_v59, %v11160_v3  ;;  %v1580_v17 = vsel %vm10985_vm5, %v1572_v56, %v11161_v7  ;;  %v1581_v31 = vsel %vm10985_vm5, %v1573_v57, %v11160_v3  ;;  %v2052_v60 = vsel %vm987_vm4, %v8123_v39, %v8076_v53  ;;  %v11162_v59 = vld [vmem:[#allocation24_spill] sm:$0xff]  ;;  %v11163_v57 = vld [vmem:[#allocation65_spill] sm:$0xff]  ;;  %v8343_v39 = vld [vmem:[%s7163_s25] sm:$0xff] }
 0x188   : > { %1664 = vrot.lane.b32.xlu1 %v1611_v10, %s11117_s15  ;;  %v1980_v10 = vsel %vm996_vm3, %v1972_v27, %v11158_v40  ;;  %v1492_v5 = vsel %vm996_vm3, %v1484_v20, %v11161_v7  ;;  %v1501_v27 = vsel %vm10985_vm5, %v1493_v62, %v7962_v47  ;;  %v1989_v58 = vsel %vm10985_vm5, %v1981_v22, %v11162_v59 }
 0x189   : > { %v2061_v56 = vsel %vm996_vm3, %v2053_v29, %v8087_v23  ;;  %v1500_v53 = vsel %vm10985_vm5, %v1492_v5, %v11163_v57  ;;  %v1588_v22 = vsel %vm11005_vm6, %v1580_v17, %v11163_v57  ;;  %v1589_v29 = vsel %vm11005_vm6, %v1581_v31, %v7962_v47  ;;  %v8322_v17 = vld [vmem:[%s7163_s25 + $0x8] sm:$0xff] }
 0x18a   : > { %v8276_v25 = vpop.permute.xlu1 %1954  ;;  %1662 = vrot.lane.b32.xlu0 %v1610_v6, %s11117_s15  ;;  %v1509_v6 = vsel %vm11005_vm6, %v1501_v27, %v7977_v44  ;;  %v8302_v20 = vpop.permute.xlu0 %1874  ;;  %v2060_v5 = vsel %vm996_vm3, %v2052_v60, %v8018_v12  ;;  %v1997_v31 = vsel %vm11005_vm6, %v1989_v58, %v8322_v17  ;;  %v1597_v12 = vsel %vm1023_vm7, %v1589_v29, %v7977_v44 }
 0x18b   : > { %11159 = vst [vmem:[#allocation18_spill] sm:$0xff] %v8276_v25  ;;  %v1517_v62 = vsel %vm1023_vm7, %v1509_v6, %v8055_v50  ;;  %v1975_v27 = vsel %vm987_vm4, %v8276_v25, %v8302_v20  ;;  %v1974_v57 = vsel %vm987_vm4, %v8236_v0, %v8267_v32 }
 0x18c   : > { %1388 = vrot.lane.b32.xlu1 %v11156_v35, %s6816_s28  ;;  %v1988_v35 = vsel %vm10985_vm5, %v1980_v10, %v7574_v15  ;;  %v1525_v6 = vsel %vm1032_vm9, %v1517_v62, %v8189_v48  ;;  %v1508_v10 = vsel %vm11005_vm6, %v1500_v53, %v7932_v4  ;;  %v2069_v62 = vsel %vm10985_vm5, %v2061_v56, %v11157_v33 }
 0x18d   : > { %v1533_v60 = vsel %vm11165_vm14, %v1525_v6, %v8197_v55  ;;  %v1516_v58 = vsel %vm1023_vm7, %v1508_v10, %v8043_v2  ;;  %v1996_v53 = vsel %vm11005_vm6, %v1988_v35, %v8343_v39  ;;  %v1983_v29 = vsel %vm996_vm3, %v1975_v27, %v7646_v34  ;;  %vm11171_vm14 = vmmov %vm11119_vm1 }
 0x18e   : > { %v8317_v23 = vpop.permute.xlu1 %2034  ;;  %1386 = vrot.lane.b32.xlu0 %v8250_v38, %s6816_s28  ;;  %v8352_v6 = vpop.permute.xlu0 %2032  ;;  %v1524_v55 = vsel %vm1032_vm9, %v1516_v58, %v8110_v42  ;;  %v2005_v10 = vsel %vm1023_vm7, %v1997_v31, %v7550_v45  ;;  %v1596_v27 = vsel %vm1023_vm7, %v1588_v22, %v7932_v4  ;;  %v2077_v58 = vsel %vm11005_vm6, %v2069_v62, %v11162_v59  ;;  %s11243_s28 = sshll.u32 %s11478_s30, 3  ;;  %s6828_s30 = smov 8  }
 0x18f   : > { %11164 = vst [vmem:[#allocation22_spill] sm:$0xff] %v8317_v23  ;;  %v2055_v56 = vsel %vm987_vm4, %v8317_v23, %v8276_v25  ;;  %11166 = vst [vmem:[#allocation81_spill] sm:$0xff] %v8352_v6  ;;  %v1532_v35 = vsel %vm11167_vm15, %v1524_v55, %v8162_v18  ;;  %v1605_v25 = vsel %vm1032_vm9, %v1597_v12, %v8055_v50  ;;  %s463_s17 = scalar_lea.vmem %s10783_s3, %s11243_s28  ;;  %s6840_s28 = smov 14  }
 0x190   : > { %1636 = vrot.lane.b32.xlu1 %v1533_v60, %s6818_s14  ;;  %v2068_v60 = vsel %vm10985_vm5, %v2060_v5, %v11158_v40  ;;  %v1613_v31 = vsel %vm11169_vm11, %v1605_v25, %v8189_v48  ;;  %v2004_v55 = vsel %vm1023_vm7, %v1996_v53, %v7556_v11  ;;  %v1982_v5 = vsel %vm996_vm3, %v1974_v57, %v7638_v49  ;;  %vm11172_vm15 = vmmov %vm11119_vm1 }
 0x191   : > { %v1991_v22 = vsel %vm10985_vm5, %v1983_v29, %v7644_v63  ;;  %v2063_v12 = vsel %vm996_vm3, %v2055_v56, %v8302_v20  ;;  %v2054_v62 = vsel %vm987_vm4, %v8352_v6, %v8236_v0  ;;  %v2013_v25 = vsel %vm1032_vm9, %v2005_v10, %v7604_v36  ;;  %vm11174_vm11 = vmmov %vm11119_vm1 }
 0x192   : > { %v8362_v33 = vpop.permute.xlu1 %1956  ;;  %1634 = vrot.lane.b32.xlu0 %v1532_v35, %s6818_s14  ;;  %v2076_v53 = vsel %vm11005_vm6, %v2068_v60, %v7574_v15  ;;  %v8389_v35 = vpop.permute.xlu0 %1876  ;;  %v1604_v57 = vsel %vm1032_vm9, %v1596_v27, %v8043_v2  ;;  %v2085_v29 = vsel %vm1023_vm7, %v2077_v58, %v8322_v17  ;;  %v2012_v10 = vsel %vm1032_vm9, %v2004_v55, %v7596_v61 }
 0x193   : > { %11168 = vst [vmem:[#allocation82_spill] sm:$0xff] %v8362_v33  ;;  %v1612_v56 = vsel %vm11119_vm1, %v1604_v57, %v8110_v42  ;;  %v1990_v60 = vsel %vm10985_vm5, %v1982_v5, %v7636_v14  ;;  %v2062_v58 = vsel %vm996_vm3, %v2054_v62, %v8267_v32  ;;  %v2021_v57 = vsel %vm11171_vm14, %v2013_v25, %v7612_v54  ;;  %vm11177_vm14 = vmmov %vm11119_vm1 }
 0x194   : > { %1668 = vrot.lane.b32.xlu1 %v1613_v31, %s11117_s15  ;;  %v8404_v31 = vld [vmem:[%s7163_s25 + $0x18] sm:$0xff]  ;;  %v2084_v42 = vsel %vm1023_vm7, %v2076_v53, %v8343_v39  ;;  %v2071_v55 = vsel %vm10985_vm5, %v2063_v12, %v7646_v34  ;;  %v1976_v5 = vsel %vm987_vm4, %v8362_v33, %v8389_v35  ;;  %v2020_v25 = vsel %vm11172_vm15, %v2012_v10, %v7598_v13  ;;  %vm11180_vm15 = vmmov %vm11119_vm1 }
 0x195   : > { %v1999_v27 = vsel %vm11005_vm6, %v1991_v22, %v8404_v31  ;;  %v2093_v22 = vsel %vm1032_vm9, %v2085_v29, %v7550_v45  ;;  %v2092_v29 = vsel %vm1032_vm9, %v2084_v42, %v7556_v11  ;;  %v2079_v10 = vsel %vm11005_vm6, %v2071_v55, %v7644_v63 }
 0x196   : > { %v8397_v18 = vpop.permute.xlu1 %1958  ;;  %1666 = vrot.lane.b32.xlu0 %v1612_v56, %s11117_s15  ;;  %v8423_v62 = vpop.permute.xlu0 %1878  ;;  %v8428_v56 = vld [vmem:[%s7163_s25 + $0x10] sm:$0xff]  ;;  %v2007_v12 = vsel %vm1023_vm7, %v1999_v27, %v7558_v24  ;;  %v2070_v48 = vsel %vm10985_vm5, %v2062_v58, %v7638_v49  ;;  %v2101_v27 = vsel %vm11174_vm11, %v2093_v22, %v7604_v36  ;;  %v1984_v50 = vsel %vm996_vm3, %v1976_v5, %v11131_v30  ;;  %vm11182_vm11 = vmmov %vm11119_vm1 }
 0x197   : > { %11170 = vst [vmem:[#allocation83_spill] sm:$0xff] %v8397_v18  ;;  %v1998_v53 = vsel %vm11005_vm6, %v1990_v60, %v8428_v56  ;;  %v2087_v5 = vsel %vm1023_vm7, %v2079_v10, %v8404_v31 }
 0x198   : > { %2118 = vrot.lane.b32.xlu1 %v2021_v57, %s6818_s14  ;;  %v1977_v57 = vsel %vm987_vm4, %v8397_v18, %v8423_v62  ;;  %v2006_v58 = vsel %vm1023_vm7, %v1998_v53, %v7564_v26  ;;  %v2100_v53 = vsel %vm11119_vm1, %v2092_v29, %v7596_v61 }
 0x199   : > { %v1985_v42 = vsel %vm996_vm3, %v1977_v57, %v11129_v52  ;;  %v2078_v57 = vsel %vm11005_vm6, %v2070_v48, %v7636_v14  ;;  %v2014_v48 = vsel %vm1032_vm9, %v2006_v58, %v7652_v1 }
 0x19a   : > { %v8437_v2 = vpop.permute.xlu1 %2038  ;;  %2116 = vrot.lane.b32.xlu0 %v2020_v25, %s6818_s14  ;;  %v2015_v25 = vsel %vm1032_vm9, %v2007_v12, %v7660_v28  ;;  %v1993_v22 = vsel %vm10985_vm5, %v1985_v42, %v7680_v21  ;;  %v8464_v13 = vpop.permute.xlu0 %2036  ;;  %v1992_v12 = vsel %vm10985_vm5, %v1984_v50, %v11130_v8  ;;  %v2095_v50 = vsel %vm1032_vm9, %v2087_v5, %v7558_v24  ;;  %v11183_v24 = vld [vmem:[#allocation62_spill] sm:$0xff] }
 0x19b   : > { %11173 = vst [vmem:[#allocation84_spill] sm:$0xff] %v8437_v2  ;;  %v2057_v60 = vsel %vm987_vm4, %v8437_v2, %v8397_v18  ;;  %11175 = vst [vmem:[#allocation85_spill] sm:$0xff] %v8464_v13  ;;  %v2001_v42 = vsel %vm11005_vm6, %v1993_v22, %v8134_v41  ;;  %v2023_v11 = vsel %vm11177_vm14, %v2015_v25, %v7668_v9  ;;  %v11179_v25 = vld [vmem:[#allocation36_spill] sm:$0xff] }
 0x19c   : > { %v2065_v55 = vsel %vm996_vm3, %v2057_v60, %v8423_v62  ;;  %2150 = vrot.lane.b32.xlu1 %v2101_v27, %s11117_s15  ;;  %v2056_v60 = vsel %vm987_vm4, %v8464_v13, %v8362_v33  ;;  %v2086_v22 = vsel %vm1023_vm7, %v2078_v57, %v8428_v56  ;;  %v2009_v58 = vsel %vm1023_vm7, %v2001_v42, %v11135_v37  ;;  %vm11188_vm14 = vmmov %vm11119_vm1 }
 0x19d   : > { %v2064_v10 = vsel %vm996_vm3, %v2056_v60, %v8389_v35  ;;  %v2073_v29 = vsel %vm10985_vm5, %v2065_v55, %v11129_v52  ;;  %v2094_v42 = vsel %vm1032_vm9, %v2086_v22, %v7564_v26  ;;  %v11189_v26 = vld [vmem:[#allocation66_spill] sm:$0xff] }
 0x19e   : > { %v8475_v27 = vpop.permute.xlu1 %1960  ;;  %2148 = vrot.lane.b32.xlu0 %v2100_v53, %s11117_s15  ;;  %v8495_v60 = vpop.permute.xlu0 %1880  ;;  %v2000_v53 = vsel %vm11005_vm6, %v1992_v12, %v8165_v16  ;;  %v2081_v5 = vsel %vm11005_vm6, %v2073_v29, %v7680_v21  ;;  %v2072_v57 = vsel %vm10985_vm5, %v2064_v10, %v11131_v30  ;;  %v2103_v12 = vsel %vm11182_vm11, %v2095_v50, %v7660_v28  ;;  %v11185_v29 = vld [vmem:[#allocation49_spill] sm:$0xff]  ;;  %vm11194_vm11 = vmmov %vm11119_vm1 }
 0x19f   : > { %11176 = vst [vmem:[#allocation86_spill] sm:$0xff] %v8475_v27  ;;  %11178 = vst [vmem:[#allocation87_spill] sm:$0xff] %v8495_v60  ;;  %v1978_v55 = vsel %vm987_vm4, %v8475_v27, %v8495_v60  ;;  %v2017_v54 = vsel %vm1032_vm9, %v2009_v58, %v11185_v29  ;;  %v2080_v50 = vsel %vm11005_vm6, %v2072_v57, %v11130_v8 }
 0x1a0   : > { %2122 = vrot.lane.b32.xlu1 %v2023_v11, %s6818_s14  ;;  %v2022_v11 = vsel %vm11180_vm15, %v2014_v48, %v11179_v25  ;;  %v1986_v61 = vsel %vm996_vm3, %v1978_v55, %v11183_v24  ;;  %v11184_v48 = vld [vmem:[#allocation10_spill] sm:$0xff]  ;;  %v2102_v55 = vsel %vm11119_vm1, %v2094_v42, %v7652_v1  ;;  %vm11193_vm15 = vmmov %vm11119_vm1 }
 0x1a1   : > { %v2008_v25 = vsel %vm1023_vm7, %v2000_v53, %v11184_v48  ;;  %v1994_v58 = vsel %vm10985_vm5, %v1986_v61, %v11148_v46 }
 0x1a2   : > { %v8506_v9 = vpop.permute.xlu1 %1962  ;;  %2120 = vrot.lane.b32.xlu0 %v2022_v11, %s6818_s14  ;;  %v8524_v10 = vpop.permute.xlu0 %1882  ;;  %v2089_v11 = vsel %vm1023_vm7, %v2081_v5, %v8134_v41  ;;  %v2016_v57 = vsel %vm1032_vm9, %v2008_v25, %v11143_v43 }
 0x1a3   : > { %11181 = vst [vmem:[#allocation88_spill] sm:$0xff] %v8506_v9  ;;  %11186 = vst [vmem:[#allocation89_spill] sm:$0xff] %v8524_v10  ;;  %v1979_v22 = vsel %vm987_vm4, %v8506_v9, %v8524_v10  ;;  %v2097_v61 = vsel %vm1032_vm9, %v2089_v11, %v11135_v37 }
 0x1a4   : > { %2154 = vrot.lane.b32.xlu1 %v2103_v12, %s11117_s15  ;;  %v2025_v12 = vsel %vm11188_vm14, %v2017_v54, %v11138_v19  ;;  %v1987_v42 = vsel %vm996_vm3, %v1979_v22, %v11189_v26  ;;  %v2002_v54 = vsel %vm11005_vm6, %v1994_v58, %v8250_v38  ;;  %v8563_v22 = vld [vmem:[%s7163_s25 + $0x38] sm:$0xff]  ;;  %vm11198_vm14 = vmmov %vm11119_vm1 }
 0x1a5   : > { %v1995_v25 = vsel %vm10985_vm5, %v1987_v42, %v11150_v51  ;;  %11191 = vst [vmem:[#allocation92_spill] sm:$0xff] %v8563_v22 }
 0x1a6   : > { %v8535_v53 = vpop.permute.xlu1 %2042  ;;  %2152 = vrot.lane.b32.xlu0 %v2102_v55, %s11117_s15  ;;  %v2088_v55 = vsel %vm1023_vm7, %v2080_v50, %v8165_v16  ;;  %v8558_v28 = vpop.permute.xlu0 %2040  ;;  %v11192_v50 = vld [vmem:[#allocation52_spill] sm:$0xff] }
 0x1a7   : > { %11187 = vst [vmem:[#allocation90_spill] sm:$0xff] %v8535_v53  ;;  %v2059_v5 = vsel %vm987_vm4, %v8535_v53, %v8506_v9  ;;  %11190 = vst [vmem:[#allocation91_spill] sm:$0xff] %v8558_v28  ;;  %v2058_v11 = vsel %vm987_vm4, %v8558_v28, %v8475_v27  ;;  %v2024_v42 = vsel %vm11193_vm15, %v2016_v57, %v11192_v50  ;;  %v11196_v50 = vld [vmem:[#allocation79_spill] sm:$0xff] }
 0x1a8   : > { %v2067_v1 = vsel %vm996_vm3, %v2059_v5, %v8524_v10  ;;  %2126 = vrot.lane.b32.xlu1 %v2025_v12, %s6818_s14  ;;  %v2003_v5 = vsel %vm11005_vm6, %v1995_v25, %v8563_v22  ;;  %v2066_v25 = vsel %vm996_vm3, %v2058_v11, %v8495_v60  ;;  %v2096_v36 = vsel %vm1032_vm9, %v2088_v55, %v11184_v48  ;;  %vm11202_vm15 = vmmov %vm11119_vm1 }
 0x1a9   : > { %v2075_v12 = vsel %vm10985_vm5, %v2067_v1, %v11189_v26  ;;  %v2011_v37 = vsel %vm1023_vm7, %v2003_v5, %v11160_v3  ;;  %v2105_v1 = vsel %vm11194_vm11, %v2097_v61, %v11185_v29  ;;  %v2010_v57 = vsel %vm1023_vm7, %v2002_v54, %v11161_v7  ;;  %v11199_v29 = vld [vmem:[#allocation76_spill] sm:$0xff]  ;;  %vm11204_vm11 = vmmov %vm11119_vm1 }
 0x1aa   : > { %v2406_v19 = vpop.permute.xlu1 %2405  ;;  %v2083_v58 = vsel %vm11005_vm6, %v2075_v12, %v11150_v51  ;;  %2124 = vrot.lane.b32.xlu0 %v2024_v42, %s6818_s14  ;;  %v2019_v5 = vsel %vm1032_vm9, %v2011_v37, %v7962_v47  ;;  %v2074_v12 = vsel %vm10985_vm5, %v2066_v25, %v11183_v24  ;;  %v8592_v11 = vpop.permute.xlu0 %2325  ;;  %v2104_v54 = vsel %vm11119_vm1, %v2096_v36, %v11143_v43  ;;  %v11197_v25 = vld [vmem:[#allocation65_spill] sm:$0xff] }
 0x1ab   : > { %11195 = vst [vmem:[#allocation93_spill] sm:$0xff] %v8592_v11  ;;  %v2091_v42 = vsel %vm1023_vm7, %v2083_v58, %v8563_v22  ;;  %v2082_v61 = vsel %vm11005_vm6, %v2074_v12, %v11148_v46  ;;  %v2429_v55 = vsel %vm987_vm4, %v2406_v19, %v8592_v11  ;;  %v2018_v48 = vsel %vm1032_vm9, %v2010_v57, %v11197_v25 }
 0x1ac   : > { %2158 = vrot.lane.b32.xlu1 %v2105_v1, %s11117_s15  ;;  %v2437_v37 = vsel %vm996_vm3, %v2429_v55, %v11196_v50  ;;  %v2027_v58 = vsel %vm11198_vm14, %v2019_v5, %v7977_v44  ;;  %v2099_v36 = vsel %vm1032_vm9, %v2091_v42, %v11160_v3  ;;  %v2090_v43 = vsel %vm1023_vm7, %v2082_v61, %v8250_v38  ;;  %v11203_v44 = vld [vmem:[#allocation44_spill] sm:$0xff]  ;;  %v11205_v3 = vld [vmem:[#allocation50_spill] sm:$0xff]  ;;  %vm11208_vm14 = vmmov %vm11119_vm1 }
 0x1ad   : > { %v2445_v12 = vsel %vm10985_vm5, %v2437_v37, %v11199_v29  ;;  %v2026_v5 = vsel %vm11202_vm15, %v2018_v48, %v7932_v4  ;;  %v2107_v61 = vsel %vm11204_vm11, %v2099_v36, %v7962_v47  ;;  %vm11210_vm15 = vmmov %vm11119_vm1 }
 0x1ae   : > { %v2408_v1 = vpop.permute.xlu1 %2407  ;;  %2156 = vrot.lane.b32.xlu0 %v2104_v54, %s11117_s15  ;;  %v8616_v55 = vpop.permute.xlu0 %2327  ;;  %v11201_v54 = vld [vmem:[#allocation73_spill] sm:$0xff]  ;;  %vm11211_vm11 = vmmov %vm11119_vm1 }
 0x1af   : > { %11200 = vst [vmem:[#allocation65_spill] sm:$0xff] %v8616_v55  ;;  %v2453_v22 = vsel %vm11005_vm6, %v2445_v12, %v11201_v54  ;;  %v2430_v57 = vsel %vm987_vm4, %v2408_v1, %v8616_v55  ;;  %v2098_v12 = vsel %vm1032_vm9, %v2090_v43, %v11161_v7 }
 0x1b0   : > { %2130 = vrot.lane.b32.xlu1 %v2027_v58, %s6818_s14  ;;  %v2438_v58 = vsel %vm996_vm3, %v2430_v57, %v11203_v44  ;;  %v2461_v57 = vsel %vm1023_vm7, %v2453_v22, %v11158_v40 }
 0x1b1   : > { %v2446_v51 = vsel %vm10985_vm5, %v2438_v58, %v11205_v3 }
 0x1b2   : > { %v2488_v37 = vpop.permute.xlu1 %2487  ;;  %2128 = vrot.lane.b32.xlu0 %v2026_v5, %s6818_s14  ;;  %v2486_v5 = vpop.permute.xlu0 %2485 }
 0x1b3   : > { %v2510_v42 = vsel %vm987_vm4, %v2488_v37, %v2408_v1  ;;  %v11206_v37 = vld [vmem:[#allocation77_spill] sm:$0xff]  ;;  %v2509_v58 = vsel %vm987_vm4, %v2486_v5, %v2406_v19 }
 0x1b4   : > { %v2518_v48 = vsel %vm996_vm3, %v2510_v42, %v8616_v55  ;;  %2162 = vrot.lane.b32.xlu1 %v2107_v61, %s11117_s15  ;;  %v2454_v36 = vsel %vm11005_vm6, %v2446_v51, %v11206_v37  ;;  %v2106_v42 = vsel %vm11119_vm1, %v2098_v12, %v11197_v25  ;;  %v11207_v61 = vld [vmem:[#allocation25_spill] sm:$0xff]  ;;  %v2517_v22 = vsel %vm996_vm3, %v2509_v58, %v8592_v11 }
 0x1b5   : > { %v2526_v1 = vsel %vm10985_vm5, %v2518_v48, %v11203_v44  ;;  %v2462_v4 = vsel %vm1023_vm7, %v2454_v36, %v11207_v61  ;;  %v2469_v51 = vsel %vm1032_vm9, %v2461_v57, %v7574_v15  ;;  %v2525_v12 = vsel %vm10985_vm5, %v2517_v22, %v11196_v50  ;;  %v11245_v44 = vld [vmem:[#allocation33_spill] sm:$0xff] }
 0x1b6   : > { %v2534_v43 = vsel %vm11005_vm6, %v2526_v1, %v11205_v3  ;;  %v2410_v55 = vpop.permute.xlu1 %2409  ;;  %2160 = vrot.lane.b32.xlu0 %v2106_v42, %s11117_s15  ;;  %v2470_v48 = vsel %vm1032_vm9, %v2462_v4, %v11162_v59  ;;  %v2533_v5 = vsel %vm11005_vm6, %v2525_v12, %v11199_v29  ;;  %v8665_v36 = vpop.permute.xlu0 %2329 }
 0x1b7   : > { %v2542_v19 = vsel %vm1023_vm7, %v2534_v43, %v11206_v37  ;;  %v2478_v1 = vsel %vm11208_vm14, %v2470_v48, %v8322_v17  ;;  %11209 = vst [vmem:[#allocation73_spill] sm:$0xff] %v8665_v36  ;;  %v2431_v4 = vsel %vm987_vm4, %v2410_v55, %v8665_v36  ;;  %v2477_v43 = vsel %vm11210_vm15, %v2469_v51, %v8343_v39  ;;  %vm11216_vm14 = vmmov %vm11119_vm1 }
 0x1b8   : > { %2575 = vrot.lane.b32.xlu1 %v2478_v1, %s6818_s14  ;;  %v2550_v57 = vsel %vm1032_vm9, %v2542_v19, %v11207_v61  ;;  %v2541_v42 = vsel %vm1023_vm7, %v2533_v5, %v11201_v54  ;;  %v2439_v22 = vsel %vm996_vm3, %v2431_v4, %v8352_v6  ;;  %vm11217_vm15 = vmmov %vm11119_vm1 }
 0x1b9   : > { %v2549_v48 = vsel %vm1032_vm9, %v2541_v42, %v11158_v40  ;;  %v2447_v19 = vsel %vm10985_vm5, %v2439_v22, %v8236_v0  ;;  %v2558_v12 = vsel %vm11211_vm11, %v2550_v57, %v11162_v59  ;;  %vm11221_vm11 = vmmov %vm11119_vm1 }
 0x1ba   : > { %v2412_v58 = vpop.permute.xlu1 %2411  ;;  %2573 = vrot.lane.b32.xlu0 %v2477_v43, %s6818_s14  ;;  %v8685_v1 = vpop.permute.xlu0 %2331  ;;  %v2455_v51 = vsel %vm11005_vm6, %v2447_v19, %v8267_v32  ;;  %v2557_v4 = vsel %vm11119_vm1, %v2549_v48, %v7574_v15 }
 0x1bb   : > { %11212 = vst [vmem:[#allocation77_spill] sm:$0xff] %v8685_v1  ;;  %v2432_v5 = vsel %vm987_vm4, %v2412_v58, %v8685_v1  ;;  %v2463_v42 = vsel %vm1023_vm7, %v2455_v51, %v7638_v49 }
 0x1bc   : > { %2607 = vrot.lane.b32.xlu1 %v2558_v12, %s11117_s15  ;;  %v2440_v57 = vsel %vm996_vm3, %v2432_v5, %v8317_v23  ;;  %v2471_v19 = vsel %vm1032_vm9, %v2463_v42, %v7636_v14  ;;  %v11213_v12 = vld [vmem:[#allocation18_spill] sm:$0xff] }
 0x1bd   : > { %v2448_v29 = vsel %vm10985_vm5, %v2440_v57, %v11213_v12  ;;  %v2479_v42 = vsel %vm11216_vm14, %v2471_v19, %v8428_v56  ;;  %vm11225_vm14 = vmmov %vm11119_vm1 }
 0x1be   : > { %v2492_v43 = vpop.permute.xlu1 %2491  ;;  %2605 = vrot.lane.b32.xlu0 %v2557_v4, %s11117_s15  ;;  %v2490_v51 = vpop.permute.xlu0 %2489  ;;  %v2456_v5 = vsel %vm11005_vm6, %v2448_v29, %v8302_v20 }
 0x1bf   : > { %v2512_v22 = vsel %vm987_vm4, %v2492_v43, %v2412_v58  ;;  %v8708_v11 = vpop.f32.mrb[8].mxu0  ;;  %v2511_v4 = vsel %vm987_vm4, %v2490_v51, %v2410_v55 }
 0x1c0   : > { %v2520_v48 = vsel %vm996_vm3, %v2512_v22, %v8685_v1  ;;  %11214 = vst [vmem:[#allocation94_spill] sm:$0xff] %v8708_v11  ;;  %v8715_v43 = vpop.f32.mrb[9].mxu0  ;;  %v2464_v22 = vsel %vm1023_vm7, %v2456_v5, %v7646_v34 }
 0x1c1   : > { %v2528_v3 = vsel %vm10985_vm5, %v2520_v48, %v8317_v23  ;;  %11215 = vst [vmem:[#allocation95_spill] sm:$0xff] %v8715_v43  ;;  %v2519_v48 = vsel %vm996_vm3, %v2511_v4, %v8665_v36  ;;  %v2472_v29 = vsel %vm1032_vm9, %v2464_v22, %v7644_v63 }
 0x1c2   : > { %v2536_v58 = vsel %vm11005_vm6, %v2528_v3, %v11213_v12  ;;  %v2414_v57 = vpop.permute.xlu1 %2413  ;;  %2577 = vrot.lane.b32.xlu0 %v2479_v42, %s6818_s14  ;;  %v2527_v55 = vsel %vm10985_vm5, %v2519_v48, %v8352_v6  ;;  %v2480_v19 = vsel %vm11217_vm15, %v2472_v29, %v8404_v31  ;;  %v8737_v4 = vpop.permute.xlu0 %2333  ;;  %vm11228_vm15 = vmmov %vm11119_vm1 }
 0x1c3   : > { %v2544_v3 = vsel %vm1023_vm7, %v2536_v58, %v8302_v20  ;;  %v2535_v5 = vsel %vm11005_vm6, %v2527_v55, %v8236_v0  ;;  %2579 = vrot.lane.b32.xlu1 %v2480_v19, %s6818_s14  ;;  %11218 = vst [vmem:[#allocation96_spill] sm:$0xff] %v8737_v4  ;;  %v8739_v42 = vpop.f32.mrb[10].mxu0  ;;  %v2433_v58 = vsel %vm987_vm4, %v2414_v57, %v8737_v4 }
 0x1c4   : > { %v2552_v51 = vsel %vm1032_vm9, %v2544_v3, %v7646_v34  ;;  %11219 = vst [vmem:[#allocation97_spill] sm:$0xff] %v8739_v42  ;;  %v8743_v22 = vpop.f32.mrb[11].mxu0  ;;  %v2543_v3 = vsel %vm1023_vm7, %v2535_v5, %v8267_v32  ;;  %v2441_v55 = vsel %vm996_vm3, %v2433_v58, %v8464_v13 }
 0x1c5   : > { %11220 = vst [vmem:[#allocation98_spill] sm:$0xff] %v8743_v22  ;;  %v2560_v29 = vsel %vm11221_vm11, %v2552_v51, %v7644_v63  ;;  %v2551_v19 = vsel %vm1032_vm9, %v2543_v3, %v7638_v49  ;;  %v2449_v12 = vsel %vm10985_vm5, %v2441_v55, %v8362_v33  ;;  %vm11230_vm11 = vmmov %vm11119_vm1 }
 0x1c6   : > { %v2416_v48 = vpop.permute.xlu1 %2415  ;;  %v2559_v0 = vsel %vm11119_vm1, %v2551_v19, %v7636_v14  ;;  %v8759_v51 = vpop.permute.xlu0 %2335  ;;  %v2457_v5 = vsel %vm11005_vm6, %v2449_v12, %v8389_v35 }
 0x1c7   : > { %2611 = vrot.lane.b32.xlu1 %v2560_v29, %s11117_s15  ;;  %2609 = vrot.lane.b32.xlu0 %v2559_v0, %s11117_s15  ;;  %11222 = vst [vmem:[#allocation99_spill] sm:$0xff] %v8759_v51  ;;  %v8761_v1 = vpop.f32.mrb[12].mxu0  ;;  %v2434_v58 = vsel %vm987_vm4, %v2416_v48, %v8759_v51  ;;  %v2465_v19 = vsel %vm1023_vm7, %v2457_v5, %v11131_v30 }
 0x1c8   : > { %11223 = vst [vmem:[#allocation100_spill] sm:$0xff] %v8761_v1  ;;  %v8767_v3 = vpop.f32.mrb[13].mxu0  ;;  %v2442_v29 = vsel %vm996_vm3, %v2434_v58, %v8437_v2  ;;  %v2473_v23 = vsel %vm1032_vm9, %v2465_v19, %v11130_v8 }
 0x1c9   : > { %11224 = vst [vmem:[#allocation101_spill] sm:$0xff] %v8767_v3  ;;  %v2450_v12 = vsel %vm10985_vm5, %v2442_v29, %v8397_v18  ;;  %v2481_v6 = vsel %vm11225_vm14, %v2473_v23, %v8165_v16  ;;  %vm11232_vm14 = vmmov %vm11119_vm1 }
 0x1ca   : > { %v2496_v55 = vpop.permute.xlu1 %2495  ;;  %v2494_v58 = vpop.permute.xlu0 %2493 }
 0x1cb   : > { %v2514_v0 = vsel %vm987_vm4, %v2496_v55, %v2416_v48  ;;  %2581 = vrot.lane.b32.xlu0 %v2481_v6, %s6818_s14  ;;  %v8785_v50 = vpop.f32.mrb[14].mxu0  ;;  %v2458_v48 = vsel %vm11005_vm6, %v2450_v12, %v8423_v62  ;;  %v2513_v19 = vsel %vm987_vm4, %v2494_v58, %v2414_v57 }
 0x1cc   : > { %v2522_v36 = vsel %vm996_vm3, %v2514_v0, %v8759_v51  ;;  %11226 = vst [vmem:[#allocation102_spill] sm:$0xff] %v8785_v50  ;;  %v8792_v29 = vpop.f32.mrb[15].mxu0  ;;  %v2466_v23 = vsel %vm1023_vm7, %v2458_v48, %v11129_v52  ;;  %v2521_v6 = vsel %vm996_vm3, %v2513_v19, %v8737_v4  ;;  %v11241_v4 = vld [vmem:[#allocation26_spill] sm:$0xff] }
 0x1cd   : > { %v2530_v5 = vsel %vm10985_vm5, %v2522_v36, %v8437_v2  ;;  %11227 = vst [vmem:[#allocation103_spill] sm:$0xff] %v8792_v29  ;;  %v2474_v36 = vsel %vm1032_vm9, %v2466_v23, %v7680_v21 }
 0x1ce   : > { %v2538_v55 = vsel %vm11005_vm6, %v2530_v5, %v8397_v18  ;;  %v2418_v0 = vpop.permute.xlu1 %2417  ;;  %v2529_v5 = vsel %vm10985_vm5, %v2521_v6, %v8464_v13  ;;  %v2482_v57 = vsel %vm11228_vm15, %v2474_v36, %v8134_v41  ;;  %v8811_v19 = vpop.permute.xlu0 %2337  ;;  %vm11236_vm15 = vmmov %vm11119_vm1 }
 0x1cf   : > { %v2546_v12 = vsel %vm1023_vm7, %v2538_v55, %v8423_v62  ;;  %v2537_v48 = vsel %vm11005_vm6, %v2529_v5, %v8362_v33  ;;  %2583 = vrot.lane.b32.xlu1 %v2482_v57, %s6818_s14  ;;  %11229 = vst [vmem:[#allocation104_spill] sm:$0xff] %v8811_v19  ;;  %v2435_v23 = vsel %vm987_vm4, %v2418_v0, %v8811_v19 }
 0x1d0   : > { %v2554_v58 = vsel %vm1032_vm9, %v2546_v12, %v11129_v52  ;;  %v2545_v36 = vsel %vm1023_vm7, %v2537_v48, %v8389_v35  ;;  %v2443_v12 = vsel %vm996_vm3, %v2435_v23, %v8558_v28 }
 0x1d1   : > { %v2562_v6 = vsel %vm11230_vm11, %v2554_v58, %v7680_v21  ;;  %v2553_v5 = vsel %vm1032_vm9, %v2545_v36, %v11131_v30  ;;  %v2451_v57 = vsel %vm10985_vm5, %v2443_v12, %v8475_v27  ;;  %vm11240_vm11 = vmmov %vm11119_vm1 }
 0x1d2   : > { %v2420_v55 = vpop.permute.xlu1 %2419  ;;  %v2561_v18 = vsel %vm11119_vm1, %v2553_v5, %v11130_v8  ;;  %v8829_v58 = vpop.permute.xlu0 %2339  ;;  %v2459_v48 = vsel %vm11005_vm6, %v2451_v57, %v8495_v60 }
 0x1d3   : > { %2615 = vrot.lane.b32.xlu1 %v2562_v6, %s11117_s15  ;;  %2613 = vrot.lane.b32.xlu0 %v2561_v18, %s11117_s15  ;;  %11231 = vst [vmem:[#allocation105_spill] sm:$0xff] %v8829_v58  ;;  %v2436_v23 = vsel %vm987_vm4, %v2420_v55, %v8829_v58  ;;  %v2467_v36 = vsel %vm1023_vm7, %v2459_v48, %v11183_v24 }
 0x1d4   : > { %v2444_v12 = vsel %vm996_vm3, %v2436_v23, %v8535_v53  ;;  %v2475_v18 = vsel %vm1032_vm9, %v2467_v36, %v11148_v46 }
 0x1d5   : > { %v2452_v6 = vsel %vm10985_vm5, %v2444_v12, %v8506_v9  ;;  %v2483_v51 = vsel %vm11232_vm14, %v2475_v18, %v8250_v38  ;;  %v1399_v18 = vsel %vm987_vm4, %v8322_v17, %v7550_v45  ;;  %vm11247_vm14 = vmmov %vm11119_vm1 }
 0x1d6   : > { %v2500_v33 = vpop.permute.xlu1 %2499  ;;  %v2498_v23 = vpop.permute.xlu0 %2497 }
 0x1d7   : > { %v2516_v5 = vsel %vm987_vm4, %v2500_v33, %v2420_v55  ;;  %2585 = vrot.lane.b32.xlu0 %v2483_v51, %s6818_s14  ;;  %v2460_v33 = vsel %vm11005_vm6, %v2452_v6, %v8524_v10  ;;  %v2515_v36 = vsel %vm987_vm4, %v2498_v23, %v2418_v0 }
 0x1d8   : > { %v2524_v57 = vsel %vm996_vm3, %v2516_v5, %v8829_v58  ;;  %v2468_v5 = vsel %vm1023_vm7, %v2460_v33, %v11189_v26  ;;  %v2523_v51 = vsel %vm996_vm3, %v2515_v36, %v8811_v19  ;;  %v11235_v33 = vld [vmem:[#allocation92_spill] sm:$0xff] }
 0x1d9   : > { %v2532_v48 = vsel %vm10985_vm5, %v2524_v57, %v8535_v53  ;;  %v11233_v57 = vld [vmem:[#allocation57_spill] sm:$0xff]  ;;  %v2531_v23 = vsel %vm10985_vm5, %v2523_v51, %v8558_v28  ;;  %v11237_v36 = vld [vmem:[#allocation12_spill] sm:$0xff]  ;;  %v11239_v51 = vld [vmem:[#allocation30_spill] sm:$0xff] }
 0x1da   : > { %v2540_v55 = vsel %vm11005_vm6, %v2532_v48, %v8506_v9  ;;  %v1377_v12 = vpop.permute.xlu1 %1376  ;;  %v2476_v58 = vsel %vm1032_vm9, %v2468_v5, %v11233_v57  ;;  %v11234_v48 = vld [vmem:[#allocation13_spill] sm:$0xff]  ;;  %v2539_v5 = vsel %vm11005_vm6, %v2531_v23, %v8475_v27 }
 0x1db   : > { %v2548_v6 = vsel %vm1023_vm7, %v2540_v55, %v8524_v10  ;;  %v1407_v0 = vsel %vm996_vm3, %v1399_v18, %v11234_v48  ;;  %v2484_v9 = vsel %vm11236_vm15, %v2476_v58, %v11235_v33  ;;  %v1375_v55 = vpop.permute.xlu0 %1374  ;;  %v11238_v18 = vld [vmem:[#allocation15_spill] sm:$0xff]  ;;  %vm1220_vm15 = vcmask 392192   ;;  %v11250_v10 = vld [vmem:[#allocation29_spill] sm:$0xff] }
 0x1dc   : > { %v2556_v53 = vsel %vm1032_vm9, %v2548_v6, %v11189_v26  ;;  %v1415_v19 = vsel %vm10985_vm5, %v1407_v0, %v11237_v36  ;;  %2587 = vrot.lane.b32.xlu1 %v2484_v9, %s6818_s14  ;;  %v1398_v2 = vsel %vm987_vm4, %v8343_v39, %v11238_v18  ;;  %v2547_v0 = vsel %vm1023_vm7, %v2539_v5, %v8495_v60  ;;  %v11242_v9 = vld [vmem:[#allocation32_spill] sm:$0xff]  ;;  %v6767_v60 = vld [vmem:[%s7150_s22] sm:$0xff] }
 0x1dd   : > { %v1423_v28 = vsel %vm11005_vm6, %v1415_v19, %v11239_v51  ;;  %v2564_v6 = vsel %vm11240_vm11, %v2556_v53, %v11233_v57  ;;  %v1406_v23 = vsel %vm996_vm3, %v1398_v2, %v11241_v4  ;;  %v2555_v13 = vsel %vm1032_vm9, %v2547_v0, %v11183_v24  ;;  %v11244_v19 = vld [vmem:[#allocation27_spill] sm:$0xff]  ;;  %v11246_v57 = vld [vmem:[#allocation28_spill] sm:$0xff]  ;;  %v11248_v24 = vld [vmem:[#allocation14_spill] sm:$0xff] }
 0x1de   : > { %v1625_v58 = vpop.permute.xlu1 %1624  ;;  %v1431_v27 = vsel %vm1023_vm7, %v1423_v28, %v11242_v9  ;;  %v1414_v53 = vsel %vm10985_vm5, %v1406_v23, %v11244_v19  ;;  %v2563_v2 = vsel %vm11119_vm1, %v2555_v13, %v11148_v46  ;;  %vm11249_vm11 = vcmask 195584   ;;  %v8917_v46 = vld [vmem:[%s463_s17] sm:$0xff]  ;;  %s10716_s17 = scalar_lea.vmem %s10789_s9, %s6912_s13 }
 0x1df   : > { %v1439_v5 = vsel %vm1032_vm9, %v1431_v27, %v11245_v44  ;;  %v1422_v28 = vsel %vm11005_vm6, %v1414_v53, %v11246_v57  ;;  %2617 = vrot.lane.b32.xlu0 %v2563_v2, %s11117_s15  ;;  %v1623_v0 = vpop.permute.xlu0 %1622  ;;  %v1219_v23 = vsel %vm11249_vm11, %v6767_v60, %v11248_v24  ;;  %vm11251_vm5 = vmmov %vm11249_vm11  ;;  %11252 = vst [vmem:[#allocation13_spill] sm:$0xff] %v8917_v46  ;;  %v11253_v53 = vld [vmem:[#allocation31_spill] sm:$0xff]  ;;  %v11254_v2 = vld [vmem:[#allocation16_spill] sm:$0xff]  ;;  %vm11259_vm11 = vcmask 72704  }
 0x1e0   : > { %v1447_v9 = vsel %vm11247_vm14, %v1439_v5, %v1377_v12  ;;  %2619 = vrot.lane.b32.xlu1 %v2564_v6, %s11117_s15  ;;  %v1430_v44 = vsel %vm1023_vm7, %v1422_v28, %v11250_v10  ;;  %v8925_v26 = vsel %vm1220_vm15, %v1219_v23, %v11254_v2  ;;  %vm11255_vm14 = vmmov %vm11251_vm5  ;;  %v11257_v23 = vld [vmem:[#allocation37_spill] sm:$0xff] }
 0x1e1   : > { %v1679_v13 = vsel %vm11251_vm5, %v1447_v9, %v1625_v58  ;;  %v1438_v12 = vsel %vm1032_vm9, %v1430_v44, %v11253_v53  ;;  %vm1738_vm5 = vcmask 588800  }
 0x1e2   : > { %v1657_v27 = vpop.permute.xlu1 %1656  ;;  %v1446_v5 = vsel %vm11119_vm1, %v1438_v12, %v1375_v55  ;;  %v11256_v55 = vld [vmem:[#allocation17_spill] sm:$0xff]  ;;  %v11260_v12 = vld [vmem:[#allocation11_spill] sm:$0xff]  ;;  %vm11267_vm1 = vmmov %vm11259_vm11 }
 0x1e3   : > { %v1687_v6 = vsel %vm1220_vm15, %v1679_v13, %v1657_v27  ;;  %v1678_v24 = vsel %vm11255_vm14, %v1446_v5, %v1623_v0  ;;  %2783 = vrot.lane.b32.xlu0 %v8917_v46, %s6828_s30  ;;  %v1655_v60 = vpop.permute.xlu0 %1654  ;;  %v1401_v9 = vsel %vm987_vm4, %v8404_v31, %v11256_v55  ;;  %v11258_v13 = vld [vmem:[#allocation39_spill] sm:$0xff]  ;;  %v11261_v5 = vld [vmem:[#allocation40_spill] sm:$0xff]  ;;  %vm11271_vm14 = vcmask 171008  }
 0x1e4   : > { %2816 = vrot.lane.b32.xlu1 %v8715_v43, %s6828_s30  ;;  %v1695_v10 = vmul.f32 %v1687_v6, %v8925_v26  ;;  %v1686_v58 = vsel %vm1220_vm15, %v1678_v24, %v1655_v60  ;;  %v1409_v44 = vsel %vm996_vm3, %v1401_v9, %v11257_v23  ;;  %v1400_v6 = vsel %vm987_vm4, %v8428_v56, %v11260_v12  ;;  %v11262_v60 = vld [vmem:[#allocation35_spill] sm:$0xff]  ;;  %v11263_v9 = vld [vmem:[#allocation48_spill] sm:$0xff] }
 0x1e5   : > { %v1694_v0 = vmul.f32 %v1686_v58, %v8925_v26  ;;  %v1417_v27 = vsel %vm11259_vm11, %v1409_v44, %v11258_v13  ;;  %v1408_v58 = vsel %vm996_vm3, %v1400_v6, %v11262_v60  ;;  %v11264_v44 = vmov 1.0|1.0  }
 0x1e6   : > { %v1381_v28 = vpop.permute.xlu1 %1380  ;;  %v1425_v2 = vsel %vm11005_vm6, %v1417_v27, %v11261_v5  ;;  %v11268_v27 = vld [vmem:[#allocation51_spill] sm:$0xff]  ;;  %vm11273_vm11 = vcmask 195584  }
 0x1e7   : > { %v1379_v53 = vpop.permute.xlu0 %1378  ;;  %6178 = vmatprep.mubr.msk.f32.mxu0 %vm1738_vm5, %v1694_v0  ;;  %2818 = vrot.lane.b32.xlu0 %v8708_v11, %s6828_s30  ;;  %v1433_v0 = vsel %vm1023_vm7, %v1425_v2, %v11263_v9  ;;  %v11266_v11 = vld [vmem:[#allocation36_spill] sm:$0xff]  ;;  %v11272_v9 = vld [vmem:[#allocation42_spill] sm:$0xff] }
 0x1e8   : > { %2820 = vrot.lane.b32.xlu1 %v8743_v22, %s6828_s30  ;;  %6179 = vmatmul.mubr.msk.f32.vlgmr.msra.gmra.mrb[16].mxu0 %vm1738_vm5, %v1695_v10  ;;  %v1416_v43 = vsel %vm11267_vm1, %v1408_v58, %v11266_v11  ;;  %v1441_v5 = vsel %vm1032_vm9, %v1433_v0, %v11268_v27  ;;  %v11270_v10 = vld [vmem:[#allocation38_spill] sm:$0xff]  ;;  %v11274_v27 = vld [vmem:[#allocation47_spill] sm:$0xff]  ;;  %vm11275_vm1 = vmmov %vm11271_vm14 }
 0x1e9   : > { %6545 = vmatpush3.bf16.msk.msra.mxu0 %vm7075_vm8, %v11264_v44  ;;  %v1424_v6 = vsel %vm11005_vm6, %v1416_v43, %v11270_v10  ;;  %v1449_v60 = vsel %vm11271_vm14, %v1441_v5, %v1381_v28  ;;  %vm11277_vm14 = vmmov %vm11273_vm11 }
 0x1ea   : > { %v1629_v24 = vpop.permute.xlu1 %1628  ;;  %6547 = vmatprep.subr.msk.bf16.mxu0 %vm7473_vm0, %v11264_v44  ;;  %v1432_v13 = vsel %vm1023_vm7, %v1424_v6, %v11272_v9 }
 0x1eb   : > { %v1627_v2 = vpop.permute.xlu0 %1626  ;;  %2822 = vrot.lane.b32.xlu0 %v8739_v42, %s6828_s30  ;;  %v1681_v58 = vsel %vm11273_vm11, %v1449_v60, %v1629_v24  ;;  %v1440_v11 = vsel %vm1032_vm9, %v1432_v13, %v11274_v27  ;;  %vm11282_vm11 = vcmask 72704  }
 0x1ec   : > { %2824 = vrot.lane.b32.xlu1 %v8767_v3, %s6828_s30  ;;  %v1448_v28 = vsel %vm11275_vm1, %v1440_v11, %v1379_v53  ;;  %vm11288_vm1 = vmmov %vm11282_vm11 }
 0x1ed   : > { %6549 = vmatpush3.bf16.msk.msra.mxu0 %vm7473_vm0, %v11264_v44  ;;  %v1680_v24 = vsel %vm11277_vm14, %v1448_v28, %v1627_v2  ;;  %v11279_v2 = vld [vmem:[#allocation49_spill] sm:$0xff]  ;;  %vm11293_vm14 = vcmask 171008  }
 0x1ee   : > { %v1661_v0 = vpop.permute.xlu1 %1660  ;;  %6551 = vmatprep.subr.msk.bf16.mxu0 %vm7864_vm10, %v11264_v44 }
 0x1ef   : > { %v1689_v43 = vsel %vm1220_vm15, %v1681_v58, %v1661_v0  ;;  %v1659_v60 = vpop.permute.xlu0 %1658  ;;  %2826 = vrot.lane.b32.xlu0 %v8761_v1, %s6828_s30  ;;  %v11278_v58 = vld [vmem:[#allocation20_spill] sm:$0xff]  ;;  %v11285_v1 = vld [vmem:[#allocation43_spill] sm:$0xff] }
 0x1f0   : > { %v1697_v13 = vmul.f32 %v1689_v43, %v8925_v26  ;;  %v1688_v6 = vsel %vm1220_vm15, %v1680_v24, %v1659_v60  ;;  %2828 = vrot.lane.b32.xlu1 %v8792_v29, %s6828_s30  ;;  %v1403_v11 = vsel %vm987_vm4, %v8134_v41, %v11278_v58  ;;  %v11281_v43 = vld [vmem:[#allocation54_spill] sm:$0xff] }
 0x1f1   : > { %v1696_v53 = vmul.f32 %v1688_v6, %v8925_v26  ;;  %6553 = vmatpush3.bf16.msk.msra.mxu0 %vm7864_vm10, %v11264_v44  ;;  %v1411_v0 = vsel %vm996_vm3, %v1403_v11, %v11279_v2  ;;  %v11283_v41 = vld [vmem:[#allocation10_spill] sm:$0xff]  ;;  %v11284_v6 = vld [vmem:[#allocation55_spill] sm:$0xff] }
 0x1f2   : > { %v1385_v9 = vpop.permute.xlu1 %1384  ;;  %6555 = vmatprep.subr.msk.bf16.mxu0 %vm7938_vm12, %v11264_v44  ;;  %v1419_v28 = vsel %vm11282_vm11, %v1411_v0, %v11281_v43  ;;  %v1402_v60 = vsel %vm987_vm4, %v8165_v16, %v11283_v41  ;;  %v11286_v0 = vld [vmem:[#allocation63_spill] sm:$0xff]  ;;  %v11289_v16 = vld [vmem:[#allocation72_spill] sm:$0xff]  ;;  %vm11295_vm11 = vcmask 195584  }
 0x1f3   : > { %v1383_v24 = vpop.permute.xlu0 %1382  ;;  %6181 = vmatprep.mubr.msk.f32.mxu0 %vm1738_vm5, %v1696_v53  ;;  %2830 = vrot.lane.b32.xlu0 %v8785_v50, %s6828_s30  ;;  %v1427_v11 = vsel %vm11005_vm6, %v1419_v28, %v11284_v6  ;;  %v1410_v3 = vsel %vm996_vm3, %v1402_v60, %v11285_v1  ;;  %v11287_v53 = vld [vmem:[#allocation52_spill] sm:$0xff]  ;;  %v11290_v28 = vmov 1.0  }
 0x1f4   : > { %6182 = vmatmul.mubr.msk.f32.gmra.mrb[18].mxu0 %vm1738_vm5, %v1697_v13  ;;  %v1435_v42 = vsel %vm1023_vm7, %v1427_v11, %v11286_v0  ;;  %v1418_v50 = vsel %vm11288_vm1, %v1410_v3, %v11287_v53  ;;  %v11292_v13 = vld [vmem:[#allocation53_spill] sm:$0xff]  ;;  %v11294_v0 = vld [vmem:[#allocation58_spill] sm:$0xff]  ;;  %v11296_v3 = vld [vmem:[#allocation67_spill] sm:$0xff] }
 0x1f5   : > { %6557 = vmatpush3.bf16.msk.msra.mxu0 %vm7938_vm12, %v11264_v44  ;;  %v1443_v5 = vsel %vm1032_vm9, %v1435_v42, %v11289_v16  ;;  %v1426_v60 = vsel %vm11005_vm6, %v1418_v50, %v11292_v13  ;;  %v1893_v42 = vsel %vm987_vm4, %v11206_v37, %v11207_v61  ;;  %vm11297_vm1 = vmmov %vm11293_vm14  ;;  %v11311_v61 = vld [vmem:[#allocation78_spill] sm:$0xff] }
 0x1f6   : > { %v1633_v29 = vpop.permute.xlu1 %1632  ;;  %6206 = vmatprep.subr.msk.mxu0 %vm7972_vm13, %v11290_v28  ;;  %v1451_v1 = vsel %vm11293_vm14, %v1443_v5, %v1385_v9  ;;  %v1434_v27 = vsel %vm1023_vm7, %v1426_v60, %v11294_v0  ;;  %vm11298_vm14 = vmmov %vm11295_vm11  ;;  %v1892_v5 = vsel %vm987_vm4, %v11201_v54, %v11158_v40  ;;  %v11300_v0 = vld [vmem:[#allocation71_spill] sm:$0xff] }
 0x1f7   : > { %v1683_v43 = vsel %vm11295_vm11, %v1451_v1, %v1633_v29  ;;  %v1442_v53 = vsel %vm1032_vm9, %v1434_v27, %v11296_v3  ;;  %vm11301_vm11 = vcmask 72704  }
 0x1f8   : > { %v1631_v11 = vpop.permute.xlu0 %1630  ;;  %v1450_v50 = vsel %vm11297_vm1, %v1442_v53, %v1383_v24  ;;  %v11299_v24 = vld [vmem:[#allocation59_spill] sm:$0xff]  ;;  %vm11302_vm1 = vmmov %vm11301_vm11 }
 0x1f9   : > { %6207 = vmatpush3.msk.msra.mxu0 %vm7972_vm13, %v11290_v28  ;;  %v1682_v1 = vsel %vm11298_vm14, %v1450_v50, %v1631_v11  ;;  %v1405_v53 = vsel %vm987_vm4, %v11235_v33, %v11299_v24  ;;  %vm11306_vm14 = vmmov %vm11302_vm1 }
 0x1fa   : > { %v1665_v22 = vpop.permute.xlu1 %1664  ;;  %6559 = vmatprep.subr.msk.bf16.mxu0 %vm7075_vm8, %v11264_v44  ;;  %v1413_v11 = vsel %vm996_vm3, %v1405_v53, %v7962_v47 }
 0x1fb   : > { %v1691_v16 = vsel %vm1220_vm15, %v1683_v43, %v1665_v22  ;;  %v1901_v43 = vsel %vm996_vm3, %v1893_v42, %v11162_v59  ;;  %v1421_v3 = vsel %vm11301_vm11, %v1413_v11, %v11300_v0  ;;  %v1900_v42 = vsel %vm996_vm3, %v1892_v5, %v7574_v15  ;;  %v11305_v5 = vld [vmem:[#allocation68_spill] sm:$0xff]  ;;  %vm11308_vm11 = vmmov %vm11302_vm1 }
 0x1fc   : > { %v1663_v29 = vpop.permute.xlu0 %1662  ;;  %v1699_v9 = vmul.f32 %v1691_v16, %v8925_v26  ;;  %v1909_v16 = vsel %vm11302_vm1, %v1901_v43, %v8322_v17  ;;  %v1895_v17 = vsel %vm987_vm4, %v8302_v20, %v7646_v34  ;;  %vm11310_vm1 = vcmask 171008  }
 0x1fd   : > { %v1690_v22 = vsel %vm1220_vm15, %v1682_v1, %v1663_v29  ;;  %v1404_v1 = vsel %vm987_vm4, %v8250_v38, %v11161_v7  ;;  %v11303_v29 = vld [vmem:[#allocation75_spill] sm:$0xff]  ;;  %v11307_v38 = vld [vmem:[#allocation45_spill] sm:$0xff] }
 0x1fe   : > { %v1389_v27 = vpop.permute.xlu1 %1388  ;;  %v1698_v60 = vmul.f32 %v1690_v22, %v8925_v26  ;;  %v1429_v22 = vsel %vm11005_vm6, %v1421_v3, %v11303_v29  ;;  %v1412_v11 = vsel %vm996_vm3, %v1404_v1, %v11197_v25  ;;  %v1908_v3 = vsel %vm11308_vm11, %v1900_v42, %v8343_v39  ;;  %v11309_v1 = vld [vmem:[#allocation74_spill] sm:$0xff]  ;;  %v11313_v39 = vld [vmem:[#allocation41_spill] sm:$0xff]  ;;  %vm11314_vm11 = vmmov %vm11310_vm1 }
 0x1ff   : > { %v1420_v43 = vsel %vm11306_vm14, %v1412_v11, %v11305_v5  ;;  %v1894_v11 = vsel %vm987_vm4, %v8267_v32, %v7638_v49  ;;  %vm11312_vm14 = vcmask 195584  }
 0x200   : > { %v1387_v50 = vpop.permute.xlu0 %1386  ;;  %6184 = vmatprep.mubr.msk.f32.mxu0 %vm1738_vm5, %v1698_v60  ;;  %v11304_v60 = vld [vmem:[#allocation46_spill] sm:$0xff]  ;;  %v1428_v40 = vsel %vm11005_vm6, %v1420_v43, %v11309_v1 }
 0x201   : > { %6185 = vmatmul.mubr.msk.f32.gmra.mrb[20].mxu0 %vm1738_vm5, %v1699_v9  ;;  %v1437_v59 = vsel %vm1023_vm7, %v1429_v22, %v11304_v60  ;;  %v1917_v9 = vsel %vm11005_vm6, %v1909_v16, %v7550_v45  ;;  %v1436_v34 = vsel %vm1023_vm7, %v1428_v40, %v11311_v61  ;;  %v1903_v16 = vsel %vm996_vm3, %v1895_v17, %v7644_v63 }
 0x202   : > { %v1637_v53 = vpop.permute.xlu1 %1636  ;;  %v1445_v15 = vsel %vm1032_vm9, %v1437_v59, %v11307_v38  ;;  %v1444_v42 = vsel %vm1032_vm9, %v1436_v34, %v11313_v39  ;;  %v1916_v40 = vsel %vm11005_vm6, %v1908_v3, %v11238_v18  ;;  %v1902_v17 = vsel %vm996_vm3, %v1894_v11, %v7636_v14 }
 0x203   : > { %v1453_v22 = vsel %vm11310_vm1, %v1445_v15, %v1389_v27  ;;  %v1925_v15 = vsel %vm1023_vm7, %v1917_v9, %v11234_v48  ;;  %v1452_v61 = vsel %vm11314_vm11, %v1444_v42, %v1387_v50  ;;  %vm11315_vm1 = vmmov %vm11312_vm14  ;;  %v1924_v50 = vsel %vm1023_vm7, %v1916_v40, %v11241_v4 }
 0x204   : > { %v1635_v60 = vpop.permute.xlu0 %1634  ;;  %v1685_v59 = vsel %vm11312_vm14, %v1453_v22, %v1637_v53  ;;  %vm11316_vm14 = vcmask 72704   ;;  %v1933_v48 = vsel %vm1032_vm9, %v1925_v15, %v11237_v36  ;;  %v1897_v3 = vsel %vm987_vm4, %v8423_v62, %v11129_v52 }
 0x205   : > { %v1684_v27 = vsel %vm11315_vm1, %v1452_v61, %v1635_v60  ;;  %v1911_v22 = vsel %vm11316_vm14, %v1903_v16, %v8404_v31  ;;  %vm11317_vm11 = vmmov %vm11316_vm14  ;;  %vm11318_vm1 = vcmask 171008   ;;  %v1896_v16 = vsel %vm987_vm4, %v8389_v35, %v11131_v30 }
 0x206   : > { %v1669_v38 = vpop.permute.xlu1 %1668  ;;  %v1919_v60 = vsel %vm11005_vm6, %v1911_v22, %v11256_v55  ;;  %v1910_v11 = vsel %vm11317_vm11, %v1902_v17, %v8428_v56  ;;  %v1941_v36 = vsel %vm11318_vm1, %v1933_v48, %v11239_v51  ;;  %vm11319_vm14 = vcmask 195584   ;;  %vm11320_vm11 = vmmov %vm11318_vm1 }
 0x207   : > { %v1693_v43 = vsel %vm1220_vm15, %v1685_v59, %v1669_v38  ;;  %v1932_v38 = vsel %vm1032_vm9, %v1924_v50, %v11244_v19  ;;  %v1905_v56 = vsel %vm996_vm3, %v1897_v3, %v7680_v21  ;;  %v1927_v19 = vsel %vm1023_vm7, %v1919_v60, %v11257_v23  ;;  %vm11321_vm1 = vmmov %vm11319_vm14  ;;  %v11325_v50 = vld [vmem:[#allocation66_spill] sm:$0xff]  ;;  %v11326_v3 = vld [vmem:[#allocation89_spill] sm:$0xff] }
 0x208   : > { %v1667_v53 = vpop.permute.xlu0 %1666  ;;  %v1701_v34 = vmul.f32 %v1693_v43, %v8925_v26  ;;  %v1918_v43 = vsel %vm11005_vm6, %v1910_v11, %v11260_v12  ;;  %v1940_v15 = vsel %vm11320_vm11, %v1932_v38, %v11246_v57  ;;  %v1904_v22 = vsel %vm996_vm3, %v1896_v16, %v11130_v8  ;;  %v11324_v57 = vld [vmem:[#allocation35_spill] sm:$0xff] }
 0x209   : > { %v1692_v59 = vsel %vm1220_vm15, %v1684_v27, %v1667_v53  ;;  %v9151_v27 = vld [vmem:[%s7163_s25 + $0x28] sm:$0xff] }
 0x20a   : > { %v2119_v9 = vpop.permute.xlu1 %2118  ;;  %v1700_v31 = vmul.f32 %v1692_v59, %v8925_v26  ;;  %v11323_v59 = vld [vmem:[#allocation39_spill] sm:$0xff] }
 0x20b   : > { %v2173_v39 = vsel %vm11319_vm14, %v1941_v36, %v2119_v9  ;;  %vm11322_vm14 = vcmask 72704   ;;  %v1935_v48 = vsel %vm1032_vm9, %v1927_v19, %v11323_v59  ;;  %v1926_v9 = vsel %vm1023_vm7, %v1918_v43, %v11324_v57  ;;  %v9170_v36 = vld [vmem:[%s7163_s25 + $0x20] sm:$0xff]  ;;  %v11329_v16 = vld [vmem:[#allocation87_spill] sm:$0xff] }
 0x20c   : > { %v2117_v4 = vpop.permute.xlu0 %2116  ;;  %6187 = vmatprep.mubr.msk.f32.mxu0 %vm1738_vm5, %v1700_v31  ;;  %v1913_v53 = vsel %vm11322_vm14, %v1905_v56, %v9151_v27  ;;  %v1899_v31 = vsel %vm987_vm4, %v11326_v3, %v11325_v50  ;;  %vm11327_vm11 = vmmov %vm11322_vm14  ;;  %vm11333_vm14 = vcmask 195584   ;;  %v11348_v57 = vld [vmem:[#allocation79_spill] sm:$0xff] }
 0x20d   : > { %6188 = vmatmul.mubr.msk.f32.gmra.mrb[22].mxu0 %vm1738_vm5, %v1701_v34  ;;  %v2172_v40 = vsel %vm11321_vm1, %v1940_v15, %v2117_v4  ;;  %v1921_v11 = vsel %vm11005_vm6, %v1913_v53, %v11278_v58  ;;  %v1912_v38 = vsel %vm11327_vm11, %v1904_v22, %v9170_v36  ;;  %v11328_v4 = vld [vmem:[#allocation62_spill] sm:$0xff]  ;;  %vm11331_vm1 = vcmask 171008  }
 0x20e   : > { %v2151_v42 = vpop.permute.xlu1 %2150  ;;  %v1920_v59 = vsel %vm11005_vm6, %v1912_v38, %v11283_v41  ;;  %vm11335_vm11 = vmmov %vm11331_vm1  ;;  %v11340_v38 = vld [vmem:[#allocation54_spill] sm:$0xff] }
 0x20f   : > { %v2181_v51 = vsel %vm1220_vm15, %v2173_v39, %v2151_v42  ;;  %v1898_v39 = vsel %vm987_vm4, %v11329_v16, %v11328_v4  ;;  %v11330_v42 = vld [vmem:[#allocation40_spill] sm:$0xff] }
 0x210   : > { %v2149_v61 = vpop.permute.xlu0 %2148  ;;  %v2189_v23 = vmul.f32 %v2181_v51, %v8925_v26  ;;  %v1943_v56 = vsel %vm11331_vm1, %v1935_v48, %v11330_v42  ;;  %v11332_v51 = vld [vmem:[#allocation36_spill] sm:$0xff]  ;;  %vm11338_vm1 = vmmov %vm11333_vm14  ;;  %v11341_v42 = vld [vmem:[#allocation43_spill] sm:$0xff] }
 0x211   : > { %v2180_v17 = vsel %vm1220_vm15, %v2172_v40, %v2149_v61  ;;  %v1934_v19 = vsel %vm1032_vm9, %v1926_v9, %v11332_v51  ;;  %v11334_v61 = vld [vmem:[#allocation57_spill] sm:$0xff]  ;;  %v9212_v51 = vld [vmem:[%s7163_s25 + $0x30] sm:$0xff] }
 0x212   : > { %v2123_v34 = vpop.permute.xlu1 %2122  ;;  %v2188_v60 = vmul.f32 %v2180_v17, %v8925_v26  ;;  %v1907_v53 = vsel %vm996_vm3, %v1899_v31, %v11334_v61  ;;  %v1929_v17 = vsel %vm1023_vm7, %v1921_v11, %v11279_v2 }
 0x213   : > { %v2175_v15 = vsel %vm11333_vm14, %v1943_v56, %v2123_v34  ;;  %v11336_v34 = vld [vmem:[#allocation56_spill] sm:$0xff]  ;;  %vm11339_vm14 = vcmask 72704  }
 0x214   : > { %v2121_v43 = vpop.permute.xlu0 %2120  ;;  %6208 = vmatprep.mubr.msk.f32.mxu0 %vm1738_vm5, %v2188_v60  ;;  %v1906_v48 = vsel %vm996_vm3, %v1898_v39, %v11336_v34  ;;  %v1915_v31 = vsel %vm11339_vm14, %v1907_v53, %v11235_v33  ;;  %v1928_v39 = vsel %vm1023_vm7, %v1920_v59, %v11341_v42  ;;  %v11343_v33 = vld [vmem:[#allocation44_spill] sm:$0xff]  ;;  %v11351_v42 = vld [vmem:[#allocation50_spill] sm:$0xff] }
 0x215   : > { %6209 = vmatmul.mubr.msk.f32.vlgmr.msra.gmra.mrb[24].mxu0 %vm1738_vm5, %v2189_v23  ;;  %v1942_v23 = vsel %vm11335_vm11, %v1934_v19, %v11270_v10  ;;  %v1937_v10 = vsel %vm1032_vm9, %v1929_v17, %v11340_v38  ;;  %v11347_v59 = vld [vmem:[#allocation52_spill] sm:$0xff] }
 0x216   : > { %v2155_v40 = vpop.permute.xlu1 %2154  ;;  %6561 = vmatpush3.bf16.msk.msra.mxu0 %vm7075_vm8, %v11264_v44  ;;  %v2174_v9 = vsel %vm11338_vm1, %v1942_v23, %v2121_v43  ;;  %vm11342_vm8 = vmmov %vm11339_vm14  ;;  %v11344_v43 = vld [vmem:[#allocation65_spill] sm:$0xff]  ;;  %v1936_v23 = vsel %vm1032_vm9, %v1928_v39, %v11347_v59 }
 0x217   : > { %v2183_v22 = vsel %vm1220_vm15, %v2175_v15, %v2155_v40  ;;  %6563 = vmatprep.subr.msk.bf16.mxu0 %vm7473_vm0, %v11264_v44  ;;  %v1914_v19 = vsel %vm11342_vm8, %v1906_v48, %v9212_v51  ;;  %v2350_v15 = vsel %vm987_vm4, %v11344_v43, %v11343_v33  ;;  %v1923_v40 = vsel %vm11005_vm6, %v1915_v31, %v11299_v24 }
 0x218   : > { %v2153_v2 = vpop.permute.xlu0 %2152  ;;  %v2191_v60 = vmul.f32 %v2183_v22, %v8925_v26  ;;  %v11346_v22 = vld [vmem:[#allocation55_spill] sm:$0xff]  ;;  %v1922_v38 = vsel %vm11005_vm6, %v1914_v19, %v11161_v7  ;;  %v11354_v19 = vld [vmem:[#allocation76_spill] sm:$0xff] }
 0x219   : > { %v2182_v46 = vsel %vm1220_vm15, %v2174_v9, %v2153_v2  ;;  %v1945_v17 = vsel %vm11335_vm11, %v1937_v10, %v11346_v22  ;;  %v11349_v9 = vld [vmem:[#allocation93_spill] sm:$0xff]  ;;  %v2358_v10 = vsel %vm996_vm3, %v2350_v15, %v11351_v42  ;;  %v11363_v42 = vld [vmem:[#allocation22_spill] sm:$0xff] }
 0x21a   : > { %v2127_v11 = vpop.permute.xlu1 %2126  ;;  %v2190_v56 = vmul.f32 %v2182_v46, %v8925_v26  ;;  %6565 = vmatpush3.bf16.msk.msra.mxu0 %vm7473_vm0, %v11264_v44  ;;  %v2349_v2 = vsel %vm987_vm4, %v11349_v9, %v11348_v57  ;;  %vm11350_vm0 = vmmov %vm11338_vm1 }
 0x21b   : > { %6567 = vmatprep.subr.msk.bf16.mxu0 %vm7864_vm10, %v11264_v44  ;;  %v2177_v46 = vsel %vm11350_vm0, %v1945_v17, %v2127_v11  ;;  %vm11352_vm1 = vmmov %vm11335_vm11  ;;  %v2357_v33 = vsel %vm996_vm3, %v2349_v2, %v11354_v19 }
 0x21c   : > { %v2125_v48 = vpop.permute.xlu0 %2124  ;;  %6211 = vmatprep.mubr.msk.f32.mxu0 %vm1738_vm5, %v2190_v56  ;;  %v1931_v56 = vsel %vm1023_vm7, %v1923_v40, %v7962_v47  ;;  %v1944_v11 = vsel %vm11352_vm1, %v1936_v23, %v11292_v13  ;;  %vm11355_vm14 = vmmov %vm11350_vm0  ;;  %v1930_v47 = vsel %vm1023_vm7, %v1922_v38, %v11197_v25  ;;  %v2366_v40 = vsel %vm11342_vm8, %v2358_v10, %v11206_v37  ;;  %v11364_v10 = vld [vmem:[#allocation77_spill] sm:$0xff] }
 0x21d   : > { %6212 = vmatmul.mubr.msk.f32.gmra.mrb[26].mxu0 %vm1738_vm5, %v2191_v60  ;;  %v2176_v43 = vsel %vm11355_vm14, %v1944_v11, %v2125_v48  ;;  %v1939_v17 = vsel %vm1032_vm9, %v1931_v56, %v11300_v0  ;;  %vm11357_vm11 = vmmov %vm11352_vm1  ;;  %v1938_v23 = vsel %vm1032_vm9, %v1930_v47, %v11305_v5  ;;  %v11358_v48 = vld [vmem:[#allocation25_spill] sm:$0xff]  ;;  %v11366_v11 = vld [vmem:[#allocation24_spill] sm:$0xff] }
 0x21e   : > { %v2159_v31 = vpop.permute.xlu1 %2158  ;;  %6569 = vmatpush3.bf16.msk.msra.mxu0 %vm7864_vm10, %v11264_v44  ;;  %vm11356_vm10 = vmmov %vm11342_vm8  ;;  %v1947_v37 = vsel %vm11357_vm11, %v1939_v17, %v11303_v29  ;;  %v2374_v57 = vsel %vm11005_vm6, %v2366_v40, %v11358_v48  ;;  %v11361_v5 = vld [vmem:[#allocation81_spill] sm:$0xff]  ;;  %v11369_v47 = vld [vmem:[#allocation80_spill] sm:$0xff] }
 0x21f   : > { %v2185_v39 = vsel %vm1220_vm15, %v2177_v46, %v2159_v31  ;;  %6571 = vmatprep.subr.msk.bf16.mxu0 %vm7938_vm12, %v11264_v44  ;;  %v2365_v25 = vsel %vm11356_vm10, %v2357_v33, %v11201_v54  ;;  %v11360_v46 = vld [vmem:[#allocation23_spill] sm:$0xff]  ;;  %v11362_v31 = vld [vmem:[#allocation73_spill] sm:$0xff]  ;;  %v2382_v60 = vsel %vm1023_vm7, %v2374_v57, %v11366_v11  ;;  %vm11372_vm14 = vmmov %vm11342_vm8 }
 0x220   : > { %v2157_v15 = vpop.permute.xlu0 %2156  ;;  %v2193_v53 = vmul.f32 %v2185_v39, %v8925_v26  ;;  %v2373_v29 = vsel %vm11005_vm6, %v2365_v25, %v11360_v46  ;;  %v2351_v38 = vsel %vm987_vm4, %v11362_v31, %v11361_v5  ;;  %v2352_v39 = vsel %vm987_vm4, %v11364_v10, %v11363_v42  ;;  %v6771_v17 = vld [vmem:[%s7163_s25 + $0x8] sm:$0xff]  ;;  %v6772_v25 = vld [vmem:[%s7163_s25] sm:$0xff]  ;;  %v11379_v10 = vld [vmem:[#allocation96_spill] sm:$0xff] }
 0x221   : > { %v2184_v13 = vsel %vm1220_vm15, %v2176_v43, %v2157_v15  ;;  %v11368_v43 = vld [vmem:[#allocation21_spill] sm:$0xff]  ;;  %v2359_v40 = vsel %vm996_vm3, %v2351_v38, %v11369_v47  ;;  %v11377_v5 = vld [vmem:[#allocation34_spill] sm:$0xff]  ;;  %v11381_v11 = vld [vmem:[#allocation99_spill] sm:$0xff] }
 0x222   : > { %v2131_v22 = vpop.permute.xlu1 %2130  ;;  %v2192_v59 = vmul.f32 %v2184_v13, %v8925_v26  ;;  %6573 = vmatpush3.bf16.msk.msra.mxu0 %vm7938_vm12, %v11264_v44  ;;  %vm11359_vm12 = vmmov %vm11350_vm0  ;;  %v2381_v15 = vsel %vm1023_vm7, %v2373_v29, %v11368_v43 }
 0x223   : > { %6236 = vmatprep.subr.msk.mxu0 %vm7972_vm13, %v11290_v28  ;;  %v2179_v9 = vsel %vm11359_vm12, %v1947_v37, %v2131_v22  ;;  %vm11365_vm0 = vmmov %vm11352_vm1  ;;  %v2389_v37 = vsel %vm1032_vm9, %v2381_v15, %v6772_v25  ;;  %v6773_v15 = vld [vmem:[%s7163_s25 + $0x10] sm:$0xff] }
 0x224   : > { %v2129_v0 = vpop.permute.xlu0 %2128  ;;  %6214 = vmatprep.mubr.msk.f32.mxu0 %vm1738_vm5, %v2192_v59  ;;  %v1946_v56 = vsel %vm11365_vm0, %v1938_v23, %v11309_v1  ;;  %vm11367_vm1 = vmmov %vm11359_vm12  ;;  %v2390_v59 = vsel %vm1032_vm9, %v2382_v60, %v6771_v17 }
 0x225   : > { %6215 = vmatmul.mubr.msk.f32.gmra.mrb[28].mxu0 %vm1738_vm5, %v2193_v53  ;;  %v2178_v19 = vsel %vm11367_vm1, %v1946_v56, %v2129_v0  ;;  %v11370_v53 = vld [vmem:[#allocation18_spill] sm:$0xff]  ;;  %vm11374_vm10 = vmmov %vm11367_vm1  ;;  %v11380_v56 = vld [vmem:[#allocation84_spill] sm:$0xff] }
 0x226   : > { %v2163_v54 = vpop.permute.xlu1 %2162  ;;  %6237 = vmatpush3.msk.msra.mxu0 %vm7972_vm13, %v11290_v28  ;;  %v2360_v13 = vsel %vm996_vm3, %v2352_v39, %v11370_v53  ;;  %vm11371_vm13 = vmmov %vm11342_vm8  ;;  %v2354_v60 = vsel %vm987_vm4, %v11381_v11, %v11380_v56 }
 0x227   : > { %v2187_v2 = vsel %vm1220_vm15, %v2179_v9, %v2163_v54  ;;  %v2367_v0 = vsel %vm11371_vm13, %v2359_v40, %v8267_v32  ;;  %v2368_v48 = vsel %vm11372_vm14, %v2360_v13, %v8302_v20  ;;  %vm11373_vm8 = vmmov %vm11365_vm0  ;;  %v6774_v13 = vld [vmem:[%s7163_s25 + $0x18] sm:$0xff] }
 0x228   : > { %v2161_v33 = vpop.permute.xlu0 %2160  ;;  %v2195_v6 = vmul.f32 %v2187_v2, %v8925_v26  ;;  %v2398_v57 = vsel %vm11373_vm8, %v2390_v59, %v7550_v45  ;;  %vm11375_vm11 = vmmov %vm11365_vm0  ;;  %v2375_v20 = vsel %vm11005_vm6, %v2367_v0, %v7638_v49  ;;  %v2376_v45 = vsel %vm11005_vm6, %v2368_v48, %v11377_v5 }
 0x229   : > { %v2186_v28 = vsel %vm1220_vm15, %v2178_v19, %v2161_v33  ;;  %v2397_v2 = vsel %vm11375_vm11, %v2389_v37, %v11238_v18  ;;  %vm11376_vm12 = vmmov %vm11367_vm1  ;;  %v11378_v18 = vld [vmem:[#allocation85_spill] sm:$0xff]  ;;  %v2383_v49 = vsel %vm1023_vm7, %v2375_v20, %v7636_v14  ;;  %v2384_v19 = vsel %vm1023_vm7, %v2376_v45, %v7644_v63  ;;  %v11382_v33 = vld [vmem:[#allocation82_spill] sm:$0xff] }
 0x22a   : > { %v2194_v1 = vmul.f32 %v2186_v28, %v8925_v26  ;;  %v2576_v22 = vpop.permute.xlu1 %2575  ;;  %v2353_v39 = vsel %vm987_vm4, %v11379_v10, %v11378_v18  ;;  %v11383_v28 = vld [vmem:[#allocation83_spill] sm:$0xff]  ;;  %v2391_v47 = vsel %vm1032_vm9, %v2383_v49, %v6773_v15  ;;  %v2392_v14 = vsel %vm1032_vm9, %v2384_v19, %v6774_v13  ;;  %vm11384_vm0 = vmmov %vm11371_vm13  ;;  %v11395_v45 = vld [vmem:[#allocation88_spill] sm:$0xff] }
 0x22b   : > { %v2630_v9 = vsel %vm11374_vm10, %v2398_v57, %v2576_v22  ;;  %v2362_v43 = vsel %vm996_vm3, %v2354_v60, %v11383_v28  ;;  %vm11385_vm1 = vmmov %vm11384_vm0  ;;  %v11390_v57 = vld [vmem:[#allocation91_spill] sm:$0xff] }
 0x22c   : > { %v2574_v23 = vpop.permute.xlu0 %2573  ;;  %6217 = vmatprep.mubr.msk.f32.mxu0 %vm1738_vm5, %v2194_v1  ;;  %v2370_v1 = vsel %vm11385_vm1, %v2362_v43, %v8423_v62  ;;  %vm11386_vm13 = vmmov %vm11373_vm8  ;;  %v538_v43 = vld [vmem:[%s10788_s8] sm:$0x3] }
 0x22d   : > { %6218 = vmatmul.mubr.msk.f32.gmra.mrb[30].mxu0 %vm1738_vm5, %v2195_v6  ;;  %v2629_v29 = vsel %vm11376_vm12, %v2397_v2, %v2574_v23  ;;  %v2361_v6 = vsel %vm996_vm3, %v2353_v39, %v11382_v33  ;;  %v2399_v22 = vsel %vm11386_vm13, %v2391_v47, %v11260_v12  ;;  %vm11387_vm14 = vmmov %vm11373_vm8  ;;  %v11392_v2 = vld [vmem:[#allocation90_spill] sm:$0xff]  ;;  %v11402_v33 = vld [vmem:[#allocation3_spill] sm:$0xff] }
 0x22e   : > { %v2608_v54 = vpop.permute.xlu1 %2607  ;;  %v2369_v63 = vsel %vm11384_vm0, %v2361_v6, %v8389_v35  ;;  %v2400_v17 = vsel %vm11387_vm14, %v2392_v14, %v11256_v55  ;;  %vm11388_vm8 = vmmov %vm11374_vm10  ;;  %v2378_v55 = vsel %vm11005_vm6, %v2370_v1, %v11129_v52  ;;  %v11394_v52 = vld [vmem:[#allocation86_spill] sm:$0xff]  ;;  %v694_v6 = vsub.s32 1, %v11402_v33 }
 0x22f   : > { %v2638_v46 = vsel %vm1220_vm15, %v2630_v9, %v2608_v54  ;;  %vm11389_vm10 = vmmov %vm11388_vm8  ;;  %v2377_v12 = vsel %vm11005_vm6, %v2369_v63, %v11131_v30  ;;  %v11391_v9 = vld [vmem:[#allocation104_spill] sm:$0xff]  ;;  %v2386_v30 = vsel %vm1023_vm7, %v2378_v55, %v7680_v21 }
 0x230   : > { %v2606_v32 = vpop.permute.xlu0 %2605  ;;  %v2646_v31 = vmul.f32 %v2638_v46, %v8925_v26  ;;  %v2355_v54 = vsel %vm987_vm4, %v11391_v9, %v11390_v57  ;;  %v11393_v46 = vld [vmem:[#allocation105_spill] sm:$0xff]  ;;  %vm11397_vm11 = vmmov %vm11384_vm0  ;;  %v9419_v47 = vrot.slane %v538_v43, %v694_v6 }
 0x231   : > { %v2637_v38 = vsel %vm1220_vm15, %v2629_v29, %v2606_v32  ;;  %v2356_v29 = vsel %vm987_vm4, %v11393_v46, %v11392_v2  ;;  %v2385_v32 = vsel %vm1023_vm7, %v2377_v12, %v11130_v8  ;;  %v2363_v5 = vsel %vm996_vm3, %v2355_v54, %v11394_v52  ;;  %vm11396_vm4 = vmmov %vm11384_vm0 }
 0x232   : > { %v2645_v42 = vmul.f32 %v2637_v38, %v8925_v26  ;;  %v2393_v38 = vsel %vm1032_vm9, %v2385_v32, %v9170_v36  ;;  %v2394_v8 = vsel %vm1032_vm9, %v2386_v30, %v9151_v27  ;;  %v2371_v10 = vsel %vm11396_vm4, %v2363_v5, %v11329_v16  ;;  %vm11398_vm12 = vmmov %vm11386_vm13 }
 0x233   : > { %v2401_v39 = vsel %vm11398_vm12, %v2393_v38, %v11283_v41  ;;  %vm11399_vm0 = vmmov %vm11398_vm12  ;;  %v2379_v41 = vsel %vm11005_vm6, %v2371_v10, %v11328_v4 }
 0x234   : > { %6238 = vmatprep.mubr.msk.f32.mxu0 %vm1738_vm5, %v2645_v42  ;;  %v2578_v40 = vpop.permute.xlu0 %2577  ;;  %v2402_v56 = vsel %vm11399_vm0, %v2394_v8, %v11278_v58  ;;  %vm11400_vm1 = vmmov %vm11388_vm8  ;;  %v2387_v15 = vsel %vm1023_vm7, %v2379_v41, %v11336_v34 }
 0x235   : > { %6239 = vmatmul.mubr.msk.f32.vlgmr.msra.gmra.mrb[32].mxu0 %vm1738_vm5, %v2646_v31  ;;  %v2580_v53 = vpop.permute.xlu1 %2579  ;;  %v2631_v59 = vsel %vm11388_vm8, %v2399_v22, %v2578_v40  ;;  %v2364_v31 = vsel %vm996_vm3, %v2356_v29, %v11395_v45  ;;  %vm11401_vm13 = vmmov %vm11400_vm1  ;;  %v2395_v34 = vsel %vm1032_vm9, %v2387_v15, %v9212_v51  ;;  %v6775_v22 = vld [vmem:[%s7163_s25 + $0x38] sm:$0xff]  ;;  %v11407_v45 = vld [vmem:[#allocation95_spill] sm:$0xff]  ;;  %s6829_s25 = smov 16  }
 0x236   : > { %v2632_v25 = vsel %vm11389_vm10, %v2400_v17, %v2580_v53  ;;  %v2372_v21 = vsel %vm11397_vm11, %v2364_v31, %v11326_v3  ;;  %v690_v17 = vsub.s32 0, %v11402_v33  ;;  %vm11404_vm14 = vmmov %vm11399_vm0  ;;  %v11412_v15 = vld [vmem:[#allocation100_spill] sm:$0xff] }
 0x237   : > { %v2380_v58 = vsel %vm11005_vm6, %v2372_v21, %v11325_v50  ;;  %vm11405_vm8 = vmmov %vm11400_vm1 }
 0x238   : > { %v2388_v4 = vsel %vm1023_vm7, %v2380_v58, %v11334_v61  ;;  %vm11403_vm7 = vmmov %vm11399_vm0  ;;  %v9447_v55 = vrot.slane %v538_v43, %v690_v17  ;;  %v11411_v58 = vld [vmem:[#allocation101_spill] sm:$0xff] }
 0x239   : > { %v2612_v37 = vpop.permute.xlu1 %2611  ;;  %v2610_v23 = vpop.permute.xlu0 %2609  ;;  %v2396_v61 = vsel %vm1032_vm9, %v2388_v4, %v6775_v22  ;;  %vm11406_vm10 = vmmov %vm11400_vm1  ;;  %vm11006_vm9 = vcmask 64512  }
 0x23a   : > { %v2640_v0 = vsel %vm1220_vm15, %v2632_v25, %v2612_v37  ;;  %v2639_v48 = vsel %vm1220_vm15, %v2631_v59, %v2610_v23  ;;  %v2403_v23 = vsel %vm11403_vm7, %v2395_v34, %v11161_v7  ;;  %v11413_v34 = vld [vmem:[#allocation103_spill] sm:$0xff]  ;;  %vm11421_vm7 = vmmov %vm11405_vm8 }
 0x23b   : > { %v2648_v35 = vmul.f32 %v2640_v0, %v8925_v26  ;;  %v2647_v62 = vmul.f32 %v2639_v48, %v8925_v26  ;;  %v2404_v0 = vsel %vm11404_vm14, %v2396_v61, %v11299_v24  ;;  %v11414_v61 = vld [vmem:[#allocation102_spill] sm:$0xff]  ;;  %vm11422_vm14 = vmmov %vm11421_vm7 }
 0x23c   : > { %v9381_v20 = vpop.f32.mrb[0].mxu1 }
 0x23d   : > { %6241 = vmatprep.mubr.msk.f32.mxu1 %vm1738_vm5, %v2647_v62  ;;  %v2582_v42 = vpop.permute.xlu0 %2581  ;;  %v766_v28 = vpop.f32.mrb[1].mxu1 }
 0x23e   : > { %6242 = vmatmul.mubr.msk.f32.vlgmr.msra.gmra.mrb[16].mxu1 %vm1738_vm5, %v2648_v35  ;;  %v2633_v11 = vsel %vm11400_vm1, %v2401_v39, %v2582_v42  ;;  %v9424_v13 = vadd.f32 %v766_v28, %v9419_v47  ;;  %v11408_v39 = vld [vmem:[#allocation94_spill] sm:$0xff] }
 0x240   : > { %v9421_v50 = vpop.f32.mrb[2].mxu1 }
 0x241   : > { %v2584_v18 = vpop.permute.xlu1 %2583  ;;  %v772_v40 = vpop.f32.mrb[3].mxu1 }
 0x242   : > { %v2634_v36 = vsel %vm11401_vm13, %v2402_v56, %v2584_v18  ;;  %v9427_v14 = vadd.f32 %v772_v40, %v9419_v47 }
 0x244   : > { %v9429_v63 = vpop.f32.mrb[4].mxu1 }
 0x245   : > { %v2616_v60 = vpop.permute.xlu1 %2615  ;;  %v2614_v49 = vpop.permute.xlu0 %2613 }
 0x246   : > { %v2642_v27 = vsel %vm1220_vm15, %v2634_v36, %v2616_v60  ;;  %v2641_v19 = vsel %vm1220_vm15, %v2633_v11, %v2614_v49  ;;  %v778_v59 = vpop.f32.mrb[5].mxu1  ;;  %v11409_v60 = vld [vmem:[#allocation98_spill] sm:$0xff] }
 0x247   : > { %v2650_v16 = vmul.f32 %v2642_v27, %v8925_v26  ;;  %v2649_v3 = vmul.f32 %v2641_v19, %v8925_v26  ;;  %v9437_v25 = vadd.f32 %v778_v59, %v9419_v47 }
 0x248   : > { %v9439_v37 = vpop.f32.mrb[6].mxu1 }
 0x249   : > { %6244 = vmatprep.mubr.msk.f32.mxu1 %vm1738_vm5, %v2649_v3  ;;  %v2586_v53 = vpop.permute.xlu0 %2585  ;;  %v784_v48 = vpop.f32.mrb[7].mxu1 }
 0x24a   : > { %6245 = vmatmul.mubr.msk.f32.gmra.mrb[18].mxu1 %vm1738_vm5, %v2650_v16  ;;  %v2635_v51 = vsel %vm11405_vm8, %v2403_v23, %v2586_v53  ;;  %v9450_v57 = vadd.f32 %v784_v48, %v9419_v47  ;;  %v11410_v16 = vld [vmem:[#allocation97_spill] sm:$0xff]  ;;  %vm11423_vm8 = vmmov %vm11421_vm7 }
 0x24c   : > { %v788_v7 = vpop.f32.mrb[8].mxu1 }
 0x24d   : > { %v9457_v46 = vadd.f32 %v788_v7, %v9447_v55  ;;  %v790_v29 = vpop.f32.mrb[9].mxu1 }
 0x24e   : > { %v2588_v1 = vpop.permute.xlu1 %2587  ;;  %v9460_v32 = vadd.f32 %v790_v29, %v9419_v47 }
 0x24f   : > { %v2636_v35 = vsel %vm11406_vm10, %v2404_v0, %v2588_v1  ;;  %vm11424_vm10 = vmmov %vm11421_vm7 }
 0x250   : > { %v9462_v30 = vpop.f32.mrb[10].mxu1 }
 0x251   : > { %v2618_v12 = vpop.permute.xlu0 %2617 }
 0x252   : > { %v2620_v62 = vpop.permute.xlu1 %2619  ;;  %v2643_v54 = vsel %vm1220_vm15, %v2635_v51, %v2618_v12 }
 0x253   : > { %v2644_v9 = vsel %vm1220_vm15, %v2636_v35, %v2620_v62  ;;  %v2651_v24 = vmul.f32 %v2643_v54, %v8925_v26 }
 0x254   : > { %v2652_v2 = vmul.f32 %v2644_v9, %v8925_v26  ;;  %v796_v26 = vpop.f32.mrb[11].mxu1 }
 0x255   : > { %v9464_v52 = vpop.permute.xlu0 %2783  ;;  %6247 = vmatprep.mubr.msk.f32.mxu1 %vm1738_vm5, %v2651_v24  ;;  %v9475_v38 = vadd.f32 %v796_v26, %v9419_v47  ;;  %v800_v42 = vpop.f32.mrb[12].mxu1 }
 0x256   : > { %v2817_v5 = vpop.permute.xlu1 %2816  ;;  %6248 = vmatmul.mubr.msk.f32.gmra.mrb[20].mxu1 %vm1738_vm5, %v2652_v2  ;;  %v9478_v18 = vadd.f32 %v800_v42, %v9447_v55  ;;  %v802_v8 = vpop.f32.mrb[13].mxu1 }
 0x257   : > { %v9469_v31 = vsel %vm11006_vm9, %v11407_v45, %v2817_v5  ;;  %v9481_v21 = vadd.f32 %v802_v8, %v9419_v47 }
 0x258   : > { %2856 = vrot.lane.b32.xlu1 %v9469_v31, %s6829_s25  ;;  %v806_v36 = vpop.f32.mrb[14].mxu1 }
 0x259   : > { %v2819_v10 = vpop.permute.xlu0 %2818  ;;  %v9494_v27 = vadd.f32 %v806_v36, %v9447_v55  ;;  %v808_v43 = vpop.f32.mrb[15].mxu1 }
 0x25a   : > { %v9485_v56 = vsel %vm11006_vm9, %v11408_v39, %v2819_v10  ;;  %v2821_v11 = vpop.permute.xlu1 %2820  ;;  %v9515_v53 = vadd.f32 %v808_v43, %v9419_v47  ;;  %v11416_v43 = vld [vmem:[#allocation2_spill] sm:$0xff] }
 0x25b   : > { %v9489_v49 = vsel %vm11006_vm9, %v11409_v60, %v2821_v11  ;;  %2858 = vrot.lane.b32.xlu0 %v9485_v56, %s6829_s25 }
 0x25c   : > { %2860 = vrot.lane.b32.xlu1 %v9489_v49, %s6829_s25 }
 0x25d   : > { %v2823_v19 = vpop.permute.xlu0 %2822 }
 0x25e   : > { %v9500_v3 = vsel %vm11006_vm9, %v11410_v16, %v2823_v19  ;;  %v2825_v41 = vpop.permute.xlu1 %2824 }
 0x25f   : > { %v9504_v6 = vsel %vm11006_vm9, %v11411_v58, %v2825_v41  ;;  %2862 = vrot.lane.b32.xlu0 %v9500_v3, %s6829_s25  ;;  %v11415_v41 = vld [vmem:[#allocation13_spill] sm:$0xff] }
 0x260   : > { %2864 = vrot.lane.b32.xlu1 %v9504_v6, %s6829_s25  ;;  %v9630_v58 = vsel %vm11006_vm9, %v11415_v41, %v9464_v52  ;;  %v9642_v52 = vadd.f32 %v9421_v50, %v9447_v55 }
 0x261   : > { %v2827_v28 = vpop.permute.xlu0 %2826 }
 0x262   : > { %v9512_v4 = vsel %vm11006_vm9, %v11412_v15, %v2827_v28  ;;  %v2829_v40 = vpop.permute.xlu1 %2828  ;;  %v2796_v15 = vmul.u32 8, %v11416_v43 }
 0x263   : > { %v9519_v1 = vsel %vm11006_vm9, %v11413_v34, %v2829_v40  ;;  %2866 = vrot.lane.b32.xlu0 %v9512_v4, %s6829_s25  ;;  %v11417_v40 = vld [vmem:[#allocation4_spill] sm:$0xff] }
 0x264   : > { %2868 = vrot.lane.b32.xlu1 %v9519_v1, %s6829_s25  ;;  %v2799_v34 = vmul.u32 8, %v11417_v40  ;;  %vm2797_vm5 = vcmp.ge.s32.totalorder %v11402_v33, %v2796_v15 }
 0x265   : > { %v2831_v22 = vpop.permute.xlu0 %2830 }
 0x266   : > { %v9527_v17 = vsel %vm11006_vm9, %v11414_v61, %v2831_v22  ;;  %vm2800_vm11 = vcmp.lt.s32.totalorder %v11402_v33, %v2799_v34 }
 0x267   : > { %2870 = vrot.lane.b32.xlu0 %v9527_v17, %s6829_s25  ;;  %vm2802_vm0 = vmand %vm2797_vm5, %vm2800_vm11 }
 0x268   : > { %vm11425_vm5 = vmmov %vm11421_vm7 }
 0x2bb   : > { %v9531_v47 = vpop.f32.mrb[16].mxu0 }
 0x2bc   : > { %3450 = vrot.lane.b32.xlu0 %v9531_v47, %s6818_s14  ;;  %v9535_v59 = vpop.f32.mrb[17].mxu0 }
 0x2bd   : > { %3448 = vrot.lane.b32.xlu1 %v9535_v59, %s6818_s14 }
 0x2c7   : > { %v9539_v23 = vpop.f32.mrb[18].mxu0 }
 0x2c8   : > { %3454 = vrot.lane.b32.xlu0 %v9539_v23, %s6818_s14  ;;  %v9543_v0 = vpop.f32.mrb[19].mxu0 }
 0x2c9   : > { %3452 = vrot.lane.b32.xlu1 %v9543_v0, %s6818_s14 }
 0x2ca   : > { %v2857_v16 = vpop.permute.xlu1 %2856 }
 0x2cd   : > { %v2859_v11 = vpop.permute.xlu0 %2858 }
 0x2ce   : > { %v2861_v22 = vpop.permute.xlu1 %2860 }
 0x2d1   : > { %v2863_v60 = vpop.permute.xlu0 %2862 }
 0x2d2   : > { %v2865_v61 = vpop.permute.xlu1 %2864 }
 0x2d4   : > { %v9547_v48 = vpop.f32.mrb[20].mxu0 }
 0x2d5   : > { %3458 = vrot.lane.b32.xlu0 %v9547_v48, %s6818_s14  ;;  %v9551_v51 = vpop.f32.mrb[21].mxu0  ;;  %v2867_v28 = vpop.permute.xlu0 %2866 }
 0x2d6   : > { %3456 = vrot.lane.b32.xlu1 %v9551_v51, %s6818_s14  ;;  %v2869_v43 = vpop.permute.xlu1 %2868 }
 0x2e0   : > { %v9555_v35 = vpop.f32.mrb[22].mxu0 }
 0x2e1   : > { %3462 = vrot.lane.b32.xlu0 %v9555_v35, %s6818_s14  ;;  %v9559_v62 = vpop.f32.mrb[23].mxu0 }
 0x2e2   : > { %3460 = vrot.lane.b32.xlu1 %v9559_v62, %s6818_s14 }
 0x2e8   : > { %v9563_v12 = vpop.f32.mrb[24].mxu0 }
 0x2e9   : > { %3707 = vrot.lane.b32.xlu0 %v9563_v12, %s6818_s14  ;;  %v9567_v9 = vpop.f32.mrb[25].mxu0 }
 0x2ea   : > { %3705 = vrot.lane.b32.xlu1 %v9567_v9, %s6818_s14 }
 0x2f0   : > { %v9571_v54 = vpop.f32.mrb[26].mxu0 }
 0x2f1   : > { %v9573_v7 = vpop.f32.mrb[27].mxu0 }
 0x2f8   : > { %v9575_v2 = vpop.f32.mrb[28].mxu0 }
 0x2f9   : > { %v9577_v24 = vpop.f32.mrb[29].mxu0 }
 0x300   : > { %v9579_v29 = vpop.f32.mrb[30].mxu0 }
 0x301   : > { %v9581_v5 = vpop.f32.mrb[31].mxu0 }
 0x308   : > { %v9583_v45 = vpop.f32.mrb[32].mxu0 }
 0x309   : > { %3932 = vrot.lane.b32.xlu0 %v9583_v45, %s6818_s14  ;;  %v9587_v26 = vpop.f32.mrb[33].mxu0 }
 0x30a   : > { %3930 = vrot.lane.b32.xlu1 %v9587_v26, %s6818_s14 }
 0x30d   : > { %3711 = vrot.lane.b32.xlu0 %v9571_v54, %s6818_s14 }
 0x30e   : > { %3709 = vrot.lane.b32.xlu1 %v9573_v7, %s6818_s14 }
 0x311   : > { %v9595_v42 = vpop.f32.mrb[16].mxu1 }
 0x312   : > { %3936 = vrot.lane.b32.xlu0 %v9595_v42, %s6818_s14  ;;  %v9599_v8 = vpop.f32.mrb[17].mxu1 }
 0x313   : > { %3934 = vrot.lane.b32.xlu1 %v9599_v8, %s6818_s14 }
 0x316   : > { %3715 = vrot.lane.b32.xlu0 %v9575_v2, %s6818_s14 }
 0x317   : > { %3713 = vrot.lane.b32.xlu1 %v9577_v24, %s6818_s14 }
 0x31d   : > { %v9607_v10 = vpop.f32.mrb[18].mxu1 }
 0x31e   : > { %3940 = vrot.lane.b32.xlu0 %v9607_v10, %s6818_s14  ;;  %v9611_v39 = vpop.f32.mrb[19].mxu1 }
 0x31f   : > { %3938 = vrot.lane.b32.xlu1 %v9611_v39, %s6818_s14 }
 0x322   : > { %3719 = vrot.lane.b32.xlu0 %v9579_v29, %s6818_s14 }
 0x323   : > { %3717 = vrot.lane.b32.xlu1 %v9581_v5, %s6818_s14 }
 0x329   : > { %v9619_v36 = vpop.f32.mrb[20].mxu1 }
 0x32a   : > { %3944 = vrot.lane.b32.xlu0 %v9619_v36, %s6818_s14  ;;  %v9623_v19 = vpop.f32.mrb[21].mxu1 }
 0x32b   : > { %3942 = vrot.lane.b32.xlu1 %v9623_v19, %s6818_s14  ;;  %s6832_s14 = smov 96  }
 0x32e   : > { %4184 = vrot.lane.b32.xlu0 %v9485_v56, %s6830_s20  ;;  %v11418_v56 = vld [vmem:[#allocation5_spill] sm:$0xff] }
 0x32f   : > { %3164 = vrot.lane.b32.xlu1 %v9630_v58, %s6831_s29  ;;  %vm2798_vm4 = vcmp.ge.s32.totalorder %v11418_v56, %v2796_v15  ;;  %vm2801_vm12 = vcmp.lt.s32.totalorder %v11418_v56, %v2799_v34  ;;  %v9693_v15 = vadd.f32 %v9429_v63, %v9447_v55 }
 0x330   : > { %vm2803_vm1 = vmand %vm2798_vm4, %vm2801_vm12 }
 0x331   : > { %vm9656_vm13 = vmpackc.low %vm2803_vm1, %vm2802_vm0  ;;  %v2882_v40 = vmul.f32 %v2861_v22, %v9693_v15 }
 0x332   : > { %4188 = vrot.lane.b32.xlu0 %v9500_v3, %s6830_s20  ;;  %v9650_v3 = vpop.permute.xlu0 %2870  ;;  %6575 = vmatprep.subr.msk.bf16.mxu0 %vm9656_vm13, %v11264_v44  ;;  %vm11426_vm4 = vmmov %vm11425_vm5 }
 0x333   : > { %4182 = vrot.lane.b32.xlu1 %v9469_v31, %s6830_s20  ;;  %v2881_v31 = vmul.f32 %v2859_v11, %v9642_v52  ;;  %6583 = vmatprep.subr.msk.bf16.mxu1 %vm9656_vm13, %v11264_v44  ;;  %vm11427_vm11 = vmmov %vm11426_vm4 }
 0x334   : > { %6577 = vmatpush3.bf16.msk.msra.mxu0 %vm9656_vm13, %v11264_v44  ;;  %6585 = vmatpush3.bf16.msk.msra.mxu1 %vm9656_vm13, %v11264_v44  ;;  %vm11428_vm12 = vmmov %vm11426_vm4 }
 0x335   : > { %6579 = vmatprep.subr.msk.bf16.mxu0 %vm9656_vm13, %v11264_v44  ;;  %vm11429_vm0 = vmmov %vm11426_vm4 }
 0x336   : > { %4192 = vrot.lane.b32.xlu0 %v9512_v4, %s6830_s20  ;;  %v9681_v4 = vadd.f32 %v9381_v20, %v9447_v55  ;;  %vm11430_vm1 = vmmov %vm11429_vm0 }
 0x337   : > { %4186 = vrot.lane.b32.xlu1 %v9489_v49, %s6830_s20  ;;  %v3451_v49 = vpop.permute.xlu0 %3450 }
 0x338   : > { %v9685_v11 = vsel %vm11421_vm7, %v9531_v47, %v3451_v49  ;;  %v3449_v47 = vpop.permute.xlu1 %3448  ;;  %vm11431_vm7 = vmmov %vm11429_vm0 }
 0x339   : > { %v9710_v63 = vsel %vm11423_vm8, %v9535_v59, %v3449_v47  ;;  %v9725_v59 = vadd.f32 %v9462_v30, %v9447_v55  ;;  %vm11433_vm8 = vmmov %vm11429_vm0 }
 0x33a   : > { %2898 = vrot.lane.b32.xlu0 %v2881_v31, %s6830_s20 }
 0x33b   : > { %4190 = vrot.lane.b32.xlu1 %v9504_v6, %s6830_s20  ;;  %v3455_v41 = vpop.permute.xlu0 %3454  ;;  %v2880_v6 = vmul.f32 %v2857_v16, %v9681_v4 }
 0x33c   : > { %v9698_v20 = vsel %vm11422_vm14, %v9539_v23, %v3455_v41  ;;  %vm11432_vm14 = vmmov %vm11429_vm0 }
 0x33e   : > { %3490 = vrot.lane.b32.xlu0 %v9685_v11, %s11117_s15 }
 0x33f   : > { %4194 = vrot.lane.b32.xlu1 %v9519_v1, %s6830_s20  ;;  %v9706_v1 = vadd.f32 %v9439_v37, %v9447_v55  ;;  %v3453_v37 = vpop.permute.xlu1 %3452 }
 0x340   : > { %v9729_v22 = vsel %vm11425_vm5, %v9543_v0, %v3453_v37  ;;  %v2884_v37 = vmul.f32 %v2865_v61, %v9457_v46  ;;  %vm11435_vm5 = vmmov %vm11429_vm0 }
 0x341   : > { %v2883_v23 = vmul.f32 %v2863_v60, %v9706_v1 }
 0x342   : > { %3494 = vrot.lane.b32.xlu0 %v9698_v20, %s11117_s15 }
 0x343   : > { %2896 = vrot.lane.b32.xlu1 %v2880_v6, %s6830_s20 }
 0x346   : > { %2900 = vrot.lane.b32.xlu0 %v2882_v40, %s6830_s20 }
 0x347   : > { %v3459_v16 = vpop.permute.xlu0 %3458  ;;  %3488 = vrot.lane.b32.xlu1 %v9710_v63, %s11117_s15 }
 0x348   : > { %v9718_v34 = vsel %vm11424_vm10, %v9547_v48, %v3459_v16  ;;  %v2885_v48 = vmul.f32 %v2867_v28, %v9725_v59  ;;  %v3457_v60 = vpop.permute.xlu1 %3456  ;;  %vm11434_vm10 = vmmov %vm11429_vm0 }
 0x349   : > { %v9737_v31 = vsel %vm11426_vm4, %v9551_v51, %v3457_v60  ;;  %vm11436_vm4 = vmmov %vm11429_vm0 }
 0x34a   : > { %3498 = vrot.lane.b32.xlu0 %v9718_v34, %s11117_s15 }
 0x34b   : > { %2902 = vrot.lane.b32.xlu1 %v2883_v23, %s6830_s20 }
 0x34f   : > { %3492 = vrot.lane.b32.xlu1 %v9729_v22, %s11117_s15 }
 0x353   : > { %2906 = vrot.lane.b32.xlu1 %v2885_v48, %s6830_s20  ;;  %v3463_v55 = vpop.permute.xlu0 %3462 }
 0x354   : > { %v3461_v30 = vpop.permute.xlu1 %3460 }
 0x355   : > { %v9760_v48 = vsel %vm11429_vm0, %v9559_v62, %v3461_v30 }
 0x357   : > { %3496 = vrot.lane.b32.xlu1 %v9737_v31, %s11117_s15 }
 0x35b   : > { %v3708_v49 = vpop.permute.xlu0 %3707 }
 0x35c   : > { %v3706_v0 = vpop.permute.xlu1 %3705 }
 0x37b   : > { %v9741_v41 = vpop.permute.xlu0 %3932 }
 0x37c   : > { %v9743_v6 = vpop.permute.xlu1 %3930 }
 0x37f   : > { %v3712_v47 = vpop.permute.xlu0 %3711 }
 0x380   : > { %v3710_v28 = vpop.permute.xlu1 %3709 }
 0x384   : > { %v3937_v40 = vpop.permute.xlu0 %3936 }
 0x385   : > { %v9747_v16 = vsel %vm11427_vm11, %v9595_v42, %v3937_v40  ;;  %v3935_v51 = vpop.permute.xlu1 %3934  ;;  %vm11437_vm11 = vmmov %vm11429_vm0 }
 0x386   : > { %v9751_v23 = vsel %vm11428_vm12, %v9599_v8, %v3935_v51  ;;  %3976 = vrot.lane.b32.xlu0 %v9747_v16, %s11117_s15  ;;  %v9767_v8 = vsel %vm11430_vm1, %v9555_v35, %v3463_v55  ;;  %v2886_v35 = vmul.f32 %v2869_v43, %v9478_v18  ;;  %vm11438_vm12 = vmmov %vm11429_vm0 }
 0x387   : > { %3974 = vrot.lane.b32.xlu1 %v9751_v23, %s11117_s15  ;;  %vm11439_vm1 = vmmov %vm11429_vm0 }
 0x388   : > { %v3716_v42 = vpop.permute.xlu0 %3715 }
 0x389   : > { %v3714_v60 = vpop.permute.xlu1 %3713 }
 0x38a   : > { %2904 = vrot.lane.b32.xlu0 %v2884_v37, %s6830_s20 }
 0x38b   : > { %3500 = vrot.lane.b32.xlu1 %v9760_v48, %s11117_s15 }
 0x38e   : > { %3502 = vrot.lane.b32.xlu0 %v9767_v8, %s11117_s15 }
 0x390   : > { %v3941_v40 = vpop.permute.xlu0 %3940 }
 0x391   : > { %v9773_v61 = vsel %vm11431_vm7, %v9607_v10, %v3941_v40  ;;  %v3939_v62 = vpop.permute.xlu1 %3938  ;;  %vm11440_vm7 = vmmov %vm11429_vm0 }
 0x392   : > { %v9777_v30 = vsel %vm11432_vm14, %v9611_v39, %v3939_v62  ;;  %3980 = vrot.lane.b32.xlu0 %v9773_v61, %s11117_s15  ;;  %v9801_v62 = vsel %vm11435_vm5, %v9563_v12, %v3708_v49  ;;  %v9821_v12 = vsel %vm11438_vm12, %v9573_v7, %v3710_v28  ;;  %v9831_v49 = vsel %vm11429_vm0, %v9575_v2, %v3716_v42  ;;  %vm11441_vm14 = vmmov %vm11429_vm0 }
 0x393   : > { %3978 = vrot.lane.b32.xlu1 %v9777_v30, %s11117_s15  ;;  %vm11443_vm5 = vmmov %vm11429_vm0 }
 0x394   : > { %v3720_v55 = vpop.permute.xlu0 %3719 }
 0x395   : > { %v3718_v51 = vpop.permute.xlu1 %3717 }
 0x396   : > { %2908 = vrot.lane.b32.xlu0 %v2886_v35, %s6830_s20  ;;  %v9851_v2 = vsel %vm11441_vm14, %v9581_v5, %v3718_v51  ;;  %v3954_v51 = vsel %vm11443_vm5, %v9587_v26, %v9743_v6 }
 0x39c   : > { %v3945_v37 = vpop.permute.xlu0 %3944 }
 0x39d   : > { %v9787_v10 = vsel %vm11433_vm8, %v9619_v36, %v3945_v37  ;;  %v3943_v40 = vpop.permute.xlu1 %3942  ;;  %v9805_v36 = vsel %vm11436_vm4, %v9567_v9, %v3706_v0  ;;  %v9815_v37 = vsel %vm11437_vm11, %v9571_v54, %v3712_v47  ;;  %v9837_v0 = vsel %vm11439_vm1, %v9577_v24, %v3714_v60 }
 0x39e   : > { %v9791_v39 = vsel %vm11434_vm10, %v9623_v19, %v3943_v40  ;;  %3984 = vrot.lane.b32.xlu0 %v9787_v10, %s11117_s15  ;;  %v9845_v47 = vsel %vm11440_vm7, %v9579_v29, %v3720_v55  ;;  %vm2912_vm8 = vcmask 130048   ;;  %vm11442_vm10 = vmmov %vm11429_vm0 }
 0x39f   : > { %3982 = vrot.lane.b32.xlu1 %v9791_v39, %s11117_s15  ;;  %v3955_v5 = vsel %vm11442_vm10, %v9583_v45, %v9741_v41 }
 0x3a0   : > { %v9797_v43 = vpop.permute.xlu0 %4184 }
 0x3a1   : > { %v3165_v35 = vpop.permute.xlu1 %3164 }
 0x3a2   : > { %3747 = vrot.lane.b32.xlu0 %v9801_v62, %s11117_s15  ;;  %v3167_v42 = vmul.f32 %v3165_v35, %v9681_v4  ;;  %v3169_v26 = vmul.f32 %v3165_v35, %v9693_v15  ;;  %v3170_v6 = vmul.f32 %v3165_v35, %v9706_v1 }
 0x3a3   : > { %3745 = vrot.lane.b32.xlu1 %v9805_v36, %s11117_s15 }
 0x3a4   : > { %v9811_v19 = vpop.permute.xlu0 %4188 }
 0x3a5   : > { %v9817_v40 = vpop.permute.xlu1 %4182 }
 0x3a6   : > { %3751 = vrot.lane.b32.xlu0 %v9815_v37, %s11117_s15 }
 0x3a7   : > { %3749 = vrot.lane.b32.xlu1 %v9821_v12, %s11117_s15 }
 0x3a8   : > { %v9827_v9 = vpop.permute.xlu0 %4192 }
 0x3a9   : > { %v9833_v54 = vpop.permute.xlu1 %4186 }
 0x3aa   : > { %3755 = vrot.lane.b32.xlu0 %v9831_v49, %s11117_s15 }
 0x3ab   : > { %3753 = vrot.lane.b32.xlu1 %v9837_v0, %s11117_s15 }
 0x3ac   : > { %v2899_v7 = vpop.permute.xlu0 %2898 }
 0x3ad   : > { %v9847_v28 = vpop.permute.xlu1 %4190 }
 0x3ae   : > { %3759 = vrot.lane.b32.xlu0 %v9845_v47, %s11117_s15 }
 0x3af   : > { %3757 = vrot.lane.b32.xlu1 %v9851_v2, %s11117_s15 }
 0x3b0   : > { %v9857_v24 = vpop.permute.xlu0 %3490 }
 0x3b1   : > { %v9860_v60 = vpop.permute.xlu1 %4194 }
 0x3b2   : > { %3183 = vrot.lane.b32.xlu0 %v3167_v42, %s6832_s14  ;;  %v3168_v42 = vmul.f32 %v3165_v35, %v9642_v52 }
 0x3b3   : > { %4196 = vrot.lane.b32.xlu1 %v9527_v17, %s6830_s20 }
 0x3b4   : > { %v9865_v29 = vpop.permute.xlu0 %3494 }
 0x3b5   : > { %v2897_v55 = vpop.permute.xlu1 %2896 }
 0x3b6   : > { %3972 = vrot.lane.b32.xlu0 %v3955_v5, %s11117_s15  ;;  %6254 = vmatprep.mubr.msk.f32.mxu0 %vm2912_vm8, %v2897_v55  ;;  %v3172_v55 = vmul.f32 %v3165_v35, %v9725_v59 }
 0x3b7   : > { %3970 = vrot.lane.b32.xlu1 %v3954_v51, %s11117_s15  ;;  %6255 = vmatmul.mubr.msk.f32.vlgmr.msra.gmra.mrb[34].mxu0 %vm2912_vm8, %v2899_v7  ;;  %v3171_v7 = vmul.f32 %v3165_v35, %v9457_v46  ;;  %s6839_s15 = smov 10  }
 0x3b8   : > { %v2901_v17 = vpop.permute.xlu0 %2900  ;;  %6581 = vmatpush3.bf16.msk.msra.mxu0 %vm9656_vm13, %v11264_v44 }
 0x3b9   : > { %6257 = vmatprep.mubr.msk.f32.mxu0 %vm2912_vm8, %v2901_v17  ;;  %v3489_v45 = vpop.permute.xlu1 %3488  ;;  %v3173_v17 = vmul.f32 %v3165_v35, %v9478_v18 }
 0x3ba   : > { %3185 = vrot.lane.b32.xlu0 %v3168_v42, %s6832_s14 }
 0x3bb   : > { %4171 = vrot.lane.b32.xlu1 %v9630_v58, %s6832_s14 }
 0x3bd   : > { %v2903_v41 = vpop.permute.xlu1 %2902 }
 0x3be   : > { %3187 = vrot.lane.b32.xlu0 %v3169_v26, %s6832_s14  ;;  %6258 = vmatmul.mubr.msk.f32.gmra.mrb[36].mxu0 %vm2912_vm8, %v2903_v41 }
 0x3bf   : > { %4665 = vrot.lane.b32.xlu1 %v9710_v63, %s6829_s25  ;;  %v2887_v63 = vmul.f32 %v9650_v3, %v9494_v27  ;;  %v11444_v3 = vld [vmem:[#allocation7_spill] sm:$0xff] }
 0x3c0   : > { %vm3521_vm0 = vcmp.ge.s32.totalorder %v11402_v33, %v11444_v3  ;;  %vm3522_vm1 = vcmp.ge.s32.totalorder %v11418_v56, %v11444_v3 }
 0x3c2   : > { %3189 = vrot.lane.b32.xlu0 %v3170_v6, %s6832_s14 }
 0x3c3   : > { %4667 = vrot.lane.b32.xlu1 %v9685_v11, %s6829_s25  ;;  %v3174_v11 = vmul.f32 %v3165_v35, %v9494_v27  ;;  %v3512_v35 = vmul.f32 %v3489_v45, %v9681_v4 }
 0x3c6   : > { %3191 = vrot.lane.b32.xlu0 %v3171_v7, %s6832_s14 }
 0x3c7   : > { %4669 = vrot.lane.b32.xlu1 %v9729_v22, %s6829_s25  ;;  %v11446_v22 = vld [vmem:[#allocation8_spill] sm:$0xff] }
 0x3c8   : > { %vm3528_vm7 = vcmp.lt.s32.totalorder %v11402_v33, %v11446_v22  ;;  %vm3529_vm14 = vcmp.lt.s32.totalorder %v11418_v56, %v11446_v22  ;;  %v3493_v56 = vpop.permute.xlu1 %3492 }
 0x3ca   : > { %3193 = vrot.lane.b32.xlu0 %v3172_v55, %s6832_s14 }
 0x3cb   : > { %4671 = vrot.lane.b32.xlu1 %v9698_v20, %s6829_s25  ;;  %v11445_v20 = vld [vmem:[#allocation60_spill] sm:$0xff] }
 0x3cc   : > { %vm3525_vm4 = vcmp.ge.s32.totalorder %v11445_v20, %v11444_v3  ;;  %vm3532_vm11 = vcmp.lt.s32.totalorder %v11445_v20, %v11446_v22 }
 0x3cd   : > { %vm9923_vm12 = vmand %vm3525_vm4, %vm3532_vm11 }
 0x3ce   : > { %2910 = vrot.lane.b32.xlu0 %v2887_v63, %s6830_s20  ;;  %vm3534_vm4 = vmand %vm3521_vm0, %vm3528_vm7  ;;  %vm11460_vm7 = vcmask 97280  }
 0x3cf   : > { %3195 = vrot.lane.b32.xlu1 %v3173_v17, %s6832_s14  ;;  %vm3535_vm11 = vmand %vm3522_vm1, %vm3529_vm14 }
 0x3d0   : > { %vm9943_vm6 = vmpackc.low %vm3535_vm11, %vm3534_vm4 }
 0x3d1   : > { %6587 = vmatprep.subr.msk.bf16.mxu1 %vm9943_vm6, %v11264_v44  ;;  %6599 = vmatprep.subr.msk.bf16.mxu0 %vm9943_vm6, %v11264_v44  ;;  %vm11464_vm4 = vmmov %vm11460_vm7 }
 0x3d2   : > { %4673 = vrot.lane.b32.xlu0 %v9737_v31, %s6829_s25 }
 0x3d3   : > { %3197 = vrot.lane.b32.xlu1 %v3174_v11, %s6832_s14 }
 0x3d6   : > { %4675 = vrot.lane.b32.xlu0 %v9718_v34, %s6829_s25  ;;  %v11449_v34 = vld [vmem:[#allocation61_spill] sm:$0xff] }
 0x3d7   : > { %4842 = vrot.lane.b32.xlu1 %v9805_v36, %s6829_s25  ;;  %vm3526_vm10 = vcmp.ge.s32.totalorder %v11449_v34, %v11444_v3  ;;  %vm3533_vm5 = vcmp.lt.s32.totalorder %v11449_v34, %v11446_v22 }
 0x3d8   : > { %vm3539_vm9 = vmand %vm3526_vm10, %vm3533_vm5 }
 0x3d9   : > { %vm9958_vm0 = vmpackc.low %vm3539_vm9, %vm9923_vm12  ;;  %vm11457_vm9 = vcmask 64512   ;;  %vm5495_vm12 = vcmask 113664  }
 0x3da   : > { %4677 = vrot.lane.b32.xlu0 %v9760_v48, %s6829_s25  ;;  %vm11459_vm1 = vmmov %vm11457_vm9 }
 0x3db   : > { %4844 = vrot.lane.b32.xlu1 %v9801_v62, %s6829_s25  ;;  %v2907_v62 = vpop.permute.xlu1 %2906  ;;  %vm11461_vm14 = vmmov %vm11459_vm1 }
 0x3dc   : > { %vm11462_vm10 = vmmov %vm11460_vm7 }
 0x3dd   : > { %vm11463_vm5 = vmmov %vm11459_vm1 }
 0x3de   : > { %4679 = vrot.lane.b32.xlu0 %v9767_v8, %s6829_s25  ;;  %v3513_v8 = vmul.f32 %v9857_v24, %v9642_v52  ;;  %v3514_v24 = vmul.f32 %v3493_v56, %v9693_v15  ;;  %vm11465_vm11 = vmmov %vm11459_vm1 }
 0x3df   : > { %4846 = vrot.lane.b32.xlu1 %v9821_v12, %s6829_s25 }
 0x3e2   : > { %5019 = vrot.lane.b32.xlu0 %v3954_v51, %s6829_s25 }
 0x3e3   : > { %4848 = vrot.lane.b32.xlu1 %v9815_v37, %s6829_s25  ;;  %v3515_v37 = vmul.f32 %v9865_v29, %v9706_v1 }
 0x3e6   : > { %5021 = vrot.lane.b32.xlu0 %v3955_v5, %s6829_s25 }
 0x3e7   : > { %4850 = vrot.lane.b32.xlu1 %v9837_v0, %s6829_s25 }
 0x3ea   : > { %5023 = vrot.lane.b32.xlu0 %v9751_v23, %s6829_s25  ;;  %v3499_v23 = vpop.permute.xlu0 %3498 }
 0x3eb   : > { %4852 = vrot.lane.b32.xlu1 %v9831_v49, %s6829_s25  ;;  %v3517_v49 = vmul.f32 %v3499_v23, %v9725_v59 }
 0x3ee   : > { %5025 = vrot.lane.b32.xlu0 %v9747_v16, %s6829_s25  ;;  %v3497_v16 = vpop.permute.xlu1 %3496 }
 0x3ef   : > { %4856 = vrot.lane.b32.xlu1 %v9845_v47, %s6829_s25 }
 0x3f2   : > { %5027 = vrot.lane.b32.xlu0 %v9777_v30, %s6829_s25 }
 0x3f3   : > { %3562 = vrot.lane.b32.xlu1 %v3513_v8, %s6833_s27 }
 0x3f6   : > { %5029 = vrot.lane.b32.xlu0 %v9773_v61, %s6829_s25  ;;  %v6834_v61 = vmov 0  }
 0x3f7   : > { %3560 = vrot.lane.b32.xlu1 %v3512_v35, %s6833_s27  ;;  %6754 = vset.pattern.permute.xlu0 %v6834_v61 }
 0x3f8   : > { %v3977_v36 = vpop.permute.xlu0 %3976  ;;  %6753 = vset.pattern.permute.xlu1 %v6834_v61  ;;  %v4206_v61 = vmul.f32 %v9817_v40, %v9681_v4 }
 0x3f9   : > { %v3975_v30 = vpop.permute.xlu1 %3974  ;;  %v3997_v51 = vmul.f32 %v3977_v36, %v9706_v1 }
 0x3fa   : > { %4854 = vrot.lane.b32.xlu0 %v9851_v2, %s6829_s25  ;;  %v3996_v47 = vmul.f32 %v3975_v30, %v9693_v15 }
 0x3fb   : > { %3566 = vrot.lane.b32.xlu1 %v3515_v37, %s6833_s27 }
 0x3fc   : > { %v2905_v12 = vpop.permute.xlu0 %2904 }
 0x3fd   : > { %6260 = vmatprep.mubr.msk.f32.mxu0 %vm2912_vm8, %v2905_v12  ;;  %v3501_v2 = vpop.permute.xlu1 %3500 }
 0x3fe   : > { %5031 = vrot.lane.b32.xlu0 %v9791_v39, %s6829_s25  ;;  %6261 = vmatmul.mubr.msk.f32.gmra.mrb[38].mxu0 %vm2912_vm8, %v2907_v62  ;;  %v3518_v26 = vmul.f32 %v3501_v2, %v9478_v18 }
 0x3ff   : > { %3570 = vrot.lane.b32.xlu1 %v3517_v49, %s6833_s27 }
 0x400   : > { %v3503_v0 = vpop.permute.xlu0 %3502 }
 0x401   : > { %v3519_v39 = vmul.f32 %v3503_v0, %v9494_v27 }
 0x402   : > { %5033 = vrot.lane.b32.xlu0 %v9787_v10, %s6829_s25  ;;  %v3516_v10 = vmul.f32 %v3497_v16, %v9457_v46 }
 0x403   : > { %4014 = vrot.lane.b32.xlu1 %v3996_v47, %s6833_s27 }
 0x404   : > { %v3981_v29 = vpop.permute.xlu0 %3980 }
 0x405   : > { %v3979_v5 = vpop.permute.xlu1 %3978  ;;  %v3999_v7 = vmul.f32 %v3981_v29, %v9725_v59 }
 0x406   : > { %3564 = vrot.lane.b32.xlu0 %v3514_v24, %s6833_s27  ;;  %v3998_v45 = vmul.f32 %v3979_v5, %v9457_v46 }
 0x407   : > { %3574 = vrot.lane.b32.xlu1 %v3519_v39, %s6833_s27  ;;  %v4207_v39 = vmul.f32 %v9797_v43, %v9642_v52  ;;  %v4209_v43 = vmul.f32 %v9811_v19, %v9706_v1  ;;  %v4211_v19 = vmul.f32 %v9827_v9, %v9725_v59 }
 0x408   : > { %v2909_v42 = vpop.permute.xlu0 %2908 }
 0x409   : > { %6263 = vmatprep.mubr.msk.f32.mxu0 %vm2912_vm8, %v2909_v42 }
 0x40a   : > { %4016 = vrot.lane.b32.xlu0 %v3997_v51, %s6833_s27 }
 0x40b   : > { %4018 = vrot.lane.b32.xlu1 %v3998_v45, %s6833_s27 }
 0x40e   : > { %3568 = vrot.lane.b32.xlu0 %v3516_v10, %s6833_s27  ;;  %v4208_v10 = vmul.f32 %v9833_v54, %v9693_v15  ;;  %v4210_v54 = vmul.f32 %v9847_v28, %v9457_v46 }
 0x410   : > { %v3985_v41 = vpop.permute.xlu0 %3984 }
 0x411   : > { %v3983_v6 = vpop.permute.xlu1 %3982  ;;  %v4001_v37 = vmul.f32 %v3985_v41, %v9494_v27 }
 0x412   : > { %3572 = vrot.lane.b32.xlu0 %v3518_v26, %s6833_s27  ;;  %v4000_v3 = vmul.f32 %v3983_v6, %v9478_v18 }
 0x414   : > { %v3748_v55 = vpop.permute.xlu0 %3747 }
 0x415   : > { %v3770_v63 = vmul.f32 %v3748_v55, %v9642_v52  ;;  %v3746_v17 = vpop.permute.xlu1 %3745  ;;  %v4212_v55 = vmul.f32 %v9860_v60, %v9478_v18 }
 0x416   : > { %4020 = vrot.lane.b32.xlu0 %v3999_v7, %s6833_s27  ;;  %v3769_v34 = vmul.f32 %v3746_v17, %v9681_v4 }
 0x417   : > { %3787 = vrot.lane.b32.xlu1 %v3770_v63, %s6833_s27 }
 0x418   : > { %v3752_v11 = vpop.permute.xlu0 %3751 }
 0x419   : > { %v3772_v20 = vmul.f32 %v3752_v11, %v9706_v1  ;;  %v3750_v22 = vpop.permute.xlu1 %3749  ;;  %v2788_v11 = vmul.f32 %v9630_v58, %v9681_v4 }
 0x41a   : > { %v3771_v23 = vmul.f32 %v3750_v22, %v9693_v15  ;;  %v2789_v22 = vmul.f32 %v9630_v58, %v9642_v52 }
 0x41b   : > { %3791 = vrot.lane.b32.xlu0 %v3772_v20, %s6833_s27  ;;  %4022 = vrot.lane.b32.xlu1 %v4000_v3, %s6833_s27 }
 0x41c   : > { %v3756_v31 = vpop.permute.xlu0 %3755 }
 0x41d   : > { %v3774_v56 = vmul.f32 %v3756_v31, %v9725_v59  ;;  %v3754_v8 = vpop.permute.xlu1 %3753 }
 0x41e   : > { %v3773_v30 = vmul.f32 %v3754_v8, %v9457_v46 }
 0x41f   : > { %3795 = vrot.lane.b32.xlu0 %v3774_v56, %s6833_s27  ;;  %3785 = vrot.lane.b32.xlu1 %v3769_v34, %s6833_s27  ;;  %v2790_v34 = vmul.f32 %v9630_v58, %v9693_v15 }
 0x420   : > { %v3760_v62 = vpop.permute.xlu0 %3759 }
 0x421   : > { %v3776_v35 = vmul.f32 %v3760_v62, %v9494_v27  ;;  %v3758_v16 = vpop.permute.xlu1 %3757 }
 0x422   : > { %v3775_v24 = vmul.f32 %v3758_v16, %v9478_v18 }
 0x423   : > { %3799 = vrot.lane.b32.xlu0 %v3776_v35, %s6833_s27  ;;  %3789 = vrot.lane.b32.xlu1 %v3771_v23, %s6833_s27  ;;  %v2792_v23 = vmul.f32 %v9630_v58, %v9457_v46 }
 0x424   : > { %v3184_v36 = vpop.permute.xlu0 %3183 }
 0x425   : > { %6286 = vmatprep.mubr.msk.f32.mxu1 %vm2912_vm8, %v3184_v36  ;;  %v4197_v12 = vpop.permute.xlu1 %4196  ;;  %v2793_v36 = vmul.f32 %v9630_v58, %v9725_v59 }
 0x426   : > { %v4213_v9 = vmul.f32 %v4197_v12, %v9494_v27 }
 0x427   : > { %4024 = vrot.lane.b32.xlu0 %v4001_v37, %s6833_s27  ;;  %3793 = vrot.lane.b32.xlu1 %v3773_v30, %s6833_s27  ;;  %v2794_v30 = vmul.f32 %v9630_v58, %v9478_v18 }
 0x428   : > { %v3973_v49 = vpop.permute.xlu0 %3972 }
 0x429   : > { %v3971_v0 = vpop.permute.xlu1 %3970  ;;  %v3995_v51 = vmul.f32 %v3973_v49, %v9642_v52 }
 0x42a   : > { %v3994_v47 = vmul.f32 %v3971_v0, %v9681_v4 }
 0x42b   : > { %4222 = vrot.lane.b32.xlu1 %v4206_v61, %s6829_s25  ;;  %v2795_v61 = vmul.f32 %v9630_v58, %v9494_v27 }
 0x42c   : > { %v3186_v2 = vpop.permute.xlu0 %3185  ;;  %4010 = vrot.lane.b32.xlu0 %v3994_v47, %s6833_s27 }
 0x42d   : > { %6287 = vmatmul.mubr.msk.f32.vlgmr.msra.gmra.mrb[22].mxu1 %vm2912_vm8, %v3186_v2  ;;  %v10038_v29 = vpop.permute.xlu1 %4171 }
 0x42e   : > { %6589 = vmatpush3.bf16.msk.msra.mxu1 %vm9943_vm6, %v11264_v44  ;;  %v4175_v17 = vmul.f32 %v10038_v29, %v9642_v52  ;;  %v4174_v60 = vmul.f32 %v10038_v29, %v9681_v4  ;;  %v4177_v8 = vmul.f32 %v10038_v29, %v9706_v1  ;;  %v2791_v52 = vmul.f32 %v9630_v58, %v9706_v1 }
 0x42f   : > { %3797 = vrot.lane.b32.xlu1 %v3775_v24, %s6833_s27  ;;  %6591 = vmatprep.subr.msk.bf16.mxu1 %vm7128_vm2, %v11264_v44  ;;  %v4176_v1 = vmul.f32 %v10038_v29, %v9693_v15  ;;  %v4179_v49 = vmul.f32 %v10038_v29, %v9725_v59  ;;  %v4178_v59 = vmul.f32 %v10038_v29, %v9457_v46 }
 0x430   : > { %v3188_v40 = vpop.permute.xlu0 %3187  ;;  %4224 = vrot.lane.b32.xlu0 %v4207_v39, %s6829_s25  ;;  %v4180_v46 = vmul.f32 %v10038_v29, %v9478_v18 }
 0x431   : > { %6289 = vmatprep.mubr.msk.f32.mxu1 %vm2912_vm8, %v3188_v40  ;;  %v4666_v42 = vpop.permute.xlu1 %4665 }
 0x432   : > { %6593 = vmatpush3.bf16.msk.msra.mxu1 %vm7128_vm2, %v11264_v44  ;;  %v4689_v56 = vmul.f32 %v4666_v42, %v9424_v13 }
 0x433   : > { %4012 = vrot.lane.b32.xlu1 %v3995_v51, %s6833_s27  ;;  %6595 = vmatprep.subr.msk.bf16.mxu1 %vm9958_vm0, %v11264_v44  ;;  %v4181_v51 = vmul.f32 %v10038_v29, %v9494_v27 }
 0x434   : > { %v3190_v45 = vpop.permute.xlu0 %3189  ;;  %4228 = vrot.lane.b32.xlu0 %v4209_v43, %s6829_s25 }
 0x435   : > { %6290 = vmatmul.mubr.msk.f32.gmra.mrb[24].mxu1 %vm2912_vm8, %v3190_v45  ;;  %v4668_v26 = vpop.permute.xlu1 %4667 }
 0x436   : > { %6597 = vmatpush3.bf16.msk.msra.mxu1 %vm9958_vm0, %v11264_v44  ;;  %v4690_v20 = vmul.f32 %v4668_v26, %v9427_v14 }
 0x437   : > { %4226 = vrot.lane.b32.xlu1 %v4208_v10, %s6829_s25  ;;  %6611 = vmatprep.subr.msk.bf16.mxu1 %vm9943_vm6, %v11264_v44 }
 0x438   : > { %v3192_v41 = vpop.permute.xlu0 %3191  ;;  %4232 = vrot.lane.b32.xlu0 %v4211_v19, %s6829_s25 }
 0x439   : > { %6292 = vmatprep.mubr.msk.f32.mxu1 %vm2912_vm8, %v3192_v41  ;;  %v4670_v6 = vpop.permute.xlu1 %4669 }
 0x43a   : > { %v4691_v15 = vmul.f32 %v4670_v6, %v9437_v25 }
 0x43b   : > { %4230 = vrot.lane.b32.xlu1 %v4210_v54, %s6829_s25 }
 0x43c   : > { %v3194_v7 = vpop.permute.xlu0 %3193  ;;  %4236 = vrot.lane.b32.xlu0 %v4213_v9, %s6829_s25 }
 0x43d   : > { %6293 = vmatmul.mubr.msk.f32.gmra.mrb[26].mxu1 %vm2912_vm8, %v3194_v7  ;;  %v4672_v63 = vpop.permute.xlu1 %4671 }
 0x43e   : > { %v4692_v16 = vmul.f32 %v4672_v63, %v9450_v57 }
 0x43f   : > { %4234 = vrot.lane.b32.xlu1 %v4212_v55, %s6829_s25 }
 0x440   : > { %v2911_v28 = vpop.permute.xlu0 %2910  ;;  %4369 = vrot.lane.b32.xlu0 %v4175_v17, %s6831_s29 }
 0x441   : > { %6264 = vmatmul.mubr.msk.f32.gmra.mrb[40].mxu0 %vm2912_vm8, %v2911_v28  ;;  %v3196_v3 = vpop.permute.xlu1 %3195 }
 0x442   : > { %6270 = vmatprep.mubr.msk.f32.mxu0 %vm2912_vm8, %v2788_v11  ;;  %6295 = vmatprep.mubr.msk.f32.mxu1 %vm2912_vm8, %v3196_v3 }
 0x443   : > { %4367 = vrot.lane.b32.xlu1 %v4174_v60, %s6831_s29 }
 0x444   : > { %v4674_v31 = vpop.permute.xlu0 %4673  ;;  %4707 = vrot.lane.b32.xlu0 %v4690_v20, %s6830_s20 }
 0x445   : > { %v3198_v4 = vpop.permute.xlu1 %3197  ;;  %6271 = vmatmul.mubr.msk.f32.vlgmr.msra.gmra.mrb[34].mxu0 %vm2912_vm8, %v2789_v22  ;;  %v4693_v39 = vmul.f32 %v4674_v31, %v9460_v32 }
 0x446   : > { %6273 = vmatprep.mubr.msk.f32.mxu0 %vm2912_vm8, %v2790_v34  ;;  %6296 = vmatmul.mubr.msk.f32.gmra.mrb[28].mxu1 %vm2912_vm8, %v3198_v4 }
 0x447   : > { %4705 = vrot.lane.b32.xlu1 %v4689_v56, %s6830_s20  ;;  %6601 = vmatpush3.bf16.msk.msra.mxu0 %vm9943_vm6, %v11264_v44 }
 0x448   : > { %v4676_v62 = vpop.permute.xlu0 %4675  ;;  %4373 = vrot.lane.b32.xlu0 %v4177_v8, %s6831_s29  ;;  %6603 = vmatprep.subr.msk.bf16.mxu0 %vm7128_vm2, %v11264_v44 }
 0x449   : > { %v4843_v35 = vpop.permute.xlu1 %4842  ;;  %6274 = vmatmul.mubr.msk.f32.gmra.mrb[36].mxu0 %vm2912_vm8, %v2791_v52  ;;  %v4694_v2 = vmul.f32 %v4676_v62, %v9475_v38 }
 0x44a   : > { %6276 = vmatprep.mubr.msk.f32.mxu0 %vm2912_vm8, %v2792_v23  ;;  %v4866_v54 = vmul.f32 %v4843_v35, %v9424_v13 }
 0x44b   : > { %4371 = vrot.lane.b32.xlu1 %v4176_v1, %s6831_s29  ;;  %6605 = vmatpush3.bf16.msk.msra.mxu0 %vm7128_vm2, %v11264_v44 }
 0x44c   : > { %v4678_v37 = vpop.permute.xlu0 %4677  ;;  %4711 = vrot.lane.b32.xlu0 %v4692_v16, %s6830_s20  ;;  %6607 = vmatprep.subr.msk.bf16.mxu0 %vm9958_vm0, %v11264_v44 }
 0x44d   : > { %v4845_v12 = vpop.permute.xlu1 %4844  ;;  %6277 = vmatmul.mubr.msk.f32.gmra.mrb[38].mxu0 %vm2912_vm8, %v2793_v36  ;;  %v4695_v26 = vmul.f32 %v4678_v37, %v9481_v21 }
 0x44e   : > { %6279 = vmatprep.mubr.msk.f32.mxu0 %vm2912_vm8, %v2794_v30  ;;  %v4867_v27 = vmul.f32 %v4845_v12, %v9427_v14  ;;  %v6776_v12 = vld [vmem:[%s6918_s16 + $0x8] sm:$0xff] }
 0x44f   : > { %4709 = vrot.lane.b32.xlu1 %v4691_v15, %s6830_s20  ;;  %6609 = vmatpush3.bf16.msk.msra.mxu0 %vm9958_vm0, %v11264_v44 }
 0x450   : > { %v4680_v0 = vpop.permute.xlu0 %4679  ;;  %4377 = vrot.lane.b32.xlu0 %v4179_v49, %s6831_s29  ;;  %6623 = vmatprep.subr.msk.bf16.mxu0 %vm9656_vm13, %v11264_v44  ;;  %v10232_v49 = vld [vmem:[%s6918_s16] sm:$0xff] }
 0x451   : > { %v4847_v47 = vpop.permute.xlu1 %4846  ;;  %6280 = vmatmul.mubr.msk.f32.gmra.mrb[40].mxu0 %vm2912_vm8, %v2795_v61  ;;  %v4696_v45 = vmul.f32 %v4680_v0, %v9515_v53  ;;  %v6778_v0 = vld [vmem:[%s6918_s16 + $0x20] sm:$0xff] }
 0x452   : > { %v4868_v17 = vmul.f32 %v4847_v47, %v9437_v25 }
 0x453   : > { %4375 = vrot.lane.b32.xlu1 %v4178_v59, %s6831_s29  ;;  %v10241_v59 = vld [vmem:[%s6918_s16 + $0x10] sm:$0xff] }
 0x454   : > { %v5020_v24 = vpop.permute.xlu0 %5019  ;;  %4715 = vrot.lane.b32.xlu0 %v4694_v2, %s6830_s20 }
 0x455   : > { %v4849_v40 = vpop.permute.xlu1 %4848  ;;  %v5043_v9 = vmul.f32 %v5020_v24, %v9424_v13  ;;  %v6780_v24 = vld [vmem:[%s6918_s16 + $0x30] sm:$0xff] }
 0x456   : > { %v4869_v55 = vmul.f32 %v4849_v40, %v9450_v57  ;;  %v10248_v40 = vld [vmem:[%s6918_s16 + $0x18] sm:$0xff] }
 0x457   : > { %4713 = vrot.lane.b32.xlu1 %v4693_v39, %s6830_s20 }
 0x458   : > { %v5022_v42 = vpop.permute.xlu0 %5021  ;;  %4381 = vrot.lane.b32.xlu0 %v4181_v51, %s6831_s29  ;;  %v6835_v51 = vmov 1  }
 0x459   : > { %v4851_v43 = vpop.permute.xlu1 %4850  ;;  %v5044_v29 = vmul.f32 %v5022_v42, %v9427_v14 }
 0x45a   : > { %v4870_v34 = vmul.f32 %v4851_v43, %v9460_v32 }
 0x45b   : > { %4379 = vrot.lane.b32.xlu1 %v4180_v46, %s6831_s29  ;;  %v10253_v46 = vld [vmem:[%s6918_s16 + $0x28] sm:$0xff] }
 0x45c   : > { %v5024_v10 = vpop.permute.xlu0 %5023  ;;  %4719 = vrot.lane.b32.xlu0 %v4696_v45, %s6830_s20 }
 0x45d   : > { %v4853_v19 = vpop.permute.xlu1 %4852  ;;  %v5045_v60 = vmul.f32 %v5024_v10, %v9437_v25 }
 0x45e   : > { %v4871_v22 = vmul.f32 %v4853_v19, %v9475_v38 }
 0x45f   : > { %4717 = vrot.lane.b32.xlu1 %v4695_v26, %s6830_s20  ;;  %v10259_v26 = vld [vmem:[%s6918_s16 + $0x38] sm:$0xff]  ;;  %s6837_s16 = smov 2  }
 0x460   : > { %v5026_v41 = vpop.permute.xlu0 %5025  ;;  %4884 = vrot.lane.b32.xlu0 %v4867_v27, %s6830_s20 }
 0x461   : > { %v4857_v18 = vpop.permute.xlu1 %4856  ;;  %v5046_v11 = vmul.f32 %v5026_v41, %v9450_v57 }
 0x462   : > { %v4873_v62 = vmul.f32 %v4857_v18, %v9515_v53  ;;  %v6836_v18 = vmov 2  }
 0x463   : > { %4882 = vrot.lane.b32.xlu1 %v4866_v54, %s6830_s20 }
 0x464   : > { %v5028_v6 = vpop.permute.xlu0 %5027  ;;  %5061 = vrot.lane.b32.xlu0 %v5044_v29, %s6830_s20 }
 0x465   : > { %v3563_v7 = vpop.permute.xlu1 %3562  ;;  %v5047_v52 = vmul.f32 %v5028_v6, %v9460_v32 }
 0x467   : > { %5059 = vrot.lane.b32.xlu1 %v5043_v9, %s6830_s20 }
 0x468   : > { %v5030_v63 = vpop.permute.xlu0 %5029  ;;  %4888 = vrot.lane.b32.xlu0 %v4869_v55, %s6830_s20 }
 0x469   : > { %v3561_v28 = vpop.permute.xlu1 %3560  ;;  %v5048_v56 = vmul.f32 %v5030_v63, %v9475_v38 }
 0x46a   : > { %6310 = vmatprep.mubr.msk.f32.mxu1 %vm1220_vm15, %v3561_v28 }
 0x46b   : > { %4886 = vrot.lane.b32.xlu1 %v4868_v17, %s6830_s20  ;;  %6311 = vmatmul.mubr.msk.f32.vlgmr.msra.gmra.mrb[30].mxu1 %vm1220_vm15, %v3563_v7 }
 0x46c   : > { %v4855_v3 = vpop.permute.xlu0 %4854  ;;  %5065 = vrot.lane.b32.xlu0 %v5046_v11, %s6830_s20  ;;  %6613 = vmatpush3.bf16.msk.msra.mxu1 %vm9943_vm6, %v11264_v44 }
 0x46d   : > { %v3567_v20 = vpop.permute.xlu1 %3566  ;;  %6615 = vmatprep.subr.msk.bf16.mxu1 %vm7128_vm2, %v11264_v44  ;;  %v4872_v35 = vmul.f32 %v4855_v3, %v9481_v21 }
 0x46f   : > { %5063 = vrot.lane.b32.xlu1 %v5045_v60, %s6830_s20  ;;  %v4504_v60 = vmul.f32 %v9630_v58, %v9424_v13  ;;  %v4507_v13 = vmul.f32 %v9630_v58, %v9450_v57  ;;  %v4509_v57 = vmul.f32 %v9630_v58, %v9475_v38 }
 0x470   : > { %v5032_v31 = vpop.permute.xlu0 %5031  ;;  %4892 = vrot.lane.b32.xlu0 %v4871_v22, %s6830_s20  ;;  %6617 = vmatpush3.bf16.msk.msra.mxu1 %vm7128_vm2, %v11264_v44  ;;  %v4505_v22 = vmul.f32 %v9630_v58, %v9427_v14 }
 0x471   : > { %6619 = vmatprep.subr.msk.bf16.mxu1 %vm9958_vm0, %v11264_v44  ;;  %v3571_v4 = vpop.permute.xlu1 %3570  ;;  %v5049_v37 = vmul.f32 %v5032_v31, %v9481_v21 }
 0x473   : > { %4890 = vrot.lane.b32.xlu1 %v4870_v34, %s6830_s20  ;;  %v4506_v34 = vmul.f32 %v9630_v58, %v9437_v25  ;;  %v4508_v25 = vmul.f32 %v9630_v58, %v9460_v32 }
 0x474   : > { %v5034_v8 = vpop.permute.xlu0 %5033  ;;  %5069 = vrot.lane.b32.xlu0 %v5048_v56, %s6830_s20  ;;  %6621 = vmatpush3.bf16.msk.msra.mxu1 %vm9958_vm0, %v11264_v44 }
 0x475   : > { %6631 = vmatprep.subr.msk.bf16.mxu1 %vm9656_vm13, %v11264_v44  ;;  %v10217_v1 = vpop.permute.xlu1 %4014  ;;  %v5050_v16 = vmul.f32 %v5034_v8, %v9515_v53  ;;  %v4510_v8 = vmul.f32 %v9630_v58, %v9481_v21  ;;  %v4511_v21 = vmul.f32 %v9630_v58, %v9515_v53 }
 0x477   : > { %5067 = vrot.lane.b32.xlu1 %v5047_v52, %s6830_s20 }
 0x478   : > { %v3565_v23 = vpop.permute.xlu0 %3564  ;;  %4896 = vrot.lane.b32.xlu0 %v4873_v62, %s6830_s20 }
 0x479   : > { %6313 = vmatprep.mubr.msk.f32.mxu1 %vm1220_vm15, %v3565_v23  ;;  %v3575_v30 = vpop.permute.xlu1 %3574 }
 0x47a   : > { %6314 = vmatmul.mubr.msk.f32.gmra.mrb[32].mxu1 %vm1220_vm15, %v3567_v20 }
 0x47b   : > { %4894 = vrot.lane.b32.xlu1 %v4872_v35, %s6830_s20 }
 0x47c   : > { %v10223_v36 = vpop.permute.xlu0 %4016  ;;  %5073 = vrot.lane.b32.xlu0 %v5050_v16, %s6830_s20 }
 0x47d   : > { %v10236_v47 = vpop.permute.xlu1 %4018 }
 0x47f   : > { %5071 = vrot.lane.b32.xlu1 %v5049_v37, %s6830_s20 }
 0x480   : > { %v3569_v15 = vpop.permute.xlu0 %3568  ;;  %3325 = vperm.xlu0 %6754, %v6776_v12  }
 0x481   : > { %6316 = vmatprep.mubr.msk.f32.mxu1 %vm1220_vm15, %v3569_v15 }
 0x482   : > { %6317 = vmatmul.mubr.msk.f32.gmra.mrb[34].mxu1 %vm1220_vm15, %v3571_v4 }
 0x483   : > { %3321 = vperm.xlu1 %6753, %v10232_v49  }
 0x484   : > { %v3573_v61 = vpop.permute.xlu0 %3572  ;;  %3337 = vperm.xlu0 %6754, %v6778_v0  }
 0x485   : > { %6319 = vmatprep.mubr.msk.f32.mxu1 %vm1220_vm15, %v3573_v61 }
 0x486   : > { %6320 = vmatmul.mubr.msk.f32.gmra.mrb[36].mxu1 %vm1220_vm15, %v3575_v30 }
 0x487   : > { %3329 = vperm.xlu1 %6753, %v10241_v59  }
 0x488   : > { %v10244_v2 = vpop.permute.xlu0 %4020  ;;  %3345 = vperm.xlu0 %6754, %v6780_v24  }
 0x489   : > { %v3788_v39 = vpop.permute.xlu1 %3787 }
 0x48b   : > { %3333 = vperm.xlu1 %6753, %v10248_v40  }
 0x48c   : > { %6755 = vset.pattern.permute.xlu0 %v6835_v51 }
 0x48d   : > { %v3792_v42 = vpop.permute.xlu0 %3791  ;;  %3361 = vperm.xlu0 %6755, %v10232_v49   ;;  %v4023_v43 = vpop.permute.xlu1 %4022 }
 0x48f   : > { %3341 = vperm.xlu1 %6753, %v10253_v46  }
 0x491   : > { %v3796_v45 = vpop.permute.xlu0 %3795  ;;  %3373 = vperm.xlu0 %6755, %v10248_v40   ;;  %v3786_v10 = vpop.permute.xlu1 %3785 }
 0x492   : > { %6334 = vmatprep.mubr.msk.f32.mxu0 %vm1220_vm15, %v3786_v10 }
 0x493   : > { %3349 = vperm.xlu1 %6753, %v10259_v26   ;;  %6335 = vmatmul.mubr.msk.f32.vlgmr.msra.gmra.mrb[42].mxu0 %vm1220_vm15, %v3788_v39 }
 0x494   : > { %6625 = vmatpush3.bf16.msk.msra.mxu0 %vm9656_vm13, %v11264_v44 }
 0x495   : > { %v3800_v19 = vpop.permute.xlu0 %3799  ;;  %3381 = vperm.xlu0 %6755, %v10253_v46   ;;  %v3790_v27 = vpop.permute.xlu1 %3789  ;;  %6627 = vmatprep.subr.msk.bf16.mxu0 %vm9656_vm13, %v11264_v44 }
 0x496   : > { %6337 = vmatprep.mubr.msk.f32.mxu0 %vm1220_vm15, %v3790_v27 }
 0x497   : > { %6756 = vset.pattern.permute.xlu1 %v6835_v51  ;;  %6338 = vmatmul.mubr.msk.f32.gmra.mrb[44].mxu0 %vm1220_vm15, %v3792_v42 }
 0x498   : > { %3365 = vperm.xlu1 %6756, %v6776_v12  }
 0x499   : > { %v4025_v41 = vpop.permute.xlu0 %4024  ;;  %3389 = vperm.xlu0 %6755, %v10259_v26   ;;  %v3794_v54 = vpop.permute.xlu1 %3793 }
 0x49a   : > { %6340 = vmatprep.mubr.msk.f32.mxu0 %vm1220_vm15, %v3794_v54 }
 0x49b   : > { %6341 = vmatmul.mubr.msk.f32.gmra.mrb[46].mxu0 %vm1220_vm15, %v3796_v45 }
 0x49c   : > { %3369 = vperm.xlu1 %6756, %v10241_v59  }
 0x49d   : > { %6758 = vset.pattern.permute.xlu0 %v6836_v18  ;;  %v4223_v29 = vpop.permute.xlu1 %4222 }
 0x49e   : > { %v4011_v6 = vpop.permute.xlu0 %4010  ;;  %3405 = vperm.xlu0 %6758, %v6776_v12  }
 0x49f   : > { %6358 = vmatprep.mubr.msk.f32.mxu1 %vm1220_vm15, %v4011_v6 }
 0x4a0   : > { %3377 = vperm.xlu1 %6756, %v6778_v0  }
 0x4a1   : > { %v3798_v9 = vpop.permute.xlu1 %3797 }
 0x4a2   : > { %v4225_v7 = vpop.permute.xlu0 %4224  ;;  %3417 = vperm.xlu0 %6758, %v6778_v0   ;;  %6343 = vmatprep.mubr.msk.f32.mxu0 %vm1220_vm15, %v3798_v9 }
 0x4a3   : > { %6344 = vmatmul.mubr.msk.f32.gmra.mrb[48].mxu0 %vm1220_vm15, %v3800_v19 }
 0x4a4   : > { %3385 = vperm.xlu1 %6756, %v6780_v24   ;;  %6374 = vmatprep.mubr.msk.f32.mxu0 %vm2912_vm8, %v4223_v29 }
 0x4a5   : > { %v4013_v55 = vpop.permute.xlu1 %4012 }
 0x4a6   : > { %v4229_v63 = vpop.permute.xlu0 %4228  ;;  %3425 = vperm.xlu0 %6758, %v6780_v24   ;;  %6359 = vmatmul.mubr.msk.f32.vlgmr.msra.gmra.mrb[38].mxu1 %vm1220_vm15, %v4013_v55 }
 0x4a7   : > { %6361 = vmatprep.mubr.msk.f32.mxu1 %vm1220_vm15, %v10217_v1  ;;  %6375 = vmatmul.mubr.msk.f32.vlgmr.msra.gmra.mrb[50].mxu0 %vm2912_vm8, %v4225_v7 }
 0x4a8   : > { %6757 = vset.pattern.permute.xlu1 %v6836_v18  ;;  %6633 = vmatpush3.bf16.msk.msra.mxu1 %vm9656_vm13, %v11264_v44 }
 0x4a9   : > { %3401 = vperm.xlu1 %6757, %v10232_v49   ;;  %v4227_v17 = vpop.permute.xlu1 %4226  ;;  %6629 = vmatpush3.bf16.msk.msra.mxu0 %vm9656_vm13, %v11264_v44  ;;  %vm11458_vm13 = vmmov %vm11457_vm9 }
 0x4aa   : > { %v4233_v28 = vpop.permute.xlu0 %4232  ;;  %6362 = vmatmul.mubr.msk.f32.gmra.mrb[40].mxu1 %vm1220_vm15, %v10223_v36  ;;  %6377 = vmatprep.mubr.msk.f32.mxu0 %vm2912_vm8, %v4227_v17 }
 0x4ab   : > { %6364 = vmatprep.mubr.msk.f32.mxu1 %vm1220_vm15, %v10236_v47  ;;  %6378 = vmatmul.mubr.msk.f32.gmra.mrb[52].mxu0 %vm2912_vm8, %v4229_v63 }
 0x4ac   : > { %6635 = vmatprep.subr.msk.bf16.mxu1 %vm9943_vm6, %v11264_v44  ;;  %6647 = vmatprep.subr.msk.bf16.mxu0 %vm9943_vm6, %v11264_v44 }
 0x4ad   : > { %3409 = vperm.xlu1 %6757, %v10241_v59   ;;  %v4231_v50 = vpop.permute.xlu1 %4230 }
 0x4ae   : > { %v4237_v11 = vpop.permute.xlu0 %4236  ;;  %6365 = vmatmul.mubr.msk.f32.gmra.mrb[42].mxu1 %vm1220_vm15, %v10244_v2  ;;  %6380 = vmatprep.mubr.msk.f32.mxu0 %vm2912_vm8, %v4231_v50 }
 0x4af   : > { %6367 = vmatprep.mubr.msk.f32.mxu1 %vm1220_vm15, %v4023_v43  ;;  %6381 = vmatmul.mubr.msk.f32.gmra.mrb[54].mxu0 %vm2912_vm8, %v4233_v28 }
 0x4b1   : > { %3413 = vperm.xlu1 %6757, %v10248_v40   ;;  %v4235_v3 = vpop.permute.xlu1 %4234 }
 0x4b2   : > { %v4370_v20 = vpop.permute.xlu0 %4369  ;;  %6368 = vmatmul.mubr.msk.f32.gmra.mrb[44].mxu1 %vm1220_vm15, %v4025_v41  ;;  %6383 = vmatprep.mubr.msk.f32.mxu0 %vm2912_vm8, %v4235_v3 }
 0x4b3   : > { %6384 = vmatmul.mubr.msk.f32.gmra.mrb[56].mxu0 %vm2912_vm8, %v4237_v11  ;;  %6406 = vmatprep.mubr.msk.f32.mxu1 %vm2912_vm8, %v4504_v60 }
 0x4b5   : > { %3421 = vperm.xlu1 %6757, %v10253_v46   ;;  %v4368_v31 = vpop.permute.xlu1 %4367 }
 0x4b6   : > { %v4708_v56 = vpop.permute.xlu0 %4707  ;;  %6390 = vmatprep.mubr.msk.f32.mxu0 %vm2912_vm8, %v4368_v31  ;;  %6407 = vmatmul.mubr.msk.f32.vlgmr.msra.gmra.mrb[46].mxu1 %vm2912_vm8, %v4505_v22 }
 0x4b7   : > { %6391 = vmatmul.mubr.msk.f32.vlgmr.msra.gmra.mrb[50].mxu0 %vm2912_vm8, %v4370_v20  ;;  %6409 = vmatprep.mubr.msk.f32.mxu1 %vm2912_vm8, %v4506_v34 }
 0x4b8   : > { %6637 = vmatpush3.bf16.msk.msra.mxu1 %vm9943_vm6, %v11264_v44  ;;  %6649 = vmatpush3.bf16.msk.msra.mxu0 %vm9943_vm6, %v11264_v44 }
 0x4b9   : > { %3429 = vperm.xlu1 %6757, %v10259_v26   ;;  %v4706_v14 = vpop.permute.xlu1 %4705  ;;  %6639 = vmatprep.subr.msk.bf16.mxu1 %vm7128_vm2, %v11264_v44 }
 0x4ba   : > { %v4374_v4 = vpop.permute.xlu0 %4373  ;;  %6410 = vmatmul.mubr.msk.f32.gmra.mrb[48].mxu1 %vm2912_vm8, %v4507_v13  ;;  %6651 = vmatprep.subr.msk.bf16.mxu0 %vm7128_vm2, %v11264_v44 }
 0x4bb   : > { %6412 = vmatprep.mubr.msk.f32.mxu1 %vm2912_vm8, %v4508_v25 }
 0x4bc   : > { %6641 = vmatpush3.bf16.msk.msra.mxu1 %vm7128_vm2, %v11264_v44  ;;  %6653 = vmatpush3.bf16.msk.msra.mxu0 %vm7128_vm2, %v11264_v44 }
 0x4bd   : > { %v4372_v32 = vpop.permute.xlu1 %4371  ;;  %6643 = vmatprep.subr.msk.bf16.mxu1 %vm9958_vm0, %v11264_v44  ;;  %6655 = vmatprep.subr.msk.bf16.mxu0 %vm9958_vm0, %v11264_v44 }
 0x4be   : > { %v4712_v38 = vpop.permute.xlu0 %4711  ;;  %6393 = vmatprep.mubr.msk.f32.mxu0 %vm2912_vm8, %v4372_v32  ;;  %6413 = vmatmul.mubr.msk.f32.gmra.mrb[50].mxu1 %vm2912_vm8, %v4509_v57 }
 0x4bf   : > { %6394 = vmatmul.mubr.msk.f32.gmra.mrb[52].mxu0 %vm2912_vm8, %v4374_v4  ;;  %6415 = vmatprep.mubr.msk.f32.mxu1 %vm2912_vm8, %v4510_v8 }
 0x4c0   : > { %6645 = vmatpush3.bf16.msk.msra.mxu1 %vm9958_vm0, %v11264_v44  ;;  %6657 = vmatpush3.bf16.msk.msra.mxu0 %vm9958_vm0, %v11264_v44 }
 0x4c1   : > { %v4710_v52 = vpop.permute.xlu1 %4709  ;;  %6659 = vmatprep.subr.msk.bf16.mxu1 %vm9943_vm6, %v11264_v44 }
 0x4c2   : > { %v4378_v62 = vpop.permute.xlu0 %4377  ;;  %6416 = vmatmul.mubr.msk.f32.gmra.mrb[52].mxu1 %vm2912_vm8, %v4511_v21 }
 0x4c3   : > { %6430 = vmatprep.mubr.msk.f32.mxu1 %vm1220_vm15, %v4706_v14 }
 0x4c5   : > { %v4376_v23 = vpop.permute.xlu1 %4375 }
 0x4c6   : > { %v4716_v53 = vpop.permute.xlu0 %4715  ;;  %6396 = vmatprep.mubr.msk.f32.mxu0 %vm2912_vm8, %v4376_v23  ;;  %6431 = vmatmul.mubr.msk.f32.vlgmr.msra.gmra.mrb[54].mxu1 %vm1220_vm15, %v4708_v56 }
 0x4c7   : > { %6397 = vmatmul.mubr.msk.f32.gmra.mrb[54].mxu0 %vm2912_vm8, %v4378_v62  ;;  %6433 = vmatprep.mubr.msk.f32.mxu1 %vm1220_vm15, %v4710_v52 }
 0x4c8   : > { %6661 = vmatpush3.bf16.msk.msra.mxu1 %vm9943_vm6, %v11264_v44  ;;  %vm5453_vm6 = vcmask 31744  }
 0x4c9   : > { %v4714_v58 = vpop.permute.xlu1 %4713  ;;  %6663 = vmatprep.subr.msk.bf16.mxu1 %vm7128_vm2, %v11264_v44 }
 0x4ca   : > { %v4382_v35 = vpop.permute.xlu0 %4381  ;;  %6434 = vmatmul.mubr.msk.f32.gmra.mrb[56].mxu1 %vm1220_vm15, %v4712_v38 }
 0x4cb   : > { %6436 = vmatprep.mubr.msk.f32.mxu1 %vm1220_vm15, %v4714_v58 }
 0x4cc   : > { %6665 = vmatpush3.bf16.msk.msra.mxu1 %vm7128_vm2, %v11264_v44  ;;  %vm5444_vm2 = vcmask 15360  }
 0x4cd   : > { %v4380_v1 = vpop.permute.xlu1 %4379  ;;  %6667 = vmatprep.subr.msk.bf16.mxu1 %vm9958_vm0, %v11264_v44 }
 0x4ce   : > { %v4720_v48 = vpop.permute.xlu0 %4719  ;;  %6399 = vmatprep.mubr.msk.f32.mxu0 %vm2912_vm8, %v4380_v1  ;;  %6437 = vmatmul.mubr.msk.f32.gmra.mrb[58].mxu1 %vm1220_vm15, %v4716_v53 }
 0x4cf   : > { %6400 = vmatmul.mubr.msk.f32.gmra.mrb[56].mxu0 %vm2912_vm8, %v4382_v35 }
 0x4d0   : > { %6669 = vmatpush3.bf16.msk.msra.mxu1 %vm9958_vm0, %v11264_v44  ;;  %vm11466_vm0 = vmmov %vm11464_vm4 }
 0x4d1   : > { %v4718_v16 = vpop.permute.xlu1 %4717 }
 0x4d2   : > { %v4885_v36 = vpop.permute.xlu0 %4884  ;;  %6439 = vmatprep.mubr.msk.f32.mxu1 %vm1220_vm15, %v4718_v16 }
 0x4d3   : > { %6440 = vmatmul.mubr.msk.f32.gmra.mrb[60].mxu1 %vm1220_vm15, %v4720_v48 }
 0x4d5   : > { %v4883_v5 = vpop.permute.xlu1 %4882 }
 0x4d6   : > { %v5062_v37 = vpop.permute.xlu0 %5061  ;;  %6454 = vmatprep.mubr.msk.f32.mxu0 %vm1220_vm15, %v4883_v5 }
 0x4d7   : > { %6455 = vmatmul.mubr.msk.f32.vlgmr.msra.gmra.mrb[58].mxu0 %vm1220_vm15, %v4885_v36 }
 0x4d9   : > { %v5060_v30 = vpop.permute.xlu1 %5059 }
 0x4da   : > { %v4889_v15 = vpop.permute.xlu0 %4888  ;;  %6478 = vmatprep.mubr.msk.f32.mxu1 %vm1220_vm15, %v5060_v30 }
 0x4db   : > { %6479 = vmatmul.mubr.msk.f32.vlgmr.msra.gmra.mrb[62].mxu1 %vm1220_vm15, %v5062_v37 }
 0x4dd   : > { %v4887_v33 = vpop.permute.xlu1 %4886 }
 0x4de   : > { %v5066_v44 = vpop.permute.xlu0 %5065  ;;  %6457 = vmatprep.mubr.msk.f32.mxu0 %vm1220_vm15, %v4887_v33 }
 0x4df   : > { %6458 = vmatmul.mubr.msk.f32.gmra.mrb[60].mxu0 %vm1220_vm15, %v4889_v15 }
 0x4e1   : > { %v5064_v12 = vpop.permute.xlu1 %5063 }
 0x4e2   : > { %v4893_v49 = vpop.permute.xlu0 %4892  ;;  %6481 = vmatprep.mubr.msk.f32.mxu1 %vm1220_vm15, %v5064_v12 }
 0x4e3   : > { %6482 = vmatmul.mubr.msk.f32.gmra.mrb[64].mxu1 %vm1220_vm15, %v5066_v44 }
 0x4e5   : > { %v4891_v61 = vpop.permute.xlu1 %4890 }
 0x4e6   : > { %v5070_v0 = vpop.permute.xlu0 %5069  ;;  %6460 = vmatprep.mubr.msk.f32.mxu0 %vm1220_vm15, %v4891_v61 }
 0x4e7   : > { %6461 = vmatmul.mubr.msk.f32.gmra.mrb[62].mxu0 %vm1220_vm15, %v4893_v49 }
 0x4e9   : > { %v5068_v47 = vpop.permute.xlu1 %5067 }
 0x4ea   : > { %6484 = vmatprep.mubr.msk.f32.mxu1 %vm1220_vm15, %v5068_v47  ;;  %v4897_v59 = vpop.permute.xlu0 %4896 }
 0x4eb   : > { %6485 = vmatmul.mubr.msk.f32.gmra.mrb[66].mxu1 %vm1220_vm15, %v5070_v0 }
 0x4ed   : > { %v4895_v2 = vpop.permute.xlu1 %4894 }
 0x4ee   : > { %6463 = vmatprep.mubr.msk.f32.mxu0 %vm1220_vm15, %v4895_v2  ;;  %v5074_v39 = vpop.permute.xlu0 %5073 }
 0x4ef   : > { %6464 = vmatmul.mubr.msk.f32.gmra.mrb[64].mxu0 %vm1220_vm15, %v4897_v59 }
 0x4f1   : > { %v5072_v24 = vpop.permute.xlu1 %5071 }
 0x4f2   : > { %6487 = vmatprep.mubr.msk.f32.mxu1 %vm1220_vm15, %v5072_v24 }
 0x4f3   : > { %6488 = vmatmul.mubr.msk.f32.gmra.mrb[68].mxu1 %vm1220_vm15, %v5074_v39  ;;  %vm5478_vm15 = vcmask 80896  }
 0x4ff   : > { %v10455_v63 = vpop.permute.xlu0 %3325 }
 0x500   : > { %v10419_v40 = vpop.f32.mrb[22].mxu1 }
 0x501   : > { %v10421_v51 = vpop.f32.mrb[23].mxu1  ;;  %v3353_v17 = vmul.f32 %v10419_v40, %v10455_v63 }
 0x502   : > { %v10451_v7 = vpop.permute.xlu1 %3321 }
 0x503   : > { %v3352_v28 = vmul.f32 %v10451_v7, %v10421_v51  ;;  %v10473_v57 = vpop.permute.xlu0 %3337 }
 0x506   : > { %v10453_v55 = vpop.permute.xlu1 %3329 }
 0x507   : > { %v10483_v52 = vpop.permute.xlu0 %3345 }
 0x508   : > { %v10423_v42 = vpop.f32.mrb[24].mxu1 }
 0x509   : > { %v10425_v43 = vpop.f32.mrb[25].mxu1 }
 0x50a   : > { %v10461_v11 = vpop.permute.xlu1 %3333  ;;  %v3354_v13 = vmul.f32 %v10453_v55, %v10425_v43 }
 0x50b   : > { %v3355_v34 = vmul.f32 %v10423_v42, %v10461_v11 }
 0x50c   : > { %v10493_v37 = vpop.permute.xlu0 %3361 }
 0x50d   : > { %v3392_v12 = vmul.f32 %v10493_v37, %v10421_v51 }
 0x50e   : > { %v10465_v22 = vpop.permute.xlu1 %3341 }
 0x510   : > { %v10427_v46 = vpop.f32.mrb[26].mxu1  ;;  %v10499_v15 = vpop.permute.xlu0 %3373 }
 0x511   : > { %v10429_v45 = vpop.f32.mrb[27].mxu1  ;;  %v3357_v8 = vmul.f32 %v10427_v46, %v10465_v22  ;;  %v3395_v2 = vmul.f32 %v10423_v42, %v10499_v15 }
 0x512   : > { %v10467_v31 = vpop.permute.xlu1 %3349  ;;  %v3356_v21 = vmul.f32 %v10473_v57, %v10429_v45 }
 0x514   : > { %v10507_v47 = vpop.permute.xlu0 %3381 }
 0x517   : > { %v10476_v32 = vpop.permute.xlu1 %3365 }
 0x518   : > { %v10431_v10 = vpop.f32.mrb[34].mxu0  ;;  %v3393_v44 = vmul.f32 %v10419_v40, %v10476_v32 }
 0x519   : > { %v10433_v26 = vpop.f32.mrb[28].mxu1  ;;  %v10435_v19 = vpop.f32.mrb[35].mxu0 }
 0x51a   : > { %v10437_v27 = vpop.f32.mrb[29].mxu1  ;;  %v3359_v35 = vmul.f32 %v10433_v26, %v10467_v31 }
 0x51b   : > { %v10485_v53 = vpop.permute.xlu1 %3369  ;;  %v3358_v48 = vmul.f32 %v10483_v52, %v10437_v27 }
 0x51c   : > { %v10439_v41 = vpop.f32.mrb[36].mxu0  ;;  %v3394_v39 = vmul.f32 %v10485_v53, %v10425_v43 }
 0x51d   : > { %v10441_v54 = vpop.f32.mrb[37].mxu0 }
 0x51f   : > { %v10496_v30 = vpop.permute.xlu1 %3377 }
 0x520   : > { %v10443_v18 = vpop.f32.mrb[38].mxu0 }
 0x521   : > { %v10445_v29 = vpop.f32.mrb[39].mxu0 }
 0x523   : > { %v10501_v33 = vpop.permute.xlu1 %3385 }
 0x524   : > { %v10447_v6 = vpop.f32.mrb[40].mxu0 }
 0x525   : > { %v10449_v9 = vpop.f32.mrb[41].mxu0 }
 0x528   : > { %v10511_v24 = vpop.permute.xlu1 %3401 }
 0x53e   : > { %v6312_v50 = vpop.f32.mrb[30].mxu1 }
 0x53f   : > { %v4148_v3 = vadd.f32 %v6312_v50, %v3353_v17  ;;  %v3658_v60 = vpop.f32.mrb[31].mxu1 }
 0x540   : > { %v4147_v20 = vadd.f32 %v3658_v60, %v3352_v28  ;;  %v3397_v60 = vmul.f32 %v10427_v46, %v10507_v47 }
 0x541   : > { %5230 = vrot.lane.b32.xlu1 %v4148_v3, %s6837_s16 }
 0x542   : > { %5228 = vrot.lane.b32.xlu0 %v4147_v20, %s6837_s16  ;;  %v10520_v20 = vpop.permute.xlu0 %3389 }
 0x54d   : > { %v6315_v56 = vpop.f32.mrb[32].mxu1 }
 0x54e   : > { %v4150_v14 = vadd.f32 %v6315_v56, %v3355_v34  ;;  %v3668_v25 = vpop.f32.mrb[33].mxu1  ;;  %v3396_v34 = vmul.f32 %v10496_v30, %v10429_v45 }
 0x54f   : > { %v4149_v4 = vadd.f32 %v3668_v25, %v3354_v13  ;;  %v10525_v13 = vpop.permute.xlu1 %3409 }
 0x550   : > { %5234 = vrot.lane.b32.xlu1 %v4150_v14, %s6837_s16 }
 0x551   : > { %5232 = vrot.lane.b32.xlu0 %v4149_v4, %s6837_s16 }
 0x555   : > { %v6318_v38 = vpop.f32.mrb[34].mxu1 }
 0x556   : > { %v4152_v62 = vadd.f32 %v6318_v38, %v3357_v8  ;;  %v3678_v23 = vpop.f32.mrb[35].mxu1  ;;  %v3399_v8 = vmul.f32 %v10433_v26, %v10520_v20  ;;  %v10531_v38 = vpop.permute.xlu0 %3405 }
 0x557   : > { %v4151_v58 = vadd.f32 %v3678_v23, %v3356_v21  ;;  %v10533_v21 = vpop.permute.xlu1 %3413 }
 0x558   : > { %5238 = vrot.lane.b32.xlu1 %v4152_v62, %s6837_s16  ;;  %v3398_v62 = vmul.f32 %v10501_v33, %v10437_v27 }
 0x559   : > { %v6321_v1 = vpop.f32.mrb[36].mxu1  ;;  %5236 = vrot.lane.b32.xlu0 %v4151_v58, %s6837_s16 }
 0x55a   : > { %v4154_v16 = vadd.f32 %v6321_v1, %v3359_v35  ;;  %v3688_v36 = vpop.f32.mrb[37].mxu1  ;;  %v3433_v1 = vmul.f32 %v10419_v40, %v10531_v38  ;;  %v3434_v40 = vmul.f32 %v10525_v13, %v10425_v43 }
 0x55b   : > { %v4153_v5 = vadd.f32 %v3688_v36, %v3358_v48 }
 0x55c   : > { %5242 = vrot.lane.b32.xlu1 %v4154_v16, %s6837_s16  ;;  %v3432_v16 = vmul.f32 %v10511_v24, %v10421_v51 }
 0x55d   : > { %5240 = vrot.lane.b32.xlu0 %v4153_v5, %s6837_s16 }
 0x566   : > { %v6336_v49 = vpop.f32.mrb[42].mxu0 }
 0x567   : > { %v4156_v61 = vadd.f32 %v6336_v49, %v3393_v44  ;;  %v3883_v0 = vpop.f32.mrb[43].mxu0 }
 0x568   : > { %v4155_v59 = vadd.f32 %v3883_v0, %v3392_v12  ;;  %v10543_v12 = vpop.permute.xlu1 %3421  ;;  %v3435_v0 = vmul.f32 %v10423_v42, %v10533_v21 }
 0x569   : > { %5262 = vrot.lane.b32.xlu1 %v4156_v61, %s6838_s26  ;;  %v10545_v61 = vpop.permute.xlu0 %3417 }
 0x56a   : > { %5260 = vrot.lane.b32.xlu0 %v4155_v59, %s6838_s26  ;;  %v6339_v17 = vpop.f32.mrb[44].mxu0 }
 0x56b   : > { %v4158_v28 = vadd.f32 %v6339_v17, %v3395_v2  ;;  %v3893_v50 = vpop.f32.mrb[45].mxu0  ;;  %v3437_v17 = vmul.f32 %v10427_v46, %v10543_v12 }
 0x56c   : > { %v4157_v3 = vadd.f32 %v3893_v50, %v3394_v39  ;;  %v10557_v50 = vpop.permute.xlu1 %3429 }
 0x56d   : > { %5266 = vrot.lane.b32.xlu1 %v4158_v28, %s6838_s26  ;;  %v3436_v28 = vmul.f32 %v10545_v61, %v10429_v45  ;;  %v10560_v43 = vpop.permute.xlu0 %3425 }
 0x56e   : > { %5264 = vrot.lane.b32.xlu0 %v4157_v3, %s6838_s26  ;;  %v6342_v56 = vpop.f32.mrb[46].mxu0  ;;  %v3438_v46 = vmul.f32 %v10560_v43, %v10437_v27 }
 0x56f   : > { %v4160_v14 = vadd.f32 %v6342_v56, %v3397_v60  ;;  %v3903_v25 = vpop.f32.mrb[47].mxu0  ;;  %v3439_v56 = vmul.f32 %v10433_v26, %v10557_v50 }
 0x570   : > { %v4159_v4 = vadd.f32 %v3903_v25, %v3396_v34 }
 0x571   : > { %5270 = vrot.lane.b32.xlu1 %v4160_v14, %s6838_s26 }
 0x572   : > { %5268 = vrot.lane.b32.xlu0 %v4159_v4, %s6838_s26 }
 0x576   : > { %v6345_v23 = vpop.f32.mrb[48].mxu0 }
 0x577   : > { %v4162_v58 = vadd.f32 %v6345_v23, %v3399_v8  ;;  %v3913_v35 = vpop.f32.mrb[49].mxu0 }
 0x578   : > { %v4161_v48 = vadd.f32 %v3913_v35, %v3398_v62 }
 0x579   : > { %v6360_v36 = vpop.f32.mrb[38].mxu1  ;;  %5274 = vrot.lane.b32.xlu1 %v4162_v58, %s6838_s26 }
 0x57a   : > { %v4164_v5 = vadd.f32 %v6360_v36, %v3433_v1  ;;  %v4108_v44 = vpop.f32.mrb[39].mxu1  ;;  %5272 = vrot.lane.b32.xlu0 %v4161_v48, %s6838_s26 }
 0x57b   : > { %v4163_v49 = vadd.f32 %v4108_v44, %v3432_v16 }
 0x57d   : > { %v6363_v59 = vpop.f32.mrb[40].mxu1  ;;  %5294 = vrot.lane.b32.xlu1 %v4164_v5, %s11455_s19 }
 0x57e   : > { %v4166_v51 = vadd.f32 %v6363_v59, %v3435_v0  ;;  %v4118_v2 = vpop.f32.mrb[41].mxu1  ;;  %5292 = vrot.lane.b32.xlu0 %v4163_v49, %s11455_s19 }
 0x57f   : > { %v4165_v39 = vadd.f32 %v4118_v2, %v3434_v40 }
 0x581   : > { %v6366_v42 = vpop.f32.mrb[42].mxu1  ;;  %5298 = vrot.lane.b32.xlu1 %v4166_v51, %s11455_s19 }
 0x582   : > { %v4168_v3 = vadd.f32 %v6366_v42, %v3437_v17  ;;  %v4128_v60 = vpop.f32.mrb[43].mxu1  ;;  %5296 = vrot.lane.b32.xlu0 %v4165_v39, %s11455_s19 }
 0x583   : > { %v4167_v34 = vadd.f32 %v4128_v60, %v3436_v28 }
 0x585   : > { %v6369_v14 = vpop.f32.mrb[44].mxu1  ;;  %5302 = vrot.lane.b32.xlu1 %v4168_v3, %s11455_s19 }
 0x586   : > { %v4170_v45 = vadd.f32 %v6369_v14, %v3439_v56  ;;  %v4138_v25 = vpop.f32.mrb[45].mxu1  ;;  %5300 = vrot.lane.b32.xlu0 %v4167_v34, %s11455_s19 }
 0x587   : > { %v4169_v4 = vadd.f32 %v4138_v25, %v3438_v46 }
 0x589   : > { %v6408_v8 = vpop.f32.mrb[46].mxu1  ;;  %5306 = vrot.lane.b32.xlu1 %v4170_v45, %s11455_s19 }
 0x58a   : > { %v6392_v62 = vpop.f32.mrb[50].mxu0  ;;  %v4602_v23 = vpop.f32.mrb[47].mxu1  ;;  %5304 = vrot.lane.b32.xlu0 %v4169_v4, %s11455_s19  ;;  %v4642_v44 = vmul.f32 %v6408_v8, %v10455_v63 }
 0x58b   : > { %v4465_v58 = vpop.f32.mrb[51].mxu0  ;;  %v4641_v0 = vmul.f32 %v4602_v23, %v10451_v7 }
 0x58d   : > { %v10571_v26 = vpop.f32.mrb[48].mxu1  ;;  %5326 = vrot.lane.b32.xlu1 %v6392_v62, %s6828_s30 }
 0x58e   : > { %v10574_v27 = vpop.f32.mrb[49].mxu1  ;;  %5324 = vrot.lane.b32.xlu0 %v4465_v58, %s6828_s30  ;;  %v4644_v17 = vmul.f32 %v10571_v26, %v10461_v11 }
 0x58f   : > { %v4643_v42 = vmul.f32 %v10574_v27, %v10453_v55 }
 0x591   : > { %v10577_v35 = vpop.f32.mrb[50].mxu1 }
 0x592   : > { %v6395_v1 = vpop.f32.mrb[52].mxu0  ;;  %v10579_v48 = vpop.f32.mrb[51].mxu1  ;;  %v4646_v7 = vmul.f32 %v10577_v35, %v10465_v22 }
 0x593   : > { %5330 = vrot.lane.b32.xlu1 %v6395_v1, %s6828_s30  ;;  %v4475_v16 = vpop.f32.mrb[53].mxu0  ;;  %v4645_v56 = vmul.f32 %v10579_v48, %v10473_v57  ;;  %v4650_v1 = vmul.f32 %v6408_v8, %v10476_v32  ;;  %v4652_v32 = vmul.f32 %v10571_v26, %v10499_v15  ;;  %v4660_v15 = vmul.f32 %v10571_v26, %v10533_v21 }
 0x594   : > { %5328 = vrot.lane.b32.xlu0 %v4475_v16, %s6828_s30  ;;  %v4653_v21 = vmul.f32 %v10579_v48, %v10496_v30 }
 0x595   : > { %v10583_v36 = vpop.f32.mrb[52].mxu1 }
 0x596   : > { %v10585_v5 = vpop.f32.mrb[53].mxu1  ;;  %v4648_v55 = vmul.f32 %v10583_v36, %v10467_v31  ;;  %v4658_v31 = vmul.f32 %v6408_v8, %v10531_v38  ;;  %v4651_v38 = vmul.f32 %v10574_v27, %v10485_v53  ;;  %v4659_v53 = vmul.f32 %v10574_v27, %v10525_v13 }
 0x597   : > { %v4647_v22 = vmul.f32 %v10585_v5, %v10483_v52  ;;  %v4657_v52 = vmul.f32 %v4602_v23, %v10511_v24  ;;  %v4662_v13 = vmul.f32 %v10577_v35, %v10543_v12  ;;  %v4656_v30 = vmul.f32 %v10583_v36, %v10520_v20 }
 0x598   : > { %v4655_v12 = vmul.f32 %v10585_v5, %v10501_v33  ;;  %v4664_v20 = vmul.f32 %v10583_v36, %v10557_v50  ;;  %v4663_v33 = vmul.f32 %v10585_v5, %v10560_v43 }
 0x599   : > { %v6432_v49 = vpop.f32.mrb[54].mxu1 }
 0x59a   : > { %v5197_v40 = vadd.f32 %v6432_v49, %v4642_v44  ;;  %v6398_v59 = vpop.f32.mrb[54].mxu0  ;;  %v4803_v51 = vpop.f32.mrb[55].mxu1  ;;  %v4649_v44 = vmul.f32 %v4602_v23, %v10493_v37 }
 0x59b   : > { %v5196_v2 = vadd.f32 %v4803_v51, %v4641_v0  ;;  %5334 = vrot.lane.b32.xlu1 %v6398_v59, %s6828_s30  ;;  %v4485_v39 = vpop.f32.mrb[55].mxu0 }
 0x59c   : > { %5332 = vrot.lane.b32.xlu0 %v4485_v39, %s6828_s30 }
 0x59d   : > { %v6435_v28 = vpop.f32.mrb[56].mxu1 }
 0x59e   : > { %v5199_v63 = vadd.f32 %v6435_v28, %v4644_v17  ;;  %v4813_v3 = vpop.f32.mrb[57].mxu1 }
 0x59f   : > { %v5198_v60 = vadd.f32 %v4813_v3, %v4643_v42 }
 0x5a1   : > { %v6438_v34 = vpop.f32.mrb[58].mxu1 }
 0x5a2   : > { %v10599_v46 = vadd.f32 %v6438_v34, %v4646_v7  ;;  %v6401_v14 = vpop.f32.mrb[56].mxu0  ;;  %v4823_v45 = vpop.f32.mrb[59].mxu1 }
 0x5a3   : > { %v10601_v25 = vadd.f32 %v4823_v45, %v4645_v56  ;;  %5338 = vrot.lane.b32.xlu1 %v6401_v14, %s6828_s30  ;;  %v4495_v11 = vpop.f32.mrb[57].mxu0 }
 0x5a4   : > { %5336 = vrot.lane.b32.xlu0 %v4495_v11, %s6828_s30 }
 0x5a6   : > { %v6441_v4 = vpop.f32.mrb[60].mxu1 }
 0x5a7   : > { %v10609_v62 = vadd.f32 %v6441_v4, %v4648_v55  ;;  %v4833_v57 = vpop.f32.mrb[61].mxu1 }
 0x5a8   : > { %v10611_v58 = vadd.f32 %v4833_v57, %v4647_v22 }
 0x5aa   : > { %v6456_v16 = vpop.f32.mrb[58].mxu0 }
 0x5ab   : > { %v5205_v49 = vadd.f32 %v6456_v16, %v4650_v1  ;;  %v4980_v0 = vpop.f32.mrb[59].mxu0 }
 0x5ac   : > { %v5204_v59 = vadd.f32 %v4980_v0, %v4649_v44 }
 0x5ad   : > { %5390 = vrot.lane.b32.xlu1 %v5205_v49, %s11456_s24 }
 0x5ae   : > { %v6480_v51 = vpop.f32.mrb[62].mxu1  ;;  %5388 = vrot.lane.b32.xlu0 %v5204_v59, %s11456_s24 }
 0x5af   : > { %v10619_v39 = vadd.f32 %v6480_v51, %v4658_v31  ;;  %v5157_v17 = vpop.f32.mrb[63].mxu1 }
 0x5b0   : > { %v10621_v28 = vadd.f32 %v5157_v17, %v4657_v52 }
 0x5b1   : > { %5358 = vrot.lane.b32.xlu1 %v5197_v40, %s6839_s15 }
 0x5b2   : > { %v6459_v37 = vpop.f32.mrb[60].mxu0  ;;  %5356 = vrot.lane.b32.xlu0 %v5196_v2, %s6839_s15 }
 0x5b3   : > { %v5207_v8 = vadd.f32 %v6459_v37, %v4652_v32  ;;  %v5231_v24 = vpop.permute.xlu1 %5230  ;;  %v4990_v23 = vpop.f32.mrb[61].mxu0 }
 0x5b4   : > { %v10631_v42 = vsel %vm5444_vm2, %v10431_v10, %v5231_v24  ;;  %v5206_v3 = vadd.f32 %v4990_v23, %v4651_v38  ;;  %v5229_v7 = vpop.permute.xlu0 %5228 }
 0x5b5   : > { %v10635_v40 = vsel %vm5444_vm2, %v10435_v19, %v5229_v7  ;;  %5394 = vrot.lane.b32.xlu1 %v5207_v8, %s11456_s24  ;;  %v4654_v19 = vmul.f32 %v10577_v35, %v10507_v47  ;;  %v4661_v47 = vmul.f32 %v10579_v48, %v10545_v61 }
 0x5b6   : > { %v6483_v2 = vpop.f32.mrb[64].mxu1  ;;  %5392 = vrot.lane.b32.xlu0 %v5206_v3, %s11456_s24 }
 0x5b7   : > { %v5215_v34 = vadd.f32 %v6483_v2, %v4660_v15  ;;  %v5167_v10 = vpop.f32.mrb[65].mxu1 }
 0x5b8   : > { %v5214_v56 = vadd.f32 %v5167_v10, %v4659_v53 }
 0x5b9   : > { %5362 = vrot.lane.b32.xlu1 %v5199_v63, %s6839_s15 }
 0x5ba   : > { %v6462_v14 = vpop.f32.mrb[62].mxu0  ;;  %5360 = vrot.lane.b32.xlu0 %v5198_v60, %s6839_s15 }
 0x5bb   : > { %v5209_v26 = vadd.f32 %v6462_v14, %v4654_v19  ;;  %v5000_v45 = vpop.f32.mrb[63].mxu0 }
 0x5bc   : > { %v5208_v11 = vadd.f32 %v5000_v45, %v4653_v21 }
 0x5bd   : > { %5398 = vrot.lane.b32.xlu1 %v5209_v26, %s11456_s24 }
 0x5be   : > { %v6486_v27 = vpop.f32.mrb[66].mxu1  ;;  %5396 = vrot.lane.b32.xlu0 %v5208_v11, %s11456_s24 }
 0x5bf   : > { %v5217_v63 = vadd.f32 %v6486_v27, %v4662_v13  ;;  %v5177_v55 = vpop.f32.mrb[67].mxu1 }
 0x5c0   : > { %v5216_v60 = vadd.f32 %v5177_v55, %v4661_v47 }
 0x5c1   : > { %5366 = vrot.lane.b32.xlu1 %v10599_v46, %s6839_s15 }
 0x5c2   : > { %v5235_v4 = vpop.permute.xlu1 %5234  ;;  %v6465_v22 = vpop.f32.mrb[64].mxu0  ;;  %5364 = vrot.lane.b32.xlu0 %v10601_v25, %s6839_s15 }
 0x5c3   : > { %v5448_v61 = vsel %vm5444_vm2, %v10439_v41, %v5235_v4  ;;  %v5211_v35 = vadd.f32 %v6465_v22, %v4656_v30  ;;  %v5233_v48 = vpop.permute.xlu0 %5232  ;;  %v5010_v57 = vpop.f32.mrb[65].mxu0 }
 0x5c4   : > { %v5447_v46 = vsel %vm5444_vm2, %v10441_v54, %v5233_v48  ;;  %v5210_v1 = vadd.f32 %v5010_v57, %v4655_v12 }
 0x5c5   : > { %5402 = vrot.lane.b32.xlu1 %v5211_v35, %s11456_s24 }
 0x5c6   : > { %v6489_v16 = vpop.f32.mrb[68].mxu1  ;;  %5400 = vrot.lane.b32.xlu0 %v5210_v1, %s11456_s24 }
 0x5c7   : > { %v5219_v25 = vadd.f32 %v6489_v16, %v4664_v20  ;;  %v5187_v41 = vpop.f32.mrb[69].mxu1 }
 0x5c8   : > { %v5218_v44 = vadd.f32 %v5187_v41, %v4663_v33 }
 0x5c9   : > { %5370 = vrot.lane.b32.xlu1 %v10609_v62, %s6839_s15 }
 0x5ca   : > { %v5239_v49 = vpop.permute.xlu1 %5238  ;;  %5368 = vrot.lane.b32.xlu0 %v10611_v58, %s6839_s15 }
 0x5cb   : > { %v5450_v54 = vsel %vm5444_vm2, %v10443_v18, %v5239_v49  ;;  %v5237_v50 = vpop.permute.xlu0 %5236 }
 0x5cc   : > { %v5449_v36 = vsel %vm5444_vm2, %v10445_v29, %v5237_v50 }
 0x5cd   : > { %5422 = vrot.lane.b32.xlu1 %v10619_v39, %s6840_s28 }
 0x5ce   : > { %v5243_v43 = vpop.permute.xlu1 %5242  ;;  %5420 = vrot.lane.b32.xlu0 %v10621_v28, %s6840_s28 }
 0x5cf   : > { %v5452_v5 = vsel %vm5444_vm2, %v10447_v6, %v5243_v43  ;;  %v5241_v62 = vpop.permute.xlu0 %5240 }
 0x5d0   : > { %v5451_v58 = vsel %vm5444_vm2, %v10449_v9, %v5241_v62  ;;  %vm11467_vm2 = vmmov %vm11459_vm1 }
 0x5d1   : > { %5426 = vrot.lane.b32.xlu1 %v5215_v34, %s6840_s28 }
 0x5d2   : > { %5424 = vrot.lane.b32.xlu0 %v5214_v56, %s6840_s28 }
 0x5d5   : > { %5430 = vrot.lane.b32.xlu1 %v5217_v63, %s6840_s28 }
 0x5d6   : > { %5428 = vrot.lane.b32.xlu0 %v5216_v60, %s6840_s28 }
 0x5d9   : > { %5434 = vrot.lane.b32.xlu1 %v5219_v25, %s6840_s28 }
 0x5da   : > { %5432 = vrot.lane.b32.xlu0 %v5218_v44, %s6840_s28 }
 0x5db   : > { %v5263_v18 = vpop.permute.xlu1 %5262 }
 0x5dc   : > { %v5455_v29 = vsel %vm5453_vm6, %v10631_v42, %v5263_v18  ;;  %v5261_v0 = vpop.permute.xlu0 %5260 }
 0x5dd   : > { %v5454_v59 = vsel %vm5453_vm6, %v10635_v40, %v5261_v0 }
 0x5df   : > { %v5267_v6 = vpop.permute.xlu1 %5266 }
 0x5e0   : > { %v5457_v31 = vsel %vm5453_vm6, %v5448_v61, %v5267_v6  ;;  %v5265_v51 = vpop.permute.xlu0 %5264 }
 0x5e1   : > { %v5456_v9 = vsel %vm5453_vm6, %v5447_v46, %v5265_v51 }
 0x5e3   : > { %v5271_v52 = vpop.permute.xlu1 %5270 }
 0x5e4   : > { %v5459_v39 = vsel %vm5453_vm6, %v5450_v54, %v5271_v52  ;;  %v5269_v17 = vpop.permute.xlu0 %5268 }
 0x5e5   : > { %v5458_v28 = vsel %vm5453_vm6, %v5449_v36, %v5269_v17 }
 0x5eb   : > { %v5275_v32 = vpop.permute.xlu1 %5274 }
 0x5ec   : > { %v10696_v37 = vsel %vm5453_vm6, %v5452_v5, %v5275_v32  ;;  %v5273_v38 = vpop.permute.xlu0 %5272 }
 0x5ed   : > { %v10699_v8 = vsel %vm5453_vm6, %v5451_v58, %v5273_v38  ;;  %vm11468_vm6 = vmmov %vm11466_vm0 }
 0x5ef   : > { %v5295_v24 = vpop.permute.xlu1 %5294 }
 0x5f0   : > { %v5293_v23 = vpop.permute.xlu0 %5292  ;;  %v5463_v48 = vsel %vm996_vm3, %v5455_v29, %v5295_v24 }
 0x5f1   : > { %v5462_v57 = vsel %vm996_vm3, %v5454_v59, %v5293_v23 }
 0x5f3   : > { %v5299_v42 = vpop.permute.xlu1 %5298 }
 0x5f4   : > { %v5297_v3 = vpop.permute.xlu0 %5296  ;;  %v5465_v41 = vsel %vm996_vm3, %v5457_v31, %v5299_v42 }
 0x5f5   : > { %v5464_v44 = vsel %vm996_vm3, %v5456_v9, %v5297_v3 }
 0x5f7   : > { %v5303_v7 = vpop.permute.xlu1 %5302 }
 0x5f8   : > { %v5301_v40 = vpop.permute.xlu0 %5300  ;;  %v5467_v0 = vsel %vm996_vm3, %v5459_v39, %v5303_v7 }
 0x5f9   : > { %v5466_v59 = vsel %vm996_vm3, %v5458_v28, %v5301_v40 }
 0x5fb   : > { %v10701_v15 = vpop.permute.xlu1 %5306 }
 0x5fc   : > { %v10703_v2 = vpop.permute.xlu0 %5304  ;;  %v5469_v24 = vsel %vm996_vm3, %v10696_v37, %v10701_v15 }
 0x5fd   : > { %v5468_v23 = vsel %vm996_vm3, %v10699_v8, %v10703_v2  ;;  %vm11471_vm3 = vmmov %vm11466_vm0 }
 0x5ff   : > { %v5327_v53 = vpop.permute.xlu1 %5326 }
 0x600   : > { %v5325_v34 = vpop.permute.xlu0 %5324  ;;  %v5471_v46 = vsel %vm11457_vm9, %v5463_v48, %v5327_v53  ;;  %vm11469_vm9 = vmmov %vm11459_vm1 }
 0x601   : > { %v5470_v20 = vsel %vm11458_vm13, %v5462_v57, %v5325_v34  ;;  %vm11470_vm13 = vmmov %vm11466_vm0 }
 0x605   : > { %v5331_v10 = vpop.permute.xlu1 %5330 }
 0x606   : > { %v5329_v56 = vpop.permute.xlu0 %5328  ;;  %v5473_v49 = vsel %vm11459_vm1, %v5465_v41, %v5331_v10  ;;  %vm11472_vm1 = vmmov %vm11466_vm0 }
 0x607   : > { %v5472_v36 = vsel %vm11461_vm14, %v5464_v44, %v5329_v56 }
 0x60d   : > { %v5335_v19 = vpop.permute.xlu1 %5334 }
 0x60e   : > { %v5333_v14 = vpop.permute.xlu0 %5332  ;;  %v5475_v6 = vsel %vm11463_vm5, %v5467_v0, %v5335_v19 }
 0x60f   : > { %v5474_v9 = vsel %vm11465_vm11, %v5466_v59, %v5333_v14 }
 0x615   : > { %v5339_v21 = vpop.permute.xlu1 %5338 }
 0x616   : > { %v5337_v26 = vpop.permute.xlu0 %5336  ;;  %v5477_v42 = vsel %vm11467_vm2, %v5469_v24, %v5339_v21 }
 0x617   : > { %v5476_v40 = vsel %vm11469_vm9, %v5468_v23, %v5337_v26 }
 0x61f   : > { %v5391_v45 = vpop.permute.xlu1 %5390 }
 0x620   : > { %v5389_v11 = vpop.permute.xlu0 %5388 }
 0x623   : > { %v5359_v13 = vpop.permute.xlu1 %5358 }
 0x624   : > { %v5357_v27 = vpop.permute.xlu0 %5356  ;;  %v5480_v16 = vsel %vm5478_vm15, %v5471_v46, %v5359_v13 }
 0x625   : > { %v5479_v25 = vsel %vm5478_vm15, %v5470_v20, %v5357_v27  ;;  %v5488_v54 = vsel %vm11460_vm7, %v5480_v16, %v5391_v45 }
 0x626   : > { %v5487_v62 = vsel %vm11462_vm10, %v5479_v25, %v5389_v11 }
 0x627   : > { %v5395_v47 = vpop.permute.xlu1 %5394 }
 0x628   : > { %v5393_v63 = vpop.permute.xlu0 %5392 }
 0x62b   : > { %v5363_v55 = vpop.permute.xlu1 %5362 }
 0x62c   : > { %v5361_v60 = vpop.permute.xlu0 %5360  ;;  %v5482_v43 = vsel %vm5478_vm15, %v5473_v49, %v5363_v55 }
 0x62d   : > { %v5481_v18 = vsel %vm5478_vm15, %v5472_v36, %v5361_v60  ;;  %v5490_v31 = vsel %vm11464_vm4, %v5482_v43, %v5395_v47 }
 0x62e   : > { %v5489_v32 = vsel %vm11466_vm0, %v5481_v18, %v5393_v63 }
 0x62f   : > { %v5399_v30 = vpop.permute.xlu1 %5398 }
 0x630   : > { %v5397_v4 = vpop.permute.xlu0 %5396 }
 0x633   : > { %v5367_v22 = vpop.permute.xlu1 %5366 }
 0x634   : > { %v5365_v12 = vpop.permute.xlu0 %5364  ;;  %v5484_v52 = vsel %vm5478_vm15, %v5475_v6, %v5367_v22 }
 0x635   : > { %v5483_v39 = vsel %vm5478_vm15, %v5474_v9, %v5365_v12  ;;  %v5492_v3 = vsel %vm11468_vm6, %v5484_v52, %v5399_v30 }
 0x636   : > { %v5491_v37 = vsel %vm11470_vm13, %v5483_v39, %v5397_v4 }
 0x637   : > { %v5403_v61 = vpop.permute.xlu1 %5402 }
 0x638   : > { %v5401_v35 = vpop.permute.xlu0 %5400 }
 0x63b   : > { %v5371_v1 = vpop.permute.xlu1 %5370 }
 0x63c   : > { %v5369_v33 = vpop.permute.xlu0 %5368  ;;  %v5486_v53 = vsel %vm5478_vm15, %v5477_v42, %v5371_v1 }
 0x63d   : > { %v5485_v10 = vsel %vm5478_vm15, %v5476_v40, %v5369_v33  ;;  %v5494_v2 = vsel %vm11471_vm3, %v5486_v53, %v5403_v61 }
 0x63e   : > { %v5493_v14 = vsel %vm11472_vm1, %v5485_v10, %v5401_v35 }
 0x63f   : > { %v5423_v50 = vpop.permute.xlu1 %5422 }
 0x640   : > { %v5497_v5 = vsel %vm5495_vm12, %v5488_v54, %v5423_v50  ;;  %v5421_v58 = vpop.permute.xlu0 %5420 }
 0x641   : > { %5505 = vst.msk [vmem:[%s10716_s17 + $0x8] sm:$0xff] %vm2912_vm8, %v5497_v5  ;;  %v5496_v29 = vsel %vm5495_vm12, %v5487_v62, %v5421_v58 }
 0x642   : > { %5504 = vst.msk [vmem:[%s10716_s17] sm:$0xff] %vm2912_vm8, %v5496_v29 }
 0x643   : > { %v5427_v51 = vpop.permute.xlu1 %5426 }
 0x644   : > { %v5499_v17 = vsel %vm5495_vm12, %v5490_v31, %v5427_v51  ;;  %v5425_v38 = vpop.permute.xlu0 %5424 }
 0x645   : > { %5507 = vst.msk [vmem:[%s10716_s17 + $0x18] sm:$0xff] %vm2912_vm8, %v5499_v17  ;;  %v5498_v28 = vsel %vm5495_vm12, %v5489_v32, %v5425_v38 }
 0x646   : > { %5506 = vst.msk [vmem:[%s10716_s17 + $0x10] sm:$0xff] %vm2912_vm8, %v5498_v28 }
 0x647   : > { %v5431_v7 = vpop.permute.xlu1 %5430 }
 0x648   : > { %v5501_v34 = vsel %vm5495_vm12, %v5492_v3, %v5431_v7  ;;  %v5429_v15 = vpop.permute.xlu0 %5428 }
 0x649   : > { %5509 = vst.msk [vmem:[%s10716_s17 + $0x28] sm:$0xff] %vm2912_vm8, %v5501_v34  ;;  %v5500_v8 = vsel %vm5495_vm12, %v5491_v37, %v5429_v15 }
 0x64a   : > { %5508 = vst.msk [vmem:[%s10716_s17 + $0x20] sm:$0xff] %vm2912_vm8, %v5500_v8 }
 0x64b   : > { %v5435_v56 = vpop.permute.xlu1 %5434 }
 0x64c   : > { %v5503_v19 = vsel %vm5495_vm12, %v5494_v2, %v5435_v56  ;;  %v5433_v21 = vpop.permute.xlu0 %5432 }
 0x64d   : > { %5511 = vst.msk [vmem:[%s10716_s17 + $0x38] sm:$0xff] %vm2912_vm8, %v5503_v19  ;;  %v5502_v26 = vsel %vm5495_vm12, %v5493_v14, %v5433_v21 }
 0x64e   : > { %5510 = vst.msk [vmem:[%s10716_s17 + $0x30] sm:$0xff] %vm2912_vm8, %v5502_v26 }
 0x64f PF: > { %s19_s11 = sadd.s32 1, %s6806_s11   ;;  %s11473_s30 = smov %s6802_s10 }
 0x650   : > { %p16_p5 = scmp.ge.s32.totalorder %s19_s11, 4   ;;  %s11474_s10 = smov %s11476_s12 }
 0x652   :  { %18 = sbr.rel (!%p16_p5) target bundleno = 2 (0x2), region = 98 }

</bundles_post_ra>
